<compile_context>
chip_gen: v5e
topology: v5e:2x2
jax: 0.10.0
libtpu: 0.0.40
codegen_flags: <defaults>
</compile_context>

<pallas_src>
import random
from functools import partial

import jax
import jax.numpy as jnp
import numpy as np
from jax.experimental import pallas as pl
from jax.experimental.pallas import tpu as pltpu

L, I, K, J, M, HW = 32, 4, 3, 3, 8, 28
C_LI = L * I                 # 128 contraction rows (4l + i)
PO = HW * HW                 # 784 spatial positions (p, o) flattened onto lanes
POP = 7 * 128                # 896: lane-dense padded width used inside the kernel
CHUNK = 32                   # contraction rows processed per grid step
NCHUNK = C_LI // CHUNK       # 4 grid steps


# ---------------------------------------------------------------------------
# Static weight preprocessing (hoisted out of forward): scatter W into ONE
# dense (256, 384) LHS with the l-direction unfold (k taps, zero padding)
# baked in and the three j taps concatenated along the contraction axis:
#     Gcat[8l+m, 128*j + 4*(l+k-1) + i] = W[k, i, l, m, j]
# ---------------------------------------------------------------------------
def precompute_weights(W):
    Wn = np.asarray(W, dtype=np.float32)                 # (k, i, l, m, j)
    G = np.zeros((J, L * M, L * I), dtype=np.float32)    # (3, 256, 128)
    for k in range(K):
        for j in range(J):
            for l in range(max(0, 1 - k), min(L, L + 1 - k)):
                lp = l + k - 1
                G[j, M * l:M * (l + 1), I * lp:I * (lp + 1)] = Wn[k, :, l, :, j].T
    Gcat = np.concatenate([G[0], G[1], G[2]], axis=1)    # (256, 384)
    return jnp.asarray(Gcat)


def _make_masks(shift):
    # Host-precomputed f32 lane masks (shift is static), replacing the old
    # int32 index inputs + in-kernel broadcasts + compares.
    col = np.arange(POP)
    o = col % HW
    valid = col < PO
    wrap_o = 0 if shift > 0 else HW - 1
    masks = np.stack([
        (o == wrap_o) & valid,      # q-roll wrap columns
        (o != 0) & valid,           # keep mask for tap j = 0
        (o != HW - 1) & valid,      # keep mask for tap j = 2
    ]).astype(np.float32)           # (3, 896)
    return jnp.asarray(masks)


# ---------------------------------------------------------------------------
# Fused Pallas kernel: group-sum + rolls + both unfolds + einsum + output roll
# ---------------------------------------------------------------------------
def _fused_kernel(shift, x_ref, g_ref, m_ref, o_ref, zbuf_ref, rhs_ref):
    # x_ref   : (2, 32, 784)   one 32-row chunk of both input groups
    # g_ref   : (256, 384)     pre-scattered weights (j taps concatenated)
    # m_ref   : (3, 896) f32   lane masks: [q-wrap, keep(j=0), keep(j=2)]
    # o_ref   : (256, 784)     output (8l+m, 28p+o), p-roll already applied
    # zbuf_ref: (32, 896)      lane-dense staging for one group-summed chunk
    # rhs_ref : (384, 896)     tap-stacked RHS, filled chunk-by-chunk over grid
    kt = pl.program_id(0)

    # Static roll amounts (shift is a Python int == +/-1).
    if shift > 0:
        r_main, r_wrap = 1, POP - (HW - 1)        # +1 lane, wrap fix from +27
    else:
        r_main, r_wrap = POP - 1, HW - 1          # -1 lane, wrap fix from -27
    s_proll = (HW * shift) % PO                   # final p-roll as a lane offset

    @pl.when(kt == 0)
    def _init():
        # Zero once; steps only ever write columns [0, 784), pads stay zero.
        zbuf_ref[...] = jnp.zeros((CHUNK, POP), jnp.float32)

    # 1) group sum for this chunk; the output p-roll (torch.roll along dim 2)
    #    is pre-applied here as a split store — whole 28-lane p-blocks commute
    #    with all downstream per-block ops, so no extra full-slab rolls needed.
    zsum = x_ref[0] + x_ref[1]                    # (32, 784)
    if s_proll == 0:
        zbuf_ref[:, pl.ds(0, PO)] = zsum
    else:
        zbuf_ref[:, pl.ds(s_proll, PO - s_proll)] = zsum[:, :PO - s_proll]
        zbuf_ref[:, pl.ds(0, s_proll)] = zsum[:, PO - s_proll:]
    zp = zbuf_ref[...]                            # (32, 896), pad lanes zero

    # 2) torch.roll along q (dim 5): one main lane shift + per-28-block wrap fix.
    wrap = m_ref[0:1, :]
    zmain = pltpu.roll(zp, r_main, axis=1)
    zwrap = pltpu.roll(zp, r_wrap, axis=1)
    zqp = zmain + wrap * (zwrap - zmain)          # (32, 896)

    # 3) q-direction unfold (kernel 3, zero pad 1): +/-1 lane shifts with zeros
    #    at the p-block edges; stage the three taps into the stacked RHS.
    row = pl.multiple_of(kt * CHUNK, CHUNK)
    rhs_ref[pl.ds(row, CHUNK), :] = pltpu.roll(zqp, 1, axis=1) * m_ref[1:2, :]
    rhs_ref[pl.ds(C_LI + row, CHUNK), :] = zqp
    rhs_ref[pl.ds(2 * C_LI + row, CHUNK), :] = (
        pltpu.roll(zqp, POP - 1, axis=1) * m_ref[2:3, :])

    # 4) last step: the whole grouped einsum as ONE (256,384)@(384,896) MXU dot
    #    (K=384 fills the systolic depth on v6e/v7x), then drop lane padding.
    @pl.when(kt == NCHUNK - 1)
    def _finish():
        acc = jnp.dot(g_ref[...], rhs_ref[...],
                      preferred_element_type=jnp.float32)     # (256, 896) f32
        o_ref[...] = acc[:, :PO]


@partial(jax.jit, static_argnums=(2,))
def forward(x, Gcat, shift):
    assert shift in (1, -1), "wrap handling assumes |shift| == 1"
    x2 = x.reshape(2, C_LI, PO)
    masks = _make_masks(shift)

    y = pl.pallas_call(
        partial(_fused_kernel, shift),
        out_shape=jax.ShapeDtypeStruct((L * M, PO), jnp.float32),
        grid=(NCHUNK,),
        in_specs=[
            pl.BlockSpec((2, CHUNK, PO), lambda k: (0, k, 0)),
            pl.BlockSpec((L * M, J * C_LI), lambda k: (0, 0)),
            pl.BlockSpec((3, POP), lambda k: (0, 0)),
        ],
        out_specs=pl.BlockSpec((L * M, PO), lambda k: (0, 0)),
        scratch_shapes=[
            pltpu.VMEM((CHUNK, POP), jnp.float32),       # z staging (one chunk)
            pltpu.VMEM((J * C_LI, POP), jnp.float32),    # tap-stacked RHS
        ],
        compiler_params=pltpu.CompilerParams(
            dimension_semantics=("arbitrary",),
            vmem_limit_bytes=32 * 1024 * 1024,
        ),
    )(x2, Gcat, masks)
    return y.reshape(1, L * M, HW, HW)


# ---------------------------------------------------------------------------
# Pure-JAX reference (mirrors the PyTorch module op-by-op)
# ---------------------------------------------------------------------------
def reference(x, W, shift):
    z = x.reshape(1, 2, 128, HW, HW).sum(axis=1)
    Z = z.reshape(L, I, HW, HW)
    Zpad = jnp.pad(Z, ((1, 1), (0, 0), (0, 0), (0, 0)))
    T1 = jnp.stack([Zpad[k:k + L] for k in range(K)], axis=0)         # (k,l,i,p,q)
    T2 = jnp.roll(T1, shift, axis=4)
    T2pad = jnp.pad(T2, ((0, 0), (0, 0), (0, 0), (0, 0), (1, 1)))
    T3 = jnp.stack([T2pad[..., j:j + HW] for j in range(J)], axis=4)  # (k,l,i,p,j,o)
    out = jnp.einsum('klipjo,kilmj->lmpo', T3, W,
                     precision=jax.lax.Precision.HIGHEST)
    y = out.reshape(1, L * M, HW, HW)
    return jnp.roll(y, shift, axis=2)


if __name__ == "__main__":
    # Mirror the module's __init__: shift_direction from seeded python RNG.
    random.seed(0)
    shift = int((random.random() > 0.5) * 2 - 1)

    key = jax.random.PRNGKey(0)
    kx, kw = jax.random.split(key)
    x = jax.random.normal(kx, (1, 256, 28, 28), dtype=jnp.float32)
    W = jax.random.normal(kw, (K, I, L, M, J), dtype=jnp.float32)

    # Static weight preprocessing, done once (hoisted out of forward()).
    Gcat = precompute_weights(W)

    y = jax.block_until_ready(forward(x, Gcat, shift))

    y_ref = jax.block_until_ready(reference(x, W, shift))
    np.testing.assert_allclose(np.asarray(y), np.asarray(y_ref),
                               rtol=1e-3, atol=1e-3)
    assert y.shape == (1, 256, 28, 28) and y.dtype == jnp.float32

    print("KERNEL_OK")
</pallas_src>

<mosaic_0001>
module attributes {stable_mosaic.version = 11 : i64} {
  func.func @_fused_kernel(%arg0: i32, %arg1: memref<2x32x784xf32, #tpu.memory_space<vmem>>, %arg2: memref<256x384xf32, #tpu.memory_space<vmem>>, %arg3: memref<3x896xf32, #tpu.memory_space<vmem>>, %arg4: memref<256x784xf32, #tpu.memory_space<vmem>>, %arg5: memref<32x896xf32, #tpu.memory_space<vmem>>, %arg6: memref<384x896xf32, #tpu.memory_space<vmem>>) attributes {dimension_semantics = [#tpu.dimension_semantics<arbitrary>], iteration_bounds = array<i64: 4>, scalar_prefetch = 0 : i64, scratch_operands = 2 : i64, tpu.core_type = #tpu.core_type<tc>, window_params = [{transform_indices = @transform_0, window_bounds = array<i64: 2, 32, 784>}, {pipeline_mode = #tpu.pipeline_mode<synchronous>, transform_indices = @transform_1, window_bounds = array<i64: 256, 384>}, {pipeline_mode = #tpu.pipeline_mode<synchronous>, transform_indices = @transform_2, window_bounds = array<i64: 3, 896>}, {pipeline_mode = #tpu.pipeline_mode<synchronous>, transform_indices = @transform_3, window_bounds = array<i64: 256, 784>}]} {
    %c0_i32 = arith.constant 0 : i32
    %0 = arith.cmpi eq, %arg0, %c0_i32 : i32
    %1 = arith.extui %0 : i1 to i32
    %c0_i32_0 = arith.constant 0 : i32
    %2 = arith.cmpi ne, %1, %c0_i32_0 : i32
    scf.if %2 {
      %cst = arith.constant 0.000000e+00 : f32
      %41 = vector.broadcast %cst : f32 to vector<32x896xf32>
      %c0_20 = arith.constant 0 : index
      %c0_21 = arith.constant 0 : index
      %42 = vector.load %arg5[%c0_20, %c0_21] : memref<32x896xf32, #tpu.memory_space<vmem>>, vector<32x896xf32>
      tpu.vector_store %arg5[%c0_20, %c0_21], %41 {strides = array<i32>} : memref<32x896xf32, #tpu.memory_space<vmem>>, vector<32x896xf32>,
    } else {
    }
    %c0 = arith.constant 0 : index
    %c0_1 = arith.constant 0 : index
    %c0_2 = arith.constant 0 : index
    %3 = vector.load %arg1[%c0, %c0_1, %c0_2] : memref<2x32x784xf32, #tpu.memory_space<vmem>>, vector<1x32x784xf32>
    %4 = vector.shape_cast %3 : vector<1x32x784xf32> to vector<32x784xf32>
    %c1 = arith.constant 1 : index
    %c0_3 = arith.constant 0 : index
    %c0_4 = arith.constant 0 : index
    %5 = vector.load %arg1[%c1, %c0_3, %c0_4] : memref<2x32x784xf32, #tpu.memory_space<vmem>>, vector<1x32x784xf32>
    %6 = vector.shape_cast %5 : vector<1x32x784xf32> to vector<32x784xf32>
    %7 = arith.addf %4, %6 : vector<32x784xf32>
    %8 = vector.extract_strided_slice %7 {offsets = [0, 0], sizes = [32, 756], strides = [1, 1]} : vector<32x784xf32> to vector<32x756xf32>
    %c0_5 = arith.constant 0 : index
    %c28 = arith.constant 28 : index
    %9 = vector.load %arg5[%c0_5, %c28] : memref<32x896xf32, #tpu.memory_space<vmem>>, vector<32x756xf32>
    tpu.vector_store %arg5[%c0_5, %c28], %8 {strides = array<i32>} : memref<32x896xf32, #tpu.memory_space<vmem>>, vector<32x756xf32>,
    %10 = vector.extract_strided_slice %7 {offsets = [0, 756], sizes = [32, 28], strides = [1, 1]} : vector<32x784xf32> to vector<32x28xf32>
    %c0_6 = arith.constant 0 : index
    %c0_7 = arith.constant 0 : index
    %11 = vector.load %arg5[%c0_6, %c0_7] : memref<32x896xf32, #tpu.memory_space<vmem>>, vector<32x28xf32>
    tpu.vector_store %arg5[%c0_6, %c0_7], %10 {strides = array<i32>} : memref<32x896xf32, #tpu.memory_space<vmem>>, vector<32x28xf32>,
    %c0_8 = arith.constant 0 : index
    %c0_9 = arith.constant 0 : index
    %12 = vector.load %arg5[%c0_8, %c0_9] : memref<32x896xf32, #tpu.memory_space<vmem>>, vector<32x896xf32>
    %c0_10 = arith.constant 0 : index
    %c0_11 = arith.constant 0 : index
    %13 = vector.load %arg3[%c0_10, %c0_11] : memref<3x896xf32, #tpu.memory_space<vmem>>, vector<1x896xf32>
    %c1_i32 = arith.constant 1 : i32
    %14 = tpu.dynamic_rotate %12 by %c1_i32 dim 1 : vector<32x896xf32>, i32 -> vector<32x896xf32>
    %c869_i32 = arith.constant 869 : i32
    %15 = tpu.dynamic_rotate %12 by %c869_i32 dim 1 : vector<32x896xf32>, i32 -> vector<32x896xf32>
    %16 = arith.subf %15, %14 : vector<32x896xf32>
    %17 = vector.broadcast %13 : vector<1x896xf32> to vector<32x896xf32>
    %18 = arith.mulf %17, %16 : vector<32x896xf32>
    %19 = arith.addf %14, %18 : vector<32x896xf32>
    %c32_i32 = arith.constant 32 : i32
    %20 = arith.muli %arg0, %c32_i32 : i32
    %21 = tpu.assume_multiple %20, 32 : i32
    %c1_i32_12 = arith.constant 1 : i32
    %22 = tpu.dynamic_rotate %19 by %c1_i32_12 dim 1 : vector<32x896xf32>, i32 -> vector<32x896xf32>
    %c1_13 = arith.constant 1 : index
    %c0_14 = arith.constant 0 : index
    %23 = vector.load %arg3[%c1_13, %c0_14] : memref<3x896xf32, #tpu.memory_space<vmem>>, vector<1x896xf32>
    %24 = vector.broadcast %23 : vector<1x896xf32> to vector<32x896xf32>
    %25 = arith.mulf %22, %24 : vector<32x896xf32>
    %26 = arith.index_cast %21 : i32 to index
    %c0_15 = arith.constant 0 : index
    %27 = vector.load %arg6[%26, %c0_15] : memref<384x896xf32, #tpu.memory_space<vmem>>, vector<32x896xf32>
    tpu.vector_store %arg6[%26, %c0_15], %25 {strides = array<i32>} : memref<384x896xf32, #tpu.memory_space<vmem>>, vector<32x896xf32>,
    %c128_i32 = arith.constant 128 : i32
    %28 = arith.addi %c128_i32, %21 : i32
    %29 = arith.index_cast %28 : i32 to index
    %c0_16 = arith.constant 0 : index
    %30 = vector.load %arg6[%29, %c0_16] : memref<384x896xf32, #tpu.memory_space<vmem>>, vector<32x896xf32>
    tpu.vector_store %arg6[%29, %c0_16], %19 {strides = array<i32>} : memref<384x896xf32, #tpu.memory_space<vmem>>, vector<32x896xf32>,
    %c895_i32 = arith.constant 895 : i32
    %31 = tpu.dynamic_rotate %19 by %c895_i32 dim 1 : vector<32x896xf32>, i32 -> vector<32x896xf32>
    %c2 = arith.constant 2 : index
    %c0_17 = arith.constant 0 : index
    %32 = vector.load %arg3[%c2, %c0_17] : memref<3x896xf32, #tpu.memory_space<vmem>>, vector<1x896xf32>
    %33 = vector.broadcast %32 : vector<1x896xf32> to vector<32x896xf32>
    %34 = arith.mulf %31, %33 : vector<32x896xf32>
    %c256_i32 = arith.constant 256 : i32
    %35 = arith.addi %c256_i32, %21 : i32
    %36 = arith.index_cast %35 : i32 to index
    %c0_18 = arith.constant 0 : index
    %37 = vector.load %arg6[%36, %c0_18] : memref<384x896xf32, #tpu.memory_space<vmem>>, vector<32x896xf32>
    tpu.vector_store %arg6[%36, %c0_18], %34 {strides = array<i32>} : memref<384x896xf32, #tpu.memory_space<vmem>>, vector<32x896xf32>,
    %c3_i32 = arith.constant 3 : i32
    %38 = arith.cmpi eq, %arg0, %c3_i32 : i32
    %39 = arith.extui %38 : i1 to i32
    %c0_i32_19 = arith.constant 0 : i32
    %40 = arith.cmpi ne, %39, %c0_i32_19 : i32
    scf.if %40 {
      %c0_20 = arith.constant 0 : index
      %c0_21 = arith.constant 0 : index
      %41 = vector.load %arg2[%c0_20, %c0_21] : memref<256x384xf32, #tpu.memory_space<vmem>>, vector<256x384xf32>
      %c0_22 = arith.constant 0 : index
      %c0_23 = arith.constant 0 : index
      %42 = vector.load %arg6[%c0_22, %c0_23] : memref<384x896xf32, #tpu.memory_space<vmem>>, vector<384x896xf32>
      %cst = arith.constant dense<0.000000e+00> : vector<256x896xf32>
      %43 = tpu.matmul %41, %42, %cst {dimension_numbers = #tpu.dot_dimension_numbers<[1], [0], [0], [1], [0, 0, 1, 1], [], []>} : vector<256x384xf32>, vector<384x896xf32>, vector<256x896xf32> -> vector<256x896xf32>
      %44 = vector.extract_strided_slice %43 {offsets = [0, 0], sizes = [256, 784], strides = [1, 1]} : vector<256x896xf32> to vector<256x784xf32>
      %c0_24 = arith.constant 0 : index
      %c0_25 = arith.constant 0 : index
      %45 = vector.load %arg4[%c0_24, %c0_25] : memref<256x784xf32, #tpu.memory_space<vmem>>, vector<256x784xf32>
      tpu.vector_store %arg4[%c0_24, %c0_25], %44 {strides = array<i32>} : memref<256x784xf32, #tpu.memory_space<vmem>>, vector<256x784xf32>,
    } else {
    }
    return
  }
  func.func @transform_0(%arg0: i32) -> (i32, i32, i32) {
    %c0_i32 = arith.constant 0 : i32
    %c0_i32_0 = arith.constant 0 : i32
    %c0_i32_1 = arith.constant 0 : i32
    return %c0_i32, %arg0, %c0_i32_0 : i32, i32, i32
  }
  func.func @transform_1(%arg0: i32) -> (i32, i32) {
    %c0_i32 = arith.constant 0 : i32
    %c0_i32_0 = arith.constant 0 : i32
    %c0_i32_1 = arith.constant 0 : i32
    return %c0_i32, %c0_i32_0 : i32, i32
  }
  func.func @transform_2(%arg0: i32) -> (i32, i32) {
    %c0_i32 = arith.constant 0 : i32
    %c0_i32_0 = arith.constant 0 : i32
    %c0_i32_1 = arith.constant 0 : i32
    return %c0_i32, %c0_i32_0 : i32, i32
  }
  func.func @transform_3(%arg0: i32) -> (i32, i32) {
    %c0_i32 = arith.constant 0 : i32
    %c0_i32_0 = arith.constant 0 : i32
    %c0_i32_1 = arith.constant 0 : i32
    return %c0_i32, %c0_i32_0 : i32, i32
  }
}

</mosaic_0001>

<bundles_post_ra>
// kernel: forward.1
= control target key start
LH: loop header
LB: loop body
LE: loop exit
PB: predicated region body
PF: predicated region fallthrough
CT: control target
= control target key end

     0   :  { %s4785_s12 = smov 0   ;;  %s4787_s13 = smov 0   ;;  %s8886_s0 = inlined_call_operand.vmem [shape: f32[2,128,784], index: 0, kind: input, shape index: {}]   ;;  %s8887_s1 = inlined_call_operand.vmem [shape: f32[256,384], index: 1, kind: input, shape index: {}]   ;;  %s8888_s2 = inlined_call_operand.vmem [shape: f32[3,896], index: 2, kind: input, shape index: {}]   ;;  %s8889_s3 = inlined_call_operand.vmem [shape: f32[256,784], index: 3, kind: output, shape index: {}]  }
   0x1   :  { %s4789_s14 = smov 0  }
   0x2 LB: > { %s4801_s15 = sadd.s32 4294967295, %s4757_s14   ;;  %s4804_s16 = sadd.s32 1, %s4757_s14   ;;  %s4757_s14 = sphi %s4789_s14, %s9066_s14   ;;  %s4753_s13 = sphi %s4787_s13, %s9065_s13   ;;  %s4749_s12 = sphi %s4785_s12, %s9064_s12  }
   0x3   : > { %s17_s17 = ssub.s32 %s4757_s14, %s4804_s16  ;;  %s20_s18 = sadd.s32 1, %s4753_s13 }
   0x4   : > { %p18_p0 = scmp.eq.s32.totalorder %s17_s17, 0  ;;  %p27_p1 = scmp.ne.s32.totalorder %s4753_s13, %s4749_s12 }
   0x5   : > { %p28_p2 = scmp.eq.s32.totalorder %s4757_s14, 0  ;;  %p4325_p4 = scmp.ge.s32.totalorder %s4757_s14, 4 }
   0x6   : > { %s4813_s19 = scalar_select %p18_p0, %s4753_s13, %s20_s18  }
   0x7   : > { %p29_p3 = por %p28_p2, %p27_p1  ;;  %122 = sbr.rel (%p4325_p4) target bundleno = 73 (0x49), region = 24 }
   0xc   : > { %125 = sbr.rel (!%p29_p3) target bundleno = 73 (0x49), region = 28  ;;  %s127_s20 = sand.u32 (%p29_p3), 1, %s4753_s13  }
   0xd   : > { %s4420_s21 = smul.u32 (%p29_p3), 224, %s4757_s14 }
   0xe   : > { %s4419_s22 = smul.u32 (%p29_p3), 448, %s127_s20 }
   0xf   : > { %s4821_s25 = scalar_lea.vmem (%p29_p3), %s8886_s0, %s4420_s21 }
  0x10   : > { %v146_v0 = vld [vmem:[%s4821_s25] sm:$0xff] (%p29_p3)  ;;  %v148_v1 = vld [vmem:[%s4821_s25 + $0x8] sm:$0xff] (%p29_p3)  ;;  %v150_v2 = vld [vmem:[%s4821_s25 + $0x10] sm:$0xff] (%p29_p3)  ;;  %s4826_s26 = scalar_lea.vmem (%p29_p3), [#allocation4], %s4419_s22 }
  0x11   : > { %147 = vst [vmem:[%s4826_s26] sm:$0xff] %v146_v0  ;;  %v152_v3 = vld [vmem:[%s4821_s25 + $0x18] sm:$0xff]  ;;  %v154_v4 = vld [vmem:[%s4821_s25 + $0x20] sm:$0xff]  ;;  %v156_v5 = vld [vmem:[%s4821_s25 + $0x28] sm:$0xff] }
  0x12   : > { %149 = vst [vmem:[%s4826_s26 + $0x8] sm:$0xff] %v148_v1  ;;  %v158_v6 = vld [vmem:[%s4821_s25 + $0x30] sm:$0xff]  ;;  %v160_v7 = vld [vmem:[%s4821_s25 + $0x38] sm:$0xff]  ;;  %v162_v8 = vld [vmem:[%s4821_s25 + $0x40] sm:$0xff] }
  0x13   : > { %151 = vst [vmem:[%s4826_s26 + $0x10] sm:$0xff] %v150_v2  ;;  %v164_v9 = vld [vmem:[%s4821_s25 + $0x48] sm:$0xff]  ;;  %v166_v10 = vld [vmem:[%s4821_s25 + $0x50] sm:$0xff]  ;;  %v168_v11 = vld [vmem:[%s4821_s25 + $0x58] sm:$0xff] }
  0x14   : > { %153 = vst [vmem:[%s4826_s26 + $0x18] sm:$0xff] %v152_v3  ;;  %v170_v12 = vld [vmem:[%s4821_s25 + $0x60] sm:$0xff]  ;;  %v172_v13 = vld [vmem:[%s4821_s25 + $0x68] sm:$0xff]  ;;  %v174_v14 = vld [vmem:[%s4821_s25 + $0x70] sm:$0xff] }
  0x15   : > { %155 = vst [vmem:[%s4826_s26 + $0x20] sm:$0xff] %v154_v4  ;;  %v176_v15 = vld [vmem:[%s4821_s25 + $0x78] sm:$0xff]  ;;  %v178_v16 = vld [vmem:[%s4821_s25 + $0x80] sm:$0xff]  ;;  %v180_v17 = vld [vmem:[%s4821_s25 + $0x88] sm:$0xff] }
  0x16   : > { %157 = vst [vmem:[%s4826_s26 + $0x28] sm:$0xff] %v156_v5  ;;  %v182_v18 = vld [vmem:[%s4821_s25 + $0x90] sm:$0xff]  ;;  %v184_v19 = vld [vmem:[%s4821_s25 + $0x98] sm:$0xff]  ;;  %v186_v20 = vld [vmem:[%s4821_s25 + $0xa0] sm:$0xff] }
  0x17   : > { %159 = vst [vmem:[%s4826_s26 + $0x30] sm:$0xff] %v158_v6  ;;  %v188_v21 = vld [vmem:[%s4821_s25 + $0xa8] sm:$0xff]  ;;  %v190_v22 = vld [vmem:[%s4821_s25 + $0xb0] sm:$0xff]  ;;  %v192_v23 = vld [vmem:[%s4821_s25 + $0xb8] sm:$0xff] }
  0x18   : > { %161 = vst [vmem:[%s4826_s26 + $0x38] sm:$0xff] %v160_v7  ;;  %v194_v24 = vld [vmem:[%s4821_s25 + $0xc0] sm:$0xff]  ;;  %v196_v25 = vld [vmem:[%s4821_s25 + $0xc8] sm:$0xff]  ;;  %v198_v26 = vld [vmem:[%s4821_s25 + $0xd0] sm:$0xff] }
  0x19   : > { %163 = vst [vmem:[%s4826_s26 + $0x40] sm:$0xff] %v162_v8  ;;  %v200_v27 = vld [vmem:[%s4821_s25 + $0xd8] sm:$0xff]  ;;  %v202_v28 = vld [vmem:[%s4821_s25 + $0x380] sm:$0xff]  ;;  %v204_v29 = vld [vmem:[%s4821_s25 + $0x388] sm:$0xff] }
  0x1a   : > { %165 = vst [vmem:[%s4826_s26 + $0x48] sm:$0xff] %v164_v9  ;;  %v206_v30 = vld [vmem:[%s4821_s25 + $0x390] sm:$0xff]  ;;  %v208_v31 = vld [vmem:[%s4821_s25 + $0x398] sm:$0xff]  ;;  %v210_v32 = vld [vmem:[%s4821_s25 + $0x3a0] sm:$0xff] }
  0x1b   : > { %167 = vst [vmem:[%s4826_s26 + $0x50] sm:$0xff] %v166_v10  ;;  %v212_v33 = vld [vmem:[%s4821_s25 + $0x3a8] sm:$0xff]  ;;  %v214_v34 = vld [vmem:[%s4821_s25 + $0x3b0] sm:$0xff]  ;;  %v216_v35 = vld [vmem:[%s4821_s25 + $0x3b8] sm:$0xff] }
  0x1c   : > { %169 = vst [vmem:[%s4826_s26 + $0x58] sm:$0xff] %v168_v11  ;;  %v218_v36 = vld [vmem:[%s4821_s25 + $0x3c0] sm:$0xff]  ;;  %v220_v37 = vld [vmem:[%s4821_s25 + $0x3c8] sm:$0xff]  ;;  %v222_v38 = vld [vmem:[%s4821_s25 + $0x3d0] sm:$0xff] }
  0x1d   : > { %171 = vst [vmem:[%s4826_s26 + $0x60] sm:$0xff] %v170_v12  ;;  %v224_v39 = vld [vmem:[%s4821_s25 + $0x3d8] sm:$0xff]  ;;  %v226_v40 = vld [vmem:[%s4821_s25 + $0x3e0] sm:$0xff]  ;;  %v228_v41 = vld [vmem:[%s4821_s25 + $0x3e8] sm:$0xff] }
  0x1e   : > { %173 = vst [vmem:[%s4826_s26 + $0x68] sm:$0xff] %v172_v13  ;;  %v230_v42 = vld [vmem:[%s4821_s25 + $0x3f0] sm:$0xff]  ;;  %v232_v43 = vld [vmem:[%s4821_s25 + $0x3f8] sm:$0xff]  ;;  %v234_v44 = vld [vmem:[%s4821_s25 + $0x400] sm:$0xff] }
  0x1f   : > { %175 = vst [vmem:[%s4826_s26 + $0x70] sm:$0xff] %v174_v14  ;;  %v236_v45 = vld [vmem:[%s4821_s25 + $0x408] sm:$0xff]  ;;  %v238_v46 = vld [vmem:[%s4821_s25 + $0x410] sm:$0xff]  ;;  %v240_v47 = vld [vmem:[%s4821_s25 + $0x418] sm:$0xff] }
  0x20   : > { %177 = vst [vmem:[%s4826_s26 + $0x78] sm:$0xff] %v176_v15  ;;  %v242_v48 = vld [vmem:[%s4821_s25 + $0x420] sm:$0xff]  ;;  %v244_v49 = vld [vmem:[%s4821_s25 + $0x428] sm:$0xff]  ;;  %v246_v50 = vld [vmem:[%s4821_s25 + $0x430] sm:$0xff] }
  0x21   : > { %179 = vst [vmem:[%s4826_s26 + $0x80] sm:$0xff] %v178_v16  ;;  %v248_v51 = vld [vmem:[%s4821_s25 + $0x438] sm:$0xff]  ;;  %v250_v52 = vld [vmem:[%s4821_s25 + $0x440] sm:$0xff]  ;;  %v252_v53 = vld [vmem:[%s4821_s25 + $0x448] sm:$0xff] }
  0x22   : > { %181 = vst [vmem:[%s4826_s26 + $0x88] sm:$0xff] %v180_v17  ;;  %v254_v54 = vld [vmem:[%s4821_s25 + $0x450] sm:$0xff]  ;;  %v256_v55 = vld [vmem:[%s4821_s25 + $0x458] sm:$0xff] }
  0x23   : > { %183 = vst [vmem:[%s4826_s26 + $0x90] sm:$0xff] %v182_v18 }
  0x24   : > { %185 = vst [vmem:[%s4826_s26 + $0x98] sm:$0xff] %v184_v19 }
  0x25   : > { %187 = vst [vmem:[%s4826_s26 + $0xa0] sm:$0xff] %v186_v20 }
  0x26   : > { %189 = vst [vmem:[%s4826_s26 + $0xa8] sm:$0xff] %v188_v21 }
  0x27   : > { %191 = vst [vmem:[%s4826_s26 + $0xb0] sm:$0xff] %v190_v22 }
  0x28   : > { %193 = vst [vmem:[%s4826_s26 + $0xb8] sm:$0xff] %v192_v23 }
  0x29   : > { %195 = vst [vmem:[%s4826_s26 + $0xc0] sm:$0xff] %v194_v24 }
  0x2a   : > { %197 = vst [vmem:[%s4826_s26 + $0xc8] sm:$0xff] %v196_v25 }
  0x2b   : > { %199 = vst [vmem:[%s4826_s26 + $0xd0] sm:$0xff] %v198_v26 }
  0x2c   : > { %201 = vst [vmem:[%s4826_s26 + $0xd8] sm:$0xff] %v200_v27 }
  0x2d   : > { %203 = vst [vmem:[%s4826_s26 + $0xe0] sm:$0xff] %v202_v28 }
  0x2e   : > { %205 = vst [vmem:[%s4826_s26 + $0xe8] sm:$0xff] %v204_v29 }
  0x2f   : > { %207 = vst [vmem:[%s4826_s26 + $0xf0] sm:$0xff] %v206_v30 }
  0x30   : > { %209 = vst [vmem:[%s4826_s26 + $0xf8] sm:$0xff] %v208_v31 }
  0x31   : > { %211 = vst [vmem:[%s4826_s26 + $0x100] sm:$0xff] %v210_v32 }
  0x32   : > { %213 = vst [vmem:[%s4826_s26 + $0x108] sm:$0xff] %v212_v33 }
  0x33   : > { %215 = vst [vmem:[%s4826_s26 + $0x110] sm:$0xff] %v214_v34 }
  0x34   : > { %217 = vst [vmem:[%s4826_s26 + $0x118] sm:$0xff] %v216_v35 }
  0x35   : > { %219 = vst [vmem:[%s4826_s26 + $0x120] sm:$0xff] %v218_v36 }
  0x36   : > { %221 = vst [vmem:[%s4826_s26 + $0x128] sm:$0xff] %v220_v37 }
  0x37   : > { %223 = vst [vmem:[%s4826_s26 + $0x130] sm:$0xff] %v222_v38 }
  0x38   : > { %225 = vst [vmem:[%s4826_s26 + $0x138] sm:$0xff] %v224_v39 }
  0x39   : > { %227 = vst [vmem:[%s4826_s26 + $0x140] sm:$0xff] %v226_v40 }
  0x3a   : > { %229 = vst [vmem:[%s4826_s26 + $0x148] sm:$0xff] %v228_v41 }
  0x3b   : > { %231 = vst [vmem:[%s4826_s26 + $0x150] sm:$0xff] %v230_v42 }
  0x3c   : > { %233 = vst [vmem:[%s4826_s26 + $0x158] sm:$0xff] %v232_v43 }
  0x3d   : > { %235 = vst [vmem:[%s4826_s26 + $0x160] sm:$0xff] %v234_v44 }
  0x3e   : > { %237 = vst [vmem:[%s4826_s26 + $0x168] sm:$0xff] %v236_v45 }
  0x3f   : > { %239 = vst [vmem:[%s4826_s26 + $0x170] sm:$0xff] %v238_v46 }
  0x40   : > { %241 = vst [vmem:[%s4826_s26 + $0x178] sm:$0xff] %v240_v47 }
  0x41   : > { %243 = vst [vmem:[%s4826_s26 + $0x180] sm:$0xff] %v242_v48 }
  0x42   : > { %245 = vst [vmem:[%s4826_s26 + $0x188] sm:$0xff] %v244_v49 }
  0x43   : > { %247 = vst [vmem:[%s4826_s26 + $0x190] sm:$0xff] %v246_v50 }
  0x44   : > { %249 = vst [vmem:[%s4826_s26 + $0x198] sm:$0xff] %v248_v51 }
  0x45   : > { %251 = vst [vmem:[%s4826_s26 + $0x1a0] sm:$0xff] %v250_v52 }
  0x46   : > { %253 = vst [vmem:[%s4826_s26 + $0x1a8] sm:$0xff] %v252_v53 }
  0x47   : > { %255 = vst [vmem:[%s4826_s26 + $0x1b0] sm:$0xff] %v254_v54 }
  0x48   : > { %257 = vst [vmem:[%s4826_s26 + $0x1b8] sm:$0xff] %v256_v55 }
  0x49 PF: > { %p4329_p5 = scmp.ge.s32.totalorder %s4757_s14, 1  ;;  %p262_p6 = scmp.lt.s32.totalorder %s4757_s14, 5 }
  0x4b   : > { %p263_p7 = pnand %p4329_p5, %p262_p6 }
  0x4c   : > { %s269_s27 = sand.u32 (!%p263_p7), 1, %s4749_s12   ;;  %p4330_p8 = scmp.ne.s32.totalorder (!%p263_p7), %s4801_s15, 0 }
  0x4d   : > { %266 = sbr.rel (%p263_p7) target bundleno = 2276 (0x8e4), region = 51 }
  0x4e   : > { %s4421_s28 = smul.u32 (!%p263_p7), 448, %s269_s27 }
  0x50   : > { %s4940_s29 = scalar_lea.vmem (!%p263_p7), [#allocation4], %s4421_s28 }
  0x52   : > { %291 = sbr.rel (%p4330_p8) target bundleno = 96 (0x60), region = 59 }
  0x57   : > { %v4759_v56 = vmov 0.0  }
  0x58   : > { %292 = vst [vmem:[#allocation2] sm:$0xff] %v4759_v56 }
  0x59   : > { %298 = vst [vmem:[#allocation2 + $0x30] sm:$0xff] %v4759_v56 }
  0x5a   : > { %299 = vst [vmem:[#allocation2 + $0x38] sm:$0xff] %v4759_v56 }
  0x5b   : > { %305 = vst [vmem:[#allocation2 + $0x68] sm:$0xff] %v4759_v56 }
  0x5c   : > { %306 = vst [vmem:[#allocation2 + $0x70] sm:$0xff] %v4759_v56 }
  0x5d   : > { %312 = vst [vmem:[#allocation2 + $0xa0] sm:$0xff] %v4759_v56 }
  0x5e   : > { %313 = vst [vmem:[#allocation2 + $0xa8] sm:$0xff] %v4759_v56 }
  0x5f   : > { %319 = vst [vmem:[#allocation2 + $0xd8] sm:$0xff] %v4759_v56 }
  0x60 PF: > { %v322_v57 = vld [vmem:[%s4940_s29 + $0x10] sm:$0xff]  ;;  %v320_v59 = vld [vmem:[%s4940_s29] sm:$0xff]  ;;  %s4760_s30 = smov 28   ;;  %v323_v1 = vld [vmem:[%s4940_s29 + $0x18] sm:$0xff]  ;;  %s4761_s4 = smov 12   ;;  %vm477_vm0 = vcmask 228352  }
  0x61   : > { %v4333_v58 = vld [vmem:[%s4940_s29 + $0xf0] sm:$0xff]  ;;  %v4331_v61 = vld [vmem:[%s4940_s29 + $0xe0] sm:$0xff]  ;;  %v4334_v2 = vld [vmem:[%s4940_s29 + $0xf8] sm:$0xff]  ;;  %vm533_vm1 = vcmask 130048   ;;  %vm526_vm2 = vcmask 1047776   ;;  %vm576_vm3 = vcmask 97280  }
  0x62   : > { %v379_v60 = vadd.f32 %v4333_v58, %v322_v57  ;;  %v377_v62 = vadd.f32 %v4331_v61, %v320_v59  ;;  %v324_v63 = vld [vmem:[%s4940_s29 + $0x20] sm:$0xff]  ;;  %v321_v4 = vld [vmem:[%s4940_s29 + $0x8] sm:$0xff]  ;;  %v380_v6 = vadd.f32 %v4334_v2, %v323_v1  ;;  %v327_v13 = vld [vmem:[%s4940_s29 + $0x38] sm:$0xff]  ;;  %s4762_s5 = smov 1   ;;  %s4763_s6 = smov 101  }
  0x63   : > { %v4335_v0 = vld [vmem:[%s4940_s29 + $0x100] sm:$0xff]  ;;  %v4332_v5 = vld [vmem:[%s4940_s29 + $0xe8] sm:$0xff]  ;;  %v4338_v14 = vld [vmem:[%s4940_s29 + $0x118] sm:$0xff]  ;;  %s4764_s9 = smov 127   ;;  %s5634_s10 = sshll.u32 %s4801_s15, 5 }
  0x64   : > { %433 = vrot.lane.b32.xlu1 %v379_v60, %s4760_s30  ;;  %429 = vrot.lane.b32.xlu0 %v377_v62, %s4760_s30  ;;  %v381_v3 = vadd.f32 %v4335_v0, %v324_v63  ;;  %v325_v7 = vld [vmem:[%s4940_s29 + $0x28] sm:$0xff]  ;;  %v378_v9 = vadd.f32 %v4332_v5, %v321_v4  ;;  %v328_v11 = vld [vmem:[%s4940_s29 + $0x40] sm:$0xff]  ;;  %v384_v18 = vadd.f32 %v4338_v14, %v327_v13  ;;  %s1019_s11 = sshra.s32 %s5634_s10, 3  ;;  %s1052_s20 = sadd.s32 128, %s5634_s10 }
  0x65   : > { %v4336_v8 = vld [vmem:[%s4940_s29 + $0x108] sm:$0xff]  ;;  %v4339_v12 = vld [vmem:[%s4940_s29 + $0x120] sm:$0xff]  ;;  %v331_v20 = vld [vmem:[%s4940_s29 + $0x58] sm:$0xff]  ;;  %s4368_s17 = smul.u32 56, %s1019_s11  ;;  %s1053_s21 = sshra.s32 %s1052_s20, 3 }
  0x66   : > { %437 = vrot.lane.b32.xlu2 %v381_v3, %s4760_s30  ;;  %v4958_v10 = vadd.f32 %v4336_v8, %v325_v7  ;;  %v385_v15 = vadd.f32 %v4339_v12, %v328_v11  ;;  %v329_v16 = vld [vmem:[%s4940_s29 + $0x48] sm:$0xff]  ;;  %v4342_v21 = vld [vmem:[%s4940_s29 + $0x138] sm:$0xff]  ;;  %v330_v22 = vld [vmem:[%s4940_s29 + $0x50] sm:$0xff]  ;;  %s4369_s22 = smul.u32 56, %s1053_s21  ;;  %s1216_s24 = sadd.s32 256, %s5634_s10 }
  0x67   : > { %v4340_v17 = vld [vmem:[%s4940_s29 + $0x128] sm:$0xff]  ;;  %v4341_v23 = vld [vmem:[%s4940_s29 + $0x130] sm:$0xff]  ;;  %v388_v24 = vadd.f32 %v4342_v21, %v331_v20  ;;  %v332_v25 = vld [vmem:[%s4940_s29 + $0x60] sm:$0xff]  ;;  %s5658_s18 = scalar_lea.vmem [#allocation3], %s4368_s17  ;;  %s5870_s27 = sshra.s32 %s1216_s24, 3 }
  0x68   : > { %v386_v19 = vadd.f32 %v4340_v17, %v329_v16  ;;  %v4343_v26 = vld [vmem:[%s4940_s29 + $0x140] sm:$0xff]  ;;  %v387_v27 = vadd.f32 %v4341_v23, %v330_v22  ;;  %v335_v29 = vld [vmem:[%s4940_s29 + $0x78] sm:$0xff]  ;;  %v334_v31 = vld [vmem:[%s4940_s29 + $0x70] sm:$0xff]  ;;  %s5816_s23 = scalar_lea.vmem [#allocation3], %s4369_s22  ;;  %s4370_s28 = smul.u32 56, %s5870_s27 }
  0x69   : > { %v389_v28 = vadd.f32 %v4343_v26, %v332_v25  ;;  %v4346_v30 = vld [vmem:[%s4940_s29 + $0x158] sm:$0xff]  ;;  %v4345_v32 = vld [vmem:[%s4940_s29 + $0x150] sm:$0xff]  ;;  %v336_v34 = vld [vmem:[%s4940_s29 + $0x80] sm:$0xff]  ;;  %p4365_p9 = scmp.ne.s32.totalorder %s4801_s15, 3 }
  0x6a   : > { %v392_v33 = vadd.f32 %v4346_v30, %v335_v29  ;;  %v4347_v35 = vld [vmem:[%s4940_s29 + $0x160] sm:$0xff]  ;;  %v391_v36 = vadd.f32 %v4345_v32, %v334_v31  ;;  %v338_v38 = vld [vmem:[%s4940_s29 + $0x90] sm:$0xff]  ;;  %v337_v40 = vld [vmem:[%s4940_s29 + $0x88] sm:$0xff] }
  0x6b   : > { %v393_v37 = vadd.f32 %v4347_v35, %v336_v34  ;;  %v4349_v39 = vld [vmem:[%s4940_s29 + $0x170] sm:$0xff]  ;;  %v4348_v41 = vld [vmem:[%s4940_s29 + $0x168] sm:$0xff]  ;;  %v339_v43 = vld [vmem:[%s4940_s29 + $0x98] sm:$0xff] }
  0x6c   : > { %435 = vrot.lane.b32.xlu1 %v380_v6, %s4760_s30  ;;  %431 = vrot.lane.b32.xlu0 %v378_v9, %s4760_s30  ;;  %v395_v42 = vadd.f32 %v4349_v39, %v338_v38  ;;  %v4350_v44 = vld [vmem:[%s4940_s29 + $0x178] sm:$0xff]  ;;  %v394_v45 = vadd.f32 %v4348_v41, %v337_v40  ;;  %v342_v47 = vld [vmem:[%s4940_s29 + $0xb0] sm:$0xff] }
  0x6d   : > { %v396_v46 = vadd.f32 %v4350_v44, %v339_v43  ;;  %v4353_v48 = vld [vmem:[%s4940_s29 + $0x190] sm:$0xff]  ;;  %v341_v49 = vld [vmem:[%s4940_s29 + $0xa8] sm:$0xff]  ;;  %v343_v52 = vld [vmem:[%s4940_s29 + $0xb8] sm:$0xff] }
  0x6e   : > { %439 = vrot.lane.b32.xlu2 %v4958_v10, %s4760_s30  ;;  %v4352_v50 = vld [vmem:[%s4940_s29 + $0x188] sm:$0xff]  ;;  %v399_v51 = vadd.f32 %v4353_v48, %v342_v47  ;;  %v4354_v53 = vld [vmem:[%s4940_s29 + $0x198] sm:$0xff]  ;;  %v344_v58 = vld [vmem:[%s4940_s29 + $0xc0] sm:$0xff] }
  0x6f   : > { %v398_v54 = vadd.f32 %v4352_v50, %v341_v49  ;;  %v400_v55 = vadd.f32 %v4354_v53, %v343_v52  ;;  %v345_v56 = vld [vmem:[%s4940_s29 + $0xc8] sm:$0xff]  ;;  %v4355_v59 = vld [vmem:[%s4940_s29 + $0x1a0] sm:$0xff]  ;;  %v346_v61 = vld [vmem:[%s4940_s29 + $0xd0] sm:$0xff] }
  0x70   : > { %v4356_v57 = vld [vmem:[%s4940_s29 + $0x1a8] sm:$0xff]  ;;  %v4357_v62 = vld [vmem:[%s4940_s29 + $0x1b0] sm:$0xff]  ;;  %v401_v63 = vadd.f32 %v4355_v59, %v344_v58  ;;  %v340_v6 = vld [vmem:[%s4940_s29 + $0xa0] sm:$0xff] }
  0x71   : > { %v402_v60 = vadd.f32 %v4356_v57, %v345_v56  ;;  %v403_v0 = vadd.f32 %v4357_v62, %v346_v61  ;;  %v326_v1 = vld [vmem:[%s4940_s29 + $0x30] sm:$0xff]  ;;  %v333_v4 = vld [vmem:[%s4940_s29 + $0x68] sm:$0xff]  ;;  %v4351_v7 = vld [vmem:[%s4940_s29 + $0x180] sm:$0xff] }
  0x72   : > { %v4337_v2 = vld [vmem:[%s4940_s29 + $0x110] sm:$0xff]  ;;  %v4344_v5 = vld [vmem:[%s4940_s29 + $0x148] sm:$0xff]  ;;  %v397_v9 = vadd.f32 %v4351_v7, %v340_v6  ;;  %v347_v11 = vld [vmem:[%s4940_s29 + $0xd8] sm:$0xff] }
  0x73   : > { %v383_v3 = vadd.f32 %v4337_v2, %v326_v1  ;;  %v390_v8 = vadd.f32 %v4344_v5, %v333_v4  ;;  %v4358_v12 = vld [vmem:[%s4940_s29 + $0x1b8] sm:$0xff]  ;;  %s5923_s29 = scalar_lea.vmem [#allocation3], %s4370_s28 }
  0x74   : > { %443 = vrot.lane.b32.xlu1 %v385_v15, %s4760_s30  ;;  %441 = vrot.lane.b32.xlu0 %v384_v18, %s4760_s30  ;;  %v404_v13 = vadd.f32 %v4358_v12, %v347_v11 }
  0x76   : > { %445 = vrot.lane.b32.xlu2 %v386_v19, %s4760_s30 }
  0x7c   : > { %449 = vrot.lane.b32.xlu1 %v388_v24, %s4760_s30  ;;  %447 = vrot.lane.b32.xlu0 %v387_v27, %s4760_s30 }
  0x7e   : > { %451 = vrot.lane.b32.xlu2 %v389_v28, %s4760_s30 }
  0x84   : > { %455 = vrot.lane.b32.xlu1 %v392_v33, %s4760_s30  ;;  %453 = vrot.lane.b32.xlu0 %v391_v36, %s4760_s30 }
  0x86   : > { %457 = vrot.lane.b32.xlu2 %v393_v37, %s4760_s30 }
  0x8c   : > { %461 = vrot.lane.b32.xlu1 %v395_v42, %s4760_s30  ;;  %459 = vrot.lane.b32.xlu0 %v394_v45, %s4760_s30 }
  0x8e   : > { %463 = vrot.lane.b32.xlu2 %v396_v46, %s4760_s30 }
  0x94   : > { %467 = vrot.lane.b32.xlu1 %v399_v51, %s4760_s30  ;;  %465 = vrot.lane.b32.xlu0 %v398_v54, %s4760_s30 }
  0x96   : > { %469 = vrot.lane.b32.xlu2 %v400_v55, %s4760_s30 }
  0x9c   : > { %473 = vrot.lane.b32.xlu1 %v402_v60, %s4760_s30  ;;  %471 = vrot.lane.b32.xlu0 %v401_v63, %s4760_s30 }
  0x9e   : > { %475 = vrot.lane.b32.xlu2 %v403_v0, %s4760_s30 }
  0xa4   : > { %562 = vrot.lane.b32.xlu1 %v383_v3, %s4761_s4  ;;  %560 = vrot.lane.b32.xlu0 %v4958_v10, %s4761_s4 }
  0xa6   : > { %564 = vrot.lane.b32.xlu2 %v389_v28, %s4761_s4 }
  0xac   : > { %568 = vrot.lane.b32.xlu1 %v396_v46, %s4761_s4  ;;  %566 = vrot.lane.b32.xlu0 %v390_v8, %s4761_s4 }
  0xae   : > { %570 = vrot.lane.b32.xlu2 %v397_v9, %s4761_s4 }
  0xb4   : > { %574 = vrot.lane.b32.xlu1 %v404_v13, %s4761_s4  ;;  %572 = vrot.lane.b32.xlu0 %v403_v0, %s4761_s4 }
  0xc0   : > { %v438_v14 = vpop.permute.xlu2 %437 }
  0xc8   : > { %v440_v15 = vpop.permute.xlu2 %439 }
  0xc9   : > { %v5028_v10 = vsel %vm477_vm0, %v438_v14, %v440_v15  ;;  %534 = vst.msk [vmem:[#allocation2 + $0x30] sm:$0xff] %vm533_vm1, %v440_v15 }
  0xd0   : > { %v446_v16 = vpop.permute.xlu2 %445  ;;  %v595_v12 = vld [vmem:[#allocation2 + $0x30] sm:$0xff] }
  0xd6   : > { %v434_v17 = vpop.permute.xlu1 %433  ;;  %v430_v18 = vpop.permute.xlu0 %429 }
  0xd7   : > { %527 = vst.msk [vmem:[#allocation2] sm:$0xff] %vm526_vm2, %v430_v18 }
  0xd8   : > { %v452_v19 = vpop.permute.xlu2 %451 }
  0xd9   : > { %541 = vst.msk [vmem:[#allocation2 + $0x68] sm:$0xff] %vm533_vm1, %v452_v19 }
  0xde   : > { %v436_v20 = vpop.permute.xlu1 %435  ;;  %v432_v23 = vpop.permute.xlu0 %431 }
  0xdf   : > { %v5034_v21 = vsel %vm477_vm0, %v434_v17, %v436_v20  ;;  %v5037_v22 = vsel %vm477_vm0, %v436_v20, %v438_v14  ;;  %v5040_v24 = vsel %vm477_vm0, %v430_v18, %v432_v23  ;;  %v5043_v25 = vsel %vm477_vm0, %v432_v23, %v434_v17 }
  0xe0   : > { %v458_v26 = vpop.permute.xlu2 %457  ;;  %v602_v11 = vld [vmem:[#allocation2 + $0x68] sm:$0xff] }
  0xe6   : > { %v444_v27 = vpop.permute.xlu1 %443  ;;  %v442_v29 = vpop.permute.xlu0 %441 }
  0xe7   : > { %v5046_v28 = vsel %vm477_vm0, %v444_v27, %v446_v16  ;;  %v5049_v30 = vsel %vm477_vm0, %v442_v29, %v444_v27  ;;  %535 = vst.msk [vmem:[#allocation2 + $0x38] sm:$0xff] %vm526_vm2, %v442_v29 }
  0xe8   : > { %v464_v31 = vpop.permute.xlu2 %463 }
  0xe9   : > { %548 = vst.msk [vmem:[#allocation2 + $0xa0] sm:$0xff] %vm533_vm1, %v464_v31 }
  0xee   : > { %v450_v32 = vpop.permute.xlu1 %449  ;;  %v448_v34 = vpop.permute.xlu0 %447 }
  0xef   : > { %v5054_v33 = vsel %vm477_vm0, %v450_v32, %v452_v19  ;;  %v5057_v35 = vsel %vm477_vm0, %v446_v16, %v448_v34  ;;  %v5060_v36 = vsel %vm477_vm0, %v448_v34, %v450_v32  ;;  %v674_v16 = vlaneseq }
  0xf0   : > { %v470_v37 = vpop.permute.xlu2 %469  ;;  %v5147_v9 = vld [vmem:[#allocation2 + $0xa0] sm:$0xff] }
  0xf1   : > { %v5182_v18 = vand.u32 127, %v674_v16 }
  0xf3   : > { %vm676_vm4 = vcmp.lt.s32.totalorder %v5182_v18, 1  ;;  %vm761_vm5 = vcmp.lt.s32.totalorder %v5182_v18, 101  ;;  %vm1142_vm6 = vcmp.lt.s32.totalorder %v5182_v18, 127 }
  0xf6   : > { %v456_v38 = vpop.permute.xlu1 %455  ;;  %v454_v40 = vpop.permute.xlu0 %453 }
  0xf7   : > { %v5063_v39 = vsel %vm477_vm0, %v456_v38, %v458_v26  ;;  %v5066_v41 = vsel %vm477_vm0, %v454_v40, %v456_v38  ;;  %542 = vst.msk [vmem:[#allocation2 + $0x70] sm:$0xff] %vm526_vm2, %v454_v40 }
  0xf8   : > { %v476_v42 = vpop.permute.xlu2 %475 }
  0xf9   : > { %555 = vst.msk [vmem:[#allocation2 + $0xd8] sm:$0xff] %vm533_vm1, %v476_v42 }
  0xfe   : > { %v462_v43 = vpop.permute.xlu1 %461  ;;  %v460_v45 = vpop.permute.xlu0 %459 }
  0xff   : > { %v5071_v44 = vsel %vm477_vm0, %v462_v43, %v464_v31  ;;  %v5074_v46 = vsel %vm477_vm0, %v458_v26, %v460_v45  ;;  %v5077_v47 = vsel %vm477_vm0, %v460_v45, %v462_v43 }
 0x100   : > { %v565_v57 = vpop.permute.xlu2 %564  ;;  %v616_v13 = vld [vmem:[#allocation2 + $0xd8] sm:$0xff] }
 0x106   : > { %v468_v48 = vpop.permute.xlu1 %467  ;;  %v466_v50 = vpop.permute.xlu0 %465 }
 0x107   : > { %v5080_v49 = vsel %vm477_vm0, %v468_v48, %v470_v37  ;;  %v5083_v51 = vsel %vm477_vm0, %v466_v50, %v468_v48  ;;  %549 = vst.msk [vmem:[#allocation2 + $0xa8] sm:$0xff] %vm526_vm2, %v466_v50 }
 0x108   : > { %v571_v61 = vpop.permute.xlu2 %570 }
 0x10e   : > { %v474_v52 = vpop.permute.xlu1 %473  ;;  %v472_v54 = vpop.permute.xlu0 %471 }
 0x10f   : > { %v5087_v53 = vsel %vm477_vm0, %v474_v52, %v476_v42  ;;  %v5090_v55 = vsel %vm477_vm0, %v470_v37, %v472_v54  ;;  %v5093_v56 = vsel %vm477_vm0, %v472_v54, %v474_v52 }
 0x116   : > { %v563_v58 = vpop.permute.xlu1 %562  ;;  %v561_v59 = vpop.permute.xlu0 %560 }
 0x117   : > { %v577_v60 = vsel %vm576_vm3, %v561_v59, %v563_v58 }
 0x118   : > { %585 = vst.msk [vmem:[#allocation2] sm:$0xff] %vm477_vm0, %v577_v60 }
 0x11e   : > { %v569_v62 = vpop.permute.xlu1 %568  ;;  %v567_v0 = vpop.permute.xlu0 %566 }
 0x11f   : > { %v579_v63 = vsel %vm576_vm3, %v569_v62, %v571_v61  ;;  %v578_v1 = vsel %vm576_vm3, %v565_v57, %v567_v0  ;;  %v589_v2 = vld [vmem:[#allocation2] sm:$0xff] }
 0x120   : > { %587 = vst.msk [vmem:[#allocation2 + $0x70] sm:$0xff] %vm477_vm0, %v579_v63  ;;  %618 = vrot.lane.b32.xlu2 %v589_v2, %s4762_s5 }
 0x121   : > { %586 = vst.msk [vmem:[#allocation2 + $0x38] sm:$0xff] %vm477_vm0, %v578_v1 }
 0x126   : > { %v575_v3 = vpop.permute.xlu1 %574  ;;  %v573_v4 = vpop.permute.xlu0 %572 }
 0x127   : > { %v603_v5 = vld [vmem:[#allocation2 + $0x70] sm:$0xff]  ;;  %v580_v6 = vsel %vm576_vm3, %v573_v4, %v575_v3 }
 0x128   : > { %622 = vrot.lane.b32.xlu1 %v603_v5, %s4762_s5  ;;  %v596_v7 = vld [vmem:[#allocation2 + $0x38] sm:$0xff]  ;;  %588 = vst.msk [vmem:[#allocation2 + $0xa8] sm:$0xff] %vm477_vm0, %v580_v6 }
 0x129   : > { %620 = vrot.lane.b32.xlu0 %v596_v7, %s4762_s5 }
 0x12f   : > { %v610_v8 = vld [vmem:[#allocation2 + $0xa8] sm:$0xff] }
 0x130   : > { %628 = vrot.lane.b32.xlu1 %v5049_v30, %s4762_s5  ;;  %624 = vrot.lane.b32.xlu2 %v610_v8, %s4762_s5 }
 0x131   : > { %626 = vrot.lane.b32.xlu0 %v5040_v24, %s4762_s5 }
 0x138   : > { %634 = vrot.lane.b32.xlu1 %v5043_v25, %s4762_s5  ;;  %630 = vrot.lane.b32.xlu2 %v5066_v41, %s4762_s5 }
 0x139   : > { %632 = vrot.lane.b32.xlu0 %v5083_v51, %s4762_s5 }
 0x140   : > { %640 = vrot.lane.b32.xlu1 %v5080_v49, %s4762_s5  ;;  %636 = vrot.lane.b32.xlu2 %v5046_v28, %s4762_s5 }
 0x141   : > { %638 = vrot.lane.b32.xlu0 %v5063_v39, %s4762_s5 }
 0x148   : > { %646 = vrot.lane.b32.xlu1 %v5074_v46, %s4762_s5  ;;  %642 = vrot.lane.b32.xlu2 %v5034_v21, %s4762_s5 }
 0x149   : > { %644 = vrot.lane.b32.xlu0 %v5057_v35, %s4762_s5 }
 0x150   : > { %652 = vrot.lane.b32.xlu1 %v5060_v36, %s4762_s5  ;;  %648 = vrot.lane.b32.xlu2 %v5090_v55, %s4762_s5 }
 0x151   : > { %650 = vrot.lane.b32.xlu0 %v5037_v22, %s4762_s5 }
 0x158   : > { %658 = vrot.lane.b32.xlu1 %v5028_v10, %s4762_s5  ;;  %654 = vrot.lane.b32.xlu2 %v5077_v47, %s4762_s5 }
 0x159   : > { %656 = vrot.lane.b32.xlu0 %v5093_v56, %s4762_s5 }
 0x160   : > { %664 = vrot.lane.b32.xlu1 %v5087_v53, %s4762_s5  ;;  %660 = vrot.lane.b32.xlu2 %v5054_v33, %s4762_s5 }
 0x161   : > { %662 = vrot.lane.b32.xlu0 %v5071_v44, %s4762_s5 }
 0x168   : > { %670 = vrot.lane.b32.xlu1 %v5147_v9, %s4762_s5  ;;  %666 = vrot.lane.b32.xlu2 %v595_v12, %s4762_s5 }
 0x169   : > { %668 = vrot.lane.b32.xlu0 %v602_v11, %s4762_s5 }
 0x170   : > { %707 = vrot.lane.b32.xlu1 %v596_v7, %s4763_s6  ;;  %672 = vrot.lane.b32.xlu2 %v616_v13, %s4762_s5 }
 0x171   : > { %705 = vrot.lane.b32.xlu0 %v589_v2, %s4763_s6 }
 0x178   : > { %713 = vrot.lane.b32.xlu1 %v5040_v24, %s4763_s6  ;;  %709 = vrot.lane.b32.xlu2 %v603_v5, %s4763_s6  ;;  %v5319_v5 = vld [vmem:[%s8888_s2] ss:$4 sm:$0xff] }
 0x179   : > { %711 = vrot.lane.b32.xlu0 %v610_v8, %s4763_s6  ;;  %v819_v6 = vperm.slane %v5319_v5, 0 }
 0x17a   : > { %v5166_v14 = vpop.permute.xlu2 %618 }
 0x180   : > { %719 = vrot.lane.b32.xlu1 %v5083_v51, %s4763_s6  ;;  %715 = vrot.lane.b32.xlu2 %v5049_v30, %s4763_s6 }
 0x181   : > { %717 = vrot.lane.b32.xlu0 %v5066_v41, %s4763_s6 }
 0x188   : > { %725 = vrot.lane.b32.xlu1 %v5063_v39, %s4763_s6  ;;  %721 = vrot.lane.b32.xlu2 %v5043_v25, %s4763_s6 }
 0x189   : > { %723 = vrot.lane.b32.xlu0 %v5046_v28, %s4763_s6 }
 0x18a   : > { %v5174_v15 = vpop.permute.xlu2 %624 }
 0x190   : > { %731 = vrot.lane.b32.xlu1 %v5057_v35, %s4763_s6  ;;  %727 = vrot.lane.b32.xlu2 %v5080_v49, %s4763_s6 }
 0x191   : > { %729 = vrot.lane.b32.xlu0 %v5034_v21, %s4763_s6 }
 0x192   : > { %v631_v17 = vpop.permute.xlu2 %630 }
 0x198   : > { %737 = vrot.lane.b32.xlu1 %v5037_v22, %s4763_s6  ;;  %733 = vrot.lane.b32.xlu2 %v5074_v46, %s4763_s6 }
 0x199   : > { %735 = vrot.lane.b32.xlu0 %v5090_v55, %s4763_s6 }
 0x19a   : > { %v5191_v19 = vpop.permute.xlu1 %622  ;;  %v637_v21 = vpop.permute.xlu2 %636 }
 0x19b   : > { %v5196_v20 = vsel %vm676_vm4, %v5191_v19, %v631_v17  ;;  %v5198_v23 = vpop.permute.xlu0 %620 }
 0x1a0   : > { %743 = vrot.lane.b32.xlu1 %v5093_v56, %s4763_s6  ;;  %739 = vrot.lane.b32.xlu2 %v5060_v36, %s4763_s6 }
 0x1a1   : > { %741 = vrot.lane.b32.xlu0 %v5077_v47, %s4763_s6 }
 0x1a2   : > { %v629_v22 = vpop.permute.xlu1 %628  ;;  %v643_v26 = vpop.permute.xlu2 %642 }
 0x1a3   : > { %v5208_v24 = vsel %vm676_vm4, %v629_v22, %v637_v21  ;;  %v5213_v25 = vsel %vm676_vm4, %v5198_v23, %v629_v22  ;;  %v627_v27 = vpop.permute.xlu0 %626 }
 0x1a4   : > { %v5218_v28 = vsel %vm676_vm4, %v5166_v14, %v627_v27 }
 0x1a8   : > { %749 = vrot.lane.b32.xlu1 %v5071_v44, %s4763_s6  ;;  %745 = vrot.lane.b32.xlu2 %v5028_v10, %s4763_s6 }
 0x1a9   : > { %747 = vrot.lane.b32.xlu0 %v5054_v33, %s4763_s6 }
 0x1aa   : > { %v635_v29 = vpop.permute.xlu1 %634  ;;  %v649_v32 = vpop.permute.xlu2 %648 }
 0x1ab   : > { %v5228_v30 = vsel %vm676_vm4, %v635_v29, %v643_v26  ;;  %v5232_v31 = vsel %vm676_vm4, %v627_v27, %v635_v29  ;;  %v633_v34 = vpop.permute.xlu0 %632 }
 0x1ac   : > { %v5237_v35 = vsel %vm676_vm4, %v5174_v15, %v633_v34 }
 0x1b0   : > { %755 = vrot.lane.b32.xlu1 %v602_v11, %s4763_s6  ;;  %751 = vrot.lane.b32.xlu2 %v5087_v53, %s4763_s6 }
 0x1b1   : > { %753 = vrot.lane.b32.xlu0 %v595_v12, %s4763_s6 }
 0x1b2   : > { %v641_v10 = vpop.permute.xlu1 %640  ;;  %v655_v37 = vpop.permute.xlu2 %654 }
 0x1b3   : > { %v5245_v33 = vsel %vm676_vm4, %v641_v10, %v649_v32  ;;  %v5249_v36 = vsel %vm676_vm4, %v633_v34, %v641_v10  ;;  %v639_v38 = vpop.permute.xlu0 %638 }
 0x1b4   : > { %v5253_v39 = vsel %vm676_vm4, %v631_v17, %v639_v38 }
 0x1b8   : > { %757 = vrot.lane.b32.xlu2 %v5147_v9, %s4763_s6 }
 0x1b9   : > { %759 = vrot.lane.b32.xlu0 %v616_v13, %s4763_s6 }
 0x1ba   : > { %v647_v40 = vpop.permute.xlu1 %646  ;;  %v661_v43 = vpop.permute.xlu2 %660 }
 0x1bb   : > { %v5260_v41 = vsel %vm676_vm4, %v647_v40, %v655_v37  ;;  %v5264_v42 = vsel %vm676_vm4, %v639_v38, %v647_v40  ;;  %v645_v44 = vpop.permute.xlu0 %644 }
 0x1bc   : > { %v5268_v45 = vsel %vm676_vm4, %v637_v21, %v645_v44  ;;  %v820_v21 = vperm.slane %v5319_v5, 1 }
 0x1c2   : > { %v653_v46 = vpop.permute.xlu1 %652  ;;  %v667_v49 = vpop.permute.xlu2 %666 }
 0x1c3   : > { %v5272_v47 = vsel %vm676_vm4, %v653_v46, %v661_v43  ;;  %v5276_v48 = vsel %vm676_vm4, %v645_v44, %v653_v46  ;;  %v651_v50 = vpop.permute.xlu0 %650 }
 0x1c4   : > { %v5280_v51 = vsel %vm676_vm4, %v643_v26, %v651_v50 }
 0x1ca   : > { %v659_v52 = vpop.permute.xlu1 %658  ;;  %v673_v55 = vpop.permute.xlu2 %672 }
 0x1cb   : > { %v5284_v53 = vsel %vm676_vm4, %v659_v52, %v667_v49  ;;  %v5288_v54 = vsel %vm676_vm4, %v651_v50, %v659_v52  ;;  %v657_v56 = vpop.permute.xlu0 %656  ;;  %v704_v44 = vsel %vm676_vm4, %v673_v55, %v5174_v15 }
 0x1cc   : > { %v5292_v57 = vsel %vm676_vm4, %v649_v32, %v657_v56 }
 0x1d2   : > { %v665_v58 = vpop.permute.xlu1 %664  ;;  %v5302_v61 = vpop.permute.xlu2 %709 }
 0x1d3   : > { %v5296_v59 = vsel %vm676_vm4, %v665_v58, %v673_v55  ;;  %v5300_v60 = vsel %vm676_vm4, %v657_v56, %v665_v58  ;;  %v663_v62 = vpop.permute.xlu0 %662 }
 0x1d4   : > { %v5306_v63 = vsel %vm676_vm4, %v655_v37, %v663_v62 }
 0x1da   : > { %v671_v0 = vpop.permute.xlu1 %670  ;;  %v716_v2 = vpop.permute.xlu2 %715 }
 0x1db   : > { %v5310_v1 = vsel %vm676_vm4, %v663_v62, %v671_v0  ;;  %v669_v3 = vpop.permute.xlu0 %668  ;;  %v703_v52 = vsel %vm676_vm4, %v671_v0, %v5191_v19  ;;  %v821_v19 = vperm.slane %v5319_v5, 2 }
 0x1dc   : > { %v5314_v4 = vsel %vm676_vm4, %v661_v43, %v669_v3  ;;  %v702_v8 = vsel %vm676_vm4, %v669_v3, %v5198_v23  ;;  %v701_v23 = vsel %vm676_vm4, %v667_v49, %v5166_v14 }
 0x1e2   : > { %v5323_v7 = vpop.permute.xlu1 %707  ;;  %v5331_v11 = vpop.permute.xlu2 %721 }
 0x1e3   : > { %v783_v9 = vsel %vm761_vm5, %v5323_v7, %v716_v2  ;;  %v5333_v12 = vpop.permute.xlu0 %705 }
 0x1e4   : > { %v797_v13 = vsub.f32 %v783_v9, %v702_v8 }
 0x1e6   : > { %v840_v16 = vmul.f32 %v819_v6, %v797_v13 }
 0x1e8   : > { %v5335_v17 = vadd.f32 %v840_v16, %v702_v8 }
 0x1ea   : > { %v714_v22 = vpop.permute.xlu1 %713  ;;  %892 = vrot.lane.b32.xlu2 %v5335_v17, %s4762_s5  ;;  %v5349_v29 = vpop.permute.xlu2 %727 }
 0x1eb   : > { %v778_v26 = vsel %vm761_vm5, %v714_v22, %v5331_v11  ;;  %v782_v27 = vsel %vm761_vm5, %v5333_v12, %v714_v22  ;;  %v5351_v32 = vpop.permute.xlu0 %711 }
 0x1ec   : > { %v790_v34 = vsub.f32 %v782_v27, %v701_v23  ;;  %v791_v10 = vsub.f32 %v778_v26, %v5218_v28 }
 0x1ee   : > { %v833_v37 = vmul.f32 %v819_v6, %v790_v34  ;;  %v834_v38 = vmul.f32 %v820_v21, %v791_v10 }
 0x1f0   : > { %v5355_v40 = vadd.f32 %v834_v38, %v5218_v28  ;;  %v5357_v14 = vadd.f32 %v833_v37, %v701_v23 }
 0x1f2   : > { %v720_v43 = vpop.permute.xlu1 %719  ;;  %898 = vrot.lane.b32.xlu2 %v5355_v40, %s4762_s5  ;;  %890 = vrot.lane.b32.xlu1 %v5357_v14, %s4762_s5  ;;  %v5372_v49 = vpop.permute.xlu2 %733 }
 0x1f3   : > { %v781_v46 = vsel %vm761_vm5, %v720_v43, %v5349_v29  ;;  %v785_v28 = vsel %vm761_vm5, %v5351_v32, %v720_v43  ;;  %v718_v50 = vpop.permute.xlu0 %717 }
 0x1f4   : > { %v811_v56 = vsub.f32 %v785_v28, %v704_v44  ;;  %v812_v58 = vsub.f32 %v781_v46, %v5237_v35  ;;  %v784_v15 = vsel %vm761_vm5, %v5302_v61, %v718_v50 }
 0x1f5   : > { %v804_v55 = vsub.f32 %v784_v15, %v703_v52 }
 0x1f6   : > { %v854_v62 = vmul.f32 %v819_v6, %v811_v56  ;;  %v855_v3 = vmul.f32 %v820_v21, %v812_v58 }
 0x1f7   : > { %v847_v8 = vmul.f32 %v819_v6, %v804_v55 }
 0x1f8   : > { %v5382_v9 = vadd.f32 %v855_v3, %v5237_v35  ;;  %v5384_v13 = vadd.f32 %v854_v62, %v704_v44 }
 0x1f9   : > { %v5386_v16 = vadd.f32 %v847_v8, %v703_v52 }
 0x1fa   : > { %v726_v0 = vpop.permute.xlu1 %725  ;;  %904 = vrot.lane.b32.xlu2 %v5382_v9, %s4762_s5  ;;  %896 = vrot.lane.b32.xlu1 %v5384_v13, %s4762_s5  ;;  %v5398_v22 = vpop.permute.xlu2 %739 }
 0x1fb   : > { %v776_v6 = vsel %vm761_vm5, %v726_v0, %v5372_v49  ;;  %v780_v35 = vsel %vm761_vm5, %v718_v50, %v726_v0  ;;  %894 = vrot.lane.b32.xlu0 %v5386_v16, %s4762_s5  ;;  %v724_v23 = vpop.permute.xlu0 %723  ;;  %v822_v50 = vperm.slane %v5319_v5, 3 }
 0x1fc   : > { %v805_v26 = vsub.f32 %v780_v35, %v5196_v20  ;;  %v806_v27 = vsub.f32 %v776_v6, %v5253_v39  ;;  %v779_v34 = vsel %vm761_vm5, %v716_v2, %v724_v23  ;;  %v823_v35 = vperm.slane %v5319_v5, 4 }
 0x1fd   : > { %v798_v10 = vsub.f32 %v779_v34, %v5213_v25 }
 0x1fe   : > { %v848_v37 = vmul.f32 %v820_v21, %v805_v26  ;;  %v849_v38 = vmul.f32 %v821_v19, %v806_v27 }
 0x1ff   : > { %v841_v43 = vmul.f32 %v820_v21, %v798_v10 }
 0x200   : > { %v5408_v44 = vadd.f32 %v849_v38, %v5253_v39  ;;  %v5411_v46 = vadd.f32 %v848_v37, %v5196_v20 }
 0x201   : > { %v5414_v28 = vadd.f32 %v841_v43, %v5213_v25 }
 0x202   : > { %v732_v52 = vpop.permute.xlu1 %731  ;;  %910 = vrot.lane.b32.xlu2 %v5408_v44, %s4762_s5  ;;  %902 = vrot.lane.b32.xlu1 %v5411_v46, %s4762_s5  ;;  %v5426_v2 = vpop.permute.xlu2 %745 }
 0x203   : > { %v771_v39 = vsel %vm761_vm5, %v732_v52, %v5398_v22  ;;  %v775_v20 = vsel %vm761_vm5, %v724_v23, %v732_v52  ;;  %900 = vrot.lane.b32.xlu0 %v5414_v28, %s4762_s5  ;;  %v730_v25 = vpop.permute.xlu0 %729 }
 0x204   : > { %v799_v21 = vsub.f32 %v775_v20, %v5208_v24  ;;  %v800_v56 = vsub.f32 %v771_v39, %v5268_v45  ;;  %v774_v58 = vsel %vm761_vm5, %v5331_v11, %v730_v25 }
 0x205   : > { %v792_v15 = vsub.f32 %v774_v58, %v5232_v31 }
 0x206   : > { %v842_v55 = vmul.f32 %v821_v19, %v799_v21  ;;  %v843_v62 = vmul.f32 %v822_v50, %v800_v56 }
 0x207   : > { %v835_v3 = vmul.f32 %v821_v19, %v792_v15 }
 0x208   : > { %v5437_v8 = vadd.f32 %v843_v62, %v5268_v45  ;;  %v5440_v0 = vadd.f32 %v842_v55, %v5208_v24 }
 0x209   : > { %v5443_v6 = vadd.f32 %v835_v3, %v5232_v31 }
 0x20a   : > { %v738_v23 = vpop.permute.xlu1 %737  ;;  %916 = vrot.lane.b32.xlu2 %v5437_v8, %s4762_s5  ;;  %908 = vrot.lane.b32.xlu1 %v5440_v0, %s4762_s5  ;;  %v5455_v11 = vpop.permute.xlu2 %751 }
 0x20b   : > { %v766_v45 = vsel %vm761_vm5, %v738_v23, %v5426_v2  ;;  %v770_v24 = vsel %vm761_vm5, %v730_v25, %v738_v23  ;;  %906 = vrot.lane.b32.xlu0 %v5443_v6, %s4762_s5  ;;  %v736_v31 = vpop.permute.xlu0 %735 }
 0x20c   : > { %v793_v26 = vsub.f32 %v770_v24, %v5228_v30  ;;  %v794_v27 = vsub.f32 %v766_v45, %v5280_v51  ;;  %v777_v34 = vsel %vm761_vm5, %v5349_v29, %v736_v31 }
 0x20d   : > { %v813_v10 = vsub.f32 %v777_v34, %v5249_v36 }
 0x20e   : > { %v836_v37 = vmul.f32 %v822_v50, %v793_v26  ;;  %v837_v38 = vmul.f32 %v823_v35, %v794_v27  ;;  %v824_v27 = vperm.slane %v5319_v5, 5 }
 0x20f   : > { %v856_v43 = vmul.f32 %v821_v19, %v813_v10 }
 0x210   : > { %v5466_v52 = vadd.f32 %v837_v38, %v5280_v51  ;;  %v5469_v39 = vadd.f32 %v836_v37, %v5228_v30  ;;  %v5484_v30 = vperm.slane %v5319_v5, 6 }
 0x211   : > { %v5472_v20 = vadd.f32 %v856_v43, %v5249_v36 }
 0x212   : > { %v744_v25 = vpop.permute.xlu1 %743  ;;  %922 = vrot.lane.b32.xlu2 %v5466_v52, %s4762_s5  ;;  %914 = vrot.lane.b32.xlu1 %v5469_v39, %s4762_s5  ;;  %v758_v19 = vpop.permute.xlu2 %757 }
 0x213   : > { %v769_v29 = vsel %vm761_vm5, %v744_v25, %v5455_v11  ;;  %v773_v51 = vsel %vm761_vm5, %v736_v31, %v744_v25  ;;  %912 = vrot.lane.b32.xlu0 %v5472_v20, %s4762_s5  ;;  %v742_v36 = vpop.permute.xlu0 %741  ;;  %v788_v58 = vsel %vm761_vm5, %v758_v19, %v5302_v61 }
 0x214   : > { %v814_v21 = vsub.f32 %v773_v51, %v5245_v33  ;;  %v815_v56 = vsub.f32 %v769_v29, %v5292_v57  ;;  %v772_v15 = vsel %vm761_vm5, %v5372_v49, %v742_v36  ;;  %v810_v55 = vsub.f32 %v788_v58, %v5310_v1 }
 0x215   : > { %v807_v62 = vsub.f32 %v772_v15, %v5264_v42 }
 0x216   : > { %v857_v3 = vmul.f32 %v822_v50, %v814_v21  ;;  %v858_v23 = vmul.f32 %v823_v35, %v815_v56  ;;  %v853_v45 = vmul.f32 %v5484_v30, %v810_v55 }
 0x217   : > { %v850_v24 = vmul.f32 %v822_v50, %v807_v62 }
 0x218   : > { %v5500_v31 = vadd.f32 %v858_v23, %v5292_v57  ;;  %v5503_v26 = vadd.f32 %v857_v3, %v5245_v33  ;;  %v5509_v49 = vadd.f32 %v853_v45, %v5310_v1 }
 0x219   : > { %v5506_v61 = vadd.f32 %v850_v24, %v5264_v42 }
 0x21a   : > { %v750_v34 = vpop.permute.xlu1 %749  ;;  %928 = vrot.lane.b32.xlu2 %v5500_v31, %s4762_s5  ;;  %920 = vrot.lane.b32.xlu1 %v5503_v26, %s4762_s5 }
 0x21b   : > { %v764_v57 = vsel %vm761_vm5, %v750_v34, %v758_v19  ;;  %v768_v33 = vsel %vm761_vm5, %v742_v36, %v750_v34  ;;  %918 = vrot.lane.b32.xlu0 %v5506_v61, %s4762_s5  ;;  %v748_v42 = vpop.permute.xlu0 %747 }
 0x21c   : > { %v808_v1 = vsub.f32 %v768_v33, %v5260_v41  ;;  %v809_v5 = vsub.f32 %v764_v57, %v5306_v63  ;;  %v767_v50 = vsel %vm761_vm5, %v5398_v22, %v748_v42 }
 0x21d   : > { %v801_v10 = vsub.f32 %v767_v50, %v5276_v48 }
 0x21e   : > { %v851_v37 = vmul.f32 %v823_v35, %v808_v1  ;;  %v852_v38 = vmul.f32 %v824_v27, %v809_v5 }
 0x21f   : > { %v844_v43 = vmul.f32 %v823_v35, %v801_v10 }
 0x220   : > { %v5529_v25 = vadd.f32 %v852_v38, %v5306_v63  ;;  %v5532_v29 = vadd.f32 %v851_v37, %v5260_v41 }
 0x221   : > { %v5535_v51 = vadd.f32 %v844_v43, %v5276_v48 }
 0x222   : > { %v756_v19 = vpop.permute.xlu1 %755  ;;  %934 = vrot.lane.b32.xlu2 %v5529_v25, %s4762_s5  ;;  %926 = vrot.lane.b32.xlu1 %v5532_v29, %s4762_s5 }
 0x223   : > { %v763_v22 = vsel %vm761_vm5, %v748_v42, %v756_v19  ;;  %v787_v63 = vsel %vm761_vm5, %v756_v19, %v5323_v7  ;;  %924 = vrot.lane.b32.xlu0 %v5535_v51, %s4762_s5  ;;  %v754_v41 = vpop.permute.xlu0 %753 }
 0x224   : > { %v802_v48 = vsub.f32 %v763_v22, %v5272_v47  ;;  %v803_v35 = vsub.f32 %v787_v63, %v5314_v4  ;;  %v762_v36 = vsel %vm761_vm5, %v5426_v2, %v754_v41  ;;  %v786_v21 = vsel %vm761_vm5, %v754_v41, %v5333_v12 }
 0x225   : > { %v795_v56 = vsub.f32 %v762_v36, %v5288_v54  ;;  %v796_v7 = vsub.f32 %v786_v21, %v5284_v53 }
 0x226   : > { %v845_v58 = vmul.f32 %v824_v27, %v802_v48  ;;  %v846_v15 = vmul.f32 %v5484_v30, %v803_v35 }
 0x227   : > { %v838_v55 = vmul.f32 %v824_v27, %v795_v56  ;;  %v839_v62 = vmul.f32 %v5484_v30, %v796_v7 }
 0x228   : > { %v5561_v3 = vadd.f32 %v846_v15, %v5314_v4  ;;  %v5564_v23 = vadd.f32 %v845_v58, %v5272_v47 }
 0x229   : > { %v5567_v2 = vadd.f32 %v838_v55, %v5288_v54  ;;  %v5570_v12 = vadd.f32 %v839_v62, %v5284_v53 }
 0x22a   : > { %940 = vrot.lane.b32.xlu2 %v5561_v3, %s4762_s5  ;;  %932 = vrot.lane.b32.xlu1 %v5564_v23, %s4762_s5 }
 0x22b   : > { %930 = vrot.lane.b32.xlu0 %v5567_v2, %s4762_s5  ;;  %v760_v4 = vpop.permute.xlu0 %759 }
 0x22c   : > { %v765_v47 = vsel %vm761_vm5, %v5455_v11, %v760_v4  ;;  %v789_v54 = vsel %vm761_vm5, %v760_v4, %v5351_v32 }
 0x22d   : > { %v816_v53 = vsub.f32 %v765_v47, %v5300_v60  ;;  %v817_v45 = vsub.f32 %v789_v54, %v5296_v59 }
 0x22f   : > { %v859_v24 = vmul.f32 %v824_v27, %v816_v53  ;;  %v860_v34 = vmul.f32 %v5484_v30, %v817_v45  ;;  %v5642_v30 = vld [vmem:[%s8888_s2 + $0x1] ss:$4 sm:$0xff] }
 0x230   : > { %v978_v27 = vperm.slane %v5642_v30, 1  ;;  %v979_v22 = vperm.slane %v5642_v30, 2  ;;  %v980_v15 = vperm.slane %v5642_v30, 3 }
 0x231   : > { %v5588_v57 = vadd.f32 %v859_v24, %v5300_v60  ;;  %v5591_v33 = vadd.f32 %v860_v34, %v5296_v59 }
 0x232   : > { %1086 = vrot.lane.b32.xlu2 %v5357_v14, %s4764_s9  ;;  %938 = vrot.lane.b32.xlu1 %v5570_v12, %s4762_s5 }
 0x233   : > { %936 = vrot.lane.b32.xlu0 %v5588_v57, %s4762_s5 }
 0x23a   : > { %1092 = vrot.lane.b32.xlu2 %v5384_v13, %s4764_s9  ;;  %944 = vrot.lane.b32.xlu1 %v5591_v33, %s4762_s5 }
 0x23b   : > { %942 = vrot.lane.b32.xlu0 %v5509_v49, %s4762_s5 }
 0x242   : > { %1098 = vrot.lane.b32.xlu2 %v5411_v46, %s4764_s9  ;;  %1090 = vrot.lane.b32.xlu1 %v5386_v16, %s4764_s9 }
 0x243   : > { %1088 = vrot.lane.b32.xlu0 %v5335_v17, %s4764_s9 }
 0x244   : > { %v5611_v59 = vpop.permute.xlu2 %892 }
 0x24a   : > { %1104 = vrot.lane.b32.xlu2 %v5440_v0, %s4764_s9  ;;  %1096 = vrot.lane.b32.xlu1 %v5414_v28, %s4764_s9 }
 0x24b   : > { %1094 = vrot.lane.b32.xlu0 %v5355_v40, %s4764_s9 }
 0x24c   : > { %v899_v60 = vpop.permute.xlu2 %898 }
 0x252   : > { %1110 = vrot.lane.b32.xlu2 %v5469_v39, %s4764_s9  ;;  %1102 = vrot.lane.b32.xlu1 %v5443_v6, %s4764_s9 }
 0x253   : > { %1100 = vrot.lane.b32.xlu0 %v5382_v9, %s4764_s9 }
 0x254   : > { %v5625_v32 = vpop.permute.xlu2 %904 }
 0x25a   : > { %1116 = vrot.lane.b32.xlu2 %v5503_v26, %s4764_s9  ;;  %1108 = vrot.lane.b32.xlu1 %v5472_v20, %s4764_s9 }
 0x25b   : > { %1106 = vrot.lane.b32.xlu0 %v5408_v44, %s4764_s9 }
 0x25c   : > { %v5636_v11 = vpop.permute.xlu2 %910 }
 0x262   : > { %1122 = vrot.lane.b32.xlu2 %v5532_v29, %s4764_s9  ;;  %1114 = vrot.lane.b32.xlu1 %v5506_v61, %s4764_s9 }
 0x263   : > { %1112 = vrot.lane.b32.xlu0 %v5437_v8, %s4764_s9 }
 0x264   : > { %v5651_v42 = vpop.permute.xlu2 %916  ;;  %v5653_v1 = vpop.permute.xlu1 %890 }
 0x265   : > { %v966_v5 = vsel %vm676_vm4, %v5653_v1, %v899_v60 }
 0x266   : > { %v992_v50 = vmul.f32 %v978_v27, %v966_v5  ;;  %v981_v5 = vperm.slane %v5642_v30, 4 }
 0x268   : > { %1025 = vst [vmem:[%s5658_s18 + $0x8] sm:$0xff] %v992_v50 }
 0x26a   : > { %1128 = vrot.lane.b32.xlu2 %v5564_v23, %s4764_s9  ;;  %1120 = vrot.lane.b32.xlu1 %v5535_v51, %s4764_s9 }
 0x26b   : > { %1118 = vrot.lane.b32.xlu0 %v5466_v52, %s4764_s9 }
 0x26c   : > { %v5667_v10 = vpop.permute.xlu2 %922  ;;  %v5669_v37 = vpop.permute.xlu1 %896 }
 0x26d   : > { %v969_v38 = vsel %vm676_vm4, %v5669_v37, %v5625_v32  ;;  %v5675_v43 = vpop.permute.xlu0 %894 }
 0x26e   : > { %v1013_v19 = vmul.f32 %v978_v27, %v969_v38 }
 0x270   : > { %1046 = vst [vmem:[%s5658_s18 + $0xb0] sm:$0xff] %v1013_v19 }
 0x272   : > { %1134 = vrot.lane.b32.xlu2 %v5570_v12, %s4764_s9  ;;  %1126 = vrot.lane.b32.xlu1 %v5567_v2, %s4764_s9 }
 0x273   : > { %1124 = vrot.lane.b32.xlu0 %v5500_v31, %s4764_s9 }
 0x274   : > { %v5685_v63 = vpop.permute.xlu2 %928  ;;  %v903_v41 = vpop.permute.xlu1 %902 }
 0x275   : > { %v964_v48 = vsel %vm676_vm4, %v903_v41, %v5636_v11  ;;  %v968_v35 = vsel %vm676_vm4, %v5675_v43, %v903_v41  ;;  %v901_v36 = vpop.permute.xlu0 %900 }
 0x276   : > { %v1006_v21 = vmul.f32 %v978_v27, %v968_v35  ;;  %v1007_v56 = vmul.f32 %v979_v22, %v964_v48  ;;  %v967_v7 = vsel %vm676_vm4, %v5611_v59, %v901_v36 }
 0x277   : > { %v999_v58 = vmul.f32 %v978_v27, %v967_v7  ;;  %v5721_v27 = vperm.slane %v5642_v30, 0 }
 0x278   : > { %1039 = vst [vmem:[%s5658_s18 + $0x78] sm:$0xff] %v1006_v21 }
 0x279   : > { %1040 = vst [vmem:[%s5658_s18 + $0x80] sm:$0xff] %v1007_v56 }
 0x27a   : > { %1032 = vst [vmem:[%s5658_s18 + $0x40] sm:$0xff] %v999_v58  ;;  %1140 = vrot.lane.b32.xlu2 %v5591_v33, %s4764_s9  ;;  %1132 = vrot.lane.b32.xlu1 %v5588_v57, %s4764_s9 }
 0x27b   : > { %1130 = vrot.lane.b32.xlu0 %v5529_v25, %s4764_s9 }
 0x27c   : > { %v5706_v55 = vpop.permute.xlu2 %934  ;;  %v909_v62 = vpop.permute.xlu1 %908 }
 0x27d   : > { %v959_v4 = vsel %vm676_vm4, %v909_v62, %v5651_v42  ;;  %v963_v47 = vsel %vm676_vm4, %v901_v36, %v909_v62  ;;  %v907_v54 = vpop.permute.xlu0 %906 }
 0x27e   : > { %v1000_v53 = vmul.f32 %v979_v22, %v963_v47  ;;  %v1001_v45 = vmul.f32 %v980_v15, %v959_v4  ;;  %v962_v24 = vsel %vm676_vm4, %v899_v60, %v907_v54 }
 0x27f   : > { %v993_v34 = vmul.f32 %v979_v22, %v962_v24 }
 0x280   : > { %1033 = vst [vmem:[%s5658_s18 + $0x48] sm:$0xff] %v1000_v53 }
 0x281   : > { %1034 = vst [vmem:[%s5658_s18 + $0x50] sm:$0xff] %v1001_v45  ;;  %v982_v45 = vperm.slane %v5642_v30, 5 }
 0x282   : > { %1026 = vst [vmem:[%s5658_s18 + $0x10] sm:$0xff] %v993_v34  ;;  %1138 = vrot.lane.b32.xlu1 %v5509_v49, %s4764_s9 }
 0x283   : > { %1136 = vrot.lane.b32.xlu0 %v5561_v3, %s4764_s9 }
 0x284   : > { %v941_v60 = vpop.permute.xlu2 %940  ;;  %v915_v50 = vpop.permute.xlu1 %914 }
 0x285   : > { %v971_v38 = vsel %vm676_vm4, %v941_v60, %v5611_v59  ;;  %v954_v19 = vsel %vm676_vm4, %v915_v50, %v5667_v10  ;;  %v958_v41 = vsel %vm676_vm4, %v907_v54, %v915_v50  ;;  %v913_v48 = vpop.permute.xlu0 %912 }
 0x286   : > { %v998_v35 = vmul.f32 %v5721_v27, %v971_v38  ;;  %v994_v36 = vmul.f32 %v980_v15, %v958_v41  ;;  %v995_v21 = vmul.f32 %v981_v5, %v954_v19  ;;  %v965_v56 = vsel %vm676_vm4, %v5625_v32, %v913_v48 }
 0x287   : > { %v1014_v7 = vmul.f32 %v979_v22, %v965_v56 }
 0x288   : > { %1031 = vst [vmem:[%s5658_s18 + $0x38] sm:$0xff] %v998_v35  ;;  %v983_v35 = vperm.slane %v5642_v30, 6 }
 0x289   : > { %1027 = vst [vmem:[%s5658_s18 + $0x18] sm:$0xff] %v994_v36 }
 0x28a   : > { %1028 = vst [vmem:[%s5658_s18 + $0x20] sm:$0xff] %v995_v21 }
 0x28b   : > { %1047 = vst [vmem:[%s5658_s18 + $0xb8] sm:$0xff] %v1014_v7 }
 0x28c   : > { %v5742_v59 = vpop.permute.xlu2 %1086  ;;  %v921_v58 = vpop.permute.xlu1 %920 }
 0x28d   : > { %v957_v62 = vsel %vm676_vm4, %v921_v58, %v5685_v63  ;;  %v961_v4 = vsel %vm676_vm4, %v913_v48, %v921_v58  ;;  %v919_v47 = vpop.permute.xlu0 %918 }
 0x28e   : > { %v1015_v54 = vmul.f32 %v980_v15, %v961_v4  ;;  %v1016_v32 = vmul.f32 %v981_v5, %v957_v62  ;;  %v960_v22 = vsel %vm676_vm4, %v5636_v11, %v919_v47 }
 0x28f   : > { %v1008_v53 = vmul.f32 %v980_v15, %v960_v22 }
 0x290   : > { %1048 = vst [vmem:[%s5658_s18 + $0xc0] sm:$0xff] %v1015_v54 }
 0x291   : > { %1049 = vst [vmem:[%s5658_s18 + $0xc8] sm:$0xff] %v1016_v32 }
 0x292   : > { %1041 = vst [vmem:[%s5658_s18 + $0x88] sm:$0xff] %v1008_v53 }
 0x294   : > { %v5756_v24 = vpop.permute.xlu2 %1092  ;;  %v927_v34 = vpop.permute.xlu1 %926 }
 0x295   : > { %v952_v50 = vsel %vm676_vm4, %v927_v34, %v5706_v55  ;;  %v956_v38 = vsel %vm676_vm4, %v919_v47, %v927_v34  ;;  %v925_v19 = vpop.permute.xlu0 %924 }
 0x296   : > { %v1009_v11 = vmul.f32 %v981_v5, %v956_v38  ;;  %v1010_v41 = vmul.f32 %v982_v45, %v952_v50  ;;  %v955_v15 = vsel %vm676_vm4, %v5651_v42, %v925_v19 }
 0x297   : > { %v1002_v48 = vmul.f32 %v981_v5, %v955_v15 }
 0x298   : > { %1042 = vst [vmem:[%s5658_s18 + $0x90] sm:$0xff] %v1009_v11 }
 0x299   : > { %1043 = vst [vmem:[%s5658_s18 + $0x98] sm:$0xff] %v1010_v41 }
 0x29a   : > { %1035 = vst [vmem:[%s5658_s18 + $0x58] sm:$0xff] %v1002_v48 }
 0x29c   : > { %v5770_v36 = vpop.permute.xlu2 %1098  ;;  %v933_v21 = vpop.permute.xlu1 %932 }
 0x29d   : > { %v947_v56 = vsel %vm676_vm4, %v933_v21, %v941_v60  ;;  %v951_v7 = vsel %vm676_vm4, %v925_v19, %v933_v21  ;;  %v931_v58 = vpop.permute.xlu0 %930 }
 0x29e   : > { %v1003_v42 = vmul.f32 %v982_v45, %v951_v7  ;;  %v1004_v62 = vmul.f32 %v983_v35, %v947_v56  ;;  %v950_v5 = vsel %vm676_vm4, %v5667_v10, %v931_v58 }
 0x29f   : > { %v996_v30 = vmul.f32 %v982_v45, %v950_v5 }
 0x2a0   : > { %1036 = vst [vmem:[%s5658_s18 + $0x60] sm:$0xff] %v1003_v42 }
 0x2a1   : > { %1037 = vst [vmem:[%s5658_s18 + $0x68] sm:$0xff] %v1004_v62 }
 0x2a2   : > { %1029 = vst [vmem:[%s5658_s18 + $0x28] sm:$0xff] %v996_v30 }
 0x2a4   : > { %v5782_v4 = vpop.permute.xlu2 %1104  ;;  %v939_v60 = vpop.permute.xlu1 %938 }
 0x2a5   : > { %v946_v47 = vsel %vm676_vm4, %v931_v58, %v939_v60  ;;  %v970_v54 = vsel %vm676_vm4, %v939_v60, %v5653_v1  ;;  %v937_v32 = vpop.permute.xlu0 %936 }
 0x2a6   : > { %v991_v22 = vmul.f32 %v5721_v27, %v970_v54  ;;  %v997_v10 = vmul.f32 %v983_v35, %v946_v47  ;;  %v953_v53 = vsel %vm676_vm4, %v5685_v63, %v937_v32 }
 0x2a7   : > { %v1017_v34 = vmul.f32 %v982_v45, %v953_v53 }
 0x2a8   : > { %1024 = vst [vmem:[%s5658_s18] sm:$0xff] %v991_v22 }
 0x2a9   : > { %1030 = vst [vmem:[%s5658_s18 + $0x30] sm:$0xff] %v997_v10 }
 0x2aa   : > { %1050 = vst [vmem:[%s5658_s18 + $0xd0] sm:$0xff] %v1017_v34 }
 0x2ac   : > { %v5797_v50 = vpop.permute.xlu2 %1110  ;;  %v945_v1 = vpop.permute.xlu1 %944 }
 0x2ad   : > { %v949_v38 = vsel %vm676_vm4, %v937_v32, %v945_v1  ;;  %v973_v63 = vsel %vm676_vm4, %v945_v1, %v5669_v37  ;;  %v943_v45 = vpop.permute.xlu0 %942 }
 0x2ae   : > { %v1012_v19 = vmul.f32 %v5721_v27, %v973_v63  ;;  %v1018_v11 = vmul.f32 %v983_v35, %v949_v38  ;;  %v948_v41 = vsel %vm676_vm4, %v5706_v55, %v943_v45  ;;  %v972_v15 = vsel %vm676_vm4, %v943_v45, %v5675_v43 }
 0x2af   : > { %v1005_v48 = vmul.f32 %v5721_v27, %v972_v15  ;;  %v1011_v21 = vmul.f32 %v983_v35, %v948_v41 }
 0x2b0   : > { %1045 = vst [vmem:[%s5658_s18 + $0xa8] sm:$0xff] %v1012_v19 }
 0x2b1   : > { %1051 = vst [vmem:[%s5658_s18 + $0xd8] sm:$0xff] %v1018_v11 }
 0x2b2   : > { %1038 = vst [vmem:[%s5658_s18 + $0x70] sm:$0xff] %v1005_v48 }
 0x2b3   : > { %1044 = vst [vmem:[%s5658_s18 + $0xa0] sm:$0xff] %v1011_v21 }
 0x2b4   : > { %1058 = vst [vmem:[%s5816_s23] sm:$0xff] %v5357_v14  ;;  %v5820_v37 = vpop.permute.xlu2 %1116  ;;  %v5822_v43 = vpop.permute.xlu1 %1090 }
 0x2b5   : > { %1059 = vst [vmem:[%s5816_s23 + $0x8] sm:$0xff] %v5355_v40  ;;  %v5826_v55 = vpop.permute.xlu0 %1088 }
 0x2b6   : > { %1060 = vst [vmem:[%s5816_s23 + $0x10] sm:$0xff] %v5443_v6 }
 0x2b7   : > { %1061 = vst [vmem:[%s5816_s23 + $0x18] sm:$0xff] %v5469_v39 }
 0x2b8   : > { %1062 = vst [vmem:[%s5816_s23 + $0x20] sm:$0xff] %v5466_v52 }
 0x2b9   : > { %1063 = vst [vmem:[%s5816_s23 + $0x28] sm:$0xff] %v5567_v2 }
 0x2ba   : > { %1064 = vst [vmem:[%s5816_s23 + $0x30] sm:$0xff] %v5570_v12 }
 0x2bb   : > { %1065 = vst [vmem:[%s5816_s23 + $0x38] sm:$0xff] %v5335_v17 }
 0x2bc   : > { %1066 = vst [vmem:[%s5816_s23 + $0x40] sm:$0xff] %v5414_v28  ;;  %v5842_v40 = vpop.permute.xlu2 %1122  ;;  %v1097_v14 = vpop.permute.xlu1 %1096 }
 0x2bd   : > { %1067 = vst [vmem:[%s5816_s23 + $0x48] sm:$0xff] %v5440_v0  ;;  %v1095_v6 = vpop.permute.xlu0 %1094  ;;  %v1164_v52 = vsel %vm1142_vm6, %v5826_v55, %v1097_v14 }
 0x2be   : > { %1068 = vst [vmem:[%s5816_s23 + $0x50] sm:$0xff] %v5437_v8  ;;  %v5868_v8 = vld [vmem:[%s8888_s2 + $0x2] ss:$4 sm:$0xff] }
 0x2bf   : > { %1069 = vst [vmem:[%s5816_s23 + $0x58] sm:$0xff] %v5535_v51  ;;  %v1175_v0 = vperm.slane %v5868_v8, 1  ;;  %v5921_v2 = vperm.slane %v5868_v8, 6  ;;  %v1177_v60 = vperm.slane %v5868_v8, 3  ;;  %v1178_v1 = vperm.slane %v5868_v8, 4 }
 0x2c0   : > { %1070 = vst [vmem:[%s5816_s23 + $0x60] sm:$0xff] %v5564_v23  ;;  %v1179_v48 = vperm.slane %v5868_v8, 5 }
 0x2c1   : > { %1071 = vst [vmem:[%s5816_s23 + $0x68] sm:$0xff] %v5561_v3 }
 0x2c2   : > { %1072 = vst [vmem:[%s5816_s23 + $0x70] sm:$0xff] %v5386_v16 }
 0x2c3   : > { %1073 = vst [vmem:[%s5816_s23 + $0x78] sm:$0xff] %v5411_v46  ;;  %v1165_v46 = vsel %vm1142_vm6, %v5822_v43, %v5770_v36 }
 0x2c4   : > { %1074 = vst [vmem:[%s5816_s23 + $0x80] sm:$0xff] %v5408_v44  ;;  %v5861_v17 = vpop.permute.xlu2 %1128  ;;  %v1103_v28 = vpop.permute.xlu1 %1102  ;;  %v1174_v44 = vperm.slane %v5868_v8, 0 }
 0x2c5   : > { %1075 = vst [vmem:[%s5816_s23 + $0x88] sm:$0xff] %v5506_v61  ;;  %v1101_v16 = vpop.permute.xlu0 %1100  ;;  %v1155_v3 = vsel %vm1142_vm6, %v1103_v28, %v5797_v50 }
 0x2c6   : > { %1076 = vst [vmem:[%s5816_s23 + $0x90] sm:$0xff] %v5532_v29  ;;  %v1202_v39 = vmul.f32 %v1174_v44, %v1165_v46  ;;  %v1176_v29 = vperm.slane %v5868_v8, 2 }
 0x2c7   : > { %1077 = vst [vmem:[%s5816_s23 + $0x98] sm:$0xff] %v5529_v25  ;;  %v1195_v25 = vmul.f32 %v1174_v44, %v1164_v52 }
 0x2c8   : > { %1078 = vst [vmem:[%s5816_s23 + $0xa0] sm:$0xff] %v5509_v49 }
 0x2c9   : > { %1079 = vst [vmem:[%s5816_s23 + $0xa8] sm:$0xff] %v5384_v13  ;;  %v1160_v13 = vsel %vm1142_vm6, %v1097_v14, %v5782_v4 }
 0x2ca   : > { %1080 = vst [vmem:[%s5816_s23 + $0xb0] sm:$0xff] %v5382_v9  ;;  %v1163_v9 = vsel %vm1142_vm6, %v5742_v59, %v1095_v6 }
 0x2cb   : > { %1081 = vst [vmem:[%s5816_s23 + $0xb8] sm:$0xff] %v5472_v20  ;;  %v1159_v20 = vsel %vm1142_vm6, %v1095_v6, %v1103_v28  ;;  %v1188_v23 = vmul.f32 %v1174_v44, %v1163_v9 }
 0x2cc   : > { %1082 = vst [vmem:[%s5816_s23 + $0xc0] sm:$0xff] %v5503_v26  ;;  %v5903_v61 = vpop.permute.xlu2 %1134  ;;  %v1109_v49 = vpop.permute.xlu1 %1108  ;;  %v1196_v26 = vmul.f32 %v1175_v0, %v1160_v13  ;;  %v1189_v12 = vmul.f32 %v1175_v0, %v1159_v20 }
 0x2cd   : > { %1083 = vst [vmem:[%s5816_s23 + $0xc8] sm:$0xff] %v5500_v31  ;;  %v1107_v51 = vpop.permute.xlu0 %1106  ;;  %v1166_v31 = vsel %vm1142_vm6, %v5756_v24, %v1101_v16  ;;  %v1162_v27 = vsel %vm1142_vm6, %v1101_v16, %v1109_v49  ;;  %v1158_v56 = vsel %vm1142_vm6, %v1109_v49, %v5820_v37 }
 0x2ce   : > { %1084 = vst [vmem:[%s5816_s23 + $0xd0] sm:$0xff] %v5588_v57  ;;  %v1167_v57 = vsel %vm1142_vm6, %v5903_v61, %v5742_v59  ;;  %v1209_v35 = vmul.f32 %v1174_v44, %v1166_v31  ;;  %v1161_v59 = vsel %vm1142_vm6, %v5770_v36, %v1107_v51  ;;  %v1210_v58 = vmul.f32 %v1175_v0, %v1162_v27 }
 0x2cf   : > { %1085 = vst [vmem:[%s5816_s23 + $0xd8] sm:$0xff] %v5591_v33  ;;  %v1190_v33 = vmul.f32 %v1176_v29, %v1155_v3  ;;  %v1194_v7 = vmul.f32 %v5921_v2, %v1167_v57  ;;  %v1211_v5 = vmul.f32 %v1176_v29, %v1158_v56  ;;  %v1203_v54 = vmul.f32 %v1175_v0, %v1161_v59 }
 0x2d0   : > { %1236 = vst [vmem:[%s5923_s29 + $0x70] sm:$0xff] %v1202_v39 }
 0x2d1   : > { %1229 = vst [vmem:[%s5923_s29 + $0x38] sm:$0xff] %v1195_v25 }
 0x2d2   : > { %1230 = vst [vmem:[%s5923_s29 + $0x40] sm:$0xff] %v1196_v26 }
 0x2d3   : > { %1222 = vst [vmem:[%s5923_s29] sm:$0xff] %v1188_v23 }
 0x2d4   : > { %1223 = vst [vmem:[%s5923_s29 + $0x8] sm:$0xff] %v1189_v12  ;;  %v1141_v42 = vpop.permute.xlu2 %1140  ;;  %v1115_v62 = vpop.permute.xlu1 %1114 }
 0x2d5   : > { %1224 = vst [vmem:[%s5923_s29 + $0x10] sm:$0xff] %v1190_v33  ;;  %v1170_v30 = vsel %vm1142_vm6, %v1141_v42, %v5756_v24  ;;  %v1157_v47 = vsel %vm1142_vm6, %v1107_v51, %v1115_v62  ;;  %v1113_v36 = vpop.permute.xlu0 %1112  ;;  %v1153_v32 = vsel %vm1142_vm6, %v1115_v62, %v5842_v40 }
 0x2d6   : > { %1243 = vst [vmem:[%s5923_s29 + $0xa8] sm:$0xff] %v1209_v35  ;;  %v1215_v22 = vmul.f32 %v5921_v2, %v1170_v30  ;;  %v1156_v24 = vsel %vm1142_vm6, %v5782_v4, %v1113_v36  ;;  %v1204_v10 = vmul.f32 %v1176_v29, %v1157_v47  ;;  %v1205_v53 = vmul.f32 %v1177_v60, %v1153_v32 }
 0x2d7   : > { %1228 = vst [vmem:[%s5923_s29 + $0x30] sm:$0xff] %v1194_v7  ;;  %v1197_v34 = vmul.f32 %v1176_v29, %v1156_v24 }
 0x2d8   : > { %1244 = vst [vmem:[%s5923_s29 + $0xb0] sm:$0xff] %v1210_v58 }
 0x2d9   : > { %1245 = vst [vmem:[%s5923_s29 + $0xb8] sm:$0xff] %v1211_v5 }
 0x2da   : > { %1237 = vst [vmem:[%s5923_s29 + $0x78] sm:$0xff] %v1203_v54 }
 0x2db   : > { %1249 = vst [vmem:[%s5923_s29 + $0xd8] sm:$0xff] %v1215_v22 }
 0x2dc   : > { %1238 = vst [vmem:[%s5923_s29 + $0x80] sm:$0xff] %v1204_v10  ;;  %v1121_v38 = vpop.permute.xlu1 %1120 }
 0x2dd   : > { %1239 = vst [vmem:[%s5923_s29 + $0x88] sm:$0xff] %v1205_v53  ;;  %v1148_v63 = vsel %vm1142_vm6, %v1121_v38, %v5861_v17  ;;  %v1152_v4 = vsel %vm1142_vm6, %v1113_v36, %v1121_v38  ;;  %v1119_v45 = vpop.permute.xlu0 %1118 }
 0x2de   : > { %1231 = vst [vmem:[%s5923_s29 + $0x48] sm:$0xff] %v1197_v34  ;;  %v1198_v19 = vmul.f32 %v1177_v60, %v1152_v4  ;;  %v1199_v11 = vmul.f32 %v1178_v1, %v1148_v63  ;;  %v1151_v41 = vsel %vm1142_vm6, %v5797_v50, %v1119_v45 }
 0x2df   : > { %v1191_v15 = vmul.f32 %v1177_v60, %v1151_v41 }
 0x2e0   : > { %1232 = vst [vmem:[%s5923_s29 + $0x50] sm:$0xff] %v1198_v19 }
 0x2e1   : > { %1233 = vst [vmem:[%s5923_s29 + $0x58] sm:$0xff] %v1199_v11 }
 0x2e2   : > { %1225 = vst [vmem:[%s5923_s29 + $0x18] sm:$0xff] %v1191_v15 }
 0x2e4   : > { %v1127_v21 = vpop.permute.xlu1 %1126 }
 0x2e5   : > { %v1143_v14 = vsel %vm1142_vm6, %v1127_v21, %v5903_v61  ;;  %v1147_v6 = vsel %vm1142_vm6, %v1119_v45, %v1127_v21  ;;  %v1125_v28 = vpop.permute.xlu0 %1124 }
 0x2e6   : > { %v1192_v16 = vmul.f32 %v1178_v1, %v1147_v6  ;;  %v1193_v50 = vmul.f32 %v1179_v48, %v1143_v14  ;;  %v1154_v44 = vsel %vm1142_vm6, %v5820_v37, %v1125_v28 }
 0x2e7   : > { %v1212_v46 = vmul.f32 %v1177_v60, %v1154_v44 }
 0x2e8   : > { %1226 = vst [vmem:[%s5923_s29 + $0x20] sm:$0xff] %v1192_v16 }
 0x2e9   : > { %1227 = vst [vmem:[%s5923_s29 + $0x28] sm:$0xff] %v1193_v50 }
 0x2ea   : > { %1246 = vst [vmem:[%s5923_s29 + $0xc0] sm:$0xff] %v1212_v46 }
 0x2ec   : > { %v1133_v8 = vpop.permute.xlu1 %1132 }
 0x2ed   : > { %v1146_v0 = vsel %vm1142_vm6, %v1133_v8, %v1141_v42  ;;  %v1150_v52 = vsel %vm1142_vm6, %v1125_v28, %v1133_v8  ;;  %v1131_v13 = vpop.permute.xlu0 %1130 }
 0x2ee   : > { %v1213_v39 = vmul.f32 %v1178_v1, %v1150_v52  ;;  %v1214_v9 = vmul.f32 %v1179_v48, %v1146_v0  ;;  %v1149_v61 = vsel %vm1142_vm6, %v5842_v40, %v1131_v13 }
 0x2ef   : > { %v1206_v37 = vmul.f32 %v1178_v1, %v1149_v61 }
 0x2f0   : > { %1247 = vst [vmem:[%s5923_s29 + $0xc8] sm:$0xff] %v1213_v39 }
 0x2f1   : > { %1248 = vst [vmem:[%s5923_s29 + $0xd0] sm:$0xff] %v1214_v9 }
 0x2f2   : > { %1240 = vst [vmem:[%s5923_s29 + $0x90] sm:$0xff] %v1206_v37 }
 0x2f4   : > { %v1139_v49 = vpop.permute.xlu1 %1138 }
 0x2f5   : > { %v1145_v25 = vsel %vm1142_vm6, %v1131_v13, %v1139_v49  ;;  %v1169_v29 = vsel %vm1142_vm6, %v1139_v49, %v5822_v43  ;;  %v1137_v20 = vpop.permute.xlu0 %1136 }
 0x2f6   : > { %v1207_v51 = vmul.f32 %v1179_v48, %v1145_v25  ;;  %v1208_v26 = vmul.f32 %v5921_v2, %v1169_v29  ;;  %v1144_v40 = vsel %vm1142_vm6, %v5861_v17, %v1137_v20  ;;  %v1168_v3 = vsel %vm1142_vm6, %v1137_v20, %v5826_v55 }
 0x2f7   : > { %v1200_v23 = vmul.f32 %v1179_v48, %v1144_v40  ;;  %v1201_v31 = vmul.f32 %v5921_v2, %v1168_v3  ;;  %1253 = sbr.rel (%p4365_p9) target bundleno = 2276 (0x8e4), region = 63 }
 0x2f8   : > { %1241 = vst [vmem:[%s5923_s29 + $0x98] sm:$0xff] %v1207_v51 }
 0x2f9   : > { %1242 = vst [vmem:[%s5923_s29 + $0xa0] sm:$0xff] %v1208_v26 }
 0x2fa   : > { %1234 = vst [vmem:[%s5923_s29 + $0x60] sm:$0xff] %v1200_v23 }
 0x2fb   : > { %1235 = vst [vmem:[%s5923_s29 + $0x68] sm:$0xff] %v1201_v31 }
 0x2fc   : > { %v6021_v5 = vld [vmem:[%s8887_s1 + $0xc0] sm:$0xff]  ;;  %v6042_v63 = vld [vmem:[%s8887_s1 + $0xd8] sm:$0xff]  ;;  %v6063_v8 = vld [vmem:[%s8887_s1 + $0xf0] sm:$0xff] }
 0x2fd   : > { %v6026_v30 = vld [vmem:[%s8887_s1 + $0x180] sm:$0xff]  ;;  %v6047_v45 = vld [vmem:[%s8887_s1 + $0x198] sm:$0xff]  ;;  %v6068_v52 = vld [vmem:[%s8887_s1 + $0x1b0] sm:$0xff] }
 0x2fe   : > { %v1326_v60 = vld [vmem:[%s8887_s1 + $0x240] sm:$0xff]  ;;  %v1329_v19 = vld [vmem:[%s8887_s1 + $0x258] sm:$0xff]  ;;  %v1332_v13 = vld [vmem:[%s8887_s1 + $0x270] sm:$0xff] }
 0x2ff   : > { %v6036_v24 = vld [vmem:[%s8887_s1] sm:$0xff]  ;;  %v6057_v6 = vld [vmem:[%s8887_s1 + $0x18] sm:$0xff]  ;;  %v6078_v29 = vld [vmem:[%s8887_s1 + $0x30] sm:$0xff] }
 0x300   : > { %v6084_v23 = vld [vmem:[%s8887_s1 + $0x108] sm:$0xff] }
 0x302   : > { %v1455_v43 = vld [vmem:[#allocation3 + $0x348] sm:$0xff]  ;;  %v1448_v12 = vld [vmem:[#allocation3 + $0x310] sm:$0xff]  ;;  %v1441_v17 = vld [vmem:[#allocation3 + $0x2d8] sm:$0xff] }
 0x303   : > { %4371 = vmatpush.msra.mxu1 %v1455_v43  ;;  %4372 = vmatpush.msra.mxu2 %v1455_v43  ;;  %v1434_v18 = vld [vmem:[#allocation3 + $0x2a0] sm:$0xff]  ;;  %v1427_v55 = vld [vmem:[#allocation3 + $0x268] sm:$0xff]  ;;  %v1420_v2 = vld [vmem:[#allocation3 + $0x230] sm:$0xff] }
 0x304   : > { %4373 = vmatpush.msra.mxu3 %v1455_v43  ;;  %1686 = vmatpush.msra.mxu0 %v1455_v43  ;;  %v1413_v57 = vld [vmem:[#allocation3 + $0x1f8] sm:$0xff]  ;;  %v1406_v33 = vld [vmem:[#allocation3 + $0x1c0] sm:$0xff]  ;;  %v1399_v27 = vld [vmem:[#allocation3 + $0x188] sm:$0xff] }
 0x305   : > { %4374 = vmatpush.msra.mxu1 %v1448_v12  ;;  %4375 = vmatpush.msra.mxu2 %v1448_v12  ;;  %v1392_v35 = vld [vmem:[#allocation3 + $0x150] sm:$0xff]  ;;  %v1385_v56 = vld [vmem:[#allocation3 + $0x118] sm:$0xff]  ;;  %v1378_v7 = vld [vmem:[#allocation3 + $0xe0] sm:$0xff] }
 0x306   : > { %4376 = vmatpush.msra.mxu3 %v1448_v12  ;;  %1687 = vmatpush.msra.mxu0 %v1448_v12  ;;  %v1371_v59 = vld [vmem:[#allocation3 + $0xa8] sm:$0xff]  ;;  %v1364_v58 = vld [vmem:[#allocation3 + $0x70] sm:$0xff]  ;;  %v1357_v42 = vld [vmem:[#allocation3 + $0x38] sm:$0xff] }
 0x307   : > { %4377 = vmatpush.msra.mxu1 %v1441_v17  ;;  %4378 = vmatpush.msra.mxu2 %v1441_v17  ;;  %v1350_v62 = vld [vmem:[#allocation3] sm:$0xff]  ;;  %v1679_v47 = vld [vmem:[#allocation3 + $0xa48] sm:$0xff]  ;;  %v1456_v36 = vld [vmem:[#allocation3 + $0x350] sm:$0xff] }
 0x308   : > { %4379 = vmatpush.msra.mxu3 %v1441_v17  ;;  %1688 = vmatpush.msra.mxu0 %v1441_v17  ;;  %v1567_v54 = vld [vmem:[#allocation3 + $0x6c8] sm:$0xff]  ;;  %v1672_v32 = vld [vmem:[#allocation3 + $0xa10] sm:$0xff]  ;;  %v1449_v22 = vld [vmem:[#allocation3 + $0x318] sm:$0xff] }
 0x309   : > { %4380 = vmatpush.msra.mxu1 %v1434_v18  ;;  %4381 = vmatpush.msra.mxu2 %v1434_v18  ;;  %v1560_v10 = vld [vmem:[#allocation3 + $0x690] sm:$0xff]  ;;  %v1665_v53 = vld [vmem:[#allocation3 + $0x9d8] sm:$0xff]  ;;  %v1442_v34 = vld [vmem:[#allocation3 + $0x2e0] sm:$0xff] }
 0x30a   : > { %4382 = vmatpush.msra.mxu3 %v1434_v18  ;;  %1689 = vmatpush.msra.mxu0 %v1434_v18  ;;  %v1568_v1 = vld [vmem:[#allocation3 + $0x6d0] sm:$0xff]  ;;  %v1553_v38 = vld [vmem:[#allocation3 + $0x658] sm:$0xff]  ;;  %v1658_v4 = vld [vmem:[#allocation3 + $0x9a0] sm:$0xff] }
 0x30b   : > { %4383 = vmatpush.msra.mxu1 %v1427_v55  ;;  %4384 = vmatpush.msra.mxu2 %v1427_v55  ;;  %v1435_v11 = vld [vmem:[#allocation3 + $0x2a8] sm:$0xff]  ;;  %v1561_v41 = vld [vmem:[#allocation3 + $0x698] sm:$0xff]  ;;  %v1546_v48 = vld [vmem:[#allocation3 + $0x620] sm:$0xff] }
 0x30c   : > { %4385 = vmatpush.msra.mxu3 %v1427_v55  ;;  %1690 = vmatpush.msra.mxu0 %v1427_v55  ;;  %v1651_v15 = vld [vmem:[#allocation3 + $0x968] sm:$0xff]  ;;  %v1428_v21 = vld [vmem:[#allocation3 + $0x270] sm:$0xff]  ;;  %v1554_v14 = vld [vmem:[#allocation3 + $0x660] sm:$0xff] }
 0x30d   : > { %4386 = vmatpush.msra.mxu1 %v1420_v2  ;;  %4387 = vmatpush.msra.mxu2 %v1420_v2  ;;  %v1644_v28 = vld [vmem:[#allocation3 + $0x930] sm:$0xff]  ;;  %v1421_v16 = vld [vmem:[#allocation3 + $0x238] sm:$0xff]  ;;  %v1547_v50 = vld [vmem:[#allocation3 + $0x628] sm:$0xff] }
 0x30e   : > { %4388 = vmatpush.msra.mxu3 %v1420_v2  ;;  %1691 = vmatpush.msra.mxu0 %v1420_v2  ;;  %v1539_v44 = vld [vmem:[#allocation3 + $0x5e8] sm:$0xff]  ;;  %v1637_v46 = vld [vmem:[#allocation3 + $0x8f8] sm:$0xff]  ;;  %v1414_v0 = vld [vmem:[#allocation3 + $0x200] sm:$0xff] }
 0x30f   : > { %4389 = vmatpush.msra.mxu1 %v1413_v57  ;;  %4390 = vmatpush.msra.mxu2 %v1413_v57  ;;  %v1540_v39 = vld [vmem:[#allocation3 + $0x5f0] sm:$0xff]  ;;  %v1630_v61 = vld [vmem:[#allocation3 + $0x8c0] sm:$0xff]  ;;  %v1407_v37 = vld [vmem:[#allocation3 + $0x1c8] sm:$0xff] }
 0x310   : > { %4391 = vmatpush.msra.mxu3 %v1413_v57  ;;  %1692 = vmatpush.msra.mxu0 %v1413_v57  ;;  %v1532_v9 = vld [vmem:[#allocation3 + $0x5b0] sm:$0xff]  ;;  %v1533_v49 = vld [vmem:[#allocation3 + $0x5b8] sm:$0xff]  ;;  %v1623_v20 = vld [vmem:[#allocation3 + $0x888] sm:$0xff] }
 0x311   : > { %4392 = vmatpush.msra.mxu1 %v1406_v33  ;;  %4393 = vmatpush.msra.mxu2 %v1406_v33  ;;  %v1525_v25 = vld [vmem:[#allocation3 + $0x578] sm:$0xff]  ;;  %v1400_v51 = vld [vmem:[#allocation3 + $0x190] sm:$0xff]  ;;  %v1526_v26 = vld [vmem:[#allocation3 + $0x580] sm:$0xff] }
 0x312   : > { %4394 = vmatpush.msra.mxu3 %v1406_v33  ;;  %1693 = vmatpush.msra.mxu0 %v1406_v33  ;;  %v1518_v40 = vld [vmem:[#allocation3 + $0x540] sm:$0xff]  ;;  %v1616_v3 = vld [vmem:[#allocation3 + $0x850] sm:$0xff]  ;;  %v1393_v31 = vld [vmem:[#allocation3 + $0x158] sm:$0xff] }
 0x313   : > { %4395 = vmatpush.msra.mxu1 %v1399_v27  ;;  %4396 = vmatpush.msra.mxu2 %v1399_v27  ;;  %v6089_v43 = vld [vmem:[%s8887_s1 + $0x1c8] sm:$0xff]  ;;  %v1609_v55 = vld [vmem:[#allocation3 + $0x818] sm:$0xff]  ;;  %v1386_v2 = vld [vmem:[#allocation3 + $0x120] sm:$0xff] }
 0x314   : > { %4397 = vmatpush.msra.mxu3 %v1399_v27  ;;  %1694 = vmatpush.msra.mxu0 %v1399_v27  ;;  %v1335_v12 = vld [vmem:[%s8887_s1 + $0x288] sm:$0xff]  ;;  %v1512_v57 = vld [vmem:[#allocation3 + $0x510] sm:$0xff] }
 0x315   : > { %4398 = vmatpush.msra.mxu1 %v1392_v35  ;;  %4399 = vmatpush.msra.mxu2 %v1392_v35  ;;  %v1519_v17 = vld [vmem:[#allocation3 + $0x548] sm:$0xff]  ;;  %v1504_v33 = vld [vmem:[#allocation3 + $0x4d0] sm:$0xff] }
 0x316   : > { %4400 = vmatpush.msra.mxu3 %v1392_v35  ;;  %1695 = vmatpush.msra.mxu0 %v1392_v35  ;;  %v1511_v18 = vld [vmem:[#allocation3 + $0x508] sm:$0xff]  ;;  %v1602_v35 = vld [vmem:[#allocation3 + $0x7e0] sm:$0xff] }
 0x317   : > { %4401 = vmatpush.msra.mxu1 %v1385_v56  ;;  %4402 = vmatpush.msra.mxu2 %v1385_v56  ;;  %v6099_v27 = vld [vmem:[%s8887_s1 + $0x48] sm:$0xff] }
 0x318   : > { %4403 = vmatpush.msra.mxu3 %v1385_v56  ;;  %1696 = vmatpush.msra.mxu0 %v1385_v56  ;;  %v1379_v56 = vld [vmem:[#allocation3 + $0xe8] sm:$0xff] }
 0x319   : > { %4404 = vmatpush.msra.mxu1 %v1378_v7  ;;  %4405 = vmatpush.msra.mxu2 %v1378_v7 }
 0x31a   : > { %4406 = vmatpush.msra.mxu3 %v1378_v7  ;;  %1697 = vmatpush.msra.mxu0 %v1378_v7  ;;  %v1505_v7 = vld [vmem:[#allocation3 + $0x4d8] sm:$0xff] }
 0x31b   : > { %4407 = vmatpush.msra.mxu1 %v1371_v59  ;;  %4408 = vmatpush.msra.mxu2 %v1371_v59 }
 0x31c   : > { %4409 = vmatpush.msra.mxu3 %v1371_v59  ;;  %1698 = vmatpush.msra.mxu0 %v1371_v59  ;;  %v1497_v59 = vld [vmem:[#allocation3 + $0x498] sm:$0xff] }
 0x31d   : > { %4410 = vmatpush.msra.mxu1 %v1364_v58  ;;  %4411 = vmatpush.msra.mxu2 %v1364_v58 }
 0x31e   : > { %4412 = vmatpush.msra.mxu3 %v1364_v58  ;;  %1699 = vmatpush.msra.mxu0 %v1364_v58  ;;  %v1595_v58 = vld [vmem:[#allocation3 + $0x7a8] sm:$0xff] }
 0x31f   : > { %4413 = vmatpush.msra.mxu1 %v1357_v42  ;;  %4414 = vmatpush.msra.mxu2 %v1357_v42 }
 0x320   : > { %4415 = vmatpush.msra.mxu3 %v1357_v42  ;;  %1700 = vmatpush.msra.mxu0 %v1357_v42  ;;  %v6105_v42 = vld [vmem:[%s8887_s1 + $0x120] sm:$0xff] }
 0x321   : > { %4416 = vmatpush.msra.mxu1 %v1350_v62  ;;  %4417 = vmatpush.msra.mxu2 %v1350_v62 }
 0x322   : > { %4418 = vmatpush.msra.mxu3 %v1350_v62  ;;  %1726 = vmatmul.f32.vlgmr.msra.gmra.mxu1 %v6021_v5 }
 0x323   : > { %1750 = vmatmul.f32.vlgmr.msra.gmra.mxu2 %v6026_v30  ;;  %1774 = vmatmul.f32.vlgmr.msra.gmra.mxu3 %v1326_v60  ;;  %v6110_v60 = vld [vmem:[%s8887_s1 + $0x1e0] sm:$0xff] }
 0x324   : > { %1912 = vmatpush.msrb.mxu2 %v1679_v47  ;;  %2025 = vmatpush.msrb.mxu3 %v1456_v36  ;;  %v6115_v47 = vld [vmem:[%s8887_s1 + $0x2a0] sm:$0xff] }
 0x325   : > { %1701 = vmatpush.msra.mxu0 %v1350_v62  ;;  %1799 = vmatpush.msrb.mxu1 %v1567_v54  ;;  %v1372_v62 = vld [vmem:[#allocation3 + $0xb0] sm:$0xff]  ;;  %v1498_v36 = vld [vmem:[#allocation3 + $0x4a0] sm:$0xff] }
 0x326   : > { %1913 = vmatpush.msrb.mxu2 %v1672_v32  ;;  %2026 = vmatpush.msrb.mxu3 %v1449_v22  ;;  %v1490_v54 = vld [vmem:[#allocation3 + $0x460] sm:$0xff]  ;;  %v1588_v32 = vld [vmem:[#allocation3 + $0x770] sm:$0xff]  ;;  %v1365_v22 = vld [vmem:[#allocation3 + $0x78] sm:$0xff] }
 0x327   : > { %1702 = vmatmul.f32.vlgmr.msra.gmra.mxu0 %v6036_v24  ;;  %1800 = vmatpush.msrb.mxu1 %v1560_v10  ;;  %v1491_v10 = vld [vmem:[#allocation3 + $0x468] sm:$0xff] }
 0x328   : > { %1914 = vmatpush.msrb.mxu2 %v1665_v53  ;;  %2027 = vmatpush.msrb.mxu3 %v1442_v34  ;;  %v1483_v53 = vld [vmem:[#allocation3 + $0x428] sm:$0xff]  ;;  %v6123_v34 = vld [vmem:[%s8887_s1 + $0x60] sm:$0xff] }
 0x329   : > { %2138 = vmatpush.msrb.mxu0 %v1568_v1  ;;  %1801 = vmatpush.msrb.mxu1 %v1553_v38  ;;  %v1581_v1 = vld [vmem:[#allocation3 + $0x738] sm:$0xff]  ;;  %v1358_v38 = vld [vmem:[#allocation3 + $0x40] sm:$0xff] }
 0x32a   : > { %1729 = vmatmul.f32.gmra.mxu1 %v6042_v63  ;;  %1915 = vmatpush.msrb.mxu2 %v1658_v4  ;;  %v1484_v4 = vld [vmem:[#allocation3 + $0x430] sm:$0xff] }
 0x32b   : > { %1753 = vmatmul.f32.gmra.mxu2 %v6047_v45  ;;  %1777 = vmatmul.f32.gmra.mxu3 %v1329_v19  ;;  %v1476_v19 = vld [vmem:[#allocation3 + $0x3f0] sm:$0xff] }
 0x32c   : > { %2028 = vmatpush.msrb.mxu3 %v1435_v11  ;;  %2139 = vmatpush.msrb.mxu0 %v1561_v41  ;;  %v1574_v11 = vld [vmem:[#allocation3 + $0x700] sm:$0xff]  ;;  %v6129_v41 = vld [vmem:[%s8887_s1 + $0x138] sm:$0xff] }
 0x32d   : > { %1916 = vmatpush.msrb.mxu2 %v1651_v15  ;;  %1802 = vmatpush.msrb.mxu1 %v1546_v48  ;;  %v1351_v15 = vld [vmem:[#allocation3 + $0x8] sm:$0xff]  ;;  %v6134_v48 = vld [vmem:[%s8887_s1 + $0x1f8] sm:$0xff] }
 0x32e   : > { %2029 = vmatpush.msrb.mxu3 %v1428_v21  ;;  %2140 = vmatpush.msrb.mxu0 %v1554_v14  ;;  %v6139_v21 = vld [vmem:[%s8887_s1 + $0x2b8] sm:$0xff] }
 0x32f   : > { %1705 = vmatmul.f32.gmra.mxu0 %v6057_v6  ;;  %1917 = vmatpush.msrb.mxu2 %v1644_v28  ;;  %v1477_v14 = vld [vmem:[#allocation3 + $0x3f8] sm:$0xff] }
 0x330   : > { %2030 = vmatpush.msrb.mxu3 %v1421_v16  ;;  %2141 = vmatpush.msrb.mxu0 %v1547_v50  ;;  %v1469_v28 = vld [vmem:[#allocation3 + $0x3b8] sm:$0xff] }
 0x331   : > { %1803 = vmatpush.msrb.mxu1 %v1539_v44  ;;  %1918 = vmatpush.msrb.mxu2 %v1637_v46  ;;  %v1457_v16 = vld [vmem:[#allocation3 + $0x358] sm:$0xff]  ;;  %v1462_v44 = vld [vmem:[#allocation3 + $0x380] sm:$0xff] }
 0x332   : > { %1732 = vmatmul.f32.gmra.mxu1 %v6063_v8  ;;  %2031 = vmatpush.msrb.mxu3 %v1414_v0  ;;  %v1569_v50 = vld [vmem:[#allocation3 + $0x6d8] sm:$0xff]  ;;  %v1470_v46 = vld [vmem:[#allocation3 + $0x3c0] sm:$0xff] }
 0x333   : > { %1756 = vmatmul.f32.gmra.mxu2 %v6068_v52  ;;  %1780 = vmatmul.f32.gmra.mxu3 %v1332_v13  ;;  %v6147_v0 = vld [vmem:[%s8887_s1 + $0x78] sm:$0xff]  ;;  %v1680_v13 = vld [vmem:[#allocation3 + $0xa50] sm:$0xff] }
 0x334   : > { %2142 = vmatpush.msrb.mxu0 %v1540_v39  ;;  %1804 = vmatpush.msrb.mxu1 %v1532_v9  ;;  %v1463_v39 = vld [vmem:[#allocation3 + $0x388] sm:$0xff]  ;;  %v1681_v9 = vld [vmem:[#allocation3 + $0xa58] sm:$0xff] }
 0x335   : > { %1919 = vmatpush.msrb.mxu2 %v1630_v61  ;;  %2032 = vmatpush.msrb.mxu3 %v1407_v37  ;;  %v6153_v61 = vld [vmem:[%s8887_s1 + $0x150] sm:$0xff] }
 0x336   : > { %2143 = vmatpush.msrb.mxu0 %v1533_v49  ;;  %1805 = vmatpush.msrb.mxu1 %v1525_v25  ;;  %v6158_v37 = vld [vmem:[%s8887_s1 + $0x210] sm:$0xff]  ;;  %v1450_v25 = vld [vmem:[#allocation3 + $0x320] sm:$0xff] }
 0x337   : > { %1708 = vmatmul.f32.gmra.mxu0 %v6078_v29  ;;  %1920 = vmatpush.msrb.mxu2 %v1623_v20  ;;  %v6163_v49 = vld [vmem:[%s8887_s1 + $0x2d0] sm:$0xff]  ;;  %v1562_v20 = vld [vmem:[#allocation3 + $0x6a0] sm:$0xff] }
 0x338   : > { %2033 = vmatpush.msrb.mxu3 %v1400_v51  ;;  %2144 = vmatpush.msrb.mxu0 %v1526_v26  ;;  %v6171_v51 = vld [vmem:[%s8887_s1 + $0x90] sm:$0xff]  ;;  %v6177_v26 = vld [vmem:[%s8887_s1 + $0x168] sm:$0xff] }
 0x339   : > { %1806 = vmatpush.msrb.mxu1 %v1518_v40  ;;  %1921 = vmatpush.msrb.mxu2 %v1616_v3  ;;  %v6182_v40 = vld [vmem:[%s8887_s1 + $0x228] sm:$0xff] }
 0x33a   : > { %1735 = vmatmul.f32.gmra.mxu1 %v6084_v23  ;;  %2034 = vmatpush.msrb.mxu3 %v1393_v31  ;;  %v6187_v3 = vld [vmem:[%s8887_s1 + $0x2e8] sm:$0xff]  ;;  %v1673_v31 = vld [vmem:[#allocation3 + $0xa18] sm:$0xff] }
 0x33b   : > { %1759 = vmatmul.f32.gmra.mxu2 %v6089_v43  ;;  %1783 = vmatmul.f32.gmra.mxu3 %v1335_v12  ;;  %v1674_v12 = vld [vmem:[#allocation3 + $0xa20] sm:$0xff] }
 0x33c   : > { %2145 = vmatpush.msrb.mxu0 %v1519_v17  ;;  %1807 = vmatpush.msrb.mxu1 %v1511_v18  ;;  %v6195_v17 = vld [vmem:[%s8887_s1 + $0xa8] sm:$0xff] }
 0x33d   : > { %1922 = vmatpush.msrb.mxu2 %v1609_v55  ;;  %2035 = vmatpush.msrb.mxu3 %v1386_v2  ;;  %v6201_v18 = vld [vmem:[%s8887_s1 + $0x8] sm:$0xff]  ;;  %v6206_v55 = vld [vmem:[%s8887_s1 + $0x10] sm:$0xff] }
 0x33e   : > { %2146 = vmatpush.msrb.mxu0 %v1512_v57  ;;  %1808 = vmatpush.msrb.mxu1 %v1504_v33  ;;  %v1443_v2 = vld [vmem:[#allocation3 + $0x2e8] sm:$0xff]  ;;  %v6215_v33 = vld [vmem:[%s8887_s1 + $0x20] sm:$0xff] }
 0x33f   : > { %1711 = vmatmul.f32.gmra.mxu0 %v6099_v27  ;;  %1923 = vmatpush.msrb.mxu2 %v1602_v35  ;;  %v1555_v57 = vld [vmem:[#allocation3 + $0x668] sm:$0xff] }
 0x340   : > { %2036 = vmatpush.msrb.mxu3 %v1379_v56  ;;  %2147 = vmatpush.msrb.mxu0 %v1505_v7  ;;  %v6220_v35 = vld [vmem:[%s8887_s1 + $0x28] sm:$0xff]  ;;  %v6229_v7 = vld [vmem:[%s8887_s1 + $0x38] sm:$0xff] }
 0x341   : > { %1809 = vmatpush.msrb.mxu1 %v1497_v59  ;;  %1924 = vmatpush.msrb.mxu2 %v1595_v58  ;;  %v1667_v56 = vld [vmem:[#allocation3 + $0x9e8] sm:$0xff]  ;;  %v6234_v59 = vld [vmem:[%s8887_s1 + $0x40] sm:$0xff]  ;;  %v1548_v58 = vld [vmem:[#allocation3 + $0x630] sm:$0xff] }
 0x342   : > { %1738 = vmatmul.f32.gmra.mxu1 %v6105_v42  ;;  %2037 = vmatpush.msrb.mxu3 %v1372_v62  ;;  %v6243_v62 = vld [vmem:[%s8887_s1 + $0x50] sm:$0xff] }
 0x343   : > { %1762 = vmatmul.f32.gmra.mxu2 %v6110_v60  ;;  %1786 = vmatmul.f32.gmra.mxu3 %v6115_v47 }
 0x344   : > { %2148 = vmatpush.msrb.mxu0 %v1498_v36  ;;  %1810 = vmatpush.msrb.mxu1 %v1490_v54  ;;  %v6248_v36 = vld [vmem:[%s8887_s1 + $0x58] sm:$0xff]  ;;  %v1660_v54 = vld [vmem:[#allocation3 + $0x9b0] sm:$0xff] }
 0x345   : > { %1925 = vmatpush.msrb.mxu2 %v1588_v32  ;;  %2038 = vmatpush.msrb.mxu3 %v1365_v22  ;;  %v6257_v32 = vld [vmem:[%s8887_s1 + $0x68] sm:$0xff]  ;;  %v6262_v22 = vld [vmem:[%s8887_s1 + $0x70] sm:$0xff] }
 0x346   : > { %2149 = vmatpush.msrb.mxu0 %v1491_v10  ;;  %1811 = vmatpush.msrb.mxu1 %v1483_v53  ;;  %v1541_v10 = vld [vmem:[#allocation3 + $0x5f8] sm:$0xff]  ;;  %v1270_v53 = vld [vmem:[%s8887_s1 + $0x80] sm:$0xff] }
 0x347   : > { %1714 = vmatmul.f32.gmra.mxu0 %v6123_v34  ;;  %1926 = vmatpush.msrb.mxu2 %v1581_v1  ;;  %v6274_v1 = vld [vmem:[%s8887_s1 + $0x88] sm:$0xff] }
 0x348   : > { %2039 = vmatpush.msrb.mxu3 %v1358_v38  ;;  %2150 = vmatpush.msrb.mxu0 %v1484_v4  ;;  %v1653_v38 = vld [vmem:[#allocation3 + $0x978] sm:$0xff] }
 0x349   : > { %1812 = vmatpush.msrb.mxu1 %v1476_v19  ;;  %1927 = vmatpush.msrb.mxu2 %v1574_v11  ;;  %v1273_v4 = vld [vmem:[%s8887_s1 + $0x98] sm:$0xff]  ;;  %v1274_v19 = vld [vmem:[%s8887_s1 + $0xa0] sm:$0xff] }
 0x34a   : > { %1741 = vmatmul.f32.gmra.mxu1 %v6129_v41  ;;  %2040 = vmatpush.msrb.mxu3 %v1351_v15  ;;  %v1422_v11 = vld [vmem:[#allocation3 + $0x240] sm:$0xff] }
 0x34b   : > { %1765 = vmatmul.f32.gmra.mxu2 %v6134_v48  ;;  %1789 = vmatmul.f32.gmra.mxu3 %v6139_v21  ;;  %v1534_v15 = vld [vmem:[#allocation3 + $0x5c0] sm:$0xff] }
 0x34c   : > { %2151 = vmatpush.msrb.mxu0 %v1477_v14  ;;  %1813 = vmatpush.msrb.mxu1 %v1469_v28  ;;  %v1276_v14 = vld [vmem:[%s8887_s1 + $0xb0] sm:$0xff]  ;;  %v1277_v28 = vld [vmem:[%s8887_s1 + $0xb8] sm:$0xff] }
 0x34d   : > { %2364 = vmatpush.msra.mxu2 %v1457_v16  ;;  %2477 = vmatpush.msra.mxu3 %v1569_v50  ;;  %v1645_v16 = vld [vmem:[#allocation3 + $0x938] sm:$0xff]  ;;  %v1646_v50 = vld [vmem:[#allocation3 + $0x940] sm:$0xff] }
 0x34e   : > { %1814 = vmatpush.msrb.mxu1 %v1462_v44  ;;  %2152 = vmatpush.msrb.mxu0 %v1470_v46  ;;  %v1279_v46 = vld [vmem:[%s8887_s1 + $0xc8] sm:$0xff] }
 0x34f   : > { %1717 = vmatmul.f32.gmra.mxu0 %v6147_v0  ;;  %2365 = vmatpush.msra.mxu2 %v1450_v25 }
 0x350   : > { %2251 = vmatpush.msra.mxu1 %v1680_v13  ;;  %2153 = vmatpush.msrb.mxu0 %v1463_v39  ;;  %v1415_v13 = vld [vmem:[#allocation3 + $0x208] sm:$0xff] }
 0x351   : > { %2478 = vmatpush.msra.mxu3 %v1562_v20  ;;  %2366 = vmatpush.msra.mxu2 %v1443_v2  ;;  %v1527_v39 = vld [vmem:[#allocation3 + $0x588] sm:$0xff] }
 0x352   : > { %2590 = vmatpush.msra.mxu0 %v1681_v9  ;;  %1744 = vmatmul.f32.gmra.mxu1 %v6153_v61 }
 0x353   : > { %1768 = vmatmul.f32.gmra.mxu2 %v6158_v37  ;;  %1792 = vmatmul.f32.gmra.mxu3 %v6163_v49 }
 0x354   : > { %2252 = vmatpush.msra.mxu1 %v1673_v31  ;;  %2591 = vmatpush.msra.mxu0 %v1674_v12  ;;  %v1282_v31 = vld [vmem:[%s8887_s1 + $0xe0] sm:$0xff] }
 0x355   : > { %2479 = vmatpush.msra.mxu3 %v1555_v57  ;;  %v1638_v12 = vld [vmem:[#allocation3 + $0x900] sm:$0xff] }
 0x356   : > { %2592 = vmatpush.msra.mxu0 %v1667_v56 }
 0x357   : > { %1720 = vmatmul.f32.gmra.mxu0 %v6171_v51  ;;  %2480 = vmatpush.msra.mxu3 %v1548_v58  ;;  %v1408_v58 = vld [vmem:[#allocation3 + $0x1d0] sm:$0xff] }
 0x358   : > { %2593 = vmatpush.msra.mxu0 %v1660_v54 }
 0x359   : > { %2481 = vmatpush.msra.mxu3 %v1541_v10 }
 0x35a   : > { %1747 = vmatmul.f32.gmra.mxu1 %v6177_v26  ;;  %2594 = vmatpush.msra.mxu0 %v1653_v38  ;;  %v1631_v38 = vld [vmem:[#allocation3 + $0x8c8] sm:$0xff] }
 0x35b   : > { %1771 = vmatmul.f32.gmra.mxu2 %v6182_v40  ;;  %1795 = vmatmul.f32.gmra.mxu3 %v6187_v3 }
 0x35c   : > { %2482 = vmatpush.msra.mxu3 %v1534_v15  ;;  %2595 = vmatpush.msra.mxu0 %v1646_v50  ;;  %v1513_v50 = vld [vmem:[#allocation3 + $0x518] sm:$0xff] }
 0x35e   : > { %2483 = vmatpush.msra.mxu3 %v1527_v39 }
 0x35f   : > { %1723 = vmatmul.f32.gmra.mxu0 %v6195_v17 }
 0x362   : > { %1815 = vmatmul.f32.vlgmr.msrb.gmra.mxu1 %v6201_v18 }
 0x363   : > { %1928 = vmatmul.f32.vlgmr.msrb.gmra.mxu2 %v6206_v55  ;;  %2041 = vmatmul.f32.vlgmr.msrb.gmra.mxu3 %v6036_v24  ;;  %v1666_v24 = vld [vmem:[#allocation3 + $0x9e0] sm:$0xff] }
 0x364   : > { %2253 = vmatpush.msra.mxu1 %v1666_v24 }
 0x367   : > { %2154 = vmatmul.f32.vlgmr.msrb.gmra.mxu0 %v6201_v18 }
 0x36a   : > { %1818 = vmatmul.f32.gmra.mxu1 %v6215_v33 }
 0x36b   : > { %1931 = vmatmul.f32.gmra.mxu2 %v6220_v35  ;;  %2044 = vmatmul.f32.gmra.mxu3 %v6057_v6  ;;  %v1436_v6 = vld [vmem:[#allocation3 + $0x2b0] sm:$0xff] }
 0x36c   : > { %2367 = vmatpush.msra.mxu2 %v1436_v6  ;;  %v1285_v6 = vld [vmem:[%s8887_s1 + $0xf8] sm:$0xff] }
 0x36f   : > { %2157 = vmatmul.f32.gmra.mxu0 %v6215_v33 }
 0x372   : > { %1821 = vmatmul.f32.gmra.mxu1 %v6229_v7 }
 0x373   : > { %1934 = vmatmul.f32.gmra.mxu2 %v6234_v59  ;;  %2047 = vmatmul.f32.gmra.mxu3 %v6078_v29  ;;  %v1659_v29 = vld [vmem:[#allocation3 + $0x9a8] sm:$0xff] }
 0x374   : > { %2254 = vmatpush.msra.mxu1 %v1659_v29  ;;  %v1520_v29 = vld [vmem:[#allocation3 + $0x550] sm:$0xff] }
 0x375   : > { %2484 = vmatpush.msra.mxu3 %v1520_v29  ;;  %v1297_v29 = vld [vmem:[%s8887_s1 + $0x158] sm:$0xff] }
 0x377   : > { %2160 = vmatmul.f32.gmra.mxu0 %v6229_v7  ;;  %2485 = vmatpush.msra.mxu3 %v1513_v50  ;;  %v1617_v50 = vld [vmem:[#allocation3 + $0x858] sm:$0xff] }
 0x37a   : > { %1824 = vmatmul.f32.gmra.mxu1 %v6243_v62 }
 0x37b   : > { %1937 = vmatmul.f32.gmra.mxu2 %v6248_v36  ;;  %2050 = vmatmul.f32.gmra.mxu3 %v6099_v27  ;;  %v1429_v27 = vld [vmem:[#allocation3 + $0x278] sm:$0xff] }
 0x37c   : > { %2368 = vmatpush.msra.mxu2 %v1429_v27 }
 0x37e   : > { %2369 = vmatpush.msra.mxu2 %v1422_v11 }
 0x37f   : > { %2163 = vmatmul.f32.gmra.mxu0 %v6243_v62 }
 0x380   : > { %2370 = vmatpush.msra.mxu2 %v1415_v13 }
 0x382   : > { %1827 = vmatmul.f32.gmra.mxu1 %v6257_v32  ;;  %2371 = vmatpush.msra.mxu2 %v1408_v58 }
 0x383   : > { %1940 = vmatmul.f32.gmra.mxu2 %v6262_v22  ;;  %2053 = vmatmul.f32.gmra.mxu3 %v6123_v34  ;;  %v1652_v34 = vld [vmem:[#allocation3 + $0x970] sm:$0xff] }
 0x384   : > { %2255 = vmatpush.msra.mxu1 %v1652_v34  ;;  %v1288_v34 = vld [vmem:[%s8887_s1 + $0x110] sm:$0xff] }
 0x386   : > { %2256 = vmatpush.msra.mxu1 %v1645_v16  ;;  %v1401_v16 = vld [vmem:[#allocation3 + $0x198] sm:$0xff] }
 0x387   : > { %2166 = vmatmul.f32.gmra.mxu0 %v6257_v32  ;;  %2372 = vmatpush.msra.mxu2 %v1401_v16  ;;  %v1300_v16 = vld [vmem:[%s8887_s1 + $0x170] sm:$0xff] }
 0x388   : > { %2257 = vmatpush.msra.mxu1 %v1638_v12  ;;  %v1625_v12 = vld [vmem:[#allocation3 + $0x898] sm:$0xff] }
 0x38a   : > { %1830 = vmatmul.f32.gmra.mxu1 %v1270_v53 }
 0x38b   : > { %1943 = vmatmul.f32.gmra.mxu2 %v6274_v1  ;;  %2056 = vmatmul.f32.gmra.mxu3 %v6147_v0  ;;  %v1280_v0 = vld [vmem:[%s8887_s1 + $0xd0] sm:$0xff] }
 0x38c   : > { %2258 = vmatpush.msra.mxu1 %v1631_v38 }
 0x38f   : > { %2169 = vmatmul.f32.gmra.mxu0 %v1270_v53 }
 0x392   : > { %1833 = vmatmul.f32.gmra.mxu1 %v1273_v4 }
 0x393   : > { %1946 = vmatmul.f32.gmra.mxu2 %v1274_v19  ;;  %2059 = vmatmul.f32.gmra.mxu3 %v6171_v51 }
 0x397   : > { %2172 = vmatmul.f32.gmra.mxu0 %v1273_v4  ;;  %v1632_v4 = vld [vmem:[#allocation3 + $0x8d0] sm:$0xff] }
 0x39a   : > { %1836 = vmatmul.f32.gmra.mxu1 %v1276_v14 }
 0x39b   : > { %1949 = vmatmul.f32.gmra.mxu2 %v1277_v28  ;;  %2062 = vmatmul.f32.gmra.mxu3 %v6195_v17  ;;  %v1639_v17 = vld [vmem:[#allocation3 + $0x908] sm:$0xff] }
 0x39c   : > { %2596 = vmatpush.msra.mxu0 %v1639_v17  ;;  %v1291_v28 = vld [vmem:[%s8887_s1 + $0x128] sm:$0xff] }
 0x39e   : > { %2597 = vmatpush.msra.mxu0 %v1632_v4 }
 0x39f   : > { %v6292_v44 = vpop.f32.mrf.mxu1  ;;  %2175 = vmatmul.f32.gmra.mxu0 %v1276_v14 }
 0x3a0   : > { %2598 = vmatpush.msra.mxu0 %v1625_v12 }
 0x3a2   : > { %1839 = vmatmul.f32.gmra.mxu1 %v1279_v46 }
 0x3a3   : > { %1952 = vmatmul.f32.gmra.mxu2 %v1280_v0  ;;  %2065 = vmatmul.f32.gmra.mxu3 %v6021_v5  ;;  %v1283_v5 = vld [vmem:[%s8887_s1 + $0xe8] sm:$0xff] }
 0x3a4   : > { %v6301_v9 = vpop.f32.mrf.mxu0 }
 0x3a6   : > { %v6303_v25 = vpop.f32.mrf.mxu2  ;;  %v6305_v20 = vpop.f32.mrf.mxu3 }
 0x3a7   : > { %v6307_v51 = vpop.f32.mrf.mxu1  ;;  %2178 = vmatmul.f32.gmra.mxu0 %v1279_v46 }
 0x3aa   : > { %1842 = vmatmul.f32.gmra.mxu1 %v1282_v31 }
 0x3ab   : > { %1955 = vmatmul.f32.gmra.mxu2 %v1283_v5  ;;  %2068 = vmatmul.f32.gmra.mxu3 %v6042_v63  ;;  %v1286_v63 = vld [vmem:[%s8887_s1 + $0x100] sm:$0xff]  ;;  %v1624_v5 = vld [vmem:[#allocation3 + $0x890] sm:$0xff] }
 0x3ac   : > { %v6316_v2 = vpop.f32.mrf.mxu0  ;;  %2259 = vmatpush.msra.mxu1 %v1624_v5 }
 0x3ae   : > { %v6318_v57 = vpop.f32.mrf.mxu2  ;;  %v6320_v24 = vpop.f32.mrf.mxu3  ;;  %2260 = vmatpush.msra.mxu1 %v1617_v50 }
 0x3af   : > { %v6322_v56 = vpop.f32.mrf.mxu1  ;;  %2181 = vmatmul.f32.gmra.mxu0 %v1282_v31  ;;  %v1294_v31 = vld [vmem:[%s8887_s1 + $0x140] sm:$0xff] }
 0x3b2   : > { %1845 = vmatmul.f32.gmra.mxu1 %v1285_v6 }
 0x3b3   : > { %1958 = vmatmul.f32.gmra.mxu2 %v1286_v63  ;;  %2071 = vmatmul.f32.gmra.mxu3 %v6063_v8  ;;  %v1289_v8 = vld [vmem:[%s8887_s1 + $0x118] sm:$0xff] }
 0x3b4   : > { %v6331_v54 = vpop.f32.mrf.mxu0 }
 0x3b6   : > { %v6333_v27 = vpop.f32.mrf.mxu2  ;;  %v6335_v10 = vpop.f32.mrf.mxu3 }
 0x3b7   : > { %v6337_v53 = vpop.f32.mrf.mxu1  ;;  %2184 = vmatmul.f32.gmra.mxu0 %v1285_v6 }
 0x3ba   : > { %1848 = vmatmul.f32.gmra.mxu1 %v1288_v34 }
 0x3bb   : > { %1961 = vmatmul.f32.gmra.mxu2 %v1289_v8  ;;  %2074 = vmatmul.f32.gmra.mxu3 %v6084_v23  ;;  %v1292_v23 = vld [vmem:[%s8887_s1 + $0x130] sm:$0xff]  ;;  %v1506_v8 = vld [vmem:[#allocation3 + $0x4e0] sm:$0xff] }
 0x3bc   : > { %v6346_v19 = vpop.f32.mrf.mxu0  ;;  %2486 = vmatpush.msra.mxu3 %v1506_v8  ;;  %v1499_v8 = vld [vmem:[#allocation3 + $0x4a8] sm:$0xff] }
 0x3be   : > { %v6348_v11 = vpop.f32.mrf.mxu2  ;;  %v6350_v15 = vpop.f32.mrf.mxu3  ;;  %2487 = vmatpush.msra.mxu3 %v1499_v8 }
 0x3bf   : > { %v6352_v14 = vpop.f32.mrf.mxu1  ;;  %2187 = vmatmul.f32.gmra.mxu0 %v1288_v34  ;;  %v1394_v34 = vld [vmem:[#allocation3 + $0x160] sm:$0xff] }
 0x3c0   : > { %2373 = vmatpush.msra.mxu2 %v1394_v34  ;;  %v1387_v34 = vld [vmem:[#allocation3 + $0x128] sm:$0xff] }
 0x3c2   : > { %1851 = vmatmul.f32.gmra.mxu1 %v1291_v28  ;;  %2374 = vmatpush.msra.mxu2 %v1387_v34 }
 0x3c3   : > { %1964 = vmatmul.f32.gmra.mxu2 %v1292_v23  ;;  %2077 = vmatmul.f32.gmra.mxu3 %v6105_v42  ;;  %v1295_v42 = vld [vmem:[%s8887_s1 + $0x148] sm:$0xff] }
 0x3c4   : > { %v6361_v46 = vpop.f32.mrf.mxu0 }
 0x3c6   : > { %v6363_v0 = vpop.f32.mrf.mxu2  ;;  %v6365_v13 = vpop.f32.mrf.mxu3 }
 0x3c7   : > { %v6367_v39 = vpop.f32.mrf.mxu1  ;;  %2190 = vmatmul.f32.gmra.mxu0 %v1291_v28 }
 0x3ca   : > { %1854 = vmatmul.f32.gmra.mxu1 %v1294_v31 }
 0x3cb   : > { %1967 = vmatmul.f32.gmra.mxu2 %v1295_v42  ;;  %2080 = vmatmul.f32.gmra.mxu3 %v6129_v41  ;;  %v1298_v41 = vld [vmem:[%s8887_s1 + $0x160] sm:$0xff] }
 0x3cc   : > { %v6376_v17 = vpop.f32.mrf.mxu0 }
 0x3ce   : > { %v6378_v6 = vpop.f32.mrf.mxu2  ;;  %v6380_v63 = vpop.f32.mrf.mxu3 }
 0x3cf   : > { %8944 = vst [vmem:[#allocation5_spill] sm:$0xff] %v6380_v63  ;;  %v6382_v58 = vpop.f32.mrf.mxu1  ;;  %2193 = vmatmul.f32.gmra.mxu0 %v1294_v31  ;;  %v1618_v31 = vld [vmem:[#allocation3 + $0x860] sm:$0xff] }
 0x3d0   : > { %2599 = vmatpush.msra.mxu0 %v1618_v31 }
 0x3d2   : > { %1857 = vmatmul.f32.gmra.mxu1 %v1297_v29 }
 0x3d3   : > { %1970 = vmatmul.f32.gmra.mxu2 %v1298_v41  ;;  %2083 = vmatmul.f32.gmra.mxu3 %v6153_v61  ;;  %v1301_v61 = vld [vmem:[%s8887_s1 + $0x178] sm:$0xff]  ;;  %v1303_v41 = vld [vmem:[%s8887_s1 + $0x188] sm:$0xff] }
 0x3d4   : > { %v6391_v38 = vpop.f32.mrf.mxu0 }
 0x3d6   : > { %v6393_v4 = vpop.f32.mrf.mxu2  ;;  %v6395_v28 = vpop.f32.mrf.mxu3 }
 0x3d7   : > { %8945 = vst [vmem:[#allocation6_spill] sm:$0xff] %v6395_v28  ;;  %v6397_v23 = vpop.f32.mrf.mxu1  ;;  %2196 = vmatmul.f32.gmra.mxu0 %v1297_v29 }
 0x3da   : > { %1860 = vmatmul.f32.gmra.mxu1 %v1300_v16 }
 0x3db   : > { %1973 = vmatmul.f32.gmra.mxu2 %v1301_v61  ;;  %2086 = vmatmul.f32.gmra.mxu3 %v6177_v26  ;;  %v1304_v26 = vld [vmem:[%s8887_s1 + $0x190] sm:$0xff] }
 0x3dc   : > { %v6406_v42 = vpop.f32.mrf.mxu0 }
 0x3de   : > { %v6408_v5 = vpop.f32.mrf.mxu2  ;;  %v6410_v12 = vpop.f32.mrf.mxu3 }
 0x3df   : > { %8946 = vst [vmem:[#allocation7_spill] sm:$0xff] %v6410_v12  ;;  %v1816_v29 = vpop.f32.mrf.mxu1  ;;  %2199 = vmatmul.f32.gmra.mxu0 %v1300_v16 }
 0x3e0   : > { %v1817_v50 = vadd.f32 %v1816_v29, %v6301_v9  ;;  %v1610_v9 = vld [vmem:[#allocation3 + $0x820] sm:$0xff]  ;;  %v1611_v29 = vld [vmem:[#allocation3 + $0x828] sm:$0xff] }
 0x3e1   : > { %2261 = vmatpush.msra.mxu1 %v1610_v9  ;;  %2600 = vmatpush.msra.mxu0 %v1611_v29 }
 0x3e2   : > { %1863 = vmatmul.f32.gmra.mxu1 %v1303_v41 }
 0x3e3   : > { %1976 = vmatmul.f32.gmra.mxu2 %v1304_v26  ;;  %2089 = vmatmul.f32.gmra.mxu3 %v6026_v30  ;;  %v1306_v26 = vld [vmem:[%s8887_s1 + $0x1a0] sm:$0xff]  ;;  %v1307_v30 = vld [vmem:[%s8887_s1 + $0x1a8] sm:$0xff] }
 0x3e4   : > { %v2155_v61 = vpop.f32.mrf.mxu0 }
 0x3e6   : > { %v1929_v16 = vpop.f32.mrf.mxu2  ;;  %v2042_v31 = vpop.f32.mrf.mxu3 }
 0x3e7   : > { %v1930_v12 = vadd.f32 %v1929_v16, %v1817_v50  ;;  %v6420_v28 = vadd.f32 %v2155_v61, %v2042_v31  ;;  %v1819_v63 = vpop.f32.mrf.mxu1  ;;  %2202 = vmatmul.f32.gmra.mxu0 %v1303_v41 }
 0x3e8   : > { %v1820_v41 = vadd.f32 %v1819_v63, %v6316_v2  ;;  %v1380_v2 = vld [vmem:[#allocation3 + $0xf0] sm:$0xff] }
 0x3e9   : > { %4059 = vst [vmem:[%s8889_s3] sm:$0xff] %v1930_v12  ;;  %v1309_v12 = vld [vmem:[%s8887_s1 + $0x1b8] sm:$0xff]  ;;  %v1492_v63 = vld [vmem:[#allocation3 + $0x470] sm:$0xff]  ;;  %2375 = vmatpush.msra.mxu2 %v1380_v2 }
 0x3ea   : > { %1866 = vmatmul.f32.gmra.mxu1 %v1306_v26  ;;  %2488 = vmatpush.msra.mxu3 %v1492_v63 }
 0x3eb   : > { %1979 = vmatmul.f32.gmra.mxu2 %v1307_v30  ;;  %2092 = vmatmul.f32.gmra.mxu3 %v6047_v45  ;;  %v1310_v45 = vld [vmem:[%s8887_s1 + $0x1c0] sm:$0xff] }
 0x3ec   : > { %v2158_v34 = vpop.f32.mrf.mxu0 }
 0x3ee   : > { %v1932_v8 = vpop.f32.mrf.mxu2  ;;  %v2045_v61 = vpop.f32.mrf.mxu3 }
 0x3ef   : > { %v1933_v50 = vadd.f32 %v1932_v8, %v1820_v41  ;;  %v6433_v16 = vadd.f32 %v2158_v34, %v2045_v61  ;;  %v1822_v31 = vpop.f32.mrf.mxu1  ;;  %2205 = vmatmul.f32.gmra.mxu0 %v1306_v26  ;;  %v1312_v61 = vld [vmem:[%s8887_s1 + $0x1d0] sm:$0xff] }
 0x3f0   : > { %v1823_v26 = vadd.f32 %v1822_v31, %v6331_v54  ;;  %v1603_v54 = vld [vmem:[#allocation3 + $0x7e8] sm:$0xff] }
 0x3f1   : > { %4066 = vst [vmem:[%s8889_s3 + $0x38] sm:$0xff] %v1933_v50  ;;  %v1604_v50 = vld [vmem:[#allocation3 + $0x7f0] sm:$0xff]  ;;  %2262 = vmatpush.msra.mxu1 %v1603_v54 }
 0x3f2   : > { %1869 = vmatmul.f32.gmra.mxu1 %v1309_v12  ;;  %2601 = vmatpush.msra.mxu0 %v1604_v50 }
 0x3f3   : > { %1982 = vmatmul.f32.gmra.mxu2 %v1310_v45  ;;  %2095 = vmatmul.f32.gmra.mxu3 %v6068_v52  ;;  %v1313_v52 = vld [vmem:[%s8887_s1 + $0x1d8] sm:$0xff] }
 0x3f4   : > { %v2161_v30 = vpop.f32.mrf.mxu0 }
 0x3f6   : > { %v1935_v9 = vpop.f32.mrf.mxu2  ;;  %v2048_v29 = vpop.f32.mrf.mxu3 }
 0x3f7   : > { %v1936_v34 = vadd.f32 %v1935_v9, %v1823_v26  ;;  %v6446_v41 = vadd.f32 %v2161_v30, %v2048_v29  ;;  %v1825_v8 = vpop.f32.mrf.mxu1  ;;  %2208 = vmatmul.f32.gmra.mxu0 %v1309_v12  ;;  %v1315_v9 = vld [vmem:[%s8887_s1 + $0x1e8] sm:$0xff]  ;;  %v1485_v29 = vld [vmem:[#allocation3 + $0x438] sm:$0xff] }
 0x3f8   : > { %v1826_v12 = vadd.f32 %v1825_v8, %v6346_v19  ;;  %v1373_v19 = vld [vmem:[#allocation3 + $0xb8] sm:$0xff]  ;;  %2489 = vmatpush.msra.mxu3 %v1485_v29 }
 0x3f9   : > { %4073 = vst [vmem:[%s8889_s3 + $0x70] sm:$0xff] %v1936_v34  ;;  %2376 = vmatpush.msra.mxu2 %v1373_v19 }
 0x3fa   : > { %1872 = vmatmul.f32.gmra.mxu1 %v1312_v61 }
 0x3fb   : > { %1985 = vmatmul.f32.gmra.mxu2 %v1313_v52  ;;  %2098 = vmatmul.f32.gmra.mxu3 %v6089_v43  ;;  %v1316_v43 = vld [vmem:[%s8887_s1 + $0x1f0] sm:$0xff] }
 0x3fc   : > { %v2164_v31 = vpop.f32.mrf.mxu0 }
 0x3fe   : > { %v1938_v45 = vpop.f32.mrf.mxu2  ;;  %v2051_v2 = vpop.f32.mrf.mxu3 }
 0x3ff   : > { %v1939_v63 = vadd.f32 %v1938_v45, %v1826_v12  ;;  %v6459_v30 = vadd.f32 %v2164_v31, %v2051_v2  ;;  %v1828_v26 = vpop.f32.mrf.mxu1  ;;  %2211 = vmatmul.f32.gmra.mxu0 %v1312_v61  ;;  %v1318_v12 = vld [vmem:[%s8887_s1 + $0x200] sm:$0xff]  ;;  %v1597_v45 = vld [vmem:[#allocation3 + $0x7b8] sm:$0xff] }
 0x400   : > { %v1829_v8 = vadd.f32 %v1828_v26, %v6361_v46  ;;  %v1596_v46 = vld [vmem:[#allocation3 + $0x7b0] sm:$0xff]  ;;  %2602 = vmatpush.msra.mxu0 %v1597_v45 }
 0x401   : > { %4080 = vst [vmem:[%s8889_s3 + $0xa8] sm:$0xff] %v1939_v63  ;;  %2263 = vmatpush.msra.mxu1 %v1596_v46  ;;  %v1324_v45 = vld [vmem:[%s8887_s1 + $0x230] sm:$0xff] }
 0x402   : > { %1875 = vmatmul.f32.gmra.mxu1 %v1315_v9 }
 0x403   : > { %1988 = vmatmul.f32.gmra.mxu2 %v1316_v43  ;;  %2101 = vmatmul.f32.gmra.mxu3 %v6110_v60  ;;  %v1319_v60 = vld [vmem:[%s8887_s1 + $0x208] sm:$0xff] }
 0x404   : > { %v2167_v34 = vpop.f32.mrf.mxu0 }
 0x406   : > { %v1941_v61 = vpop.f32.mrf.mxu2  ;;  %v2054_v52 = vpop.f32.mrf.mxu3 }
 0x407   : > { %v1942_v54 = vadd.f32 %v1941_v61, %v1829_v8  ;;  %v6472_v50 = vadd.f32 %v2167_v34, %v2054_v52  ;;  %v1831_v31 = vpop.f32.mrf.mxu1  ;;  %2214 = vmatmul.f32.gmra.mxu0 %v1315_v9  ;;  %v1321_v34 = vld [vmem:[%s8887_s1 + $0x218] sm:$0xff]  ;;  %v1478_v8 = vld [vmem:[#allocation3 + $0x400] sm:$0xff] }
 0x408   : > { %v1832_v63 = vadd.f32 %v1831_v31, %v6376_v17  ;;  %v1366_v17 = vld [vmem:[#allocation3 + $0x80] sm:$0xff]  ;;  %2490 = vmatpush.msra.mxu3 %v1478_v8  ;;  %v1359_v8 = vld [vmem:[#allocation3 + $0x48] sm:$0xff] }
 0x409   : > { %4087 = vst [vmem:[%s8889_s3 + $0xe0] sm:$0xff] %v1942_v54  ;;  %2377 = vmatpush.msra.mxu2 %v1366_v17  ;;  %v1327_v17 = vld [vmem:[%s8887_s1 + $0x248] sm:$0xff] }
 0x40a   : > { %1878 = vmatmul.f32.gmra.mxu1 %v1318_v12 }
 0x40b   : > { %1991 = vmatmul.f32.gmra.mxu2 %v1319_v60  ;;  %2104 = vmatmul.f32.gmra.mxu3 %v6134_v48  ;;  %v1322_v48 = vld [vmem:[%s8887_s1 + $0x220] sm:$0xff] }
 0x40c   : > { %v2170_v2 = vpop.f32.mrf.mxu0  ;;  %2378 = vmatpush.msra.mxu2 %v1359_v8  ;;  %v1333_v8 = vld [vmem:[%s8887_s1 + $0x278] sm:$0xff] }
 0x40e   : > { %v1944_v26 = vpop.f32.mrf.mxu2  ;;  %v2057_v9 = vpop.f32.mrf.mxu3 }
 0x40f   : > { %v1945_v43 = vadd.f32 %v1944_v26, %v1832_v63  ;;  %v6485_v19 = vadd.f32 %v2170_v2, %v2057_v9  ;;  %v1834_v29 = vpop.f32.mrf.mxu1  ;;  %2217 = vmatmul.f32.gmra.mxu0 %v1318_v12  ;;  %v1590_v2 = vld [vmem:[#allocation3 + $0x780] sm:$0xff] }
 0x410   : > { %v1835_v52 = vadd.f32 %v1834_v29, %v6391_v38  ;;  %v1589_v38 = vld [vmem:[#allocation3 + $0x778] sm:$0xff]  ;;  %2603 = vmatpush.msra.mxu0 %v1590_v2  ;;  %v1331_v2 = vld [vmem:[%s8887_s1 + $0x268] sm:$0xff] }
 0x411   : > { %4094 = vst [vmem:[%s8889_s3 + $0x118] sm:$0xff] %v1945_v43  ;;  %2264 = vmatpush.msra.mxu1 %v1589_v38  ;;  %v1330_v38 = vld [vmem:[%s8887_s1 + $0x260] sm:$0xff] }
 0x412   : > { %1881 = vmatmul.f32.gmra.mxu1 %v1321_v34 }
 0x413   : > { %1994 = vmatmul.f32.gmra.mxu2 %v1322_v48  ;;  %2107 = vmatmul.f32.gmra.mxu3 %v6158_v37  ;;  %v1325_v37 = vld [vmem:[%s8887_s1 + $0x238] sm:$0xff] }
 0x414   : > { %v2173_v61 = vpop.f32.mrf.mxu0 }
 0x416   : > { %v1947_v54 = vpop.f32.mrf.mxu2  ;;  %v2060_v31 = vpop.f32.mrf.mxu3 }
 0x417   : > { %v1948_v12 = vadd.f32 %v1947_v54, %v1835_v52  ;;  %v6498_v60 = vadd.f32 %v2173_v61, %v2060_v31  ;;  %v1837_v46 = vpop.f32.mrf.mxu1  ;;  %2220 = vmatmul.f32.gmra.mxu0 %v1321_v34  ;;  %v1471_v61 = vld [vmem:[#allocation3 + $0x3c8] sm:$0xff] }
 0x418   : > { %v1838_v26 = vadd.f32 %v1837_v46, %v6406_v42  ;;  %v4452_v42 = vld [vmem:[%s8887_s1 + $0x240] sm:$0xff]  ;;  %2491 = vmatpush.msra.mxu3 %v1471_v61 }
 0x419   : > { %4101 = vst [vmem:[%s8889_s3 + $0x150] sm:$0xff] %v1948_v12  ;;  %v1334_v61 = vld [vmem:[%s8887_s1 + $0x280] sm:$0xff] }
 0x41a   : > { %1884 = vmatmul.f32.gmra.mxu1 %v1324_v45 }
 0x41b   : > { %1997 = vmatmul.f32.gmra.mxu2 %v1325_v37  ;;  %2110 = vmatmul.f32.gmra.mxu3 %v6182_v40  ;;  %v1328_v40 = vld [vmem:[%s8887_s1 + $0x250] sm:$0xff] }
 0x41c   : > { %v2176_v63 = vpop.f32.mrf.mxu0 }
 0x41e   : > { %v1950_v9 = vpop.f32.mrf.mxu2  ;;  %v2063_v43 = vpop.f32.mrf.mxu3 }
 0x41f   : > { %v1951_v29 = vadd.f32 %v1950_v9, %v1838_v26  ;;  %v6511_v34 = vadd.f32 %v2176_v63, %v2063_v43  ;;  %v1840_v48 = vpop.f32.mrf.mxu1  ;;  %2223 = vmatmul.f32.gmra.mxu0 %v1324_v45  ;;  %v1582_v63 = vld [vmem:[#allocation3 + $0x740] sm:$0xff]  ;;  %v1583_v26 = vld [vmem:[#allocation3 + $0x748] sm:$0xff] }
 0x420   : > { %v1841_v54 = vadd.f32 %v1840_v48, %v6292_v44  ;;  %v4453_v44 = vld [vmem:[%s8887_s1 + $0x258] sm:$0xff]  ;;  %2265 = vmatpush.msra.mxu1 %v1582_v63  ;;  %2604 = vmatpush.msra.mxu0 %v1583_v26  ;;  %v1336_v63 = vld [vmem:[%s8887_s1 + $0x290] sm:$0xff] }
 0x421   : > { %4108 = vst [vmem:[%s8889_s3 + $0x188] sm:$0xff] %v1951_v29  ;;  %v1337_v26 = vld [vmem:[%s8887_s1 + $0x298] sm:$0xff] }
 0x422   : > { %1887 = vmatmul.f32.gmra.mxu1 %v1327_v17 }
 0x423   : > { %2000 = vmatmul.f32.gmra.mxu2 %v1328_v40  ;;  %2113 = vmatmul.f32.gmra.mxu3 %v4452_v42 }
 0x424   : > { %v2179_v52 = vpop.f32.mrf.mxu0 }
 0x426   : > { %v1953_v31 = vpop.f32.mrf.mxu2  ;;  %v2066_v12 = vpop.f32.mrf.mxu3 }
 0x427   : > { %v1954_v46 = vadd.f32 %v1953_v31, %v1841_v54  ;;  %v6526_v45 = vadd.f32 %v2179_v52, %v2066_v12  ;;  %v1843_v37 = vpop.f32.mrf.mxu1  ;;  %2226 = vmatmul.f32.gmra.mxu0 %v1327_v17  ;;  %v1352_v52 = vld [vmem:[#allocation3 + $0x10] sm:$0xff] }
 0x428   : > { %v1844_v43 = vadd.f32 %v1843_v37, %v6307_v51  ;;  %v4454_v51 = vld [vmem:[%s8887_s1 + $0x270] sm:$0xff]  ;;  %2379 = vmatpush.msra.mxu2 %v1352_v52  ;;  %v1339_v52 = vld [vmem:[%s8887_s1 + $0x2a8] sm:$0xff] }
 0x429   : > { %4115 = vst [vmem:[%s8889_s3 + $0x1c0] sm:$0xff] %v1954_v46  ;;  %v1464_v54 = vld [vmem:[#allocation3 + $0x390] sm:$0xff] }
 0x42a   : > { %1890 = vmatmul.f32.gmra.mxu1 %v1330_v38  ;;  %2492 = vmatpush.msra.mxu3 %v1464_v54  ;;  %v1340_v54 = vld [vmem:[%s8887_s1 + $0x2b0] sm:$0xff] }
 0x42b   : > { %2003 = vmatmul.f32.gmra.mxu2 %v1331_v2  ;;  %2116 = vmatmul.f32.gmra.mxu3 %v4453_v44 }
 0x42c   : > { %v2182_v9 = vpop.f32.mrf.mxu0 }
 0x42e   : > { %v1956_v29 = vpop.f32.mrf.mxu2  ;;  %v2069_v48 = vpop.f32.mrf.mxu3 }
 0x42f   : > { %v1957_v17 = vadd.f32 %v1956_v29, %v1844_v43  ;;  %v6541_v40 = vadd.f32 %v2182_v9, %v2069_v48  ;;  %v1846_v42 = vpop.f32.mrf.mxu1  ;;  %2229 = vmatmul.f32.gmra.mxu0 %v1330_v38  ;;  %v1575_v9 = vld [vmem:[#allocation3 + $0x708] sm:$0xff]  ;;  %v1576_v43 = vld [vmem:[#allocation3 + $0x710] sm:$0xff] }
 0x430   : > { %v1847_v12 = vadd.f32 %v1846_v42, %v6322_v56  ;;  %v4455_v56 = vld [vmem:[%s8887_s1 + $0x288] sm:$0xff]  ;;  %2266 = vmatpush.msra.mxu1 %v1575_v9  ;;  %2605 = vmatpush.msra.mxu0 %v1576_v43 }
 0x431   : > { %4122 = vst [vmem:[%s8889_s3 + $0x1f8] sm:$0xff] %v1957_v17  ;;  %v1459_v9 = vld [vmem:[#allocation3 + $0x368] sm:$0xff] }
 0x432   : > { %1893 = vmatmul.f32.gmra.mxu1 %v1333_v8  ;;  %3042 = vmatpush.msrb.mxu0 %v1459_v9 }
 0x433   : > { %2006 = vmatmul.f32.gmra.mxu2 %v1334_v61  ;;  %2119 = vmatmul.f32.gmra.mxu3 %v4454_v51 }
 0x434   : > { %v2185_v31 = vpop.f32.mrf.mxu0 }
 0x436   : > { %v1959_v46 = vpop.f32.mrf.mxu2  ;;  %v2072_v37 = vpop.f32.mrf.mxu3 }
 0x437   : > { %v1960_v38 = vadd.f32 %v1959_v46, %v1847_v12  ;;  %v6556_v2 = vadd.f32 %v2185_v31, %v2072_v37  ;;  %v1849_v44 = vpop.f32.mrf.mxu1  ;;  %2232 = vmatmul.f32.gmra.mxu0 %v1333_v8  ;;  %v1682_v31 = vld [vmem:[#allocation3 + $0xa60] sm:$0xff] }
 0x438   : > { %v1850_v48 = vadd.f32 %v1849_v44, %v6337_v53  ;;  %v1570_v53 = vld [vmem:[#allocation3 + $0x6e0] sm:$0xff]  ;;  %2929 = vmatpush.msrb.mxu3 %v1682_v31 }
 0x439   : > { %4129 = vst [vmem:[%s8889_s3 + $0x230] sm:$0xff] %v1960_v38  ;;  %2816 = vmatpush.msrb.mxu2 %v1570_v53 }
 0x43a   : > { %1896 = vmatmul.f32.gmra.mxu1 %v1336_v63 }
 0x43b   : > { %2009 = vmatmul.f32.gmra.mxu2 %v1337_v26  ;;  %2122 = vmatmul.f32.gmra.mxu3 %v4455_v56  ;;  %v1342_v56 = vld [vmem:[%s8887_s1 + $0x2c0] sm:$0xff] }
 0x43c   : > { %v2188_v29 = vpop.f32.mrf.mxu0 }
 0x43e   : > { %v1962_v17 = vpop.f32.mrf.mxu2  ;;  %v2075_v42 = vpop.f32.mrf.mxu3 }
 0x43f   : > { %v1963_v8 = vadd.f32 %v1962_v17, %v1850_v48  ;;  %v6571_v61 = vadd.f32 %v2188_v29, %v2075_v42  ;;  %v1852_v51 = vpop.f32.mrf.mxu1  ;;  %2235 = vmatmul.f32.gmra.mxu0 %v1336_v63 }
 0x440   : > { %v1853_v46 = vadd.f32 %v1852_v51, %v6352_v14  ;;  %v1458_v14 = vld [vmem:[#allocation3 + $0x360] sm:$0xff] }
 0x441   : > { %4136 = vst [vmem:[%s8889_s3 + $0x268] sm:$0xff] %v1963_v8  ;;  %2703 = vmatpush.msrb.mxu1 %v1458_v14 }
 0x442   : > { %1899 = vmatmul.f32.gmra.mxu1 %v1339_v52 }
 0x443   : > { %2012 = vmatmul.f32.gmra.mxu2 %v1340_v54  ;;  %2125 = vmatmul.f32.gmra.mxu3 %v6115_v47  ;;  %v1343_v47 = vld [vmem:[%s8887_s1 + $0x2c8] sm:$0xff] }
 0x444   : > { %v2191_v12 = vpop.f32.mrf.mxu0  ;;  %v1675_v54 = vld [vmem:[#allocation3 + $0xa28] sm:$0xff] }
 0x445   : > { %2930 = vmatpush.msrb.mxu3 %v1675_v54 }
 0x446   : > { %v1965_v37 = vpop.f32.mrf.mxu2  ;;  %v2078_v38 = vpop.f32.mrf.mxu3 }
 0x447   : > { %v1966_v44 = vadd.f32 %v1965_v37, %v1853_v46  ;;  %v6584_v63 = vadd.f32 %v2191_v12, %v2078_v38  ;;  %v1855_v26 = vpop.f32.mrf.mxu1  ;;  %2238 = vmatmul.f32.gmra.mxu0 %v1339_v52  ;;  %v1345_v52 = vld [vmem:[%s8887_s1 + $0x2d8] sm:$0xff] }
 0x448   : > { %v1856_v29 = vadd.f32 %v1855_v26, %v6367_v39  ;;  %v1563_v39 = vld [vmem:[#allocation3 + $0x6a8] sm:$0xff]  ;;  %v1348_v26 = vld [vmem:[%s8887_s1 + $0x2f0] sm:$0xff] }
 0x449   : > { %4143 = vst [vmem:[%s8889_s3 + $0x2a0] sm:$0xff] %v1966_v44  ;;  %2817 = vmatpush.msrb.mxu2 %v1563_v39 }
 0x44a   : > { %1902 = vmatmul.f32.gmra.mxu1 %v1342_v56 }
 0x44b   : > { %2015 = vmatmul.f32.gmra.mxu2 %v1343_v47  ;;  %2128 = vmatmul.f32.gmra.mxu3 %v6139_v21  ;;  %v1346_v21 = vld [vmem:[%s8887_s1 + $0x2e0] sm:$0xff] }
 0x44c   : > { %v2194_v43 = vpop.f32.mrf.mxu0 }
 0x44e   : > { %v1968_v48 = vpop.f32.mrf.mxu2  ;;  %v2081_v17 = vpop.f32.mrf.mxu3 }
 0x44f   : > { %v1969_v42 = vadd.f32 %v1968_v48, %v1856_v29  ;;  %v6597_v8 = vadd.f32 %v2194_v43, %v2081_v17  ;;  %v1858_v51 = vpop.f32.mrf.mxu1  ;;  %2241 = vmatmul.f32.gmra.mxu0 %v1342_v56  ;;  %v1452_v56 = vld [vmem:[#allocation3 + $0x330] sm:$0xff] }
 0x450   : > { %v1859_v31 = vadd.f32 %v1858_v51, %v6382_v58  ;;  %v1451_v58 = vld [vmem:[#allocation3 + $0x328] sm:$0xff]  ;;  %3043 = vmatpush.msrb.mxu0 %v1452_v56  ;;  %v1661_v56 = vld [vmem:[#allocation3 + $0x9b8] sm:$0xff] }
 0x451   : > { %4150 = vst [vmem:[%s8889_s3 + $0x2d8] sm:$0xff] %v1969_v42  ;;  %2704 = vmatpush.msrb.mxu1 %v1451_v58  ;;  %v1668_v42 = vld [vmem:[#allocation3 + $0x9f0] sm:$0xff] }
 0x452   : > { %1905 = vmatmul.f32.gmra.mxu1 %v1345_v52  ;;  %2931 = vmatpush.msrb.mxu3 %v1668_v42 }
 0x453   : > { %2018 = vmatmul.f32.gmra.mxu2 %v1346_v21  ;;  %2131 = vmatmul.f32.gmra.mxu3 %v6163_v49  ;;  %v1349_v49 = vld [vmem:[%s8887_s1 + $0x2f8] sm:$0xff] }
 0x454   : > { %v2197_v53 = vpop.f32.mrf.mxu0  ;;  %2932 = vmatpush.msrb.mxu3 %v1661_v56 }
 0x456   : > { %v1971_v12 = vpop.f32.mrf.mxu2  ;;  %v2084_v46 = vpop.f32.mrf.mxu3 }
 0x457   : > { %v1972_v37 = vadd.f32 %v1971_v12, %v1859_v31  ;;  %v6610_v38 = vadd.f32 %v2197_v53, %v2084_v46  ;;  %v1861_v44 = vpop.f32.mrf.mxu1  ;;  %2244 = vmatmul.f32.gmra.mxu0 %v1345_v52  ;;  %v1445_v12 = vld [vmem:[#allocation3 + $0x2f8] sm:$0xff] }
 0x458   : > { %v1862_v14 = vadd.f32 %v1861_v44, %v6397_v23  ;;  %v1556_v23 = vld [vmem:[#allocation3 + $0x670] sm:$0xff]  ;;  %3044 = vmatpush.msrb.mxu0 %v1445_v12 }
 0x459   : > { %4157 = vst [vmem:[%s8889_s3 + $0x310] sm:$0xff] %v1972_v37  ;;  %2818 = vmatpush.msrb.mxu2 %v1556_v23 }
 0x45a   : > { %1908 = vmatmul.f32.gmra.mxu1 %v1348_v26 }
 0x45b   : > { %2021 = vmatmul.f32.gmra.mxu2 %v1349_v49  ;;  %2134 = vmatmul.f32.gmra.mxu3 %v6187_v3  ;;  %v4456_v3 = vld [vmem:[%s8887_s1] sm:$0xff] }
 0x45c   : > { %v2200_v47 = vpop.f32.mrf.mxu0 }
 0x45e   : > { %v1974_v9 = vpop.f32.mrf.mxu2  ;;  %v2087_v43 = vpop.f32.mrf.mxu3 }
 0x45f   : > { %v1975_v29 = vadd.f32 %v1974_v9, %v1862_v14  ;;  %v6623_v48 = vadd.f32 %v2200_v47, %v2087_v43  ;;  %v1864_v17 = vpop.f32.mrf.mxu1  ;;  %2247 = vmatmul.f32.gmra.mxu0 %v1348_v26 }
 0x460   : > { %v1865_v52 = vadd.f32 %v1864_v17, %v6303_v25  ;;  %v1444_v25 = vld [vmem:[#allocation3 + $0x2f0] sm:$0xff] }
 0x461   : > { %4164 = vst [vmem:[%s8889_s3 + $0x348] sm:$0xff] %v1975_v29  ;;  %2705 = vmatpush.msrb.mxu1 %v1444_v25 }
 0x462   : > { %2267 = vmatmul.f32.vlgmr.msra.gmra.mxu1 %v6206_v55 }
 0x463   : > { %2380 = vmatmul.f32.vlgmr.msra.gmra.mxu2 %v4456_v3  ;;  %2493 = vmatmul.f32.vlgmr.msra.gmra.mxu3 %v6201_v18  ;;  %v4457_v18 = vld [vmem:[%s8887_s1 + $0x18] sm:$0xff]  ;;  %v1438_v3 = vld [vmem:[#allocation3 + $0x2c0] sm:$0xff] }
 0x464   : > { %v2203_v51 = vpop.f32.mrf.mxu0  ;;  %3045 = vmatpush.msrb.mxu0 %v1438_v3 }
 0x466   : > { %v1977_v21 = vpop.f32.mrf.mxu2  ;;  %v2090_v39 = vpop.f32.mrf.mxu3 }
 0x467   : > { %v1978_v54 = vadd.f32 %v1977_v21, %v1865_v52  ;;  %v6634_v53 = vadd.f32 %v2203_v51, %v2090_v39  ;;  %v1867_v31 = vpop.f32.mrf.mxu1  ;;  %2606 = vmatmul.f32.vlgmr.msra.gmra.mxu0 %v6206_v55  ;;  %v4460_v39 = vld [vmem:[%s8887_s1 + $0x58] sm:$0xff] }
 0x468   : > { %v1868_v55 = vadd.f32 %v1867_v31, %v6318_v57  ;;  %v1549_v57 = vld [vmem:[#allocation3 + $0x638] sm:$0xff] }
 0x469   : > { %4171 = vst [vmem:[%s8889_s3 + $0x380] sm:$0xff] %v1978_v54  ;;  %2819 = vmatpush.msrb.mxu2 %v1549_v57  ;;  %v1654_v54 = vld [vmem:[#allocation3 + $0x980] sm:$0xff] }
 0x46a   : > { %2270 = vmatmul.f32.gmra.mxu1 %v6220_v35  ;;  %2933 = vmatpush.msrb.mxu3 %v1654_v54 }
 0x46b   : > { %2383 = vmatmul.f32.gmra.mxu2 %v4457_v18  ;;  %2496 = vmatmul.f32.gmra.mxu3 %v6215_v33  ;;  %v4458_v33 = vld [vmem:[%s8887_s1 + $0x30] sm:$0xff] }
 0x46c   : > { %v2206_v46 = vpop.f32.mrf.mxu0 }
 0x46e   : > { %v1980_v37 = vpop.f32.mrf.mxu2  ;;  %v2093_v44 = vpop.f32.mrf.mxu3 }
 0x46f   : > { %v1981_v26 = vadd.f32 %v1980_v37, %v1868_v55  ;;  %v6646_v49 = vadd.f32 %v2206_v46, %v2093_v44  ;;  %v1870_v58 = vpop.f32.mrf.mxu1  ;;  %2609 = vmatmul.f32.gmra.mxu0 %v6220_v35  ;;  %v4462_v37 = vld [vmem:[%s8887_s1 + $0x70] sm:$0xff]  ;;  %v1430_v44 = vld [vmem:[#allocation3 + $0x280] sm:$0xff] }
 0x470   : > { %v1871_v35 = vadd.f32 %v1870_v58, %v6333_v27  ;;  %v1437_v27 = vld [vmem:[#allocation3 + $0x2b8] sm:$0xff] }
 0x471   : > { %4178 = vst [vmem:[%s8889_s3 + $0x3b8] sm:$0xff] %v1981_v26  ;;  %2706 = vmatpush.msrb.mxu1 %v1437_v27  ;;  %v1431_v26 = vld [vmem:[#allocation3 + $0x288] sm:$0xff] }
 0x472   : > { %2273 = vmatmul.f32.gmra.mxu1 %v6234_v59  ;;  %3046 = vmatpush.msrb.mxu0 %v1431_v26 }
 0x473   : > { %2386 = vmatmul.f32.gmra.mxu2 %v4458_v33  ;;  %2499 = vmatmul.f32.gmra.mxu3 %v6229_v7  ;;  %v4459_v7 = vld [vmem:[%s8887_s1 + $0x48] sm:$0xff] }
 0x474   : > { %v2209_v47 = vpop.f32.mrf.mxu0  ;;  %2707 = vmatpush.msrb.mxu1 %v1430_v44  ;;  %v1640_v44 = vld [vmem:[#allocation3 + $0x910] sm:$0xff] }
 0x476   : > { %v1983_v14 = vpop.f32.mrf.mxu2  ;;  %v2096_v9 = vpop.f32.mrf.mxu3 }
 0x477   : > { %v1984_v43 = vadd.f32 %v1983_v14, %v1871_v35  ;;  %v6658_v29 = vadd.f32 %v2209_v47, %v2096_v9  ;;  %v1873_v17 = vpop.f32.mrf.mxu1  ;;  %2612 = vmatmul.f32.gmra.mxu0 %v6234_v59  ;;  %v4465_v14 = vld [vmem:[%s8887_s1 + $0x88] sm:$0xff]  ;;  %v4466_v9 = vld [vmem:[%s8887_s1 + $0xa0] sm:$0xff] }
 0x478   : > { %v1874_v59 = vadd.f32 %v1873_v17, %v6348_v11  ;;  %v1542_v11 = vld [vmem:[#allocation3 + $0x600] sm:$0xff]  ;;  %v1535_v17 = vld [vmem:[#allocation3 + $0x5c8] sm:$0xff] }
 0x479   : > { %4185 = vst [vmem:[%s8889_s3 + $0x3f0] sm:$0xff] %v1984_v43  ;;  %2820 = vmatpush.msrb.mxu2 %v1542_v11  ;;  %v4468_v43 = vld [vmem:[%s8887_s1 + $0x98] sm:$0xff]  ;;  %v1424_v11 = vld [vmem:[#allocation3 + $0x250] sm:$0xff] }
 0x47a   : > { %2276 = vmatmul.f32.gmra.mxu1 %v6248_v36  ;;  %3047 = vmatpush.msrb.mxu0 %v1424_v11 }
 0x47b   : > { %2389 = vmatmul.f32.gmra.mxu2 %v4459_v7  ;;  %2502 = vmatmul.f32.gmra.mxu3 %v6243_v62  ;;  %v4461_v62 = vld [vmem:[%s8887_s1 + $0x60] sm:$0xff]  ;;  %v1647_v7 = vld [vmem:[#allocation3 + $0x948] sm:$0xff] }
 0x47c   : > { %v2212_v23 = vpop.f32.mrf.mxu0  ;;  %2821 = vmatpush.msrb.mxu2 %v1535_v17  ;;  %2934 = vmatpush.msrb.mxu3 %v1647_v7 }
 0x47e   : > { %v1986_v42 = vpop.f32.mrf.mxu2  ;;  %v2099_v51 = vpop.f32.mrf.mxu3  ;;  %2935 = vmatpush.msrb.mxu3 %v1640_v44 }
 0x47f   : > { %v1987_v52 = vadd.f32 %v1986_v42, %v1874_v59  ;;  %v6670_v21 = vadd.f32 %v2212_v23, %v2099_v51  ;;  %v1876_v36 = vpop.f32.mrf.mxu1  ;;  %2615 = vmatmul.f32.gmra.mxu0 %v4460_v39  ;;  %v4471_v39 = vld [vmem:[%s8887_s1 + $0xb0] sm:$0xff] }
 0x480   : > { %v1877_v18 = vadd.f32 %v1876_v36, %v6363_v0  ;;  %v4464_v0 = vld [vmem:[%s8887_s1 + $0x80] sm:$0xff]  ;;  %v4469_v36 = vld [vmem:[%s8887_s1 + $0xb8] sm:$0xff] }
 0x481   : > { %4192 = vst [vmem:[%s8889_s3 + $0x428] sm:$0xff] %v1987_v52 }
 0x482   : > { %2279 = vmatmul.f32.gmra.mxu1 %v6262_v22 }
 0x483   : > { %2392 = vmatmul.f32.gmra.mxu2 %v4461_v62  ;;  %2505 = vmatmul.f32.gmra.mxu3 %v6257_v32  ;;  %v4463_v32 = vld [vmem:[%s8887_s1 + $0x78] sm:$0xff]  ;;  %v1423_v62 = vld [vmem:[#allocation3 + $0x248] sm:$0xff] }
 0x484   : > { %v2215_v31 = vpop.f32.mrf.mxu0  ;;  %2708 = vmatpush.msrb.mxu1 %v1423_v62 }
 0x486   : > { %v1989_v25 = vpop.f32.mrf.mxu2  ;;  %v2102_v12 = vpop.f32.mrf.mxu3 }
 0x487   : > { %v1990_v46 = vadd.f32 %v1989_v25, %v1877_v18  ;;  %v6684_v55 = vadd.f32 %v2215_v31, %v2102_v12  ;;  %v1879_v22 = vpop.f32.mrf.mxu1  ;;  %2618 = vmatmul.f32.gmra.mxu0 %v4462_v37  ;;  %v4472_v37 = vld [vmem:[%s8887_s1 + $0xd0] sm:$0xff] }
 0x488   : > { %v1880_v33 = vadd.f32 %v1879_v22, %v6378_v6  ;;  %v4467_v6 = vld [vmem:[%s8887_s1 + $0x90] sm:$0xff] }
 0x489   : > { %4199 = vst [vmem:[%s8889_s3 + $0x460] sm:$0xff] %v1990_v46 }
 0x48a   : > { %2282 = vmatmul.f32.gmra.mxu1 %v6274_v1 }
 0x48b   : > { %2395 = vmatmul.f32.gmra.mxu2 %v4463_v32  ;;  %2508 = vmatmul.f32.gmra.mxu3 %v4464_v0  ;;  %v4474_v32 = vld [vmem:[%s8887_s1 + $0xc8] sm:$0xff]  ;;  %v1528_v0 = vld [vmem:[#allocation3 + $0x590] sm:$0xff] }
 0x48c   : > { %v2218_v58 = vpop.f32.mrf.mxu0  ;;  %2822 = vmatpush.msrb.mxu2 %v1528_v0 }
 0x48e   : > { %v1992_v57 = vpop.f32.mrf.mxu2  ;;  %v2105_v56 = vpop.f32.mrf.mxu3 }
 0x48f   : > { %v1993_v1 = vadd.f32 %v1992_v57, %v1880_v33  ;;  %v6700_v47 = vadd.f32 %v2218_v58, %v2105_v56  ;;  %v1882_v35 = vpop.f32.mrf.mxu1  ;;  %2621 = vmatmul.f32.gmra.mxu0 %v4465_v14  ;;  %v4475_v14 = vld [vmem:[%s8887_s1 + $0xe8] sm:$0xff] }
 0x490   : > { %v1883_v3 = vadd.f32 %v1882_v35, %v6393_v4  ;;  %v4470_v4 = vld [vmem:[%s8887_s1 + $0xa8] sm:$0xff] }
 0x491   : > { %4206 = vst [vmem:[%s8889_s3 + $0x498] sm:$0xff] %v1993_v1 }
 0x492   : > { %2285 = vmatmul.f32.gmra.mxu1 %v4466_v9 }
 0x493   : > { %2398 = vmatmul.f32.gmra.mxu2 %v4467_v6  ;;  %2511 = vmatmul.f32.gmra.mxu3 %v4468_v43  ;;  %v1416_v6 = vld [vmem:[#allocation3 + $0x210] sm:$0xff]  ;;  %v1417_v43 = vld [vmem:[#allocation3 + $0x218] sm:$0xff] }
 0x494   : > { %v2221_v27 = vpop.f32.mrf.mxu0  ;;  %2709 = vmatpush.msrb.mxu1 %v1416_v6  ;;  %3048 = vmatpush.msrb.mxu0 %v1417_v43 }
 0x496   : > { %v1995_v23 = vpop.f32.mrf.mxu2  ;;  %v2108_v59 = vpop.f32.mrf.mxu3 }
 0x497   : > { %v1996_v42 = vadd.f32 %v1995_v23, %v1883_v3  ;;  %v6718_v51 = vadd.f32 %v2221_v27, %v2108_v59  ;;  %v1885_v52 = vpop.f32.mrf.mxu1  ;;  %2624 = vmatmul.f32.gmra.mxu0 %v4466_v9  ;;  %v4477_v9 = vld [vmem:[%s8887_s1 + $0xe0] sm:$0xff] }
 0x498   : > { %v1886_v31 = vadd.f32 %v1885_v52, %v6408_v5  ;;  %v4473_v5 = vld [vmem:[%s8887_s1 + $0xc0] sm:$0xff] }
 0x499   : > { %4213 = vst [vmem:[%s8889_s3 + $0x4d0] sm:$0xff] %v1996_v42  ;;  %v4478_v52 = vld [vmem:[%s8887_s1 + $0x100] sm:$0xff] }
 0x49a   : > { %2288 = vmatmul.f32.gmra.mxu1 %v4469_v36 }
 0x49b   : > { %2401 = vmatmul.f32.gmra.mxu2 %v4470_v4  ;;  %2514 = vmatmul.f32.gmra.mxu3 %v4471_v39  ;;  %v1521_v4 = vld [vmem:[#allocation3 + $0x558] sm:$0xff] }
 0x49c   : > { %v2224_v54 = vpop.f32.mrf.mxu0  ;;  %v1633_v39 = vld [vmem:[#allocation3 + $0x8d8] sm:$0xff]  ;;  %2823 = vmatpush.msrb.mxu2 %v1521_v4 }
 0x49d   : > { %2936 = vmatpush.msrb.mxu3 %v1633_v39  ;;  %v8947_v39 = vld [vmem:[#allocation5_spill] sm:$0xff] }
 0x49e   : > { %v1998_v18 = vpop.f32.mrf.mxu2  ;;  %v2111_v25 = vpop.f32.mrf.mxu3 }
 0x49f   : > { %v1999_v12 = vadd.f32 %v1998_v18, %v1886_v31  ;;  %v6733_v46 = vadd.f32 %v2224_v54, %v2111_v25  ;;  %v1888_v22 = vpop.f32.mrf.mxu1  ;;  %2627 = vmatmul.f32.gmra.mxu0 %v4469_v36  ;;  %v4480_v36 = vld [vmem:[%s8887_s1 + $0xf8] sm:$0xff] }
 0x4a0   : > { %v1889_v58 = vadd.f32 %v1888_v22, %v6305_v20  ;;  %v4476_v20 = vld [vmem:[%s8887_s1 + $0xd8] sm:$0xff] }
 0x4a1   : > { %4220 = vst [vmem:[%s8889_s3 + $0x508] sm:$0xff] %v1999_v12  ;;  %v4481_v22 = vld [vmem:[%s8887_s1 + $0x118] sm:$0xff] }
 0x4a2   : > { %2291 = vmatmul.f32.gmra.mxu1 %v4472_v37 }
 0x4a3   : > { %2404 = vmatmul.f32.gmra.mxu2 %v4473_v5  ;;  %2517 = vmatmul.f32.gmra.mxu3 %v4474_v32  ;;  %v1409_v5 = vld [vmem:[#allocation3 + $0x1d8] sm:$0xff]  ;;  %v1410_v32 = vld [vmem:[#allocation3 + $0x1e0] sm:$0xff] }
 0x4a4   : > { %v2227_v26 = vpop.f32.mrf.mxu0  ;;  %2710 = vmatpush.msrb.mxu1 %v1409_v5  ;;  %3049 = vmatpush.msrb.mxu0 %v1410_v32  ;;  %v1507_v5 = vld [vmem:[#allocation3 + $0x4e8] sm:$0xff] }
 0x4a5   : > { %v1619_v32 = vld [vmem:[#allocation3 + $0x868] sm:$0xff] }
 0x4a6   : > { %v2001_v33 = vpop.f32.mrf.mxu2  ;;  %v2114_v57 = vpop.f32.mrf.mxu3 }
 0x4a7   : > { %v2002_v56 = vadd.f32 %v2001_v33, %v1889_v58  ;;  %v6748_v1 = vadd.f32 %v2227_v26, %v2114_v57  ;;  %v1891_v35 = vpop.f32.mrf.mxu1  ;;  %2630 = vmatmul.f32.gmra.mxu0 %v4472_v37  ;;  %v4483_v37 = vld [vmem:[%s8887_s1 + $0x110] sm:$0xff] }
 0x4a8   : > { %v1892_v7 = vadd.f32 %v1891_v35, %v6320_v24  ;;  %v4479_v24 = vld [vmem:[%s8887_s1 + $0xf0] sm:$0xff] }
 0x4a9   : > { %4227 = vst [vmem:[%s8889_s3 + $0x540] sm:$0xff] %v2002_v56  ;;  %v4484_v35 = vld [vmem:[%s8887_s1 + $0x130] sm:$0xff] }
 0x4aa   : > { %2294 = vmatmul.f32.gmra.mxu1 %v4475_v14 }
 0x4ab   : > { %2407 = vmatmul.f32.gmra.mxu2 %v4476_v20  ;;  %2520 = vmatmul.f32.gmra.mxu3 %v4477_v9  ;;  %v1514_v20 = vld [vmem:[#allocation3 + $0x520] sm:$0xff] }
 0x4ac   : > { %v2230_v17 = vpop.f32.mrf.mxu0  ;;  %v1626_v9 = vld [vmem:[#allocation3 + $0x8a0] sm:$0xff]  ;;  %2824 = vmatpush.msrb.mxu2 %v1514_v20  ;;  %v4494_v20 = vld [vmem:[%s8887_s1 + $0x168] sm:$0xff] }
 0x4ad   : > { %2937 = vmatpush.msrb.mxu3 %v1626_v9  ;;  %v4495_v9 = vld [vmem:[%s8887_s1 + $0x170] sm:$0xff] }
 0x4ae   : > { %v2004_v27 = vpop.f32.mrf.mxu2  ;;  %v2117_v3 = vpop.f32.mrf.mxu3  ;;  %2825 = vmatpush.msrb.mxu2 %v1507_v5 }
 0x4af   : > { %v2005_v23 = vadd.f32 %v2004_v27, %v1892_v7  ;;  %v6763_v59 = vadd.f32 %v2230_v17, %v2117_v3  ;;  %v1894_v42 = vpop.f32.mrf.mxu1  ;;  %2633 = vmatmul.f32.gmra.mxu0 %v4475_v14  ;;  %v4486_v14 = vld [vmem:[%s8887_s1 + $0x128] sm:$0xff]  ;;  %2938 = vmatpush.msrb.mxu3 %v1619_v32 }
 0x4b0   : > { %v1895_v11 = vadd.f32 %v1894_v42, %v6335_v10  ;;  %v4482_v10 = vld [vmem:[%s8887_s1 + $0x108] sm:$0xff] }
 0x4b1   : > { %4234 = vst [vmem:[%s8889_s3 + $0x578] sm:$0xff] %v2005_v23  ;;  %v4487_v42 = vld [vmem:[%s8887_s1 + $0x148] sm:$0xff] }
 0x4b2   : > { %2297 = vmatmul.f32.gmra.mxu1 %v4478_v52  ;;  %v4499_v32 = vld [vmem:[%s8887_s1 + $0x1a8] sm:$0xff] }
 0x4b3   : > { %2410 = vmatmul.f32.gmra.mxu2 %v4479_v24  ;;  %2523 = vmatmul.f32.gmra.mxu3 %v4480_v36  ;;  %v1402_v24 = vld [vmem:[#allocation3 + $0x1a0] sm:$0xff]  ;;  %v1403_v36 = vld [vmem:[#allocation3 + $0x1a8] sm:$0xff] }
 0x4b4   : > { %v2233_v62 = vpop.f32.mrf.mxu0  ;;  %2711 = vmatpush.msrb.mxu1 %v1402_v24  ;;  %3050 = vmatpush.msrb.mxu0 %v1403_v36 }
 0x4b6   : > { %v2007_v54 = vpop.f32.mrf.mxu2  ;;  %v2120_v31 = vpop.f32.mrf.mxu3 }
 0x4b7   : > { %v2008_v18 = vadd.f32 %v2007_v54, %v1895_v11  ;;  %v6778_v25 = vadd.f32 %v2233_v62, %v2120_v31  ;;  %v1897_v12 = vpop.f32.mrf.mxu1  ;;  %2636 = vmatmul.f32.gmra.mxu0 %v4478_v52  ;;  %v4489_v52 = vld [vmem:[%s8887_s1 + $0x140] sm:$0xff] }
 0x4b8   : > { %v1898_v44 = vadd.f32 %v1897_v12, %v6350_v15  ;;  %v4485_v15 = vld [vmem:[%s8887_s1 + $0x120] sm:$0xff] }
 0x4b9   : > { %4241 = vst [vmem:[%s8889_s3 + $0x5b0] sm:$0xff] %v2008_v18 }
 0x4ba   : > { %2300 = vmatmul.f32.gmra.mxu1 %v4481_v22 }
 0x4bb   : > { %2413 = vmatmul.f32.gmra.mxu2 %v4482_v10  ;;  %2526 = vmatmul.f32.gmra.mxu3 %v4483_v37  ;;  %v4491_v10 = vld [vmem:[%s8887_s1 + $0x150] sm:$0xff]  ;;  %v4492_v37 = vld [vmem:[%s8887_s1 + $0x158] sm:$0xff] }
 0x4bc   : > { %v2236_v0 = vpop.f32.mrf.mxu0 }
 0x4be   : > { %v2010_v26 = vpop.f32.mrf.mxu2  ;;  %v2123_v58 = vpop.f32.mrf.mxu3 }
 0x4bf   : > { %v2011_v33 = vadd.f32 %v2010_v26, %v1898_v44  ;;  %v6793_v57 = vadd.f32 %v2236_v0, %v2123_v58  ;;  %v1900_v56 = vpop.f32.mrf.mxu1  ;;  %2639 = vmatmul.f32.gmra.mxu0 %v4481_v22  ;;  %v4490_v22 = vld [vmem:[%s8887_s1 + $0x160] sm:$0xff]  ;;  %v8948_v44 = vld [vmem:[#allocation6_spill] sm:$0xff] }
 0x4c0   : > { %v1901_v43 = vadd.f32 %v1900_v56, %v6365_v13  ;;  %v4488_v13 = vld [vmem:[%s8887_s1 + $0x138] sm:$0xff] }
 0x4c1   : > { %4248 = vst [vmem:[%s8889_s3 + $0x5e8] sm:$0xff] %v2011_v33 }
 0x4c2   : > { %2303 = vmatmul.f32.gmra.mxu1 %v4484_v35 }
 0x4c3   : > { %2416 = vmatmul.f32.gmra.mxu2 %v4485_v15  ;;  %2529 = vmatmul.f32.gmra.mxu3 %v4486_v14  ;;  %v4493_v14 = vld [vmem:[%s8887_s1 + $0x178] sm:$0xff] }
 0x4c4   : > { %v2239_v6 = vpop.f32.mrf.mxu0 }
 0x4c6   : > { %v2013_v17 = vpop.f32.mrf.mxu2  ;;  %v2126_v7 = vpop.f32.mrf.mxu3 }
 0x4c7   : > { %v2014_v27 = vadd.f32 %v2013_v17, %v1901_v43  ;;  %v6808_v3 = vadd.f32 %v2239_v6, %v2126_v7  ;;  %v1903_v23 = vpop.f32.mrf.mxu1  ;;  %2642 = vmatmul.f32.gmra.mxu0 %v4484_v35  ;;  %v1395_v6 = vld [vmem:[#allocation3 + $0x168] sm:$0xff]  ;;  %v1396_v43 = vld [vmem:[#allocation3 + $0x170] sm:$0xff] }
 0x4c8   : > { %v1904_v62 = vadd.f32 %v1903_v23, %v8947_v39  ;;  %2712 = vmatpush.msrb.mxu1 %v1395_v6  ;;  %3051 = vmatpush.msrb.mxu0 %v1396_v43  ;;  %v8949_v7 = vld [vmem:[#allocation7_spill] sm:$0xff]  ;;  %v4497_v39 = vld [vmem:[%s8887_s1 + $0x180] sm:$0xff] }
 0x4c9   : > { %4255 = vst [vmem:[%s8889_s3 + $0x620] sm:$0xff] %v2014_v27  ;;  %v4502_v6 = vld [vmem:[%s8887_s1 + $0x1c0] sm:$0xff]  ;;  %v4503_v43 = vld [vmem:[%s8887_s1 + $0x1b0] sm:$0xff] }
 0x4ca   : > { %2306 = vmatmul.f32.gmra.mxu1 %v4487_v42 }
 0x4cb   : > { %2419 = vmatmul.f32.gmra.mxu2 %v4488_v13  ;;  %2532 = vmatmul.f32.gmra.mxu3 %v4489_v52 }
 0x4cc   : > { %v2242_v4 = vpop.f32.mrf.mxu0 }
 0x4ce   : > { %v2016_v11 = vpop.f32.mrf.mxu2  ;;  %v2129_v54 = vpop.f32.mrf.mxu3 }
 0x4cf   : > { %v2017_v31 = vadd.f32 %v2016_v11, %v1904_v62  ;;  %v6823_v18 = vadd.f32 %v2242_v4, %v2129_v54  ;;  %v1906_v12 = vpop.f32.mrf.mxu1  ;;  %2645 = vmatmul.f32.gmra.mxu0 %v4487_v42  ;;  %v4496_v4 = vld [vmem:[%s8887_s1 + $0x190] sm:$0xff] }
 0x4d0   : > { %v1907_v26 = vadd.f32 %v1906_v12, %v8948_v44  ;;  %v1500_v62 = vld [vmem:[#allocation3 + $0x4b0] sm:$0xff] }
 0x4d1   : > { %4262 = vst [vmem:[%s8889_s3 + $0x658] sm:$0xff] %v2017_v31  ;;  %v1612_v11 = vld [vmem:[#allocation3 + $0x830] sm:$0xff]  ;;  %2826 = vmatpush.msrb.mxu2 %v1500_v62  ;;  %v1381_v62 = vld [vmem:[#allocation3 + $0xf8] sm:$0xff] }
 0x4d2   : > { %2309 = vmatmul.f32.gmra.mxu1 %v4490_v22  ;;  %2939 = vmatpush.msrb.mxu3 %v1612_v11  ;;  %v1388_v44 = vld [vmem:[#allocation3 + $0x130] sm:$0xff]  ;;  %v1382_v11 = vld [vmem:[#allocation3 + $0x100] sm:$0xff] }
 0x4d3   : > { %2422 = vmatmul.f32.gmra.mxu2 %v4491_v10  ;;  %2535 = vmatmul.f32.gmra.mxu3 %v4492_v37 }
 0x4d4   : > { %v2245_v0 = vpop.f32.mrf.mxu0  ;;  %2713 = vmatpush.msrb.mxu1 %v1388_v44  ;;  %v1598_v44 = vld [vmem:[#allocation3 + $0x7c0] sm:$0xff] }
 0x4d6   : > { %v2019_v58 = vpop.f32.mrf.mxu2  ;;  %v2132_v33 = vpop.f32.mrf.mxu3  ;;  %2714 = vmatpush.msrb.mxu1 %v1381_v62 }
 0x4d7   : > { %v2020_v56 = vadd.f32 %v2019_v58, %v1907_v26  ;;  %v6838_v35 = vadd.f32 %v2245_v0, %v2132_v33  ;;  %v1909_v15 = vpop.f32.mrf.mxu1  ;;  %2648 = vmatmul.f32.gmra.mxu0 %v4490_v22  ;;  %v4500_v0 = vld [vmem:[%s8887_s1 + $0x198] sm:$0xff] }
 0x4d8   : > { %v1910_v27 = vadd.f32 %v1909_v15, %v8949_v7  ;;  %v1389_v26 = vld [vmem:[#allocation3 + $0x138] sm:$0xff] }
 0x4d9   : > { %4269 = vst [vmem:[%s8889_s3 + $0x690] sm:$0xff] %v2020_v56  ;;  %3052 = vmatpush.msrb.mxu0 %v1389_v26  ;;  %v1605_v7 = vld [vmem:[#allocation3 + $0x7f8] sm:$0xff] }
 0x4da   : > { %2312 = vmatmul.f32.gmra.mxu1 %v4493_v14  ;;  %2940 = vmatpush.msrb.mxu3 %v1605_v7 }
 0x4db   : > { %2425 = vmatmul.f32.gmra.mxu2 %v4494_v20  ;;  %2538 = vmatmul.f32.gmra.mxu3 %v4495_v9 }
 0x4dc   : > { %v2248_v17 = vpop.f32.mrf.mxu0  ;;  %3053 = vmatpush.msrb.mxu0 %v1382_v11  ;;  %2941 = vmatpush.msrb.mxu3 %v1598_v44 }
 0x4de   : > { %v2022_v23 = vpop.f32.mrf.mxu2  ;;  %v2135_v42 = vpop.f32.mrf.mxu3 }
 0x4df   : > { %v2023_v13 = vadd.f32 %v2022_v23, %v1910_v27  ;;  %v6853_v52 = vadd.f32 %v2248_v17, %v2135_v42  ;;  %v2268_v24 = vpop.f32.mrf.mxu1  ;;  %2651 = vmatmul.f32.gmra.mxu0 %v4493_v14  ;;  %v1493_v17 = vld [vmem:[#allocation3 + $0x478] sm:$0xff] }
 0x4e0   : > { %v2269_v36 = vadd.f32 %v2268_v24, %v6420_v28  ;;  %v4498_v28 = vld [vmem:[%s8887_s1 + $0x188] sm:$0xff]  ;;  %2827 = vmatpush.msrb.mxu2 %v1493_v17 }
 0x4e1   : > { %4276 = vst [vmem:[%s8889_s3 + $0x6c8] sm:$0xff] %v2023_v13 }
 0x4e2   : > { %4060 = vst [vmem:[%s8889_s3 + $0x8] sm:$0xff] %v2269_v36  ;;  %2315 = vmatmul.f32.gmra.mxu1 %v4496_v4 }
 0x4e3   : > { %2428 = vmatmul.f32.gmra.mxu2 %v4497_v39  ;;  %2541 = vmatmul.f32.gmra.mxu3 %v4498_v28  ;;  %v4505_v39 = vld [vmem:[%s8887_s1 + $0x1d8] sm:$0xff]  ;;  %v4506_v28 = vld [vmem:[%s8887_s1 + $0x1c8] sm:$0xff] }
 0x4e4   : > { %v2607_v54 = vpop.f32.mrf.mxu0 }
 0x4e6   : > { %v2381_v31 = vpop.f32.mrf.mxu2  ;;  %v2494_v12 = vpop.f32.mrf.mxu3 }
 0x4e7   : > { %v2495_v22 = vadd.f32 %v2494_v12, %v2381_v31  ;;  %v2271_v10 = vpop.f32.mrf.mxu1  ;;  %2654 = vmatmul.f32.gmra.mxu0 %v4496_v4 }
 0x4e8   : > { %v2272_v37 = vadd.f32 %v2271_v10, %v6433_v16  ;;  %v4501_v16 = vld [vmem:[%s8887_s1 + $0x1a0] sm:$0xff] }
 0x4e9   : > { %v2608_v5 = vadd.f32 %v2607_v54, %v2495_v22 }
 0x4ea   : > { %4067 = vst [vmem:[%s8889_s3 + $0x40] sm:$0xff] %v2272_v37  ;;  %2318 = vmatmul.f32.gmra.mxu1 %v4499_v32 }
 0x4eb   : > { %4061 = vst [vmem:[%s8889_s3 + $0x10] sm:$0xff] %v2608_v5  ;;  %2431 = vmatmul.f32.gmra.mxu2 %v4500_v0  ;;  %2544 = vmatmul.f32.gmra.mxu3 %v4501_v16  ;;  %v4509_v0 = vld [vmem:[%s8887_s1 + $0x1e0] sm:$0xff] }
 0x4ec   : > { %v2610_v58 = vpop.f32.mrf.mxu0  ;;  %v1486_v16 = vld [vmem:[#allocation3 + $0x440] sm:$0xff] }
 0x4ed   : > { %2828 = vmatpush.msrb.mxu2 %v1486_v16 }
 0x4ee   : > { %v2384_v33 = vpop.f32.mrf.mxu2  ;;  %v2497_v56 = vpop.f32.mrf.mxu3 }
 0x4ef   : > { %v2498_v15 = vadd.f32 %v2497_v56, %v2384_v33  ;;  %v2274_v14 = vpop.f32.mrf.mxu1  ;;  %2657 = vmatmul.f32.gmra.mxu0 %v4499_v32  ;;  %v4508_v32 = vld [vmem:[%s8887_s1 + $0x1f0] sm:$0xff] }
 0x4f0   : > { %v2275_v20 = vadd.f32 %v2274_v14, %v6446_v41  ;;  %v4504_v41 = vld [vmem:[%s8887_s1 + $0x1b8] sm:$0xff] }
 0x4f1   : > { %v2611_v9 = vadd.f32 %v2610_v58, %v2498_v15 }
 0x4f2   : > { %4074 = vst [vmem:[%s8889_s3 + $0x78] sm:$0xff] %v2275_v20  ;;  %2321 = vmatmul.f32.gmra.mxu1 %v4502_v6 }
 0x4f3   : > { %4068 = vst [vmem:[%s8889_s3 + $0x48] sm:$0xff] %v2611_v9  ;;  %2434 = vmatmul.f32.gmra.mxu2 %v4503_v43  ;;  %2547 = vmatmul.f32.gmra.mxu3 %v4504_v41  ;;  %v4511_v9 = vld [vmem:[%s8887_s1 + $0x208] sm:$0xff]  ;;  %v1374_v43 = vld [vmem:[#allocation3 + $0xc0] sm:$0xff] }
 0x4f4   : > { %v2613_v27 = vpop.f32.mrf.mxu0  ;;  %v1375_v41 = vld [vmem:[#allocation3 + $0xc8] sm:$0xff]  ;;  %2715 = vmatpush.msrb.mxu1 %v1374_v43 }
 0x4f5   : > { %3054 = vmatpush.msrb.mxu0 %v1375_v41 }
 0x4f6   : > { %v2387_v23 = vpop.f32.mrf.mxu2  ;;  %v2500_v42 = vpop.f32.mrf.mxu3 }
 0x4f7   : > { %v2501_v13 = vadd.f32 %v2500_v42, %v2387_v23  ;;  %v2277_v24 = vpop.f32.mrf.mxu1  ;;  %2660 = vmatmul.f32.gmra.mxu0 %v4502_v6  ;;  %v4512_v6 = vld [vmem:[%s8887_s1 + $0x1f8] sm:$0xff] }
 0x4f8   : > { %v2278_v36 = vadd.f32 %v2277_v24, %v6459_v30  ;;  %v4507_v30 = vld [vmem:[%s8887_s1 + $0x1d0] sm:$0xff] }
 0x4f9   : > { %v2614_v4 = vadd.f32 %v2613_v27, %v2501_v13 }
 0x4fa   : > { %4081 = vst [vmem:[%s8889_s3 + $0xb0] sm:$0xff] %v2278_v36  ;;  %2324 = vmatmul.f32.gmra.mxu1 %v4505_v39  ;;  %v4514_v36 = vld [vmem:[%s8887_s1 + $0x220] sm:$0xff] }
 0x4fb   : > { %4075 = vst [vmem:[%s8889_s3 + $0x80] sm:$0xff] %v2614_v4  ;;  %2437 = vmatmul.f32.gmra.mxu2 %v4506_v28  ;;  %2550 = vmatmul.f32.gmra.mxu3 %v4507_v30  ;;  %v4515_v4 = vld [vmem:[%s8887_s1 + $0x210] sm:$0xff]  ;;  %v1591_v28 = vld [vmem:[#allocation3 + $0x788] sm:$0xff] }
 0x4fc   : > { %v2616_v54 = vpop.f32.mrf.mxu0  ;;  %2942 = vmatpush.msrb.mxu3 %v1591_v28 }
 0x4fe   : > { %v2390_v31 = vpop.f32.mrf.mxu2  ;;  %v2503_v12 = vpop.f32.mrf.mxu3 }
 0x4ff   : > { %v2504_v22 = vadd.f32 %v2503_v12, %v2390_v31  ;;  %v2280_v10 = vpop.f32.mrf.mxu1  ;;  %2663 = vmatmul.f32.gmra.mxu0 %v4505_v39  ;;  %v1479_v39 = vld [vmem:[#allocation3 + $0x408] sm:$0xff] }
 0x500   : > { %v2281_v37 = vadd.f32 %v2280_v10, %v6472_v50  ;;  %v4510_v50 = vld [vmem:[%s8887_s1 + $0x1e8] sm:$0xff]  ;;  %2829 = vmatpush.msrb.mxu2 %v1479_v39  ;;  %v4517_v10 = vld [vmem:[%s8887_s1 + $0x238] sm:$0xff] }
 0x501   : > { %v2617_v5 = vadd.f32 %v2616_v54, %v2504_v22 }
 0x502   : > { %4088 = vst [vmem:[%s8889_s3 + $0xe8] sm:$0xff] %v2281_v37  ;;  %2327 = vmatmul.f32.gmra.mxu1 %v4508_v32  ;;  %v4518_v37 = vld [vmem:[%s8887_s1 + $0x228] sm:$0xff] }
 0x503   : > { %4082 = vst [vmem:[%s8889_s3 + $0xb8] sm:$0xff] %v2617_v5  ;;  %2440 = vmatmul.f32.gmra.mxu2 %v4509_v0  ;;  %2553 = vmatmul.f32.gmra.mxu3 %v4510_v50  ;;  %v1367_v5 = vld [vmem:[#allocation3 + $0x88] sm:$0xff] }
 0x504   : > { %v2619_v26 = vpop.f32.mrf.mxu0  ;;  %2716 = vmatpush.msrb.mxu1 %v1367_v5 }
 0x506   : > { %v2393_v58 = vpop.f32.mrf.mxu2  ;;  %v2506_v33 = vpop.f32.mrf.mxu3 }
 0x507   : > { %v2507_v56 = vadd.f32 %v2506_v33, %v2393_v58  ;;  %v2283_v15 = vpop.f32.mrf.mxu1  ;;  %2666 = vmatmul.f32.gmra.mxu0 %v4508_v32  ;;  %v1368_v32 = vld [vmem:[#allocation3 + $0x90] sm:$0xff] }
 0x508   : > { %v2284_v14 = vadd.f32 %v2283_v15, %v6485_v19  ;;  %v4513_v19 = vld [vmem:[%s8887_s1 + $0x200] sm:$0xff]  ;;  %3055 = vmatpush.msrb.mxu0 %v1368_v32 }
 0x509   : > { %v2620_v20 = vadd.f32 %v2619_v26, %v2507_v56  ;;  %v4520_v56 = vld [vmem:[%s8887_s1 + $0x250] sm:$0xff]  ;;  %v4521_v15 = vld [vmem:[%s8887_s1 + $0x240] sm:$0xff] }
 0x50a   : > { %4095 = vst [vmem:[%s8889_s3 + $0x120] sm:$0xff] %v2284_v14  ;;  %2330 = vmatmul.f32.gmra.mxu1 %v4511_v9  ;;  %v1472_v14 = vld [vmem:[#allocation3 + $0x3d0] sm:$0xff] }
 0x50b   : > { %4089 = vst [vmem:[%s8889_s3 + $0xf0] sm:$0xff] %v2620_v20  ;;  %2443 = vmatmul.f32.gmra.mxu2 %v4512_v6  ;;  %2556 = vmatmul.f32.gmra.mxu3 %v4513_v19  ;;  %v1584_v20 = vld [vmem:[#allocation3 + $0x750] sm:$0xff] }
 0x50c   : > { %v2622_v17 = vpop.f32.mrf.mxu0  ;;  %2830 = vmatpush.msrb.mxu2 %v1472_v14  ;;  %2943 = vmatpush.msrb.mxu3 %v1584_v20  ;;  %v4532_v20 = vld [vmem:[%s8887_s1 + $0x2b0] sm:$0xff] }
 0x50e   : > { %v2396_v7 = vpop.f32.mrf.mxu2  ;;  %v2509_v27 = vpop.f32.mrf.mxu3 }
 0x50f   : > { %v2510_v23 = vadd.f32 %v2509_v27, %v2396_v7  ;;  %v2286_v42 = vpop.f32.mrf.mxu1  ;;  %2669 = vmatmul.f32.gmra.mxu0 %v4511_v9  ;;  %v4523_v27 = vld [vmem:[%s8887_s1 + $0x268] sm:$0xff] }
 0x510   : > { %v2287_v13 = vadd.f32 %v2286_v42, %v6498_v60  ;;  %v4516_v60 = vld [vmem:[%s8887_s1 + $0x218] sm:$0xff]  ;;  %v1360_v42 = vld [vmem:[#allocation3 + $0x50] sm:$0xff] }
 0x511   : > { %v2623_v24 = vadd.f32 %v2622_v17, %v2510_v23  ;;  %v4524_v23 = vld [vmem:[%s8887_s1 + $0x258] sm:$0xff]  ;;  %2717 = vmatpush.msrb.mxu1 %v1360_v42  ;;  %v4535_v42 = vld [vmem:[%s8887_s1 + $0x2c8] sm:$0xff] }
 0x512   : > { %4102 = vst [vmem:[%s8889_s3 + $0x158] sm:$0xff] %v2287_v13  ;;  %2333 = vmatmul.f32.gmra.mxu1 %v4514_v36  ;;  %v1361_v13 = vld [vmem:[#allocation3 + $0x58] sm:$0xff] }
 0x513   : > { %4096 = vst [vmem:[%s8889_s3 + $0x128] sm:$0xff] %v2623_v24  ;;  %2446 = vmatmul.f32.gmra.mxu2 %v4515_v4  ;;  %2559 = vmatmul.f32.gmra.mxu3 %v4516_v60 }
 0x514   : > { %v2625_v30 = vpop.f32.mrf.mxu0  ;;  %3056 = vmatpush.msrb.mxu0 %v1361_v13  ;;  %v4536_v13 = vld [vmem:[%s8887_s1 + $0x2b8] sm:$0xff] }
 0x516   : > { %v2399_v62 = vpop.f32.mrf.mxu2  ;;  %v2512_v11 = vpop.f32.mrf.mxu3 }
 0x517   : > { %v2513_v54 = vadd.f32 %v2512_v11, %v2399_v62  ;;  %v2289_v31 = vpop.f32.mrf.mxu1  ;;  %2672 = vmatmul.f32.gmra.mxu0 %v4514_v36  ;;  %v4526_v62 = vld [vmem:[%s8887_s1 + $0x280] sm:$0xff]  ;;  %v4527_v11 = vld [vmem:[%s8887_s1 + $0x270] sm:$0xff] }
 0x518   : > { %v2290_v12 = vadd.f32 %v2289_v31, %v6511_v34  ;;  %v4519_v34 = vld [vmem:[%s8887_s1 + $0x230] sm:$0xff]  ;;  %v1577_v31 = vld [vmem:[#allocation3 + $0x718] sm:$0xff] }
 0x519   : > { %v2626_v22 = vadd.f32 %v2625_v30, %v2513_v54  ;;  %v1465_v54 = vld [vmem:[#allocation3 + $0x398] sm:$0xff]  ;;  %2944 = vmatpush.msrb.mxu3 %v1577_v31  ;;  %v1676_v31 = vld [vmem:[#allocation3 + $0xa30] sm:$0xff] }
 0x51a   : > { %4109 = vst [vmem:[%s8889_s3 + $0x190] sm:$0xff] %v2290_v12  ;;  %2336 = vmatmul.f32.gmra.mxu1 %v4517_v10  ;;  %2831 = vmatpush.msrb.mxu2 %v1465_v54  ;;  %v4539_v54 = vld [vmem:[%s8887_s1 + $0x2d0] sm:$0xff] }
 0x51b   : > { %4103 = vst [vmem:[%s8889_s3 + $0x160] sm:$0xff] %v2626_v22  ;;  %2449 = vmatmul.f32.gmra.mxu2 %v4518_v37  ;;  %2562 = vmatmul.f32.gmra.mxu3 %v4519_v34 }
 0x51c   : > { %v2628_v0 = vpop.f32.mrf.mxu0 }
 0x51e   : > { %v2402_v50 = vpop.f32.mrf.mxu2  ;;  %v2515_v16 = vpop.f32.mrf.mxu3 }
 0x51f   : > { %v2516_v44 = vadd.f32 %v2515_v16, %v2402_v50  ;;  %v2292_v26 = vpop.f32.mrf.mxu1  ;;  %2675 = vmatmul.f32.gmra.mxu0 %v4517_v10  ;;  %v4530_v50 = vld [vmem:[%s8887_s1 + $0x288] sm:$0xff]  ;;  %v1353_v16 = vld [vmem:[#allocation3 + $0x18] sm:$0xff] }
 0x520   : > { %v2293_v58 = vadd.f32 %v2292_v26, %v6526_v45  ;;  %v4522_v45 = vld [vmem:[%s8887_s1 + $0x248] sm:$0xff]  ;;  %2718 = vmatpush.msrb.mxu1 %v1353_v16  ;;  %v1564_v16 = vld [vmem:[#allocation3 + $0x6b0] sm:$0xff] }
 0x521   : > { %v2629_v33 = vadd.f32 %v2628_v0, %v2516_v44  ;;  %v4529_v0 = vld [vmem:[%s8887_s1 + $0x298] sm:$0xff]  ;;  %v1354_v44 = vld [vmem:[#allocation3 + $0x20] sm:$0xff] }
 0x522   : > { %4116 = vst [vmem:[%s8889_s3 + $0x1c8] sm:$0xff] %v2293_v58  ;;  %2339 = vmatmul.f32.gmra.mxu1 %v4520_v56  ;;  %3057 = vmatpush.msrb.mxu0 %v1354_v44  ;;  %v1565_v44 = vld [vmem:[#allocation3 + $0x6b8] sm:$0xff] }
 0x523   : > { %4110 = vst [vmem:[%s8889_s3 + $0x198] sm:$0xff] %v2629_v33  ;;  %2452 = vmatmul.f32.gmra.mxu2 %v4521_v15  ;;  %2565 = vmatmul.f32.gmra.mxu3 %v4522_v45 }
 0x524   : > { %v2631_v9 = vpop.f32.mrf.mxu0 }
 0x526   : > { %v2405_v6 = vpop.f32.mrf.mxu2  ;;  %v2518_v19 = vpop.f32.mrf.mxu3 }
 0x527   : > { %v2519_v43 = vadd.f32 %v2518_v19, %v2405_v6  ;;  %v2295_v41 = vpop.f32.mrf.mxu1  ;;  %2678 = vmatmul.f32.gmra.mxu0 %v4520_v56  ;;  %v1683_v6 = vld [vmem:[#allocation3 + $0xa68] sm:$0xff]  ;;  %v1460_v19 = vld [vmem:[#allocation3 + $0x370] sm:$0xff] }
 0x528   : > { %v2296_v17 = vadd.f32 %v2295_v41, %v6541_v40  ;;  %v4525_v40 = vld [vmem:[%s8887_s1 + $0x260] sm:$0xff]  ;;  %3268 = vmatpush.msra.mxu2 %v1683_v6  ;;  %3381 = vmatpush.msra.mxu3 %v1460_v19 }
 0x529   : > { %v2632_v7 = vadd.f32 %v2631_v9, %v2519_v43  ;;  %v4533_v9 = vld [vmem:[%s8887_s1 + $0x2a0] sm:$0xff] }
 0x52a   : > { %4123 = vst [vmem:[%s8889_s3 + $0x200] sm:$0xff] %v2296_v17  ;;  %2342 = vmatmul.f32.gmra.mxu1 %v4523_v27  ;;  %3269 = vmatpush.msra.mxu2 %v1676_v31  ;;  %v1446_v6 = vld [vmem:[#allocation3 + $0x300] sm:$0xff] }
 0x52b   : > { %4117 = vst [vmem:[%s8889_s3 + $0x1d0] sm:$0xff] %v2632_v7  ;;  %2455 = vmatmul.f32.gmra.mxu2 %v4524_v23  ;;  %2568 = vmatmul.f32.gmra.mxu3 %v4525_v40 }
 0x52c   : > { %v2634_v24 = vpop.f32.mrf.mxu0 }
 0x52e   : > { %v2408_v36 = vpop.f32.mrf.mxu2  ;;  %v2521_v4 = vpop.f32.mrf.mxu3 }
 0x52f   : > { %v2522_v60 = vadd.f32 %v2521_v4, %v2408_v36  ;;  %v2298_v39 = vpop.f32.mrf.mxu1  ;;  %2681 = vmatmul.f32.gmra.mxu0 %v4523_v27  ;;  %v1572_v36 = vld [vmem:[#allocation3 + $0x6f0] sm:$0xff] }
 0x530   : > { %v2299_v28 = vadd.f32 %v2298_v39, %v6556_v2  ;;  %v4528_v2 = vld [vmem:[%s8887_s1 + $0x278] sm:$0xff]  ;;  %3494 = vmatpush.msra.mxu0 %v1572_v36 }
 0x531   : > { %v2635_v30 = vadd.f32 %v2634_v24, %v2522_v60  ;;  %v1571_v24 = vld [vmem:[#allocation3 + $0x6e8] sm:$0xff] }
 0x532   : > { %4130 = vst [vmem:[%s8889_s3 + $0x238] sm:$0xff] %v2299_v28  ;;  %2345 = vmatmul.f32.gmra.mxu1 %v4526_v62  ;;  %3495 = vmatpush.msra.mxu0 %v1565_v44 }
 0x533   : > { %4124 = vst [vmem:[%s8889_s3 + $0x208] sm:$0xff] %v2635_v30  ;;  %2458 = vmatmul.f32.gmra.mxu2 %v4527_v11  ;;  %2571 = vmatmul.f32.gmra.mxu3 %v4528_v2  ;;  %v4538_v2 = vld [vmem:[%s8887_s1 + $0x2e0] sm:$0xff] }
 0x534   : > { %v2637_v12 = vpop.f32.mrf.mxu0  ;;  %3155 = vmatpush.msra.mxu1 %v1571_v24 }
 0x536   : > { %v2411_v22 = vpop.f32.mrf.mxu2  ;;  %v2524_v10 = vpop.f32.mrf.mxu3  ;;  %3156 = vmatpush.msra.mxu1 %v1564_v16 }
 0x537   : > { %v2525_v37 = vadd.f32 %v2524_v10, %v2411_v22  ;;  %v2301_v34 = vpop.f32.mrf.mxu1  ;;  %2684 = vmatmul.f32.gmra.mxu0 %v4526_v62 }
 0x538   : > { %v2302_v5 = vadd.f32 %v2301_v34, %v6571_v61  ;;  %v4531_v61 = vld [vmem:[%s8887_s1 + $0x290] sm:$0xff] }
 0x539   : > { %v2638_v32 = vadd.f32 %v2637_v12, %v2525_v37  ;;  %v1453_v12 = vld [vmem:[#allocation3 + $0x338] sm:$0xff] }
 0x53a   : > { %4137 = vst [vmem:[%s8889_s3 + $0x270] sm:$0xff] %v2302_v5  ;;  %2348 = vmatmul.f32.gmra.mxu1 %v4529_v0  ;;  %3382 = vmatpush.msra.mxu3 %v1453_v12 }
 0x53b   : > { %4131 = vst [vmem:[%s8889_s3 + $0x240] sm:$0xff] %v2638_v32  ;;  %2461 = vmatmul.f32.gmra.mxu2 %v4530_v50  ;;  %2574 = vmatmul.f32.gmra.mxu3 %v4531_v61  ;;  %v4541_v50 = vld [vmem:[%s8887_s1 + $0x2f8] sm:$0xff]  ;;  %v7108_v61 = vld [vmem:[%s8887_s1 + $0x2e8] sm:$0xff] }
 0x53c   : > { %v2640_v26 = vpop.f32.mrf.mxu0  ;;  %3383 = vmatpush.msra.mxu3 %v1446_v6 }
 0x53e   : > { %v2414_v58 = vpop.f32.mrf.mxu2  ;;  %v2527_v33 = vpop.f32.mrf.mxu3 }
 0x53f   : > { %v2528_v56 = vadd.f32 %v2527_v33, %v2414_v58  ;;  %v2304_v15 = vpop.f32.mrf.mxu1  ;;  %2687 = vmatmul.f32.gmra.mxu0 %v4529_v0 }
 0x540   : > { %v2305_v45 = vadd.f32 %v2304_v15, %v6584_v63  ;;  %v4534_v63 = vld [vmem:[%s8887_s1 + $0x2a8] sm:$0xff] }
 0x541   : > { %v2641_v14 = vadd.f32 %v2640_v26, %v2528_v56 }
 0x542   : > { %4144 = vst [vmem:[%s8889_s3 + $0x2a8] sm:$0xff] %v2305_v45  ;;  %2351 = vmatmul.f32.gmra.mxu1 %v4532_v20 }
 0x543   : > { %4138 = vst [vmem:[%s8889_s3 + $0x278] sm:$0xff] %v2641_v14  ;;  %2464 = vmatmul.f32.gmra.mxu2 %v4533_v9  ;;  %2577 = vmatmul.f32.gmra.mxu3 %v4534_v63  ;;  %v7130_v9 = vld [vmem:[%s8887_s1 + $0x8] sm:$0xff]  ;;  %v1669_v63 = vld [vmem:[#allocation3 + $0x9f8] sm:$0xff] }
 0x544   : > { %v2643_v43 = vpop.f32.mrf.mxu0  ;;  %3270 = vmatpush.msra.mxu2 %v1669_v63  ;;  %v1432_v63 = vld [vmem:[#allocation3 + $0x290] sm:$0xff] }
 0x546   : > { %v2417_v41 = vpop.f32.mrf.mxu2  ;;  %v2530_v17 = vpop.f32.mrf.mxu3 }
 0x547   : > { %v2531_v7 = vadd.f32 %v2530_v17, %v2417_v41  ;;  %v2307_v27 = vpop.f32.mrf.mxu1  ;;  %2690 = vmatmul.f32.gmra.mxu0 %v4532_v20  ;;  %v4544_v20 = vld [vmem:[%s8887_s1] sm:$0xff] }
 0x548   : > { %v2308_v23 = vadd.f32 %v2307_v27, %v6597_v8  ;;  %v4537_v8 = vld [vmem:[%s8887_s1 + $0x2c0] sm:$0xff] }
 0x549   : > { %v2644_v40 = vadd.f32 %v2643_v43, %v2531_v7 }
 0x54a   : > { %4151 = vst [vmem:[%s8889_s3 + $0x2e0] sm:$0xff] %v2308_v23  ;;  %2354 = vmatmul.f32.gmra.mxu1 %v4535_v42 }
 0x54b   : > { %4145 = vst [vmem:[%s8889_s3 + $0x2b0] sm:$0xff] %v2644_v40  ;;  %2467 = vmatmul.f32.gmra.mxu2 %v4536_v13  ;;  %2580 = vmatmul.f32.gmra.mxu3 %v4537_v8  ;;  %v7146_v40 = vld [vmem:[%s8887_s1 + $0x18] sm:$0xff]  ;;  %v1558_v8 = vld [vmem:[#allocation3 + $0x680] sm:$0xff] }
 0x54c   : > { %v2646_v4 = vpop.f32.mrf.mxu0  ;;  %v1557_v13 = vld [vmem:[#allocation3 + $0x678] sm:$0xff]  ;;  %3496 = vmatpush.msra.mxu0 %v1558_v8  ;;  %v1543_v8 = vld [vmem:[#allocation3 + $0x608] sm:$0xff] }
 0x54d   : > { %3157 = vmatpush.msra.mxu1 %v1557_v13  ;;  %v7265_v13 = vld [vmem:[%s8887_s1 + $0x88] sm:$0xff] }
 0x54e   : > { %v2420_v60 = vpop.f32.mrf.mxu2  ;;  %v2533_v39 = vpop.f32.mrf.mxu3 }
 0x54f   : > { %v2534_v28 = vadd.f32 %v2533_v39, %v2420_v60  ;;  %v2310_v30 = vpop.f32.mrf.mxu1  ;;  %2693 = vmatmul.f32.gmra.mxu0 %v4535_v42  ;;  %v7161_v42 = vld [vmem:[%s8887_s1 + $0x28] sm:$0xff] }
 0x550   : > { %v2311_v62 = vadd.f32 %v2310_v30, %v6610_v38  ;;  %v4540_v38 = vld [vmem:[%s8887_s1 + $0x2d8] sm:$0xff] }
 0x551   : > { %v2647_v11 = vadd.f32 %v2646_v4, %v2534_v28 }
 0x552   : > { %4158 = vst [vmem:[%s8889_s3 + $0x318] sm:$0xff] %v2311_v62  ;;  %2357 = vmatmul.f32.gmra.mxu1 %v4538_v2  ;;  %v7172_v62 = vld [vmem:[%s8887_s1 + $0x30] sm:$0xff] }
 0x553   : > { %4152 = vst [vmem:[%s8889_s3 + $0x2e8] sm:$0xff] %v2647_v11  ;;  %2470 = vmatmul.f32.gmra.mxu2 %v4539_v54  ;;  %2583 = vmatmul.f32.gmra.mxu3 %v4540_v38  ;;  %v7187_v11 = vld [vmem:[%s8887_s1 + $0x40] sm:$0xff]  ;;  %v1439_v54 = vld [vmem:[#allocation3 + $0x2c8] sm:$0xff] }
 0x554   : > { %v2649_v22 = vpop.f32.mrf.mxu0  ;;  %3384 = vmatpush.msra.mxu3 %v1439_v54  ;;  %v7276_v54 = vld [vmem:[%s8887_s1 + $0x90] sm:$0xff] }
 0x556   : > { %v2423_v10 = vpop.f32.mrf.mxu2  ;;  %v2536_v37 = vpop.f32.mrf.mxu3  ;;  %3385 = vmatpush.msra.mxu3 %v1432_v63 }
 0x557   : > { %v2537_v34 = vadd.f32 %v2536_v37, %v2423_v10  ;;  %v2313_v5 = vpop.f32.mrf.mxu1  ;;  %2696 = vmatmul.f32.gmra.mxu0 %v4538_v2  ;;  %v1662_v2 = vld [vmem:[#allocation3 + $0x9c0] sm:$0xff] }
 0x558   : > { %v2314_v32 = vadd.f32 %v2313_v5, %v6623_v48  ;;  %v7114_v48 = vld [vmem:[%s8887_s1 + $0x2f0] sm:$0xff]  ;;  %3271 = vmatpush.msra.mxu2 %v1662_v2  ;;  %v7198_v5 = vld [vmem:[%s8887_s1 + $0x48] sm:$0xff] }
 0x559   : > { %v2650_v0 = vadd.f32 %v2649_v22, %v2537_v34 }
 0x55a   : > { %4165 = vst [vmem:[%s8889_s3 + $0x350] sm:$0xff] %v2314_v32  ;;  %2360 = vmatmul.f32.gmra.mxu1 %v4541_v50  ;;  %v7213_v32 = vld [vmem:[%s8887_s1 + $0x58] sm:$0xff] }
 0x55b   : > { %4159 = vst [vmem:[%s8889_s3 + $0x320] sm:$0xff] %v2650_v0  ;;  %2473 = vmatmul.f32.gmra.mxu2 %v7108_v61  ;;  %2586 = vmatmul.f32.gmra.mxu3 %v7114_v48  ;;  %v1550_v0 = vld [vmem:[#allocation3 + $0x640] sm:$0xff] }
 0x55c   : > { %v2652_v26 = vpop.f32.mrf.mxu0  ;;  %3158 = vmatpush.msra.mxu1 %v1550_v0 }
 0x55e   : > { %v2426_v58 = vpop.f32.mrf.mxu2  ;;  %v2539_v33 = vpop.f32.mrf.mxu3  ;;  %3159 = vmatpush.msra.mxu1 %v1543_v8 }
 0x55f   : > { %v2540_v56 = vadd.f32 %v2539_v33, %v2426_v58  ;;  %v2316_v15 = vpop.f32.mrf.mxu1  ;;  %2699 = vmatmul.f32.gmra.mxu0 %v4541_v50  ;;  %v1551_v50 = vld [vmem:[#allocation3 + $0x648] sm:$0xff] }
 0x560   : > { %v2317_v45 = vadd.f32 %v2316_v15, %v6634_v53  ;;  %v7136_v53 = vld [vmem:[%s8887_s1 + $0x10] sm:$0xff]  ;;  %3497 = vmatpush.msra.mxu0 %v1551_v50 }
 0x561   : > { %v2653_v14 = vadd.f32 %v2652_v26, %v2540_v56 }
 0x562   : > { %4172 = vst [vmem:[%s8889_s3 + $0x388] sm:$0xff] %v2317_v45  ;;  %2719 = vmatmul.f32.vlgmr.msrb.gmra.mxu1 %v4544_v20  ;;  %v7224_v45 = vld [vmem:[%s8887_s1 + $0x60] sm:$0xff] }
 0x563   : > { %4166 = vst [vmem:[%s8889_s3 + $0x358] sm:$0xff] %v2653_v14  ;;  %2832 = vmatmul.f32.vlgmr.msrb.gmra.mxu2 %v7130_v9  ;;  %2945 = vmatmul.f32.vlgmr.msrb.gmra.mxu3 %v7136_v53  ;;  %v7239_v14 = vld [vmem:[%s8887_s1 + $0x70] sm:$0xff] }
 0x564   : > { %v2655_v19 = vpop.f32.mrf.mxu0 }
 0x566   : > { %v2429_v43 = vpop.f32.mrf.mxu2  ;;  %v2542_v41 = vpop.f32.mrf.mxu3 }
 0x567   : > { %v2543_v17 = vadd.f32 %v2542_v41, %v2429_v43  ;;  %v2319_v7 = vpop.f32.mrf.mxu1  ;;  %3058 = vmatmul.f32.vlgmr.msrb.gmra.mxu0 %v4544_v20  ;;  %v1655_v20 = vld [vmem:[#allocation3 + $0x988] sm:$0xff] }
 0x568   : > { %v2320_v27 = vadd.f32 %v2319_v7, %v6646_v49  ;;  %v7155_v49 = vld [vmem:[%s8887_s1 + $0x20] sm:$0xff]  ;;  %3272 = vmatpush.msra.mxu2 %v1655_v20 }
 0x569   : > { %v2656_v23 = vadd.f32 %v2655_v19, %v2543_v17 }
 0x56a   : > { %4179 = vst [vmem:[%s8889_s3 + $0x3c0] sm:$0xff] %v2320_v27  ;;  %2722 = vmatmul.f32.gmra.mxu1 %v7146_v40 }
 0x56b   : > { %4173 = vst [vmem:[%s8889_s3 + $0x390] sm:$0xff] %v2656_v23  ;;  %2835 = vmatmul.f32.gmra.mxu2 %v7155_v49  ;;  %2948 = vmatmul.f32.gmra.mxu3 %v7161_v42  ;;  %v7250_v23 = vld [vmem:[%s8887_s1 + $0x78] sm:$0xff] }
 0x56c   : > { %v2658_v24 = vpop.f32.mrf.mxu0 }
 0x56e   : > { %v2432_v36 = vpop.f32.mrf.mxu2  ;;  %v2545_v4 = vpop.f32.mrf.mxu3 }
 0x56f   : > { %v2546_v60 = vadd.f32 %v2545_v4, %v2432_v36  ;;  %v2322_v39 = vpop.f32.mrf.mxu1  ;;  %3061 = vmatmul.f32.gmra.mxu0 %v7146_v40 }
 0x570   : > { %v2323_v28 = vadd.f32 %v2322_v39, %v6658_v29  ;;  %v7181_v29 = vld [vmem:[%s8887_s1 + $0x38] sm:$0xff] }
 0x571   : > { %v2659_v30 = vadd.f32 %v2658_v24, %v2546_v60  ;;  %v1544_v24 = vld [vmem:[#allocation3 + $0x610] sm:$0xff] }
 0x572   : > { %4186 = vst [vmem:[%s8889_s3 + $0x3f8] sm:$0xff] %v2323_v28  ;;  %2725 = vmatmul.f32.gmra.mxu1 %v7172_v62  ;;  %3498 = vmatpush.msra.mxu0 %v1544_v24 }
 0x573   : > { %4180 = vst [vmem:[%s8889_s3 + $0x3c8] sm:$0xff] %v2659_v30  ;;  %2838 = vmatmul.f32.gmra.mxu2 %v7181_v29  ;;  %2951 = vmatmul.f32.gmra.mxu3 %v7187_v11 }
 0x574   : > { %v2661_v38 = vpop.f32.mrf.mxu0 }
 0x576   : > { %v2435_v31 = vpop.f32.mrf.mxu2  ;;  %v2548_v12 = vpop.f32.mrf.mxu3 }
 0x577   : > { %v2549_v22 = vadd.f32 %v2548_v12, %v2435_v31  ;;  %v2325_v10 = vpop.f32.mrf.mxu1  ;;  %3064 = vmatmul.f32.gmra.mxu0 %v7172_v62  ;;  %v1648_v31 = vld [vmem:[#allocation3 + $0x950] sm:$0xff]  ;;  %v1425_v12 = vld [vmem:[#allocation3 + $0x258] sm:$0xff] }
 0x578   : > { %v2326_v37 = vadd.f32 %v2325_v10, %v6670_v21  ;;  %v7207_v21 = vld [vmem:[%s8887_s1 + $0x50] sm:$0xff]  ;;  %3273 = vmatpush.msra.mxu2 %v1648_v31  ;;  %3386 = vmatpush.msra.mxu3 %v1425_v12  ;;  %v1529_v31 = vld [vmem:[#allocation3 + $0x598] sm:$0xff]  ;;  %v1530_v12 = vld [vmem:[#allocation3 + $0x5a0] sm:$0xff] }
 0x579   : > { %v2662_v34 = vadd.f32 %v2661_v38, %v2549_v22  ;;  %v7291_v38 = vld [vmem:[%s8887_s1 + $0xa0] sm:$0xff] }
 0x57a   : > { %4193 = vst [vmem:[%s8889_s3 + $0x430] sm:$0xff] %v2326_v37  ;;  %2728 = vmatmul.f32.gmra.mxu1 %v7198_v5 }
 0x57b   : > { %4187 = vst [vmem:[%s8889_s3 + $0x400] sm:$0xff] %v2662_v34  ;;  %2841 = vmatmul.f32.gmra.mxu2 %v7207_v21  ;;  %2954 = vmatmul.f32.gmra.mxu3 %v7213_v32 }
 0x57c   : > { %v2664_v16 = vpop.f32.mrf.mxu0 }
 0x57e   : > { %v2438_v44 = vpop.f32.mrf.mxu2  ;;  %v2551_v26 = vpop.f32.mrf.mxu3 }
 0x57f   : > { %v2552_v58 = vadd.f32 %v2551_v26, %v2438_v44  ;;  %v2328_v33 = vpop.f32.mrf.mxu1  ;;  %3067 = vmatmul.f32.gmra.mxu0 %v7198_v5  ;;  %v7302_v44 = vld [vmem:[%s8887_s1 + $0xa8] sm:$0xff]  ;;  %v7317_v26 = vld [vmem:[%s8887_s1 + $0xb8] sm:$0xff] }
 0x580   : > { %v2329_v56 = vadd.f32 %v2328_v33, %v6684_v55  ;;  %v7233_v55 = vld [vmem:[%s8887_s1 + $0x68] sm:$0xff]  ;;  %v1537_v33 = vld [vmem:[#allocation3 + $0x5d8] sm:$0xff] }
 0x581   : > { %v2665_v15 = vadd.f32 %v2664_v16, %v2552_v58  ;;  %v1536_v58 = vld [vmem:[#allocation3 + $0x5d0] sm:$0xff]  ;;  %3499 = vmatpush.msra.mxu0 %v1537_v33  ;;  %v7395_v33 = vld [vmem:[%s8887_s1 + $0x100] sm:$0xff] }
 0x582   : > { %4200 = vst [vmem:[%s8889_s3 + $0x468] sm:$0xff] %v2329_v56  ;;  %2731 = vmatmul.f32.gmra.mxu1 %v7224_v45 }
 0x583   : > { %4194 = vst [vmem:[%s8889_s3 + $0x438] sm:$0xff] %v2665_v15  ;;  %2844 = vmatmul.f32.gmra.mxu2 %v7233_v55  ;;  %2957 = vmatmul.f32.gmra.mxu3 %v7239_v14 }
 0x584   : > { %v2667_v6 = vpop.f32.mrf.mxu0  ;;  %3160 = vmatpush.msra.mxu1 %v1536_v58  ;;  %3500 = vmatpush.msra.mxu0 %v1530_v12  ;;  %v7380_v58 = vld [vmem:[%s8887_s1 + $0xf0] sm:$0xff] }
 0x586   : > { %v2441_v19 = vpop.f32.mrf.mxu2  ;;  %v2554_v43 = vpop.f32.mrf.mxu3  ;;  %3161 = vmatpush.msra.mxu1 %v1529_v31 }
 0x587   : > { %v2555_v41 = vadd.f32 %v2554_v43, %v2441_v19  ;;  %v2331_v17 = vpop.f32.mrf.mxu1  ;;  %3070 = vmatmul.f32.gmra.mxu0 %v7224_v45 }
 0x588   : > { %v2332_v7 = vadd.f32 %v2331_v17, %v6700_v47  ;;  %v7259_v47 = vld [vmem:[%s8887_s1 + $0x80] sm:$0xff]  ;;  %v7343_v17 = vld [vmem:[%s8887_s1 + $0xd0] sm:$0xff] }
 0x589   : > { %v2668_v27 = vadd.f32 %v2667_v6, %v2555_v41  ;;  %v7328_v41 = vld [vmem:[%s8887_s1 + $0xc0] sm:$0xff] }
 0x58a   : > { %4207 = vst [vmem:[%s8889_s3 + $0x4a0] sm:$0xff] %v2332_v7  ;;  %2734 = vmatmul.f32.gmra.mxu1 %v7250_v23  ;;  %v1641_v7 = vld [vmem:[#allocation3 + $0x918] sm:$0xff] }
 0x58b   : > { %4201 = vst [vmem:[%s8889_s3 + $0x470] sm:$0xff] %v2668_v27  ;;  %2847 = vmatmul.f32.gmra.mxu2 %v7259_v47  ;;  %2960 = vmatmul.f32.gmra.mxu3 %v7265_v13  ;;  %v1418_v27 = vld [vmem:[#allocation3 + $0x220] sm:$0xff] }
 0x58c   : > { %v2670_v36 = vpop.f32.mrf.mxu0  ;;  %3274 = vmatpush.msra.mxu2 %v1641_v7  ;;  %3387 = vmatpush.msra.mxu3 %v1418_v27 }
 0x58e   : > { %v2444_v4 = vpop.f32.mrf.mxu2  ;;  %v2557_v60 = vpop.f32.mrf.mxu3 }
 0x58f   : > { %v2558_v39 = vadd.f32 %v2557_v60, %v2444_v4  ;;  %v2334_v28 = vpop.f32.mrf.mxu1  ;;  %3073 = vmatmul.f32.gmra.mxu0 %v7250_v23 }
 0x590   : > { %v2335_v30 = vadd.f32 %v2334_v28, %v6718_v51  ;;  %v7285_v51 = vld [vmem:[%s8887_s1 + $0x98] sm:$0xff] }
 0x591   : > { %v2671_v2 = vadd.f32 %v2670_v36, %v2558_v39 }
 0x592   : > { %4214 = vst [vmem:[%s8889_s3 + $0x4d8] sm:$0xff] %v2335_v30  ;;  %2737 = vmatmul.f32.gmra.mxu1 %v7276_v54  ;;  %v7354_v30 = vld [vmem:[%s8887_s1 + $0xd8] sm:$0xff] }
 0x593   : > { %4208 = vst [vmem:[%s8889_s3 + $0x4a8] sm:$0xff] %v2671_v2  ;;  %2850 = vmatmul.f32.gmra.mxu2 %v7285_v51  ;;  %2963 = vmatmul.f32.gmra.mxu3 %v7291_v38  ;;  %v7369_v2 = vld [vmem:[%s8887_s1 + $0xe8] sm:$0xff] }
 0x594   : > { %v2673_v22 = vpop.f32.mrf.mxu0 }
 0x596   : > { %v2447_v10 = vpop.f32.mrf.mxu2  ;;  %v2560_v37 = vpop.f32.mrf.mxu3 }
 0x597   : > { %v2561_v34 = vadd.f32 %v2560_v37, %v2447_v10  ;;  %v2337_v0 = vpop.f32.mrf.mxu1  ;;  %3076 = vmatmul.f32.gmra.mxu0 %v7276_v54 }
 0x598   : > { %v2338_v50 = vadd.f32 %v2337_v0, %v6733_v46  ;;  %v7311_v46 = vld [vmem:[%s8887_s1 + $0xb0] sm:$0xff] }
 0x599   : > { %v2674_v16 = vadd.f32 %v2673_v22, %v2561_v34 }
 0x59a   : > { %4221 = vst [vmem:[%s8889_s3 + $0x510] sm:$0xff] %v2338_v50  ;;  %2740 = vmatmul.f32.gmra.mxu1 %v7302_v44 }
 0x59b   : > { %4215 = vst [vmem:[%s8889_s3 + $0x4e0] sm:$0xff] %v2674_v16  ;;  %2853 = vmatmul.f32.gmra.mxu2 %v7311_v46  ;;  %2966 = vmatmul.f32.gmra.mxu3 %v7317_v26 }
 0x59c   : > { %v2676_v56 = vpop.f32.mrf.mxu0 }
 0x59e   : > { %v2450_v15 = vpop.f32.mrf.mxu2  ;;  %v2563_v20 = vpop.f32.mrf.mxu3 }
 0x59f   : > { %v2564_v63 = vadd.f32 %v2563_v20, %v2450_v15  ;;  %v2340_v6 = vpop.f32.mrf.mxu1  ;;  %3079 = vmatmul.f32.gmra.mxu0 %v7302_v44  ;;  %v1411_v15 = vld [vmem:[#allocation3 + $0x1e8] sm:$0xff] }
 0x5a0   : > { %v2341_v19 = vadd.f32 %v2340_v6, %v6748_v1  ;;  %v7337_v1 = vld [vmem:[%s8887_s1 + $0xc8] sm:$0xff]  ;;  %3388 = vmatpush.msra.mxu3 %v1411_v15 }
 0x5a1   : > { %v2677_v43 = vadd.f32 %v2676_v56, %v2564_v63  ;;  %v1634_v56 = vld [vmem:[#allocation3 + $0x8e0] sm:$0xff] }
 0x5a2   : > { %4228 = vst [vmem:[%s8889_s3 + $0x548] sm:$0xff] %v2341_v19  ;;  %2743 = vmatmul.f32.gmra.mxu1 %v7328_v41  ;;  %3275 = vmatpush.msra.mxu2 %v1634_v56 }
 0x5a3   : > { %4222 = vst [vmem:[%s8889_s3 + $0x518] sm:$0xff] %v2677_v43  ;;  %2856 = vmatmul.f32.gmra.mxu2 %v7337_v1  ;;  %2969 = vmatmul.f32.gmra.mxu3 %v7343_v17 }
 0x5a4   : > { %v2679_v8 = vpop.f32.mrf.mxu0 }
 0x5a6   : > { %v2453_v24 = vpop.f32.mrf.mxu2  ;;  %v2566_v36 = vpop.f32.mrf.mxu3 }
 0x5a7   : > { %v2567_v4 = vadd.f32 %v2566_v36, %v2453_v24  ;;  %v2343_v60 = vpop.f32.mrf.mxu1  ;;  %3082 = vmatmul.f32.gmra.mxu0 %v7328_v41  ;;  %v7421_v24 = vld [vmem:[%s8887_s1 + $0x118] sm:$0xff]  ;;  %v1522_v36 = vld [vmem:[#allocation3 + $0x560] sm:$0xff] }
 0x5a8   : > { %v2344_v39 = vadd.f32 %v2343_v60, %v6763_v59  ;;  %v7363_v59 = vld [vmem:[%s8887_s1 + $0xe0] sm:$0xff]  ;;  %3162 = vmatpush.msra.mxu1 %v1522_v36  ;;  %v1516_v36 = vld [vmem:[#allocation3 + $0x530] sm:$0xff] }
 0x5a9   : > { %v2680_v28 = vadd.f32 %v2679_v8, %v2567_v4  ;;  %v7406_v8 = vld [vmem:[%s8887_s1 + $0x108] sm:$0xff] }
 0x5aa   : > { %4235 = vst [vmem:[%s8889_s3 + $0x580] sm:$0xff] %v2344_v39  ;;  %2746 = vmatmul.f32.gmra.mxu1 %v7354_v30  ;;  %v1523_v4 = vld [vmem:[#allocation3 + $0x568] sm:$0xff] }
 0x5ab   : > { %4229 = vst [vmem:[%s8889_s3 + $0x550] sm:$0xff] %v2680_v28  ;;  %2859 = vmatmul.f32.gmra.mxu2 %v7363_v59  ;;  %2972 = vmatmul.f32.gmra.mxu3 %v7369_v2 }
 0x5ac   : > { %v2682_v22 = vpop.f32.mrf.mxu0  ;;  %3501 = vmatpush.msra.mxu0 %v1523_v4 }
 0x5ae   : > { %v2456_v10 = vpop.f32.mrf.mxu2  ;;  %v2569_v37 = vpop.f32.mrf.mxu3  ;;  %3502 = vmatpush.msra.mxu0 %v1516_v36  ;;  %v7510_v36 = vld [vmem:[%s8887_s1 + $0x168] sm:$0xff] }
 0x5af   : > { %v2570_v34 = vadd.f32 %v2569_v37, %v2456_v10  ;;  %v2346_v0 = vpop.f32.mrf.mxu1  ;;  %3085 = vmatmul.f32.gmra.mxu0 %v7354_v30  ;;  %v7432_v37 = vld [vmem:[%s8887_s1 + $0x120] sm:$0xff] }
 0x5b0   : > { %v2347_v50 = vadd.f32 %v2346_v0, %v6778_v25  ;;  %v7389_v25 = vld [vmem:[%s8887_s1 + $0xf8] sm:$0xff]  ;;  %v1627_v0 = vld [vmem:[#allocation3 + $0x8a8] sm:$0xff] }
 0x5b1   : > { %v2683_v16 = vadd.f32 %v2682_v22, %v2570_v34  ;;  %v7447_v34 = vld [vmem:[%s8887_s1 + $0x130] sm:$0xff]  ;;  %3276 = vmatpush.msra.mxu2 %v1627_v0  ;;  %v7499_v0 = vld [vmem:[%s8887_s1 + $0x160] sm:$0xff] }
 0x5b2   : > { %4242 = vst [vmem:[%s8889_s3 + $0x5b8] sm:$0xff] %v2347_v50  ;;  %2749 = vmatmul.f32.gmra.mxu1 %v7380_v58  ;;  %v1404_v50 = vld [vmem:[#allocation3 + $0x1b0] sm:$0xff] }
 0x5b3   : > { %4236 = vst [vmem:[%s8889_s3 + $0x588] sm:$0xff] %v2683_v16  ;;  %2862 = vmatmul.f32.gmra.mxu2 %v7389_v25  ;;  %2975 = vmatmul.f32.gmra.mxu3 %v7395_v33 }
 0x5b4   : > { %v2685_v20 = vpop.f32.mrf.mxu0  ;;  %3389 = vmatpush.msra.mxu3 %v1404_v50  ;;  %v1620_v50 = vld [vmem:[#allocation3 + $0x870] sm:$0xff] }
 0x5b5   : > { %3277 = vmatpush.msra.mxu2 %v1620_v50 }
 0x5b6   : > { %v2459_v63 = vpop.f32.mrf.mxu2  ;;  %v2572_v6 = vpop.f32.mrf.mxu3 }
 0x5b7   : > { %v2573_v19 = vadd.f32 %v2572_v6, %v2459_v63  ;;  %v2349_v43 = vpop.f32.mrf.mxu1  ;;  %3088 = vmatmul.f32.gmra.mxu0 %v7380_v58 }
 0x5b8   : > { %v2350_v7 = vadd.f32 %v2349_v43, %v6793_v57  ;;  %v7415_v57 = vld [vmem:[%s8887_s1 + $0x110] sm:$0xff]  ;;  %v7458_v43 = vld [vmem:[%s8887_s1 + $0x138] sm:$0xff] }
 0x5b9   : > { %v2686_v27 = vadd.f32 %v2685_v20, %v2573_v19 }
 0x5ba   : > { %4249 = vst [vmem:[%s8889_s3 + $0x5f0] sm:$0xff] %v2350_v7  ;;  %2752 = vmatmul.f32.gmra.mxu1 %v7406_v8  ;;  %v7473_v7 = vld [vmem:[%s8887_s1 + $0x148] sm:$0xff] }
 0x5bb   : > { %4243 = vst [vmem:[%s8889_s3 + $0x5c0] sm:$0xff] %v2686_v27  ;;  %2865 = vmatmul.f32.gmra.mxu2 %v7415_v57  ;;  %2978 = vmatmul.f32.gmra.mxu3 %v7421_v24  ;;  %v1515_v27 = vld [vmem:[#allocation3 + $0x528] sm:$0xff] }
 0x5bc   : > { %v2688_v60 = vpop.f32.mrf.mxu0  ;;  %3163 = vmatpush.msra.mxu1 %v1515_v27 }
 0x5be   : > { %v2462_v39 = vpop.f32.mrf.mxu2  ;;  %v2575_v28 = vpop.f32.mrf.mxu3 }
 0x5bf   : > { %v2576_v31 = vadd.f32 %v2575_v28, %v2462_v39  ;;  %v2352_v12 = vpop.f32.mrf.mxu1  ;;  %3091 = vmatmul.f32.gmra.mxu0 %v7406_v8 }
 0x5c0   : > { %v2353_v22 = vadd.f32 %v2352_v12, %v6808_v3  ;;  %v7441_v3 = vld [vmem:[%s8887_s1 + $0x128] sm:$0xff] }
 0x5c1   : > { %v2689_v10 = vadd.f32 %v2688_v60, %v2576_v31 }
 0x5c2   : > { %4256 = vst [vmem:[%s8889_s3 + $0x628] sm:$0xff] %v2353_v22  ;;  %2755 = vmatmul.f32.gmra.mxu1 %v7432_v37 }
 0x5c3   : > { %4250 = vst [vmem:[%s8889_s3 + $0x5f8] sm:$0xff] %v2689_v10  ;;  %2868 = vmatmul.f32.gmra.mxu2 %v7441_v3  ;;  %2981 = vmatmul.f32.gmra.mxu3 %v7447_v34  ;;  %v7484_v10 = vld [vmem:[%s8887_s1 + $0x150] sm:$0xff] }
 0x5c4   : > { %v2691_v16 = vpop.f32.mrf.mxu0 }
 0x5c6   : > { %v2465_v56 = vpop.f32.mrf.mxu2  ;;  %v2578_v15 = vpop.f32.mrf.mxu3 }
 0x5c7   : > { %v2579_v20 = vadd.f32 %v2578_v15, %v2465_v56  ;;  %v2355_v63 = vpop.f32.mrf.mxu1  ;;  %3094 = vmatmul.f32.gmra.mxu0 %v7432_v37 }
 0x5c8   : > { %v2356_v6 = vadd.f32 %v2355_v63, %v6823_v18  ;;  %v7467_v18 = vld [vmem:[%s8887_s1 + $0x140] sm:$0xff] }
 0x5c9   : > { %v2692_v19 = vadd.f32 %v2691_v16, %v2579_v20  ;;  %v1397_v16 = vld [vmem:[#allocation3 + $0x178] sm:$0xff] }
 0x5ca   : > { %4263 = vst [vmem:[%s8889_s3 + $0x660] sm:$0xff] %v2356_v6  ;;  %2758 = vmatmul.f32.gmra.mxu1 %v7458_v43  ;;  %3390 = vmatpush.msra.mxu3 %v1397_v16 }
 0x5cb   : > { %4257 = vst [vmem:[%s8889_s3 + $0x630] sm:$0xff] %v2692_v19  ;;  %2871 = vmatmul.f32.gmra.mxu2 %v7467_v18  ;;  %2984 = vmatmul.f32.gmra.mxu3 %v7473_v7 }
 0x5cc   : > { %v2694_v4 = vpop.f32.mrf.mxu0 }
 0x5ce   : > { %v2468_v60 = vpop.f32.mrf.mxu2  ;;  %v2581_v39 = vpop.f32.mrf.mxu3 }
 0x5cf   : > { %v2582_v28 = vadd.f32 %v2581_v39, %v2468_v60  ;;  %v2358_v31 = vpop.f32.mrf.mxu1  ;;  %3097 = vmatmul.f32.gmra.mxu0 %v7458_v43  ;;  %v1508_v60 = vld [vmem:[#allocation3 + $0x4f0] sm:$0xff]  ;;  %v1509_v39 = vld [vmem:[#allocation3 + $0x4f8] sm:$0xff] }
 0x5d0   : > { %v2359_v12 = vadd.f32 %v2358_v31, %v6838_v35  ;;  %v7493_v35 = vld [vmem:[%s8887_s1 + $0x158] sm:$0xff]  ;;  %3164 = vmatpush.msra.mxu1 %v1508_v60  ;;  %3503 = vmatpush.msra.mxu0 %v1509_v39 }
 0x5d1   : > { %v2695_v22 = vadd.f32 %v2694_v4, %v2582_v28  ;;  %v7525_v4 = vld [vmem:[%s8887_s1 + $0x178] sm:$0xff] }
 0x5d2   : > { %4270 = vst [vmem:[%s8889_s3 + $0x698] sm:$0xff] %v2359_v12  ;;  %2761 = vmatmul.f32.gmra.mxu1 %v7484_v10 }
 0x5d3   : > { %4264 = vst [vmem:[%s8889_s3 + $0x668] sm:$0xff] %v2695_v22  ;;  %2874 = vmatmul.f32.gmra.mxu2 %v7493_v35  ;;  %2987 = vmatmul.f32.gmra.mxu3 %v7499_v0 }
 0x5d4   : > { %v2697_v56 = vpop.f32.mrf.mxu0 }
 0x5d6   : > { %v2471_v15 = vpop.f32.mrf.mxu2  ;;  %v2584_v20 = vpop.f32.mrf.mxu3 }
 0x5d7   : > { %v2585_v63 = vadd.f32 %v2584_v20, %v2471_v15  ;;  %v2361_v6 = vpop.f32.mrf.mxu1  ;;  %3100 = vmatmul.f32.gmra.mxu0 %v7484_v10  ;;  %v7541_v15 = vld [vmem:[%s8887_s1 + $0x188] sm:$0xff]  ;;  %v7547_v20 = vld [vmem:[%s8887_s1 + $0x190] sm:$0xff] }
 0x5d8   : > { %v2362_v19 = vadd.f32 %v2361_v6, %v6853_v52  ;;  %v7519_v52 = vld [vmem:[%s8887_s1 + $0x170] sm:$0xff]  ;;  %v1390_v6 = vld [vmem:[#allocation3 + $0x140] sm:$0xff] }
 0x5d9   : > { %v2698_v27 = vadd.f32 %v2697_v56, %v2585_v63  ;;  %v7532_v56 = vld [vmem:[%s8887_s1 + $0x180] sm:$0xff]  ;;  %v1613_v63 = vld [vmem:[#allocation3 + $0x838] sm:$0xff]  ;;  %3391 = vmatpush.msra.mxu3 %v1390_v6 }
 0x5da   : > { %4277 = vst [vmem:[%s8889_s3 + $0x6d0] sm:$0xff] %v2362_v19  ;;  %2764 = vmatmul.f32.gmra.mxu1 %v7510_v36  ;;  %3278 = vmatpush.msra.mxu2 %v1613_v63  ;;  %v1502_v63 = vld [vmem:[#allocation3 + $0x4c0] sm:$0xff] }
 0x5db   : > { %4271 = vst [vmem:[%s8889_s3 + $0x6a0] sm:$0xff] %v2698_v27  ;;  %2877 = vmatmul.f32.gmra.mxu2 %v7519_v52  ;;  %2990 = vmatmul.f32.gmra.mxu3 %v7525_v4 }
 0x5dc   : > { %v2700_v28 = vpop.f32.mrf.mxu0  ;;  %3504 = vmatpush.msra.mxu0 %v1502_v63  ;;  %v1606_v63 = vld [vmem:[#allocation3 + $0x800] sm:$0xff] }
 0x5dd   : > { %3279 = vmatpush.msra.mxu2 %v1606_v63  ;;  %v7613_v63 = vld [vmem:[%s8887_s1 + $0x1d0] sm:$0xff] }
 0x5de   : > { %v2474_v31 = vpop.f32.mrf.mxu2  ;;  %v2587_v12 = vpop.f32.mrf.mxu3  ;;  %8960 = vst [vmem:[#allocation15_spill] sm:$0xff] %v7613_v63 }
 0x5df   : > { %v2588_v22 = vadd.f32 %v2587_v12, %v2474_v31  ;;  %v2720_v50 = vpop.f32.mrf.mxu1  ;;  %3103 = vmatmul.f32.gmra.mxu0 %v7510_v36  ;;  %v7556_v12 = vld [vmem:[%s8887_s1 + $0x198] sm:$0xff] }
 0x5e0   : > { %8951 = vst [vmem:[#allocation6_spill] sm:$0xff] %v7556_v12 }
 0x5e1   : > { %v2701_v16 = vadd.f32 %v2700_v28, %v2588_v22  ;;  %v7565_v22 = vld [vmem:[%s8887_s1 + $0x1a0] sm:$0xff] }
 0x5e2   : > { %2767 = vmatmul.f32.gmra.mxu1 %v7532_v56  ;;  %8952 = vst [vmem:[#allocation7_spill] sm:$0xff] %v7565_v22 }
 0x5e3   : > { %4278 = vst [vmem:[%s8889_s3 + $0x6d8] sm:$0xff] %v2701_v16  ;;  %2880 = vmatmul.f32.gmra.mxu2 %v7541_v15  ;;  %2993 = vmatmul.f32.gmra.mxu3 %v7547_v20  ;;  %v1501_v16 = vld [vmem:[#allocation3 + $0x4b8] sm:$0xff] }
 0x5e4   : > { %v7550_v19 = vpop.f32.mrf.mxu0  ;;  %3165 = vmatpush.msra.mxu1 %v1501_v16  ;;  %v7589_v16 = vld [vmem:[%s8887_s1 + $0x1b8] sm:$0xff] }
 0x5e5   : > { %8950 = vst [vmem:[#allocation5_spill] sm:$0xff] %v7550_v19  ;;  %v7580_v19 = vld [vmem:[%s8887_s1 + $0x1b0] sm:$0xff] }
 0x5e6   : > { %v2833_v27 = vpop.f32.mrf.mxu2  ;;  %v2946_v60 = vpop.f32.mrf.mxu3  ;;  %8955 = vst [vmem:[#allocation10_spill] sm:$0xff] %v7580_v19 }
 0x5e7   : > { %v2834_v39 = vadd.f32 %v2833_v27, %v2720_v50  ;;  %v2723_v28 = vpop.f32.mrf.mxu1  ;;  %3106 = vmatmul.f32.gmra.mxu0 %v7532_v56  ;;  %v7571_v50 = vld [vmem:[%s8887_s1 + $0x1a8] sm:$0xff]  ;;  %8956 = vst [vmem:[#allocation11_spill] sm:$0xff] %v7589_v16 }
 0x5e8   : > { %8953 = vst [vmem:[#allocation8_spill] sm:$0xff] %v7571_v50 }
 0x5e9   : > { %v2947_v31 = vadd.f32 %v2946_v60, %v2834_v39 }
 0x5ea   : > { %2770 = vmatmul.f32.gmra.mxu1 %v7556_v12 }
 0x5eb   : > { %4062 = vst [vmem:[%s8889_s3 + $0x18] sm:$0xff] %v2947_v31  ;;  %2883 = vmatmul.f32.gmra.mxu2 %v7565_v22  ;;  %2996 = vmatmul.f32.gmra.mxu3 %v7571_v50  ;;  %v7604_v50 = vld [vmem:[%s8887_s1 + $0x1c8] sm:$0xff] }
 0x5ec   : > { %v7574_v6 = vpop.f32.mrf.mxu0  ;;  %8959 = vst [vmem:[#allocation14_spill] sm:$0xff] %v7604_v50 }
 0x5ed   : > { %8954 = vst [vmem:[#allocation9_spill] sm:$0xff] %v7574_v6 }
 0x5ee   : > { %v2836_v27 = vpop.f32.mrf.mxu2  ;;  %v2949_v60 = vpop.f32.mrf.mxu3 }
 0x5ef   : > { %v2837_v39 = vadd.f32 %v2836_v27, %v2723_v28  ;;  %v2726_v31 = vpop.f32.mrf.mxu1  ;;  %3109 = vmatmul.f32.gmra.mxu0 %v7556_v12  ;;  %v7595_v28 = vld [vmem:[%s8887_s1 + $0x1c0] sm:$0xff]  ;;  %v1383_v27 = vld [vmem:[#allocation3 + $0x108] sm:$0xff] }
 0x5f0   : > { %8957 = vst [vmem:[#allocation12_spill] sm:$0xff] %v7595_v28  ;;  %3392 = vmatpush.msra.mxu3 %v1383_v27  ;;  %v1495_v27 = vld [vmem:[#allocation3 + $0x488] sm:$0xff] }
 0x5f1   : > { %v2950_v22 = vadd.f32 %v2949_v60, %v2837_v39  ;;  %3505 = vmatpush.msra.mxu0 %v1495_v27  ;;  %v1376_v27 = vld [vmem:[#allocation3 + $0xd0] sm:$0xff] }
 0x5f2   : > { %2773 = vmatmul.f32.gmra.mxu1 %v7580_v19  ;;  %3393 = vmatpush.msra.mxu3 %v1376_v27  ;;  %v1488_v27 = vld [vmem:[#allocation3 + $0x450] sm:$0xff] }
 0x5f3   : > { %4069 = vst [vmem:[%s8889_s3 + $0x50] sm:$0xff] %v2950_v22  ;;  %2886 = vmatmul.f32.gmra.mxu2 %v7589_v16  ;;  %2999 = vmatmul.f32.gmra.mxu3 %v7595_v28  ;;  %v7628_v28 = vld [vmem:[%s8887_s1 + $0x1e0] sm:$0xff] }
 0x5f4   : > { %v7598_v60 = vpop.f32.mrf.mxu0  ;;  %8963 = vst [vmem:[#allocation18_spill] sm:$0xff] %v7628_v28  ;;  %3506 = vmatpush.msra.mxu0 %v1488_v27  ;;  %v1369_v27 = vld [vmem:[#allocation3 + $0x98] sm:$0xff] }
 0x5f5   : > { %8958 = vst [vmem:[#allocation13_spill] sm:$0xff] %v7598_v60  ;;  %3394 = vmatpush.msra.mxu3 %v1369_v27  ;;  %v1481_v27 = vld [vmem:[#allocation3 + $0x418] sm:$0xff] }
 0x5f6   : > { %v2839_v22 = vpop.f32.mrf.mxu2  ;;  %v2952_v39 = vpop.f32.mrf.mxu3  ;;  %3507 = vmatpush.msra.mxu0 %v1481_v27  ;;  %v1362_v27 = vld [vmem:[#allocation3 + $0x60] sm:$0xff] }
 0x5f7   : > { %v2840_v6 = vadd.f32 %v2839_v22, %v2726_v31  ;;  %v2729_v12 = vpop.f32.mrf.mxu1  ;;  %3112 = vmatmul.f32.gmra.mxu0 %v7580_v19  ;;  %v1494_v31 = vld [vmem:[#allocation3 + $0x480] sm:$0xff]  ;;  %3395 = vmatpush.msra.mxu3 %v1362_v27 }
 0x5f8   : > { %3166 = vmatpush.msra.mxu1 %v1494_v31  ;;  %v7637_v31 = vld [vmem:[%s8887_s1 + $0x1e8] sm:$0xff]  ;;  %v1474_v27 = vld [vmem:[#allocation3 + $0x3e0] sm:$0xff] }
 0x5f9   : > { %v2953_v16 = vadd.f32 %v2952_v39, %v2840_v6  ;;  %v7619_v6 = vld [vmem:[%s8887_s1 + $0x1d8] sm:$0xff]  ;;  %8964 = vst [vmem:[#allocation19_spill] sm:$0xff] %v7637_v31  ;;  %3508 = vmatpush.msra.mxu0 %v1474_v27  ;;  %v1355_v27 = vld [vmem:[#allocation3 + $0x28] sm:$0xff] }
 0x5fa   : > { %2776 = vmatmul.f32.gmra.mxu1 %v7604_v50  ;;  %8961 = vst [vmem:[#allocation16_spill] sm:$0xff] %v7619_v6  ;;  %3396 = vmatpush.msra.mxu3 %v1355_v27  ;;  %v1467_v27 = vld [vmem:[#allocation3 + $0x3a8] sm:$0xff] }
 0x5fb   : > { %4076 = vst [vmem:[%s8889_s3 + $0x88] sm:$0xff] %v2953_v16  ;;  %2889 = vmatmul.f32.gmra.mxu2 %v7613_v63  ;;  %3002 = vmatmul.f32.gmra.mxu3 %v7619_v6  ;;  %v7652_v6 = vld [vmem:[%s8887_s1 + $0x1f8] sm:$0xff] }
 0x5fc   : > { %v7622_v22 = vpop.f32.mrf.mxu0  ;;  %8967 = vst [vmem:[#allocation22_spill] sm:$0xff] %v7652_v6  ;;  %3509 = vmatpush.msra.mxu0 %v1467_v27  ;;  %v1573_v27 = vld [vmem:[#allocation3 + $0x6f8] sm:$0xff] }
 0x5fd   : > { %8962 = vst [vmem:[#allocation17_spill] sm:$0xff] %v7622_v22  ;;  %3833 = vmatpush.msrb.mxu3 %v1573_v27  ;;  %v1685_v27 = vld [vmem:[#allocation3 + $0xa78] sm:$0xff] }
 0x5fe   : > { %v2842_v16 = vpop.f32.mrf.mxu2  ;;  %v2955_v39 = vpop.f32.mrf.mxu3  ;;  %3946 = vmatpush.msrb.mxu0 %v1685_v27  ;;  %v1566_v27 = vld [vmem:[#allocation3 + $0x6c0] sm:$0xff] }
 0x5ff   : > { %v2843_v60 = vadd.f32 %v2842_v16, %v2729_v12  ;;  %v2732_v19 = vpop.f32.mrf.mxu1  ;;  %3115 = vmatmul.f32.gmra.mxu0 %v7604_v50  ;;  %v7643_v12 = vld [vmem:[%s8887_s1 + $0x1f0] sm:$0xff]  ;;  %3834 = vmatpush.msrb.mxu3 %v1566_v27  ;;  %v1678_v27 = vld [vmem:[#allocation3 + $0xa40] sm:$0xff] }
 0x600   : > { %8965 = vst [vmem:[#allocation20_spill] sm:$0xff] %v7643_v12  ;;  %3947 = vmatpush.msrb.mxu0 %v1678_v27  ;;  %v1559_v27 = vld [vmem:[#allocation3 + $0x688] sm:$0xff] }
 0x601   : > { %v2956_v63 = vadd.f32 %v2955_v39, %v2843_v60  ;;  %v1599_v60 = vld [vmem:[#allocation3 + $0x7c8] sm:$0xff]  ;;  %3835 = vmatpush.msrb.mxu3 %v1559_v27 }
 0x602   : > { %2779 = vmatmul.f32.gmra.mxu1 %v7628_v28  ;;  %3280 = vmatpush.msra.mxu2 %v1599_v60  ;;  %v7661_v60 = vld [vmem:[%s8887_s1 + $0x200] sm:$0xff] }
 0x603   : > { %4083 = vst [vmem:[%s8889_s3 + $0xc0] sm:$0xff] %v2956_v63  ;;  %2892 = vmatmul.f32.gmra.mxu2 %v7637_v31  ;;  %3005 = vmatmul.f32.gmra.mxu3 %v7643_v12  ;;  %v7676_v12 = vld [vmem:[%s8887_s1 + $0x210] sm:$0xff] }
 0x604   : > { %v7646_v16 = vpop.f32.mrf.mxu0  ;;  %8968 = vst [vmem:[#allocation23_spill] sm:$0xff] %v7661_v60 }
 0x605   : > { %8966 = vst [vmem:[#allocation21_spill] sm:$0xff] %v7646_v16 }
 0x606   : > { %v2845_v63 = vpop.f32.mrf.mxu2  ;;  %v2958_v39 = vpop.f32.mrf.mxu3  ;;  %8971 = vst [vmem:[#allocation26_spill] sm:$0xff] %v7676_v12 }
 0x607   : > { %v2846_v22 = vadd.f32 %v2845_v63, %v2732_v19  ;;  %v2735_v50 = vpop.f32.mrf.mxu1  ;;  %3118 = vmatmul.f32.gmra.mxu0 %v7628_v28  ;;  %v7667_v19 = vld [vmem:[%s8887_s1 + $0x208] sm:$0xff] }
 0x608   : > { %8969 = vst [vmem:[#allocation24_spill] sm:$0xff] %v7667_v19 }
 0x609   : > { %v2959_v31 = vadd.f32 %v2958_v39, %v2846_v22  ;;  %v1487_v22 = vld [vmem:[#allocation3 + $0x448] sm:$0xff] }
 0x60a   : > { %2782 = vmatmul.f32.gmra.mxu1 %v7652_v6 }
 0x60b   : > { %4090 = vst [vmem:[%s8889_s3 + $0xf8] sm:$0xff] %v2959_v31  ;;  %2895 = vmatmul.f32.gmra.mxu2 %v7661_v60  ;;  %3008 = vmatmul.f32.gmra.mxu3 %v7667_v19  ;;  %v7700_v19 = vld [vmem:[%s8887_s1 + $0x228] sm:$0xff] }
 0x60c   : > { %v7670_v63 = vpop.f32.mrf.mxu0  ;;  %3167 = vmatpush.msra.mxu1 %v1487_v22  ;;  %v7685_v22 = vld [vmem:[%s8887_s1 + $0x218] sm:$0xff]  ;;  %8975 = vst [vmem:[#allocation30_spill] sm:$0xff] %v7700_v19 }
 0x60d   : > { %8970 = vst [vmem:[#allocation25_spill] sm:$0xff] %v7670_v63 }
 0x60e   : > { %v2848_v31 = vpop.f32.mrf.mxu2  ;;  %v2961_v39 = vpop.f32.mrf.mxu3  ;;  %8972 = vst [vmem:[#allocation27_spill] sm:$0xff] %v7685_v22 }
 0x60f   : > { %v2849_v16 = vadd.f32 %v2848_v31, %v2735_v50  ;;  %v2738_v28 = vpop.f32.mrf.mxu1  ;;  %3121 = vmatmul.f32.gmra.mxu0 %v7652_v6  ;;  %v7691_v50 = vld [vmem:[%s8887_s1 + $0x220] sm:$0xff] }
 0x610   : > { %8973 = vst [vmem:[#allocation28_spill] sm:$0xff] %v7691_v50 }
 0x611   : > { %v2962_v60 = vadd.f32 %v2961_v39, %v2849_v16  ;;  %v1592_v16 = vld [vmem:[#allocation3 + $0x790] sm:$0xff] }
 0x612   : > { %2785 = vmatmul.f32.gmra.mxu1 %v7676_v12  ;;  %3281 = vmatpush.msra.mxu2 %v1592_v16  ;;  %v7709_v16 = vld [vmem:[%s8887_s1 + $0x230] sm:$0xff] }
 0x613   : > { %4097 = vst [vmem:[%s8889_s3 + $0x130] sm:$0xff] %v2962_v60  ;;  %2898 = vmatmul.f32.gmra.mxu2 %v7685_v22  ;;  %3011 = vmatmul.f32.gmra.mxu3 %v7691_v50  ;;  %v7724_v50 = vld [vmem:[%s8887_s1 + $0x240] sm:$0xff] }
 0x614   : > { %v7694_v31 = vpop.f32.mrf.mxu0  ;;  %8976 = vst [vmem:[#allocation31_spill] sm:$0xff] %v7709_v16 }
 0x615   : > { %8974 = vst [vmem:[#allocation29_spill] sm:$0xff] %v7694_v31 }
 0x616   : > { %v2851_v60 = vpop.f32.mrf.mxu2  ;;  %v2964_v39 = vpop.f32.mrf.mxu3  ;;  %8979 = vst [vmem:[#allocation34_spill] sm:$0xff] %v7724_v50 }
 0x617   : > { %v2852_v63 = vadd.f32 %v2851_v60, %v2738_v28  ;;  %v2741_v6 = vpop.f32.mrf.mxu1  ;;  %3124 = vmatmul.f32.gmra.mxu0 %v7676_v12  ;;  %v7715_v28 = vld [vmem:[%s8887_s1 + $0x238] sm:$0xff] }
 0x618   : > { %8977 = vst [vmem:[#allocation32_spill] sm:$0xff] %v7715_v28 }
 0x619   : > { %v2965_v22 = vadd.f32 %v2964_v39, %v2852_v63  ;;  %v1480_v63 = vld [vmem:[#allocation3 + $0x410] sm:$0xff] }
 0x61a   : > { %2788 = vmatmul.f32.gmra.mxu1 %v7700_v19 }
 0x61b   : > { %4104 = vst [vmem:[%s8889_s3 + $0x168] sm:$0xff] %v2965_v22  ;;  %2901 = vmatmul.f32.gmra.mxu2 %v7709_v16  ;;  %3014 = vmatmul.f32.gmra.mxu3 %v7715_v28  ;;  %v7748_v28 = vld [vmem:[%s8887_s1 + $0x258] sm:$0xff] }
 0x61c   : > { %v7718_v60 = vpop.f32.mrf.mxu0  ;;  %3168 = vmatpush.msra.mxu1 %v1480_v63  ;;  %v7733_v63 = vld [vmem:[%s8887_s1 + $0x248] sm:$0xff]  ;;  %8983 = vst [vmem:[#allocation38_spill] sm:$0xff] %v7748_v28 }
 0x61d   : > { %8978 = vst [vmem:[#allocation33_spill] sm:$0xff] %v7718_v60 }
 0x61e   : > { %v2854_v22 = vpop.f32.mrf.mxu2  ;;  %v2967_v39 = vpop.f32.mrf.mxu3  ;;  %8980 = vst [vmem:[#allocation35_spill] sm:$0xff] %v7733_v63 }
 0x61f   : > { %v2855_v31 = vadd.f32 %v2854_v22, %v2741_v6  ;;  %v2744_v12 = vpop.f32.mrf.mxu1  ;;  %3127 = vmatmul.f32.gmra.mxu0 %v7700_v19  ;;  %v7739_v6 = vld [vmem:[%s8887_s1 + $0x250] sm:$0xff] }
 0x620   : > { %8981 = vst [vmem:[#allocation36_spill] sm:$0xff] %v7739_v6 }
 0x621   : > { %v2968_v16 = vadd.f32 %v2967_v39, %v2855_v31  ;;  %v1585_v31 = vld [vmem:[#allocation3 + $0x758] sm:$0xff] }
 0x622   : > { %2791 = vmatmul.f32.gmra.mxu1 %v7724_v50  ;;  %3282 = vmatpush.msra.mxu2 %v1585_v31  ;;  %v7757_v31 = vld [vmem:[%s8887_s1 + $0x260] sm:$0xff] }
 0x623   : > { %4111 = vst [vmem:[%s8889_s3 + $0x1a0] sm:$0xff] %v2968_v16  ;;  %2904 = vmatmul.f32.gmra.mxu2 %v7733_v63  ;;  %3017 = vmatmul.f32.gmra.mxu3 %v7739_v6  ;;  %v7772_v6 = vld [vmem:[%s8887_s1 + $0x270] sm:$0xff] }
 0x624   : > { %v7742_v22 = vpop.f32.mrf.mxu0  ;;  %8984 = vst [vmem:[#allocation39_spill] sm:$0xff] %v7757_v31 }
 0x625   : > { %8982 = vst [vmem:[#allocation37_spill] sm:$0xff] %v7742_v22 }
 0x626   : > { %v2857_v16 = vpop.f32.mrf.mxu2  ;;  %v2970_v39 = vpop.f32.mrf.mxu3  ;;  %8987 = vst [vmem:[#allocation42_spill] sm:$0xff] %v7772_v6 }
 0x627   : > { %v2858_v60 = vadd.f32 %v2857_v16, %v2744_v12  ;;  %v2747_v19 = vpop.f32.mrf.mxu1  ;;  %3130 = vmatmul.f32.gmra.mxu0 %v7724_v50  ;;  %v7763_v12 = vld [vmem:[%s8887_s1 + $0x268] sm:$0xff] }
 0x628   : > { %8985 = vst [vmem:[#allocation40_spill] sm:$0xff] %v7763_v12 }
 0x629   : > { %v2971_v63 = vadd.f32 %v2970_v39, %v2858_v60  ;;  %v1473_v60 = vld [vmem:[#allocation3 + $0x3d8] sm:$0xff] }
 0x62a   : > { %2794 = vmatmul.f32.gmra.mxu1 %v7748_v28 }
 0x62b   : > { %4118 = vst [vmem:[%s8889_s3 + $0x1d8] sm:$0xff] %v2971_v63  ;;  %2907 = vmatmul.f32.gmra.mxu2 %v7757_v31  ;;  %3020 = vmatmul.f32.gmra.mxu3 %v7763_v12  ;;  %v7796_v12 = vld [vmem:[%s8887_s1 + $0x288] sm:$0xff] }
 0x62c   : > { %v7766_v16 = vpop.f32.mrf.mxu0  ;;  %3169 = vmatpush.msra.mxu1 %v1473_v60  ;;  %v7781_v60 = vld [vmem:[%s8887_s1 + $0x278] sm:$0xff]  ;;  %8991 = vst [vmem:[#allocation46_spill] sm:$0xff] %v7796_v12 }
 0x62d   : > { %8986 = vst [vmem:[#allocation41_spill] sm:$0xff] %v7766_v16 }
 0x62e   : > { %v2860_v63 = vpop.f32.mrf.mxu2  ;;  %v2973_v39 = vpop.f32.mrf.mxu3  ;;  %8988 = vst [vmem:[#allocation43_spill] sm:$0xff] %v7781_v60 }
 0x62f   : > { %v2861_v22 = vadd.f32 %v2860_v63, %v2747_v19  ;;  %v2750_v50 = vpop.f32.mrf.mxu1  ;;  %3133 = vmatmul.f32.gmra.mxu0 %v7748_v28  ;;  %v7787_v19 = vld [vmem:[%s8887_s1 + $0x280] sm:$0xff] }
 0x630   : > { %8989 = vst [vmem:[#allocation44_spill] sm:$0xff] %v7787_v19 }
 0x631   : > { %v2974_v31 = vadd.f32 %v2973_v39, %v2861_v22  ;;  %v1578_v22 = vld [vmem:[#allocation3 + $0x720] sm:$0xff] }
 0x632   : > { %2797 = vmatmul.f32.gmra.mxu1 %v7772_v6  ;;  %3283 = vmatpush.msra.mxu2 %v1578_v22  ;;  %v7805_v22 = vld [vmem:[%s8887_s1 + $0x290] sm:$0xff] }
 0x633   : > { %4125 = vst [vmem:[%s8889_s3 + $0x210] sm:$0xff] %v2974_v31  ;;  %2910 = vmatmul.f32.gmra.mxu2 %v7781_v60  ;;  %3023 = vmatmul.f32.gmra.mxu3 %v7787_v19  ;;  %v7820_v19 = vld [vmem:[%s8887_s1 + $0x2a0] sm:$0xff] }
 0x634   : > { %v7790_v63 = vpop.f32.mrf.mxu0  ;;  %8992 = vst [vmem:[#allocation47_spill] sm:$0xff] %v7805_v22 }
 0x635   : > { %8990 = vst [vmem:[#allocation45_spill] sm:$0xff] %v7790_v63 }
 0x636   : > { %v2863_v31 = vpop.f32.mrf.mxu2  ;;  %v2976_v39 = vpop.f32.mrf.mxu3  ;;  %8995 = vst [vmem:[#allocation50_spill] sm:$0xff] %v7820_v19 }
 0x637   : > { %v2864_v16 = vadd.f32 %v2863_v31, %v2750_v50  ;;  %v2753_v28 = vpop.f32.mrf.mxu1  ;;  %3136 = vmatmul.f32.gmra.mxu0 %v7772_v6  ;;  %v7811_v50 = vld [vmem:[%s8887_s1 + $0x298] sm:$0xff] }
 0x638   : > { %8993 = vst [vmem:[#allocation48_spill] sm:$0xff] %v7811_v50 }
 0x639   : > { %v2977_v60 = vadd.f32 %v2976_v39, %v2864_v16  ;;  %v1466_v16 = vld [vmem:[#allocation3 + $0x3a0] sm:$0xff] }
 0x63a   : > { %2800 = vmatmul.f32.gmra.mxu1 %v7796_v12 }
 0x63b   : > { %4132 = vst [vmem:[%s8889_s3 + $0x248] sm:$0xff] %v2977_v60  ;;  %2913 = vmatmul.f32.gmra.mxu2 %v7805_v22  ;;  %3026 = vmatmul.f32.gmra.mxu3 %v7811_v50  ;;  %v7844_v50 = vld [vmem:[%s8887_s1 + $0x2b8] sm:$0xff] }
 0x63c   : > { %v7814_v31 = vpop.f32.mrf.mxu0  ;;  %3170 = vmatpush.msra.mxu1 %v1466_v16  ;;  %v7829_v16 = vld [vmem:[%s8887_s1 + $0x2a8] sm:$0xff]  ;;  %8999 = vst [vmem:[#allocation54_spill] sm:$0xff] %v7844_v50 }
 0x63d   : > { %8994 = vst [vmem:[#allocation49_spill] sm:$0xff] %v7814_v31 }
 0x63e   : > { %v2866_v60 = vpop.f32.mrf.mxu2  ;;  %v2979_v39 = vpop.f32.mrf.mxu3  ;;  %8996 = vst [vmem:[#allocation51_spill] sm:$0xff] %v7829_v16 }
 0x63f   : > { %v2867_v63 = vadd.f32 %v2866_v60, %v2753_v28  ;;  %v2756_v6 = vpop.f32.mrf.mxu1  ;;  %3139 = vmatmul.f32.gmra.mxu0 %v7796_v12  ;;  %v7835_v28 = vld [vmem:[%s8887_s1 + $0x2b0] sm:$0xff] }
 0x640   : > { %8997 = vst [vmem:[#allocation52_spill] sm:$0xff] %v7835_v28 }
 0x641   : > { %v2980_v22 = vadd.f32 %v2979_v39, %v2867_v63  ;;  %v1461_v63 = vld [vmem:[#allocation3 + $0x378] sm:$0xff] }
 0x642   : > { %2803 = vmatmul.f32.gmra.mxu1 %v7820_v19  ;;  %3720 = vmatpush.msrb.mxu2 %v1461_v63  ;;  %v7853_v63 = vld [vmem:[%s8887_s1 + $0x2c0] sm:$0xff] }
 0x643   : > { %4139 = vst [vmem:[%s8889_s3 + $0x280] sm:$0xff] %v2980_v22  ;;  %2916 = vmatmul.f32.gmra.mxu2 %v7829_v16  ;;  %3029 = vmatmul.f32.gmra.mxu3 %v7835_v28  ;;  %v7868_v28 = vld [vmem:[%s8887_s1 + $0x2d0] sm:$0xff] }
 0x644   : > { %v7838_v60 = vpop.f32.mrf.mxu0  ;;  %9000 = vst [vmem:[#allocation55_spill] sm:$0xff] %v7853_v63 }
 0x645   : > { %8998 = vst [vmem:[#allocation53_spill] sm:$0xff] %v7838_v60 }
 0x646   : > { %v2869_v22 = vpop.f32.mrf.mxu2  ;;  %v2982_v39 = vpop.f32.mrf.mxu3 }
 0x647   : > { %v2870_v31 = vadd.f32 %v2869_v22, %v2756_v6  ;;  %v2759_v12 = vpop.f32.mrf.mxu1  ;;  %3142 = vmatmul.f32.gmra.mxu0 %v7820_v19  ;;  %v7859_v6 = vld [vmem:[%s8887_s1 + $0x2c8] sm:$0xff] }
 0x649   : > { %v2983_v16 = vadd.f32 %v2982_v39, %v2870_v31  ;;  %v1684_v31 = vld [vmem:[#allocation3 + $0xa70] sm:$0xff] }
 0x64a   : > { %2806 = vmatmul.f32.gmra.mxu1 %v7844_v50 }
 0x64b   : > { %4146 = vst [vmem:[%s8889_s3 + $0x2b8] sm:$0xff] %v2983_v16  ;;  %2919 = vmatmul.f32.gmra.mxu2 %v7853_v63  ;;  %3032 = vmatmul.f32.gmra.mxu3 %v7859_v6 }
 0x64c   : > { %v7862_v22 = vpop.f32.mrf.mxu0  ;;  %3607 = vmatpush.msrb.mxu1 %v1684_v31  ;;  %v7877_v31 = vld [vmem:[%s8887_s1 + $0x2d8] sm:$0xff] }
 0x64d   : > { %9001 = vst [vmem:[#allocation56_spill] sm:$0xff] %v7862_v22 }
 0x64e   : > { %v2872_v16 = vpop.f32.mrf.mxu2  ;;  %v2985_v39 = vpop.f32.mrf.mxu3  ;;  %9002 = vst [vmem:[#allocation57_spill] sm:$0xff] %v7877_v31 }
 0x64f   : > { %v2873_v60 = vadd.f32 %v2872_v16, %v2759_v12  ;;  %v2762_v19 = vpop.f32.mrf.mxu1  ;;  %3145 = vmatmul.f32.gmra.mxu0 %v7844_v50  ;;  %v7883_v12 = vld [vmem:[%s8887_s1 + $0x2e0] sm:$0xff] }
 0x651   : > { %v2986_v63 = vadd.f32 %v2985_v39, %v2873_v60  ;;  %v1454_v60 = vld [vmem:[#allocation3 + $0x340] sm:$0xff] }
 0x652   : > { %2809 = vmatmul.f32.gmra.mxu1 %v7868_v28  ;;  %3721 = vmatpush.msrb.mxu2 %v1454_v60  ;;  %v7897_v60 = vld [vmem:[%s8887_s1 + $0x2f8] sm:$0xff] }
 0x653   : > { %4153 = vst [vmem:[%s8889_s3 + $0x2f0] sm:$0xff] %v2986_v63  ;;  %2922 = vmatmul.f32.gmra.mxu2 %v7877_v31  ;;  %3035 = vmatmul.f32.gmra.mxu3 %v7883_v12 }
 0x654   : > { %v7886_v16 = vpop.f32.mrf.mxu0 }
 0x655   : > { %9003 = vst [vmem:[#allocation58_spill] sm:$0xff] %v7886_v16 }
 0x656   : > { %v2875_v63 = vpop.f32.mrf.mxu2  ;;  %v2988_v39 = vpop.f32.mrf.mxu3 }
 0x657   : > { %v2876_v22 = vadd.f32 %v2875_v63, %v2762_v19  ;;  %v2765_v50 = vpop.f32.mrf.mxu1  ;;  %3148 = vmatmul.f32.gmra.mxu0 %v7868_v28  ;;  %v1677_v19 = vld [vmem:[#allocation3 + $0xa38] sm:$0xff] }
 0x658   : > { %3608 = vmatpush.msrb.mxu1 %v1677_v19  ;;  %v1447_v19 = vld [vmem:[#allocation3 + $0x308] sm:$0xff] }
 0x659   : > { %v2989_v31 = vadd.f32 %v2988_v39, %v2876_v22  ;;  %3722 = vmatpush.msrb.mxu2 %v1447_v19  ;;  %v1671_v19 = vld [vmem:[#allocation3 + $0xa08] sm:$0xff] }
 0x65a   : > { %2812 = vmatmul.f32.gmra.mxu1 %v7108_v61  ;;  %3948 = vmatpush.msrb.mxu0 %v1671_v19 }
 0x65b   : > { %4160 = vst [vmem:[%s8889_s3 + $0x328] sm:$0xff] %v2989_v31  ;;  %2925 = vmatmul.f32.gmra.mxu2 %v7114_v48  ;;  %3038 = vmatmul.f32.gmra.mxu3 %v7897_v60  ;;  %v7905_v48 = vld [vmem:[%s8887_s1 + $0x2e8] sm:$0xff] }
 0x65c   : > { %v7900_v63 = vpop.f32.mrf.mxu0 }
 0x65d   : > { %9004 = vst [vmem:[#allocation59_spill] sm:$0xff] %v7900_v63 }
 0x65e   : > { %v2878_v61 = vpop.f32.mrf.mxu2  ;;  %v2991_v22 = vpop.f32.mrf.mxu3 }
 0x65f   : > { %v2879_v39 = vadd.f32 %v2878_v61, %v2765_v50  ;;  %v2768_v16 = vpop.f32.mrf.mxu1  ;;  %3151 = vmatmul.f32.gmra.mxu0 %v7905_v48  ;;  %v7916_v50 = vld [vmem:[%s8887_s1] sm:$0xff] }
 0x661   : > { %v2992_v31 = vadd.f32 %v2991_v22, %v2879_v39 }
 0x662   : > { %3171 = vmatmul.f32.vlgmr.msra.gmra.mxu1 %v7130_v9 }
 0x663   : > { %4167 = vst [vmem:[%s8889_s3 + $0x360] sm:$0xff] %v2992_v31  ;;  %3284 = vmatmul.f32.vlgmr.msra.gmra.mxu2 %v7136_v53  ;;  %3397 = vmatmul.f32.vlgmr.msra.gmra.mxu3 %v7916_v50  ;;  %v7924_v53 = vld [vmem:[%s8887_s1 + $0x8] sm:$0xff] }
 0x664   : > { %v7919_v61 = vpop.f32.mrf.mxu0  ;;  %9006 = vst [vmem:[#allocation61_spill] sm:$0xff] %v7924_v53 }
 0x665   : > { %9005 = vst [vmem:[#allocation60_spill] sm:$0xff] %v7919_v61 }
 0x666   : > { %v2881_v9 = vpop.f32.mrf.mxu2  ;;  %v2994_v22 = vpop.f32.mrf.mxu3 }
 0x667   : > { %v2882_v39 = vadd.f32 %v2881_v9, %v2768_v16  ;;  %v2771_v63 = vpop.f32.mrf.mxu1  ;;  %3510 = vmatmul.f32.vlgmr.msra.gmra.mxu0 %v7924_v53  ;;  %v1670_v16 = vld [vmem:[#allocation3 + $0xa00] sm:$0xff] }
 0x668   : > { %3609 = vmatpush.msrb.mxu1 %v1670_v16 }
 0x669   : > { %v2995_v31 = vadd.f32 %v2994_v22, %v2882_v39 }
 0x66a   : > { %3174 = vmatmul.f32.gmra.mxu1 %v7155_v49  ;;  %v7938_v49 = vld [vmem:[%s8887_s1 + $0x20] sm:$0xff] }
 0x66b   : > { %4174 = vst [vmem:[%s8889_s3 + $0x398] sm:$0xff] %v2995_v31  ;;  %3287 = vmatmul.f32.gmra.mxu2 %v7161_v42  ;;  %3400 = vmatmul.f32.gmra.mxu3 %v7146_v40  ;;  %v1440_v40 = vld [vmem:[#allocation3 + $0x2d0] sm:$0xff] }
 0x66c   : > { %v7933_v27 = vpop.f32.mrf.mxu0  ;;  %3723 = vmatpush.msrb.mxu2 %v1440_v40 }
 0x66e   : > { %v2884_v9 = vpop.f32.mrf.mxu2  ;;  %v2997_v61 = vpop.f32.mrf.mxu3 }
 0x66f   : > { %v2885_v53 = vadd.f32 %v2884_v9, %v2771_v63  ;;  %v2774_v22 = vpop.f32.mrf.mxu1  ;;  %3513 = vmatmul.f32.gmra.mxu0 %v7938_v49  ;;  %v1552_v63 = vld [vmem:[#allocation3 + $0x650] sm:$0xff] }
 0x670   : > { %3836 = vmatpush.msrb.mxu3 %v1552_v63 }
 0x671   : > { %v2998_v42 = vadd.f32 %v2997_v61, %v2885_v53  ;;  %v1664_v53 = vld [vmem:[#allocation3 + $0x9d0] sm:$0xff] }
 0x672   : > { %3177 = vmatmul.f32.gmra.mxu1 %v7181_v29  ;;  %v7952_v29 = vld [vmem:[%s8887_s1 + $0x38] sm:$0xff]  ;;  %3949 = vmatpush.msrb.mxu0 %v1664_v53 }
 0x673   : > { %4181 = vst [vmem:[%s8889_s3 + $0x3d0] sm:$0xff] %v2998_v42  ;;  %3290 = vmatmul.f32.gmra.mxu2 %v7187_v11  ;;  %3403 = vmatmul.f32.gmra.mxu3 %v7172_v62  ;;  %v1663_v62 = vld [vmem:[#allocation3 + $0x9c8] sm:$0xff]  ;;  %v1657_v53 = vld [vmem:[#allocation3 + $0x998] sm:$0xff] }
 0x674   : > { %v7947_v39 = vpop.f32.mrf.mxu0  ;;  %3610 = vmatpush.msrb.mxu1 %v1663_v62  ;;  %3950 = vmatpush.msrb.mxu0 %v1657_v53 }
 0x676   : > { %v2887_v31 = vpop.f32.mrf.mxu2  ;;  %v3000_v16 = vpop.f32.mrf.mxu3 }
 0x677   : > { %v2888_v19 = vadd.f32 %v2887_v31, %v2774_v22  ;;  %v2777_v61 = vpop.f32.mrf.mxu1  ;;  %3516 = vmatmul.f32.gmra.mxu0 %v7952_v29  ;;  %v1545_v31 = vld [vmem:[#allocation3 + $0x618] sm:$0xff] }
 0x678   : > { %3837 = vmatpush.msrb.mxu3 %v1545_v31 }
 0x679   : > { %v3001_v11 = vadd.f32 %v3000_v16, %v2888_v19 }
 0x67a   : > { %3180 = vmatmul.f32.gmra.mxu1 %v7207_v21  ;;  %v7966_v21 = vld [vmem:[%s8887_s1 + $0x50] sm:$0xff] }
 0x67b   : > { %4188 = vst [vmem:[%s8889_s3 + $0x408] sm:$0xff] %v3001_v11  ;;  %3293 = vmatmul.f32.gmra.mxu2 %v7213_v32  ;;  %3406 = vmatmul.f32.gmra.mxu3 %v7198_v5  ;;  %v1433_v5 = vld [vmem:[#allocation3 + $0x298] sm:$0xff] }
 0x67c   : > { %v7961_v9 = vpop.f32.mrf.mxu0  ;;  %3724 = vmatpush.msrb.mxu2 %v1433_v5 }
 0x67e   : > { %v2890_v22 = vpop.f32.mrf.mxu2  ;;  %v3003_v42 = vpop.f32.mrf.mxu3 }
 0x67f   : > { %v2891_v40 = vadd.f32 %v2890_v22, %v2777_v61  ;;  %v2780_v63 = vpop.f32.mrf.mxu1  ;;  %3519 = vmatmul.f32.gmra.mxu0 %v7966_v21 }
 0x681   : > { %v3004_v32 = vadd.f32 %v3003_v42, %v2891_v40 }
 0x682   : > { %3183 = vmatmul.f32.gmra.mxu1 %v7233_v55  ;;  %v7980_v55 = vld [vmem:[%s8887_s1 + $0x68] sm:$0xff] }
 0x683   : > { %4195 = vst [vmem:[%s8889_s3 + $0x440] sm:$0xff] %v3004_v32  ;;  %3296 = vmatmul.f32.gmra.mxu2 %v7239_v14  ;;  %3409 = vmatmul.f32.gmra.mxu3 %v7224_v45  ;;  %v1656_v45 = vld [vmem:[#allocation3 + $0x990] sm:$0xff] }
 0x684   : > { %v7975_v16 = vpop.f32.mrf.mxu0  ;;  %3611 = vmatpush.msrb.mxu1 %v1656_v45 }
 0x686   : > { %v2893_v19 = vpop.f32.mrf.mxu2  ;;  %v3006_v61 = vpop.f32.mrf.mxu3 }
 0x687   : > { %v2894_v11 = vadd.f32 %v2893_v19, %v2780_v63  ;;  %v2783_v62 = vpop.f32.mrf.mxu1  ;;  %3522 = vmatmul.f32.gmra.mxu0 %v7980_v55 }
 0x689   : > { %v3007_v14 = vadd.f32 %v3006_v61, %v2894_v11 }
 0x68a   : > { %3186 = vmatmul.f32.gmra.mxu1 %v7259_v47 }
 0x68b   : > { %4202 = vst [vmem:[%s8889_s3 + $0x478] sm:$0xff] %v3007_v14  ;;  %3299 = vmatmul.f32.gmra.mxu2 %v7265_v13  ;;  %3412 = vmatmul.f32.gmra.mxu3 %v7250_v23  ;;  %v1426_v23 = vld [vmem:[#allocation3 + $0x260] sm:$0xff] }
 0x68c   : > { %v7989_v22 = vpop.f32.mrf.mxu0  ;;  %v1538_v13 = vld [vmem:[#allocation3 + $0x5e0] sm:$0xff]  ;;  %3725 = vmatpush.msrb.mxu2 %v1426_v23 }
 0x68d   : > { %3838 = vmatpush.msrb.mxu3 %v1538_v13 }
 0x68e   : > { %v2896_v42 = vpop.f32.mrf.mxu2  ;;  %v3009_v40 = vpop.f32.mrf.mxu3 }
 0x68f   : > { %v2897_v63 = vadd.f32 %v2896_v42, %v2783_v62  ;;  %v2786_v32 = vpop.f32.mrf.mxu1  ;;  %3525 = vmatmul.f32.gmra.mxu0 %v7259_v47 }
 0x691   : > { %v3010_v5 = vadd.f32 %v3009_v40, %v2897_v63 }
 0x692   : > { %3189 = vmatmul.f32.gmra.mxu1 %v7285_v51 }
 0x693   : > { %4209 = vst [vmem:[%s8889_s3 + $0x4b0] sm:$0xff] %v3010_v5  ;;  %3302 = vmatmul.f32.gmra.mxu2 %v7291_v38  ;;  %3415 = vmatmul.f32.gmra.mxu3 %v7276_v54  ;;  %v1649_v54 = vld [vmem:[#allocation3 + $0x958] sm:$0xff]  ;;  %v1650_v38 = vld [vmem:[#allocation3 + $0x960] sm:$0xff] }
 0x694   : > { %v7998_v31 = vpop.f32.mrf.mxu0  ;;  %3612 = vmatpush.msrb.mxu1 %v1649_v54  ;;  %3951 = vmatpush.msrb.mxu0 %v1650_v38 }
 0x696   : > { %v2899_v19 = vpop.f32.mrf.mxu2  ;;  %v3012_v61 = vpop.f32.mrf.mxu3 }
 0x697   : > { %v2900_v47 = vadd.f32 %v2899_v19, %v2786_v32  ;;  %v2789_v11 = vpop.f32.mrf.mxu1  ;;  %3528 = vmatmul.f32.gmra.mxu0 %v7285_v51 }
 0x699   : > { %v3013_v62 = vadd.f32 %v3012_v61, %v2900_v47 }
 0x69a   : > { %3192 = vmatmul.f32.gmra.mxu1 %v7311_v46 }
 0x69b   : > { %4216 = vst [vmem:[%s8889_s3 + $0x4e8] sm:$0xff] %v3013_v62  ;;  %3305 = vmatmul.f32.gmra.mxu2 %v7317_v26  ;;  %3418 = vmatmul.f32.gmra.mxu3 %v7302_v44  ;;  %v1419_v44 = vld [vmem:[#allocation3 + $0x228] sm:$0xff] }
 0x69c   : > { %v8007_v14 = vpop.f32.mrf.mxu0  ;;  %v1531_v26 = vld [vmem:[#allocation3 + $0x5a8] sm:$0xff]  ;;  %3726 = vmatpush.msrb.mxu2 %v1419_v44 }
 0x69d   : > { %3839 = vmatpush.msrb.mxu3 %v1531_v26 }
 0x69e   : > { %v2902_v45 = vpop.f32.mrf.mxu2  ;;  %v3015_v53 = vpop.f32.mrf.mxu3 }
 0x69f   : > { %v2903_v51 = vadd.f32 %v2902_v45, %v2789_v11  ;;  %v2792_v42 = vpop.f32.mrf.mxu1  ;;  %3531 = vmatmul.f32.gmra.mxu0 %v7311_v46 }
 0x6a1   : > { %v3016_v40 = vadd.f32 %v3015_v53, %v2903_v51 }
 0x6a2   : > { %3195 = vmatmul.f32.gmra.mxu1 %v7337_v1 }
 0x6a3   : > { %4223 = vst [vmem:[%s8889_s3 + $0x520] sm:$0xff] %v3016_v40  ;;  %3308 = vmatmul.f32.gmra.mxu2 %v7343_v17  ;;  %3421 = vmatmul.f32.gmra.mxu3 %v7328_v41  ;;  %v1642_v41 = vld [vmem:[#allocation3 + $0x920] sm:$0xff]  ;;  %v1643_v17 = vld [vmem:[#allocation3 + $0x928] sm:$0xff] }
 0x6a4   : > { %v8016_v63 = vpop.f32.mrf.mxu0  ;;  %3613 = vmatpush.msrb.mxu1 %v1642_v41  ;;  %3952 = vmatpush.msrb.mxu0 %v1643_v17 }
 0x6a6   : > { %v2905_v32 = vpop.f32.mrf.mxu2  ;;  %v3018_v5 = vpop.f32.mrf.mxu3 }
 0x6a7   : > { %v2906_v46 = vadd.f32 %v2905_v32, %v2792_v42  ;;  %v2795_v23 = vpop.f32.mrf.mxu1  ;;  %3534 = vmatmul.f32.gmra.mxu0 %v7337_v1 }
 0x6a9   : > { %v3019_v13 = vadd.f32 %v3018_v5, %v2906_v46 }
 0x6aa   : > { %3198 = vmatmul.f32.gmra.mxu1 %v7363_v59 }
 0x6ab   : > { %4230 = vst [vmem:[%s8889_s3 + $0x558] sm:$0xff] %v3019_v13  ;;  %3311 = vmatmul.f32.gmra.mxu2 %v7369_v2  ;;  %3424 = vmatmul.f32.gmra.mxu3 %v7354_v30  ;;  %v1412_v30 = vld [vmem:[#allocation3 + $0x1f0] sm:$0xff] }
 0x6ac   : > { %v8025_v19 = vpop.f32.mrf.mxu0  ;;  %v1524_v2 = vld [vmem:[#allocation3 + $0x570] sm:$0xff]  ;;  %3727 = vmatpush.msrb.mxu2 %v1412_v30 }
 0x6ad   : > { %3840 = vmatpush.msrb.mxu3 %v1524_v2 }
 0x6ae   : > { %v2908_v61 = vpop.f32.mrf.mxu2  ;;  %v3021_v47 = vpop.f32.mrf.mxu3 }
 0x6af   : > { %v2909_v1 = vadd.f32 %v2908_v61, %v2795_v23  ;;  %v2798_v11 = vpop.f32.mrf.mxu1  ;;  %3537 = vmatmul.f32.gmra.mxu0 %v7363_v59 }
 0x6b1   : > { %v3022_v62 = vadd.f32 %v3021_v47, %v2909_v1 }
 0x6b2   : > { %3201 = vmatmul.f32.gmra.mxu1 %v7389_v25 }
 0x6b3   : > { %4237 = vst [vmem:[%s8889_s3 + $0x590] sm:$0xff] %v3022_v62  ;;  %3314 = vmatmul.f32.gmra.mxu2 %v7395_v33  ;;  %3427 = vmatmul.f32.gmra.mxu3 %v7380_v58  ;;  %v1635_v58 = vld [vmem:[#allocation3 + $0x8e8] sm:$0xff]  ;;  %v1636_v33 = vld [vmem:[#allocation3 + $0x8f0] sm:$0xff] }
 0x6b4   : > { %v8034_v54 = vpop.f32.mrf.mxu0  ;;  %3614 = vmatpush.msrb.mxu1 %v1635_v58  ;;  %3953 = vmatpush.msrb.mxu0 %v1636_v33 }
 0x6b6   : > { %v2911_v38 = vpop.f32.mrf.mxu2  ;;  %v3024_v45 = vpop.f32.mrf.mxu3 }
 0x6b7   : > { %v2912_v59 = vadd.f32 %v2911_v38, %v2798_v11  ;;  %v2801_v53 = vpop.f32.mrf.mxu1  ;;  %3540 = vmatmul.f32.gmra.mxu0 %v7389_v25 }
 0x6b9   : > { %v3025_v51 = vadd.f32 %v3024_v45, %v2912_v59 }
 0x6ba   : > { %3204 = vmatmul.f32.gmra.mxu1 %v7415_v57 }
 0x6bb   : > { %4244 = vst [vmem:[%s8889_s3 + $0x5c8] sm:$0xff] %v3025_v51  ;;  %3317 = vmatmul.f32.gmra.mxu2 %v7421_v24  ;;  %3430 = vmatmul.f32.gmra.mxu3 %v7406_v8  ;;  %v1405_v8 = vld [vmem:[#allocation3 + $0x1b8] sm:$0xff] }
 0x6bc   : > { %v8043_v42 = vpop.f32.mrf.mxu0  ;;  %v1517_v24 = vld [vmem:[#allocation3 + $0x538] sm:$0xff]  ;;  %3728 = vmatpush.msrb.mxu2 %v1405_v8 }
 0x6bd   : > { %3841 = vmatpush.msrb.mxu3 %v1517_v24 }
 0x6be   : > { %v2914_v40 = vpop.f32.mrf.mxu2  ;;  %v3027_v44 = vpop.f32.mrf.mxu3 }
 0x6bf   : > { %v2915_v25 = vadd.f32 %v2914_v40, %v2801_v53  ;;  %v2804_v26 = vpop.f32.mrf.mxu1  ;;  %3543 = vmatmul.f32.gmra.mxu0 %v7415_v57 }
 0x6c1   : > { %v3028_v32 = vadd.f32 %v3027_v44, %v2915_v25  ;;  %v9007_v44 = vld [vmem:[#allocation5_spill] sm:$0xff] }
 0x6c2   : > { %3207 = vmatmul.f32.gmra.mxu1 %v7441_v3 }
 0x6c3   : > { %4251 = vst [vmem:[%s8889_s3 + $0x600] sm:$0xff] %v3028_v32  ;;  %3320 = vmatmul.f32.gmra.mxu2 %v7447_v34  ;;  %3433 = vmatmul.f32.gmra.mxu3 %v7432_v37  ;;  %v1628_v37 = vld [vmem:[#allocation3 + $0x8b0] sm:$0xff]  ;;  %v1629_v34 = vld [vmem:[#allocation3 + $0x8b8] sm:$0xff] }
 0x6c4   : > { %v8052_v5 = vpop.f32.mrf.mxu0  ;;  %3615 = vmatpush.msrb.mxu1 %v1628_v37  ;;  %3954 = vmatpush.msrb.mxu0 %v1629_v34 }
 0x6c6   : > { %v2917_v46 = vpop.f32.mrf.mxu2  ;;  %v3030_v23 = vpop.f32.mrf.mxu3 }
 0x6c7   : > { %v2918_v57 = vadd.f32 %v2917_v46, %v2804_v26  ;;  %v2807_v13 = vpop.f32.mrf.mxu1  ;;  %3546 = vmatmul.f32.gmra.mxu0 %v7441_v3  ;;  %v9010_v46 = vld [vmem:[#allocation6_spill] sm:$0xff] }
 0x6c9   : > { %v3031_v41 = vadd.f32 %v3030_v23, %v2918_v57  ;;  %v1614_v23 = vld [vmem:[#allocation3 + $0x840] sm:$0xff]  ;;  %v1615_v57 = vld [vmem:[#allocation3 + $0x848] sm:$0xff] }
 0x6ca   : > { %3210 = vmatmul.f32.gmra.mxu1 %v7467_v18 }
 0x6cb   : > { %4258 = vst [vmem:[%s8889_s3 + $0x638] sm:$0xff] %v3031_v41  ;;  %3323 = vmatmul.f32.gmra.mxu2 %v7473_v7  ;;  %3436 = vmatmul.f32.gmra.mxu3 %v7458_v43  ;;  %v1398_v43 = vld [vmem:[#allocation3 + $0x180] sm:$0xff] }
 0x6cc   : > { %v8061_v17 = vpop.f32.mrf.mxu0  ;;  %v1510_v7 = vld [vmem:[#allocation3 + $0x500] sm:$0xff]  ;;  %3729 = vmatpush.msrb.mxu2 %v1398_v43  ;;  %v9014_v43 = vld [vmem:[#allocation10_spill] sm:$0xff] }
 0x6cd   : > { %3842 = vmatpush.msrb.mxu3 %v1510_v7  ;;  %v9011_v41 = vld [vmem:[#allocation9_spill] sm:$0xff]  ;;  %v1384_v7 = vld [vmem:[#allocation3 + $0x110] sm:$0xff] }
 0x6ce   : > { %v2920_v61 = vpop.f32.mrf.mxu2  ;;  %v3033_v47 = vpop.f32.mrf.mxu3 }
 0x6cf   : > { %v2921_v3 = vadd.f32 %v2920_v61, %v2807_v13  ;;  %v2810_v1 = vpop.f32.mrf.mxu1  ;;  %3549 = vmatmul.f32.gmra.mxu0 %v7467_v18 }
 0x6d1   : > { %v3034_v11 = vadd.f32 %v3033_v47, %v2921_v3 }
 0x6d2   : > { %3213 = vmatmul.f32.gmra.mxu1 %v7493_v35 }
 0x6d3   : > { %4265 = vst [vmem:[%s8889_s3 + $0x670] sm:$0xff] %v3034_v11  ;;  %3326 = vmatmul.f32.gmra.mxu2 %v7499_v0  ;;  %3439 = vmatmul.f32.gmra.mxu3 %v7484_v10  ;;  %v1621_v10 = vld [vmem:[#allocation3 + $0x878] sm:$0xff]  ;;  %v1622_v0 = vld [vmem:[#allocation3 + $0x880] sm:$0xff] }
 0x6d4   : > { %v8070_v62 = vpop.f32.mrf.mxu0  ;;  %3616 = vmatpush.msrb.mxu1 %v1621_v10  ;;  %3955 = vmatpush.msrb.mxu0 %v1622_v0  ;;  %v9013_v11 = vld [vmem:[#allocation12_spill] sm:$0xff] }
 0x6d6   : > { %v2923_v30 = vpop.f32.mrf.mxu2  ;;  %v3036_v2 = vpop.f32.mrf.mxu3  ;;  %3617 = vmatpush.msrb.mxu1 %v1614_v23  ;;  %3956 = vmatpush.msrb.mxu0 %v1615_v57  ;;  %v9022_v23 = vld [vmem:[#allocation18_spill] sm:$0xff]  ;;  %v1377_v57 = vld [vmem:[#allocation3 + $0xd8] sm:$0xff] }
 0x6d7   : > { %v2924_v18 = vadd.f32 %v2923_v30, %v2810_v1  ;;  %v2813_v38 = vpop.f32.mrf.mxu1  ;;  %3552 = vmatmul.f32.gmra.mxu0 %v7493_v35  ;;  %v9012_v1 = vld [vmem:[#allocation11_spill] sm:$0xff] }
 0x6d8   : > { %v1496_v30 = vld [vmem:[#allocation3 + $0x490] sm:$0xff] }
 0x6d9   : > { %v3037_v45 = vadd.f32 %v3036_v2, %v2924_v18  ;;  %v9015_v18 = vld [vmem:[#allocation13_spill] sm:$0xff] }
 0x6da   : > { %3216 = vmatmul.f32.gmra.mxu1 %v7519_v52 }
 0x6db   : > { %4272 = vst [vmem:[%s8889_s3 + $0x6a8] sm:$0xff] %v3037_v45  ;;  %3329 = vmatmul.f32.gmra.mxu2 %v7525_v4  ;;  %3442 = vmatmul.f32.gmra.mxu3 %v7510_v36  ;;  %v1391_v36 = vld [vmem:[#allocation3 + $0x148] sm:$0xff] }
 0x6dc   : > { %v8079_v59 = vpop.f32.mrf.mxu0  ;;  %v1503_v4 = vld [vmem:[#allocation3 + $0x4c8] sm:$0xff]  ;;  %3730 = vmatpush.msrb.mxu2 %v1391_v36 }
 0x6dd   : > { %3843 = vmatpush.msrb.mxu3 %v1503_v4  ;;  %v1607_v36 = vld [vmem:[#allocation3 + $0x808] sm:$0xff]  ;;  %v1608_v4 = vld [vmem:[#allocation3 + $0x810] sm:$0xff] }
 0x6de   : > { %v2926_v53 = vpop.f32.mrf.mxu2  ;;  %v3039_v51 = vpop.f32.mrf.mxu3  ;;  %3731 = vmatpush.msrb.mxu2 %v1384_v7  ;;  %3618 = vmatpush.msrb.mxu1 %v1607_v36  ;;  %v9025_v7 = vld [vmem:[#allocation24_spill] sm:$0xff]  ;;  %v9028_v36 = vld [vmem:[#allocation27_spill] sm:$0xff] }
 0x6df   : > { %v2927_v35 = vadd.f32 %v2926_v53, %v2813_v38  ;;  %v3172_v58 = vpop.f32.mrf.mxu1  ;;  %3555 = vmatmul.f32.gmra.mxu0 %v7519_v52  ;;  %3844 = vmatpush.msrb.mxu3 %v1496_v30  ;;  %v9026_v30 = vld [vmem:[#allocation22_spill] sm:$0xff] }
 0x6e0   : > { %v3173_v25 = vadd.f32 %v3172_v58, %v9007_v44  ;;  %v9017_v58 = vld [vmem:[#allocation16_spill] sm:$0xff]  ;;  %3957 = vmatpush.msrb.mxu0 %v1608_v4  ;;  %v9019_v44 = vld [vmem:[#allocation17_spill] sm:$0xff]  ;;  %3732 = vmatpush.msrb.mxu2 %v1377_v57 }
 0x6e1   : > { %v3040_v33 = vadd.f32 %v3039_v51, %v2927_v35  ;;  %v9016_v35 = vld [vmem:[#allocation15_spill] sm:$0xff]  ;;  %v9029_v4 = vld [vmem:[#allocation28_spill] sm:$0xff] }
 0x6e2   : > { %3219 = vmatmul.f32.gmra.mxu1 %v7541_v15 }
 0x6e3   : > { %4279 = vst [vmem:[%s8889_s3 + $0x6e0] sm:$0xff] %v3040_v33  ;;  %3332 = vmatmul.f32.gmra.mxu2 %v7547_v20  ;;  %3445 = vmatmul.f32.gmra.mxu3 %v7532_v56  ;;  %v9008_v56 = vld [vmem:[#allocation7_spill] sm:$0xff]  ;;  %v9009_v20 = vld [vmem:[#allocation8_spill] sm:$0xff]  ;;  %v9018_v33 = vld [vmem:[#allocation14_spill] sm:$0xff] }
 0x6e4   : > { %v3511_v40 = vpop.f32.mrf.mxu0 }
 0x6e6   : > { %v3285_v26 = vpop.f32.mrf.mxu2  ;;  %v3398_v52 = vpop.f32.mrf.mxu3 }
 0x6e7   : > { %v3286_v32 = vadd.f32 %v3285_v26, %v3173_v25  ;;  %v8089_v8 = vadd.f32 %v3511_v40, %v3398_v52  ;;  %v3175_v24 = vpop.f32.mrf.mxu1  ;;  %3558 = vmatmul.f32.gmra.mxu0 %v7541_v15 }
 0x6e8   : > { %v3176_v37 = vadd.f32 %v3175_v24, %v9011_v41 }
 0x6e9   : > { %4063 = vst [vmem:[%s8889_s3 + $0x20] sm:$0xff] %v3286_v32 }
 0x6ea   : > { %3222 = vmatmul.f32.gmra.mxu1 %v9008_v56 }
 0x6eb   : > { %3335 = vmatmul.f32.gmra.mxu2 %v9009_v20  ;;  %3448 = vmatmul.f32.gmra.mxu3 %v9010_v46  ;;  %v9020_v20 = vld [vmem:[#allocation19_spill] sm:$0xff]  ;;  %v9021_v46 = vld [vmem:[#allocation20_spill] sm:$0xff] }
 0x6ec   : > { %v3514_v13 = vpop.f32.mrf.mxu0 }
 0x6ee   : > { %v3288_v34 = vpop.f32.mrf.mxu2  ;;  %v3401_v61 = vpop.f32.mrf.mxu3 }
 0x6ef   : > { %v3289_v15 = vadd.f32 %v3288_v34, %v3176_v37  ;;  %v8099_v47 = vadd.f32 %v3514_v13, %v3401_v61  ;;  %v3178_v3 = vpop.f32.mrf.mxu1  ;;  %3561 = vmatmul.f32.gmra.mxu0 %v9008_v56  ;;  %v1489_v13 = vld [vmem:[#allocation3 + $0x458] sm:$0xff]  ;;  %v9023_v37 = vld [vmem:[#allocation21_spill] sm:$0xff] }
 0x6f0   : > { %v3179_v38 = vadd.f32 %v3178_v3, %v9015_v18  ;;  %3845 = vmatpush.msrb.mxu3 %v1489_v13  ;;  %v1601_v18 = vld [vmem:[#allocation3 + $0x7d8] sm:$0xff]  ;;  %v9032_v13 = vld [vmem:[#allocation31_spill] sm:$0xff] }
 0x6f1   : > { %4070 = vst [vmem:[%s8889_s3 + $0x58] sm:$0xff] %v3289_v15  ;;  %3958 = vmatpush.msrb.mxu0 %v1601_v18 }
 0x6f2   : > { %3225 = vmatmul.f32.gmra.mxu1 %v9012_v1 }
 0x6f3   : > { %3338 = vmatmul.f32.gmra.mxu2 %v9013_v11  ;;  %3451 = vmatmul.f32.gmra.mxu3 %v9014_v43  ;;  %v9024_v43 = vld [vmem:[#allocation23_spill] sm:$0xff] }
 0x6f4   : > { %v3517_v2 = vpop.f32.mrf.mxu0 }
 0x6f6   : > { %v3291_v45 = vpop.f32.mrf.mxu2  ;;  %v3404_v10 = vpop.f32.mrf.mxu3 }
 0x6f7   : > { %v3292_v0 = vadd.f32 %v3291_v45, %v3179_v38  ;;  %v8109_v53 = vadd.f32 %v3517_v2, %v3404_v10  ;;  %v3181_v51 = vpop.f32.mrf.mxu1  ;;  %3564 = vmatmul.f32.gmra.mxu0 %v9012_v1  ;;  %v1600_v2 = vld [vmem:[#allocation3 + $0x7d0] sm:$0xff]  ;;  %v9027_v45 = vld [vmem:[#allocation25_spill] sm:$0xff] }
 0x6f8   : > { %v3182_v25 = vadd.f32 %v3181_v51, %v9019_v44  ;;  %3619 = vmatpush.msrb.mxu1 %v1600_v2  ;;  %v1370_v44 = vld [vmem:[#allocation3 + $0xa0] sm:$0xff] }
 0x6f9   : > { %4077 = vst [vmem:[%s8889_s3 + $0x90] sm:$0xff] %v3292_v0  ;;  %3733 = vmatpush.msrb.mxu2 %v1370_v44 }
 0x6fa   : > { %3228 = vmatmul.f32.gmra.mxu1 %v9016_v35 }
 0x6fb   : > { %3341 = vmatmul.f32.gmra.mxu2 %v9017_v58  ;;  %3454 = vmatmul.f32.gmra.mxu3 %v9018_v33 }
 0x6fc   : > { %v3520_v40 = vpop.f32.mrf.mxu0 }
 0x6fe   : > { %v3294_v26 = vpop.f32.mrf.mxu2  ;;  %v3407_v52 = vpop.f32.mrf.mxu3 }
 0x6ff   : > { %v3295_v32 = vadd.f32 %v3294_v26, %v3182_v25  ;;  %v8119_v24 = vadd.f32 %v3520_v40, %v3407_v52  ;;  %v3184_v56 = vpop.f32.mrf.mxu1  ;;  %3567 = vmatmul.f32.gmra.mxu0 %v9016_v35  ;;  %v9030_v40 = vld [vmem:[#allocation26_spill] sm:$0xff]  ;;  %v1482_v25 = vld [vmem:[#allocation3 + $0x420] sm:$0xff] }
 0x700   : > { %v3185_v34 = vadd.f32 %v3184_v56, %v9023_v37  ;;  %3846 = vmatpush.msrb.mxu3 %v1482_v25  ;;  %v9031_v52 = vld [vmem:[#allocation29_spill] sm:$0xff]  ;;  %v9034_v37 = vld [vmem:[#allocation30_spill] sm:$0xff] }
 0x701   : > { %4084 = vst [vmem:[%s8889_s3 + $0xc8] sm:$0xff] %v3295_v32 }
 0x702   : > { %3231 = vmatmul.f32.gmra.mxu1 %v9020_v20 }
 0x703   : > { %3344 = vmatmul.f32.gmra.mxu2 %v9021_v46  ;;  %3457 = vmatmul.f32.gmra.mxu3 %v9022_v23 }
 0x704   : > { %v3523_v41 = vpop.f32.mrf.mxu0 }
 0x706   : > { %v3297_v61 = vpop.f32.mrf.mxu2  ;;  %v3410_v15 = vpop.f32.mrf.mxu3 }
 0x707   : > { %v3298_v3 = vadd.f32 %v3297_v61, %v3185_v34  ;;  %v8129_v1 = vadd.f32 %v3523_v41, %v3410_v15  ;;  %v3187_v11 = vpop.f32.mrf.mxu1  ;;  %3570 = vmatmul.f32.gmra.mxu0 %v9020_v20  ;;  %v9033_v41 = vld [vmem:[#allocation32_spill] sm:$0xff]  ;;  %v1594_v61 = vld [vmem:[#allocation3 + $0x7a0] sm:$0xff] }
 0x708   : > { %v3188_v10 = vadd.f32 %v3187_v11, %v9027_v45  ;;  %v1593_v34 = vld [vmem:[#allocation3 + $0x798] sm:$0xff]  ;;  %3959 = vmatpush.msrb.mxu0 %v1594_v61 }
 0x709   : > { %4091 = vst [vmem:[%s8889_s3 + $0x100] sm:$0xff] %v3298_v3  ;;  %3620 = vmatpush.msrb.mxu1 %v1593_v34  ;;  %v9035_v3 = vld [vmem:[#allocation33_spill] sm:$0xff]  ;;  %v9037_v45 = vld [vmem:[#allocation36_spill] sm:$0xff] }
 0x70a   : > { %3234 = vmatmul.f32.gmra.mxu1 %v9024_v43 }
 0x70b   : > { %3347 = vmatmul.f32.gmra.mxu2 %v9025_v7  ;;  %3460 = vmatmul.f32.gmra.mxu3 %v9026_v30 }
 0x70c   : > { %v3526_v38 = vpop.f32.mrf.mxu0 }
 0x70e   : > { %v3300_v0 = vpop.f32.mrf.mxu2  ;;  %v3413_v51 = vpop.f32.mrf.mxu3 }
 0x70f   : > { %v3301_v35 = vadd.f32 %v3300_v0, %v3188_v10  ;;  %v8139_v58 = vadd.f32 %v3526_v38, %v3413_v51  ;;  %v3190_v33 = vpop.f32.mrf.mxu1  ;;  %3573 = vmatmul.f32.gmra.mxu0 %v9024_v43  ;;  %v9036_v38 = vld [vmem:[#allocation35_spill] sm:$0xff]  ;;  %v9038_v10 = vld [vmem:[#allocation34_spill] sm:$0xff] }
 0x710   : > { %v3191_v32 = vadd.f32 %v3190_v33, %v9031_v52  ;;  %v1363_v0 = vld [vmem:[#allocation3 + $0x68] sm:$0xff]  ;;  %v9039_v33 = vld [vmem:[#allocation37_spill] sm:$0xff]  ;;  %v9040_v52 = vld [vmem:[#allocation39_spill] sm:$0xff] }
 0x711   : > { %4098 = vst [vmem:[%s8889_s3 + $0x138] sm:$0xff] %v3301_v35  ;;  %v1475_v51 = vld [vmem:[#allocation3 + $0x3e8] sm:$0xff]  ;;  %3734 = vmatpush.msrb.mxu2 %v1363_v0 }
 0x712   : > { %3237 = vmatmul.f32.gmra.mxu1 %v9028_v36  ;;  %3847 = vmatpush.msrb.mxu3 %v1475_v51 }
 0x713   : > { %3350 = vmatmul.f32.gmra.mxu2 %v9029_v4  ;;  %3463 = vmatmul.f32.gmra.mxu3 %v9030_v40 }
 0x714   : > { %v3529_v26 = vpop.f32.mrf.mxu0 }
 0x716   : > { %v3303_v56 = vpop.f32.mrf.mxu2  ;;  %v3416_v20 = vpop.f32.mrf.mxu3 }
 0x717   : > { %v3304_v46 = vadd.f32 %v3303_v56, %v3191_v32  ;;  %v8149_v23 = vadd.f32 %v3529_v26, %v3416_v20  ;;  %v3193_v57 = vpop.f32.mrf.mxu1  ;;  %3576 = vmatmul.f32.gmra.mxu0 %v9028_v36  ;;  %v9041_v32 = vld [vmem:[#allocation40_spill] sm:$0xff]  ;;  %v9042_v56 = vld [vmem:[#allocation38_spill] sm:$0xff]  ;;  %v1586_v20 = vld [vmem:[#allocation3 + $0x760] sm:$0xff] }
 0x718   : > { %v3194_v11 = vadd.f32 %v3193_v57, %v9035_v3  ;;  %3621 = vmatpush.msrb.mxu1 %v1586_v20 }
 0x719   : > { %4105 = vst [vmem:[%s8889_s3 + $0x170] sm:$0xff] %v3304_v46  ;;  %v1587_v46 = vld [vmem:[#allocation3 + $0x768] sm:$0xff] }
 0x71a   : > { %3240 = vmatmul.f32.gmra.mxu1 %v9032_v13  ;;  %3960 = vmatpush.msrb.mxu0 %v1587_v46 }
 0x71b   : > { %3353 = vmatmul.f32.gmra.mxu2 %v9033_v41  ;;  %3466 = vmatmul.f32.gmra.mxu3 %v9034_v37 }
 0x71c   : > { %v3532_v15 = vpop.f32.mrf.mxu0 }
 0x71e   : > { %v3306_v43 = vpop.f32.mrf.mxu2  ;;  %v3419_v7 = vpop.f32.mrf.mxu3 }
 0x71f   : > { %v3307_v30 = vadd.f32 %v3306_v43, %v3194_v11  ;;  %v8159_v2 = vadd.f32 %v3532_v15, %v3419_v7  ;;  %v3196_v18 = vpop.f32.mrf.mxu1  ;;  %3579 = vmatmul.f32.gmra.mxu0 %v9032_v13  ;;  %v9043_v13 = vld [vmem:[#allocation41_spill] sm:$0xff]  ;;  %v9044_v11 = vld [vmem:[#allocation43_spill] sm:$0xff]  ;;  %v9045_v43 = vld [vmem:[#allocation44_spill] sm:$0xff] }
 0x720   : > { %v3197_v36 = vadd.f32 %v3196_v18, %v9039_v33  ;;  %v9046_v7 = vld [vmem:[#allocation42_spill] sm:$0xff]  ;;  %v1468_v18 = vld [vmem:[#allocation3 + $0x3b0] sm:$0xff] }
 0x721   : > { %4112 = vst [vmem:[%s8889_s3 + $0x1a8] sm:$0xff] %v3307_v30  ;;  %v1356_v30 = vld [vmem:[#allocation3 + $0x30] sm:$0xff]  ;;  %3848 = vmatpush.msrb.mxu3 %v1468_v18 }
 0x722   : > { %3243 = vmatmul.f32.gmra.mxu1 %v9036_v38  ;;  %3735 = vmatpush.msrb.mxu2 %v1356_v30 }
 0x723   : > { %3356 = vmatmul.f32.gmra.mxu2 %v9037_v45  ;;  %3469 = vmatmul.f32.gmra.mxu3 %v9038_v10  ;;  %v9047_v45 = vld [vmem:[#allocation45_spill] sm:$0xff] }
 0x724   : > { %v3535_v35 = vpop.f32.mrf.mxu0 }
 0x726   : > { %v3309_v4 = vpop.f32.mrf.mxu2  ;;  %v3422_v40 = vpop.f32.mrf.mxu3 }
 0x727   : > { %v3310_v44 = vadd.f32 %v3309_v4, %v3197_v36  ;;  %v8169_v25 = vadd.f32 %v3535_v35, %v3422_v40  ;;  %v3199_v26 = vpop.f32.mrf.mxu1  ;;  %3582 = vmatmul.f32.gmra.mxu0 %v9036_v38  ;;  %v9048_v4 = vld [vmem:[#allocation47_spill] sm:$0xff]  ;;  %v9049_v40 = vld [vmem:[#allocation48_spill] sm:$0xff] }
 0x728   : > { %v3200_v41 = vadd.f32 %v3199_v26, %v9043_v13  ;;  %v1579_v26 = vld [vmem:[#allocation3 + $0x728] sm:$0xff] }
 0x729   : > { %4119 = vst [vmem:[%s8889_s3 + $0x1e0] sm:$0xff] %v3310_v44  ;;  %v9050_v44 = vld [vmem:[#allocation46_spill] sm:$0xff]  ;;  %3622 = vmatpush.msrb.mxu1 %v1579_v26 }
 0x72a   : > { %3246 = vmatmul.f32.gmra.mxu1 %v9040_v52 }
 0x72b   : > { %3359 = vmatmul.f32.gmra.mxu2 %v9041_v32  ;;  %3472 = vmatmul.f32.gmra.mxu3 %v9042_v56  ;;  %v9051_v56 = vld [vmem:[#allocation49_spill] sm:$0xff] }
 0x72c   : > { %v3538_v57 = vpop.f32.mrf.mxu0 }
 0x72e   : > { %v3312_v37 = vpop.f32.mrf.mxu2  ;;  %v3425_v34 = vpop.f32.mrf.mxu3 }
 0x72f   : > { %v3313_v61 = vadd.f32 %v3312_v37, %v3200_v41  ;;  %v8179_v15 = vadd.f32 %v3538_v57, %v3425_v34  ;;  %v3202_v3 = vpop.f32.mrf.mxu1  ;;  %3585 = vmatmul.f32.gmra.mxu0 %v9040_v52  ;;  %v1580_v52 = vld [vmem:[#allocation3 + $0x730] sm:$0xff] }
 0x730   : > { %v3203_v10 = vadd.f32 %v3202_v3, %v9047_v45  ;;  %3961 = vmatpush.msrb.mxu0 %v1580_v52  ;;  %v9052_v34 = vld [vmem:[#allocation51_spill] sm:$0xff]  ;;  %v9054_v3 = vld [vmem:[#allocation50_spill] sm:$0xff] }
 0x731   : > { %4126 = vst [vmem:[%s8889_s3 + $0x218] sm:$0xff] %v3313_v61  ;;  %v9053_v61 = vld [vmem:[#allocation52_spill] sm:$0xff] }
 0x732   : > { %3249 = vmatmul.f32.gmra.mxu1 %v9044_v11 }
 0x733   : > { %3362 = vmatmul.f32.gmra.mxu2 %v9045_v43  ;;  %3475 = vmatmul.f32.gmra.mxu3 %v9046_v7  ;;  %v9055_v43 = vld [vmem:[#allocation53_spill] sm:$0xff] }
 0x734   : > { %v3541_v38 = vpop.f32.mrf.mxu0 }
 0x736   : > { %v3315_v0 = vpop.f32.mrf.mxu2  ;;  %v3428_v51 = vpop.f32.mrf.mxu3 }
 0x737   : > { %v3316_v35 = vadd.f32 %v3315_v0, %v3203_v10  ;;  %v8189_v33 = vadd.f32 %v3541_v38, %v3428_v51  ;;  %v3205_v36 = vpop.f32.mrf.mxu1  ;;  %3588 = vmatmul.f32.gmra.mxu0 %v9044_v11  ;;  %v9056_v0 = vld [vmem:[#allocation55_spill] sm:$0xff]  ;;  %v9057_v51 = vld [vmem:[#allocation54_spill] sm:$0xff] }
 0x738   : > { %v3206_v20 = vadd.f32 %v3205_v36, %v9051_v56  ;;  %v9058_v36 = vld [vmem:[#allocation56_spill] sm:$0xff]  ;;  %v9059_v56 = vld [vmem:[#allocation57_spill] sm:$0xff] }
 0x739   : > { %4133 = vst [vmem:[%s8889_s3 + $0x250] sm:$0xff] %v3316_v35 }
 0x73a   : > { %3252 = vmatmul.f32.gmra.mxu1 %v9048_v4 }
 0x73b   : > { %3365 = vmatmul.f32.gmra.mxu2 %v9049_v40  ;;  %3478 = vmatmul.f32.gmra.mxu3 %v9050_v44 }
 0x73c   : > { %v3544_v32 = vpop.f32.mrf.mxu0 }
 0x73e   : > { %v3318_v46 = vpop.f32.mrf.mxu2  ;;  %v3431_v57 = vpop.f32.mrf.mxu3 }
 0x73f   : > { %v3319_v13 = vadd.f32 %v3318_v46, %v3206_v20  ;;  %v8199_v41 = vadd.f32 %v3544_v32, %v3431_v57  ;;  %v3208_v37 = vpop.f32.mrf.mxu1  ;;  %3591 = vmatmul.f32.gmra.mxu0 %v9048_v4  ;;  %v9060_v20 = vld [vmem:[#allocation58_spill] sm:$0xff] }
 0x740   : > { %v3209_v7 = vadd.f32 %v3208_v37, %v9055_v43 }
 0x741   : > { %4140 = vst [vmem:[%s8889_s3 + $0x288] sm:$0xff] %v3319_v13 }
 0x742   : > { %3255 = vmatmul.f32.gmra.mxu1 %v9052_v34 }
 0x743   : > { %3368 = vmatmul.f32.gmra.mxu2 %v9053_v61  ;;  %3481 = vmatmul.f32.gmra.mxu3 %v9054_v3  ;;  %v9061_v3 = vld [vmem:[#allocation59_spill] sm:$0xff] }
 0x744   : > { %v3547_v11 = vpop.f32.mrf.mxu0 }
 0x746   : > { %v3321_v30 = vpop.f32.mrf.mxu2  ;;  %v3434_v18 = vpop.f32.mrf.mxu3 }
 0x747   : > { %v3322_v38 = vadd.f32 %v3321_v30, %v3209_v7  ;;  %v8209_v45 = vadd.f32 %v3547_v11, %v3434_v18  ;;  %v3211_v10 = vpop.f32.mrf.mxu1  ;;  %3594 = vmatmul.f32.gmra.mxu0 %v9052_v34 }
 0x748   : > { %v3212_v4 = vadd.f32 %v3211_v10, %v9058_v36 }
 0x749   : > { %4147 = vst [vmem:[%s8889_s3 + $0x2c0] sm:$0xff] %v3322_v38 }
 0x74a   : > { %3258 = vmatmul.f32.gmra.mxu1 %v9056_v0 }
 0x74b   : > { %3371 = vmatmul.f32.gmra.mxu2 %v7859_v6  ;;  %3484 = vmatmul.f32.gmra.mxu3 %v9057_v51 }
 0x74c   : > { %v3550_v35 = vpop.f32.mrf.mxu0 }
 0x74e   : > { %v3324_v40 = vpop.f32.mrf.mxu2  ;;  %v3437_v44 = vpop.f32.mrf.mxu3 }
 0x74f   : > { %v3325_v26 = vadd.f32 %v3324_v40, %v3212_v4  ;;  %v8219_v52 = vadd.f32 %v3550_v35, %v3437_v44  ;;  %v3214_v32 = vpop.f32.mrf.mxu1  ;;  %3597 = vmatmul.f32.gmra.mxu0 %v9056_v0  ;;  %v9063_v0 = vld [vmem:[#allocation60_spill] sm:$0xff] }
 0x750   : > { %v3215_v46 = vadd.f32 %v3214_v32, %v9060_v20 }
 0x751   : > { %4154 = vst [vmem:[%s8889_s3 + $0x2f8] sm:$0xff] %v3325_v26  ;;  %v4648_v26 = vld [vmem:[%s8887_s1 + $0x18] sm:$0xff] }
 0x752   : > { %3261 = vmatmul.f32.gmra.mxu1 %v9059_v56 }
 0x753   : > { %3374 = vmatmul.f32.gmra.mxu2 %v7883_v12  ;;  %3487 = vmatmul.f32.gmra.mxu3 %v7868_v28  ;;  %v8238_v12 = vld [vmem:[%s8887_s1 + $0x2f0] sm:$0xff] }
 0x754   : > { %v3553_v6 = vpop.f32.mrf.mxu0 }
 0x756   : > { %v3327_v57 = vpop.f32.mrf.mxu2  ;;  %v3440_v13 = vpop.f32.mrf.mxu3 }
 0x757   : > { %v3328_v37 = vadd.f32 %v3327_v57, %v3215_v46  ;;  %v8229_v34 = vadd.f32 %v3553_v6, %v3440_v13  ;;  %v3217_v61 = vpop.f32.mrf.mxu1  ;;  %3600 = vmatmul.f32.gmra.mxu0 %v9059_v56 }
 0x758   : > { %v3218_v11 = vadd.f32 %v3217_v61, %v9061_v3 }
 0x759   : > { %4161 = vst [vmem:[%s8889_s3 + $0x330] sm:$0xff] %v3328_v37  ;;  %v4649_v37 = vld [vmem:[%s8887_s1 + $0x40] sm:$0xff] }
 0x75a   : > { %3264 = vmatmul.f32.gmra.mxu1 %v8238_v12 }
 0x75b   : > { %3377 = vmatmul.f32.gmra.mxu2 %v7897_v60  ;;  %3490 = vmatmul.f32.gmra.mxu3 %v7905_v48  ;;  %v4646_v60 = vld [vmem:[%s8887_s1 + $0x10] sm:$0xff]  ;;  %v9062_v48 = vld [vmem:[#allocation61_spill] sm:$0xff] }
 0x75c   : > { %v3556_v28 = vpop.f32.mrf.mxu0 }
 0x75e   : > { %v3330_v43 = vpop.f32.mrf.mxu2  ;;  %v3443_v7 = vpop.f32.mrf.mxu3 }
 0x75f   : > { %v3331_v30 = vadd.f32 %v3330_v43, %v3218_v11  ;;  %v8244_v18 = vadd.f32 %v3556_v28, %v3443_v7  ;;  %v3220_v38 = vpop.f32.mrf.mxu1  ;;  %3603 = vmatmul.f32.gmra.mxu0 %v8238_v12 }
 0x760   : > { %v3221_v51 = vadd.f32 %v3220_v38, %v9063_v0 }
 0x761   : > { %4168 = vst [vmem:[%s8889_s3 + $0x368] sm:$0xff] %v3331_v30  ;;  %v4651_v30 = vld [vmem:[%s8887_s1 + $0x58] sm:$0xff] }
 0x762   : > { %3623 = vmatmul.f32.vlgmr.msrb.gmra.mxu1 %v4646_v60 }
 0x763   : > { %3736 = vmatmul.f32.vlgmr.msrb.gmra.mxu2 %v7916_v50  ;;  %3849 = vmatmul.f32.vlgmr.msrb.gmra.mxu3 %v9062_v48  ;;  %v4647_v50 = vld [vmem:[%s8887_s1 + $0x28] sm:$0xff] }
 0x764   : > { %v3559_v10 = vpop.f32.mrf.mxu0 }
 0x766   : > { %v3333_v35 = vpop.f32.mrf.mxu2  ;;  %v3446_v36 = vpop.f32.mrf.mxu3 }
 0x767   : > { %v3334_v4 = vadd.f32 %v3333_v35, %v3221_v51  ;;  %v8256_v40 = vadd.f32 %v3559_v10, %v3446_v36  ;;  %v3223_v44 = vpop.f32.mrf.mxu1  ;;  %3962 = vmatmul.f32.vlgmr.msrb.gmra.mxu0 %v4646_v60  ;;  %v4653_v35 = vld [vmem:[%s8887_s1 + $0x70] sm:$0xff] }
 0x768   : > { %v3224_v56 = vadd.f32 %v3223_v44, %v7933_v27  ;;  %v4650_v27 = vld [vmem:[%s8887_s1 + $0x30] sm:$0xff] }
 0x769   : > { %4175 = vst [vmem:[%s8889_s3 + $0x3a0] sm:$0xff] %v3334_v4 }
 0x76a   : > { %3626 = vmatmul.f32.gmra.mxu1 %v4647_v50 }
 0x76b   : > { %3739 = vmatmul.f32.gmra.mxu2 %v4648_v26  ;;  %3852 = vmatmul.f32.gmra.mxu3 %v7938_v49 }
 0x76c   : > { %v3562_v32 = vpop.f32.mrf.mxu0 }
 0x76e   : > { %v3336_v6 = vpop.f32.mrf.mxu2  ;;  %v3449_v20 = vpop.f32.mrf.mxu3 }
 0x76f   : > { %v3337_v46 = vadd.f32 %v3336_v6, %v3224_v56  ;;  %v8269_v57 = vadd.f32 %v3562_v32, %v3449_v20  ;;  %v3226_v13 = vpop.f32.mrf.mxu1  ;;  %3965 = vmatmul.f32.gmra.mxu0 %v4647_v50  ;;  %v4655_v56 = vld [vmem:[%s8887_s1 + $0x88] sm:$0xff] }
 0x770   : > { %v3227_v61 = vadd.f32 %v3226_v13, %v7947_v39  ;;  %v4652_v39 = vld [vmem:[%s8887_s1 + $0x48] sm:$0xff] }
 0x771   : > { %4182 = vst [vmem:[%s8889_s3 + $0x3d8] sm:$0xff] %v3337_v46 }
 0x772   : > { %3629 = vmatmul.f32.gmra.mxu1 %v4649_v37 }
 0x773   : > { %3742 = vmatmul.f32.gmra.mxu2 %v4650_v27  ;;  %3855 = vmatmul.f32.gmra.mxu3 %v7952_v29 }
 0x774   : > { %v3565_v49 = vpop.f32.mrf.mxu0 }
 0x776   : > { %v3339_v28 = vpop.f32.mrf.mxu2  ;;  %v3452_v3 = vpop.f32.mrf.mxu3 }
 0x777   : > { %v3340_v11 = vadd.f32 %v3339_v28, %v3227_v61  ;;  %v8282_v43 = vadd.f32 %v3565_v49, %v3452_v3  ;;  %v3229_v7 = vpop.f32.mrf.mxu1  ;;  %3968 = vmatmul.f32.gmra.mxu0 %v4649_v37  ;;  %v4658_v61 = vld [vmem:[%s8887_s1 + $0xa0] sm:$0xff]  ;;  %v4660_v28 = vld [vmem:[%s8887_s1 + $0x98] sm:$0xff] }
 0x778   : > { %v3230_v38 = vadd.f32 %v3229_v7, %v7961_v9  ;;  %v4654_v9 = vld [vmem:[%s8887_s1 + $0x60] sm:$0xff] }
 0x779   : > { %4189 = vst [vmem:[%s8889_s3 + $0x410] sm:$0xff] %v3340_v11 }
 0x77a   : > { %3632 = vmatmul.f32.gmra.mxu1 %v4651_v30 }
 0x77b   : > { %3745 = vmatmul.f32.gmra.mxu2 %v4652_v39  ;;  %3858 = vmatmul.f32.gmra.mxu3 %v7966_v21 }
 0x77c   : > { %v3568_v29 = vpop.f32.mrf.mxu0 }
 0x77e   : > { %v3342_v60 = vpop.f32.mrf.mxu2  ;;  %v3455_v48 = vpop.f32.mrf.mxu3 }
 0x77f   : > { %v3343_v10 = vadd.f32 %v3342_v60, %v3230_v38  ;;  %v8295_v0 = vadd.f32 %v3568_v29, %v3455_v48  ;;  %v3232_v51 = vpop.f32.mrf.mxu1  ;;  %3971 = vmatmul.f32.gmra.mxu0 %v4651_v30  ;;  %v4661_v60 = vld [vmem:[%s8887_s1 + $0xb8] sm:$0xff]  ;;  %v4663_v48 = vld [vmem:[%s8887_s1 + $0xb0] sm:$0xff] }
 0x780   : > { %v3233_v36 = vadd.f32 %v3232_v51, %v7975_v16  ;;  %v4656_v16 = vld [vmem:[%s8887_s1 + $0x78] sm:$0xff] }
 0x781   : > { %4196 = vst [vmem:[%s8889_s3 + $0x448] sm:$0xff] %v3343_v10 }
 0x782   : > { %3635 = vmatmul.f32.gmra.mxu1 %v4653_v35 }
 0x783   : > { %3748 = vmatmul.f32.gmra.mxu2 %v4654_v9  ;;  %3861 = vmatmul.f32.gmra.mxu3 %v7980_v55  ;;  %v4657_v55 = vld [vmem:[%s8887_s1 + $0x80] sm:$0xff] }
 0x784   : > { %v3571_v21 = vpop.f32.mrf.mxu0 }
 0x786   : > { %v3345_v4 = vpop.f32.mrf.mxu2  ;;  %v3458_v44 = vpop.f32.mrf.mxu3 }
 0x787   : > { %v3346_v50 = vadd.f32 %v3345_v4, %v3233_v36  ;;  %v8308_v26 = vadd.f32 %v3571_v21, %v3458_v44  ;;  %v3235_v32 = vpop.f32.mrf.mxu1  ;;  %3974 = vmatmul.f32.gmra.mxu0 %v4653_v35  ;;  %v4664_v44 = vld [vmem:[%s8887_s1 + $0xd0] sm:$0xff] }
 0x788   : > { %v3236_v20 = vadd.f32 %v3235_v32, %v7989_v22  ;;  %v4659_v22 = vld [vmem:[%s8887_s1 + $0x90] sm:$0xff] }
 0x789   : > { %4203 = vst [vmem:[%s8889_s3 + $0x480] sm:$0xff] %v3346_v50  ;;  %v4666_v50 = vld [vmem:[%s8887_s1 + $0xc8] sm:$0xff] }
 0x78a   : > { %3638 = vmatmul.f32.gmra.mxu1 %v4655_v56 }
 0x78b   : > { %3751 = vmatmul.f32.gmra.mxu2 %v4656_v16  ;;  %3864 = vmatmul.f32.gmra.mxu3 %v4657_v55 }
 0x78c   : > { %v3574_v6 = vpop.f32.mrf.mxu0 }
 0x78e   : > { %v3348_v46 = vpop.f32.mrf.mxu2  ;;  %v3461_v13 = vpop.f32.mrf.mxu3 }
 0x78f   : > { %v3349_v37 = vadd.f32 %v3348_v46, %v3236_v20  ;;  %v8323_v27 = vadd.f32 %v3574_v6, %v3461_v13  ;;  %v3238_v49 = vpop.f32.mrf.mxu1  ;;  %3977 = vmatmul.f32.gmra.mxu0 %v4655_v56  ;;  %v4667_v13 = vld [vmem:[%s8887_s1 + $0xe8] sm:$0xff] }
 0x790   : > { %v3239_v11 = vadd.f32 %v3238_v49, %v7998_v31  ;;  %v4662_v31 = vld [vmem:[%s8887_s1 + $0xa8] sm:$0xff] }
 0x791   : > { %4210 = vst [vmem:[%s8889_s3 + $0x4b8] sm:$0xff] %v3349_v37  ;;  %v4669_v37 = vld [vmem:[%s8887_s1 + $0xe0] sm:$0xff] }
 0x792   : > { %3641 = vmatmul.f32.gmra.mxu1 %v4658_v61 }
 0x793   : > { %3754 = vmatmul.f32.gmra.mxu2 %v4659_v22  ;;  %3867 = vmatmul.f32.gmra.mxu3 %v4660_v28 }
 0x794   : > { %v3577_v3 = vpop.f32.mrf.mxu0 }
 0x796   : > { %v3351_v7 = vpop.f32.mrf.mxu2  ;;  %v3464_v30 = vpop.f32.mrf.mxu3 }
 0x797   : > { %v3352_v39 = vadd.f32 %v3351_v7, %v3239_v11  ;;  %v8338_v29 = vadd.f32 %v3577_v3, %v3464_v30  ;;  %v3241_v38 = vpop.f32.mrf.mxu1  ;;  %3980 = vmatmul.f32.gmra.mxu0 %v4658_v61  ;;  %v4670_v30 = vld [vmem:[%s8887_s1 + $0x100] sm:$0xff] }
 0x798   : > { %v3242_v51 = vadd.f32 %v3241_v38, %v8007_v14  ;;  %v4665_v14 = vld [vmem:[%s8887_s1 + $0xc0] sm:$0xff] }
 0x799   : > { %4217 = vst [vmem:[%s8889_s3 + $0x4f0] sm:$0xff] %v3352_v39  ;;  %v4672_v39 = vld [vmem:[%s8887_s1 + $0xf8] sm:$0xff] }
 0x79a   : > { %3644 = vmatmul.f32.gmra.mxu1 %v4661_v60 }
 0x79b   : > { %3757 = vmatmul.f32.gmra.mxu2 %v4662_v31  ;;  %3870 = vmatmul.f32.gmra.mxu3 %v4663_v48 }
 0x79c   : > { %v3580_v10 = vpop.f32.mrf.mxu0 }
 0x79e   : > { %v3354_v35 = vpop.f32.mrf.mxu2  ;;  %v3467_v9 = vpop.f32.mrf.mxu3 }
 0x79f   : > { %v3355_v21 = vadd.f32 %v3354_v35, %v3242_v51  ;;  %v8353_v36 = vadd.f32 %v3580_v10, %v3467_v9  ;;  %v3244_v4 = vpop.f32.mrf.mxu1  ;;  %3983 = vmatmul.f32.gmra.mxu0 %v4661_v60  ;;  %v4673_v9 = vld [vmem:[%s8887_s1 + $0x118] sm:$0xff] }
 0x7a0   : > { %v3245_v56 = vadd.f32 %v3244_v4, %v8016_v63  ;;  %v4668_v63 = vld [vmem:[%s8887_s1 + $0xd8] sm:$0xff] }
 0x7a1   : > { %4224 = vst [vmem:[%s8889_s3 + $0x528] sm:$0xff] %v3355_v21  ;;  %v4675_v21 = vld [vmem:[%s8887_s1 + $0x110] sm:$0xff] }
 0x7a2   : > { %3647 = vmatmul.f32.gmra.mxu1 %v4664_v44 }
 0x7a3   : > { %3760 = vmatmul.f32.gmra.mxu2 %v4665_v14  ;;  %3873 = vmatmul.f32.gmra.mxu3 %v4666_v50 }
 0x7a4   : > { %v3583_v32 = vpop.f32.mrf.mxu0 }
 0x7a6   : > { %v3357_v16 = vpop.f32.mrf.mxu2  ;;  %v3470_v55 = vpop.f32.mrf.mxu3 }
 0x7a7   : > { %v3358_v6 = vadd.f32 %v3357_v16, %v3245_v56  ;;  %v8368_v20 = vadd.f32 %v3583_v32, %v3470_v55  ;;  %v3247_v46 = vpop.f32.mrf.mxu1  ;;  %3986 = vmatmul.f32.gmra.mxu0 %v4664_v44  ;;  %v4676_v55 = vld [vmem:[%s8887_s1 + $0x130] sm:$0xff] }
 0x7a8   : > { %v3248_v61 = vadd.f32 %v3247_v46, %v8025_v19  ;;  %v4671_v19 = vld [vmem:[%s8887_s1 + $0xf0] sm:$0xff] }
 0x7a9   : > { %4231 = vst [vmem:[%s8889_s3 + $0x560] sm:$0xff] %v3358_v6  ;;  %v4678_v6 = vld [vmem:[%s8887_s1 + $0x128] sm:$0xff] }
 0x7aa   : > { %3650 = vmatmul.f32.gmra.mxu1 %v4667_v13 }
 0x7ab   : > { %3763 = vmatmul.f32.gmra.mxu2 %v4668_v63  ;;  %3876 = vmatmul.f32.gmra.mxu3 %v4669_v37 }
 0x7ac   : > { %v3586_v49 = vpop.f32.mrf.mxu0 }
 0x7ae   : > { %v3360_v22 = vpop.f32.mrf.mxu2  ;;  %v3473_v28 = vpop.f32.mrf.mxu3 }
 0x7af   : > { %v3361_v3 = vadd.f32 %v3360_v22, %v3248_v61  ;;  %v8383_v11 = vadd.f32 %v3586_v49, %v3473_v28  ;;  %v3250_v7 = vpop.f32.mrf.mxu1  ;;  %3989 = vmatmul.f32.gmra.mxu0 %v4667_v13  ;;  %v4679_v28 = vld [vmem:[%s8887_s1 + $0x148] sm:$0xff] }
 0x7b0   : > { %v3251_v60 = vadd.f32 %v3250_v7, %v8034_v54  ;;  %v4674_v54 = vld [vmem:[%s8887_s1 + $0x108] sm:$0xff] }
 0x7b1   : > { %4238 = vst [vmem:[%s8889_s3 + $0x598] sm:$0xff] %v3361_v3  ;;  %v4681_v3 = vld [vmem:[%s8887_s1 + $0x140] sm:$0xff] }
 0x7b2   : > { %3653 = vmatmul.f32.gmra.mxu1 %v4670_v30 }
 0x7b3   : > { %3766 = vmatmul.f32.gmra.mxu2 %v4671_v19  ;;  %3879 = vmatmul.f32.gmra.mxu3 %v4672_v39 }
 0x7b4   : > { %v3589_v38 = vpop.f32.mrf.mxu0 }
 0x7b6   : > { %v3363_v31 = vpop.f32.mrf.mxu2  ;;  %v3476_v48 = vpop.f32.mrf.mxu3 }
 0x7b7   : > { %v3364_v10 = vadd.f32 %v3363_v31, %v3251_v60  ;;  %v8398_v51 = vadd.f32 %v3589_v38, %v3476_v48  ;;  %v3253_v35 = vpop.f32.mrf.mxu1  ;;  %3992 = vmatmul.f32.gmra.mxu0 %v4670_v30  ;;  %v4682_v48 = vld [vmem:[%s8887_s1 + $0x160] sm:$0xff] }
 0x7b8   : > { %v3254_v44 = vadd.f32 %v3253_v35, %v8043_v42  ;;  %v4677_v42 = vld [vmem:[%s8887_s1 + $0x120] sm:$0xff] }
 0x7b9   : > { %4245 = vst [vmem:[%s8889_s3 + $0x5d0] sm:$0xff] %v3364_v10  ;;  %v4684_v10 = vld [vmem:[%s8887_s1 + $0x158] sm:$0xff] }
 0x7ba   : > { %3656 = vmatmul.f32.gmra.mxu1 %v4673_v9 }
 0x7bb   : > { %3769 = vmatmul.f32.gmra.mxu2 %v4674_v54  ;;  %3882 = vmatmul.f32.gmra.mxu3 %v4675_v21 }
 0x7bc   : > { %v3592_v4 = vpop.f32.mrf.mxu0 }
 0x7be   : > { %v3366_v14 = vpop.f32.mrf.mxu2  ;;  %v3479_v50 = vpop.f32.mrf.mxu3 }
 0x7bf   : > { %v3367_v32 = vadd.f32 %v3366_v14, %v3254_v44  ;;  %v8413_v56 = vadd.f32 %v3592_v4, %v3479_v50  ;;  %v3256_v16 = vpop.f32.mrf.mxu1  ;;  %3995 = vmatmul.f32.gmra.mxu0 %v4673_v9  ;;  %v4685_v50 = vld [vmem:[%s8887_s1 + $0x178] sm:$0xff] }
 0x7c0   : > { %v3257_v13 = vadd.f32 %v3256_v16, %v8052_v5  ;;  %v4680_v5 = vld [vmem:[%s8887_s1 + $0x138] sm:$0xff] }
 0x7c1   : > { %4252 = vst [vmem:[%s8889_s3 + $0x608] sm:$0xff] %v3367_v32  ;;  %v4687_v32 = vld [vmem:[%s8887_s1 + $0x170] sm:$0xff] }
 0x7c2   : > { %3659 = vmatmul.f32.gmra.mxu1 %v4676_v55 }
 0x7c3   : > { %3772 = vmatmul.f32.gmra.mxu2 %v4677_v42  ;;  %3885 = vmatmul.f32.gmra.mxu3 %v4678_v6 }
 0x7c4   : > { %v3595_v46 = vpop.f32.mrf.mxu0 }
 0x7c6   : > { %v3369_v63 = vpop.f32.mrf.mxu2  ;;  %v3482_v37 = vpop.f32.mrf.mxu3 }
 0x7c7   : > { %v3370_v49 = vadd.f32 %v3369_v63, %v3257_v13  ;;  %v8428_v61 = vadd.f32 %v3595_v46, %v3482_v37  ;;  %v3259_v22 = vpop.f32.mrf.mxu1  ;;  %3998 = vmatmul.f32.gmra.mxu0 %v4676_v55 }
 0x7c8   : > { %v3260_v30 = vadd.f32 %v3259_v22, %v8061_v17  ;;  %v4683_v17 = vld [vmem:[%s8887_s1 + $0x150] sm:$0xff] }
 0x7c9   : > { %4259 = vst [vmem:[%s8889_s3 + $0x640] sm:$0xff] %v3370_v49  ;;  %v4689_v49 = vld [vmem:[%s8887_s1 + $0x180] sm:$0xff] }
 0x7ca   : > { %3662 = vmatmul.f32.gmra.mxu1 %v4679_v28 }
 0x7cb   : > { %3775 = vmatmul.f32.gmra.mxu2 %v4680_v5  ;;  %3888 = vmatmul.f32.gmra.mxu3 %v4681_v3 }
 0x7cc   : > { %v3598_v7 = vpop.f32.mrf.mxu0 }
 0x7ce   : > { %v3372_v19 = vpop.f32.mrf.mxu2  ;;  %v3485_v39 = vpop.f32.mrf.mxu3 }
 0x7cf   : > { %v3373_v38 = vadd.f32 %v3372_v19, %v3260_v30  ;;  %v8443_v60 = vadd.f32 %v3598_v7, %v3485_v39  ;;  %v3262_v31 = vpop.f32.mrf.mxu1  ;;  %4001 = vmatmul.f32.gmra.mxu0 %v4679_v28  ;;  %v4691_v39 = vld [vmem:[%s8887_s1 + $0x1a8] sm:$0xff] }
 0x7d0   : > { %v3263_v9 = vadd.f32 %v3262_v31, %v8070_v62  ;;  %v4686_v62 = vld [vmem:[%s8887_s1 + $0x168] sm:$0xff] }
 0x7d1   : > { %4266 = vst [vmem:[%s8889_s3 + $0x678] sm:$0xff] %v3373_v38  ;;  %v4692_v38 = vld [vmem:[%s8887_s1 + $0x198] sm:$0xff] }
 0x7d2   : > { %3665 = vmatmul.f32.gmra.mxu1 %v4682_v48 }
 0x7d3   : > { %3778 = vmatmul.f32.gmra.mxu2 %v4683_v17  ;;  %3891 = vmatmul.f32.gmra.mxu3 %v4684_v10 }
 0x7d4   : > { %v3601_v35 = vpop.f32.mrf.mxu0 }
 0x7d6   : > { %v3375_v54 = vpop.f32.mrf.mxu2  ;;  %v3488_v21 = vpop.f32.mrf.mxu3 }
 0x7d7   : > { %v3376_v4 = vadd.f32 %v3375_v54, %v3263_v9  ;;  %v8458_v44 = vadd.f32 %v3601_v35, %v3488_v21  ;;  %v3265_v14 = vpop.f32.mrf.mxu1  ;;  %4004 = vmatmul.f32.gmra.mxu0 %v4682_v48  ;;  %v4694_v21 = vld [vmem:[%s8887_s1 + $0x1c0] sm:$0xff] }
 0x7d8   : > { %v3266_v55 = vadd.f32 %v3265_v14, %v8079_v59  ;;  %v4688_v59 = vld [vmem:[%s8887_s1 + $0x190] sm:$0xff] }
 0x7d9   : > { %4273 = vst [vmem:[%s8889_s3 + $0x6b0] sm:$0xff] %v3376_v4  ;;  %v4695_v4 = vld [vmem:[%s8887_s1 + $0x1b0] sm:$0xff] }
 0x7da   : > { %3668 = vmatmul.f32.gmra.mxu1 %v4685_v50 }
 0x7db   : > { %3781 = vmatmul.f32.gmra.mxu2 %v4686_v62  ;;  %3894 = vmatmul.f32.gmra.mxu3 %v4687_v32 }
 0x7dc   : > { %v3604_v16 = vpop.f32.mrf.mxu0 }
 0x7de   : > { %v3378_v42 = vpop.f32.mrf.mxu2  ;;  %v3491_v6 = vpop.f32.mrf.mxu3 }
 0x7df   : > { %v3379_v46 = vadd.f32 %v3378_v42, %v3266_v55  ;;  %v8473_v13 = vadd.f32 %v3604_v16, %v3491_v6  ;;  %v3624_v63 = vpop.f32.mrf.mxu1  ;;  %4007 = vmatmul.f32.gmra.mxu0 %v4685_v50  ;;  %v4697_v6 = vld [vmem:[%s8887_s1 + $0x1d8] sm:$0xff] }
 0x7e0   : > { %v3625_v37 = vadd.f32 %v3624_v63, %v8089_v8  ;;  %v4690_v8 = vld [vmem:[%s8887_s1 + $0x188] sm:$0xff] }
 0x7e1   : > { %4280 = vst [vmem:[%s8889_s3 + $0x6e8] sm:$0xff] %v3379_v46  ;;  %v4698_v46 = vld [vmem:[%s8887_s1 + $0x1c8] sm:$0xff] }
 0x7e2   : > { %4064 = vst [vmem:[%s8889_s3 + $0x28] sm:$0xff] %v3625_v37  ;;  %3671 = vmatmul.f32.gmra.mxu1 %v4688_v59 }
 0x7e3   : > { %3784 = vmatmul.f32.gmra.mxu2 %v4689_v49  ;;  %3897 = vmatmul.f32.gmra.mxu3 %v4690_v8 }
 0x7e4   : > { %v3963_v22 = vpop.f32.mrf.mxu0 }
 0x7e6   : > { %v3737_v28 = vpop.f32.mrf.mxu2  ;;  %v3850_v5 = vpop.f32.mrf.mxu3 }
 0x7e7   : > { %v3851_v3 = vadd.f32 %v3850_v5, %v3737_v28  ;;  %v3627_v7 = vpop.f32.mrf.mxu1  ;;  %4010 = vmatmul.f32.gmra.mxu0 %v4688_v59  ;;  %v4700_v5 = vld [vmem:[%s8887_s1 + $0x1f0] sm:$0xff] }
 0x7e8   : > { %v3628_v30 = vadd.f32 %v3627_v7, %v8099_v47  ;;  %v4693_v47 = vld [vmem:[%s8887_s1 + $0x1a0] sm:$0xff] }
 0x7e9   : > { %v3964_v19 = vadd.f32 %v3963_v22, %v3851_v3  ;;  %v4701_v3 = vld [vmem:[%s8887_s1 + $0x1e0] sm:$0xff] }
 0x7ea   : > { %4071 = vst [vmem:[%s8889_s3 + $0x60] sm:$0xff] %v3628_v30  ;;  %3674 = vmatmul.f32.gmra.mxu1 %v4691_v39 }
 0x7eb   : > { %4065 = vst.msk [vmem:[%s8889_s3 + $0x30] sm:$0xff] %vm533_vm1, %v3964_v19  ;;  %3787 = vmatmul.f32.gmra.mxu2 %v4692_v38  ;;  %3900 = vmatmul.f32.gmra.mxu3 %v4693_v47 }
 0x7ec   : > { %v3966_v31 = vpop.f32.mrf.mxu0 }
 0x7ee   : > { %v3740_v48 = vpop.f32.mrf.mxu2  ;;  %v3853_v17 = vpop.f32.mrf.mxu3 }
 0x7ef   : > { %v3854_v10 = vadd.f32 %v3853_v17, %v3740_v48  ;;  %v3630_v35 = vpop.f32.mrf.mxu1  ;;  %4013 = vmatmul.f32.gmra.mxu0 %v4691_v39  ;;  %v4703_v48 = vld [vmem:[%s8887_s1 + $0x208] sm:$0xff]  ;;  %v4704_v17 = vld [vmem:[%s8887_s1 + $0x1f8] sm:$0xff] }
 0x7f0   : > { %v3631_v9 = vadd.f32 %v3630_v35, %v8109_v53  ;;  %v4696_v53 = vld [vmem:[%s8887_s1 + $0x1b8] sm:$0xff] }
 0x7f1   : > { %v3967_v54 = vadd.f32 %v3966_v31, %v3854_v10 }
 0x7f2   : > { %4078 = vst [vmem:[%s8889_s3 + $0x98] sm:$0xff] %v3631_v9  ;;  %3677 = vmatmul.f32.gmra.mxu1 %v4694_v21 }
 0x7f3   : > { %4072 = vst.msk [vmem:[%s8889_s3 + $0x68] sm:$0xff] %vm533_vm1, %v3967_v54  ;;  %3790 = vmatmul.f32.gmra.mxu2 %v4695_v4  ;;  %3903 = vmatmul.f32.gmra.mxu3 %v4696_v53 }
 0x7f4   : > { %v3969_v14 = vpop.f32.mrf.mxu0 }
 0x7f6   : > { %v3743_v50 = vpop.f32.mrf.mxu2  ;;  %v3856_v62 = vpop.f32.mrf.mxu3 }
 0x7f7   : > { %v3857_v32 = vadd.f32 %v3856_v62, %v3743_v50  ;;  %v3633_v16 = vpop.f32.mrf.mxu1  ;;  %4016 = vmatmul.f32.gmra.mxu0 %v4694_v21  ;;  %v4707_v50 = vld [vmem:[%s8887_s1 + $0x210] sm:$0xff] }
 0x7f8   : > { %v3634_v55 = vadd.f32 %v3633_v16, %v8119_v24  ;;  %v4699_v24 = vld [vmem:[%s8887_s1 + $0x1d0] sm:$0xff] }
 0x7f9   : > { %v3970_v42 = vadd.f32 %v3969_v14, %v3857_v32  ;;  %v4706_v14 = vld [vmem:[%s8887_s1 + $0x220] sm:$0xff] }
 0x7fa   : > { %4085 = vst [vmem:[%s8889_s3 + $0xd0] sm:$0xff] %v3634_v55  ;;  %3680 = vmatmul.f32.gmra.mxu1 %v4697_v6 }
 0x7fb   : > { %4079 = vst.msk [vmem:[%s8889_s3 + $0xa0] sm:$0xff] %vm533_vm1, %v3970_v42  ;;  %3793 = vmatmul.f32.gmra.mxu2 %v4698_v46  ;;  %3906 = vmatmul.f32.gmra.mxu3 %v4699_v24  ;;  %v4709_v24 = vld [vmem:[%s8887_s1 + $0x238] sm:$0xff] }
 0x7fc   : > { %v3972_v63 = vpop.f32.mrf.mxu0 }
 0x7fe   : > { %v3746_v37 = vpop.f32.mrf.mxu2  ;;  %v3859_v59 = vpop.f32.mrf.mxu3 }
 0x7ff   : > { %v3860_v49 = vadd.f32 %v3859_v59, %v3746_v37  ;;  %v3636_v8 = vpop.f32.mrf.mxu1  ;;  %4019 = vmatmul.f32.gmra.mxu0 %v4697_v6 }
 0x800   : > { %v3637_v22 = vadd.f32 %v3636_v8, %v8129_v1  ;;  %v4702_v1 = vld [vmem:[%s8887_s1 + $0x1e8] sm:$0xff] }
 0x801   : > { %v3973_v28 = vadd.f32 %v3972_v63, %v3860_v49  ;;  %v4710_v63 = vld [vmem:[%s8887_s1 + $0x228] sm:$0xff] }
 0x802   : > { %4092 = vst [vmem:[%s8889_s3 + $0x108] sm:$0xff] %v3637_v22  ;;  %3683 = vmatmul.f32.gmra.mxu1 %v4700_v5 }
 0x803   : > { %4086 = vst.msk [vmem:[%s8889_s3 + $0xd8] sm:$0xff] %vm533_vm1, %v3973_v28  ;;  %3796 = vmatmul.f32.gmra.mxu2 %v4701_v3  ;;  %3909 = vmatmul.f32.gmra.mxu3 %v4702_v1  ;;  %v4712_v3 = vld [vmem:[%s8887_s1 + $0x250] sm:$0xff]  ;;  %v4713_v1 = vld [vmem:[%s8887_s1 + $0x240] sm:$0xff] }
 0x804   : > { %v3975_v7 = vpop.f32.mrf.mxu0 }
 0x806   : > { %v3749_v30 = vpop.f32.mrf.mxu2  ;;  %v3862_v19 = vpop.f32.mrf.mxu3 }
 0x807   : > { %v3863_v39 = vadd.f32 %v3862_v19, %v3749_v30  ;;  %v3639_v38 = vpop.f32.mrf.mxu1  ;;  %4022 = vmatmul.f32.gmra.mxu0 %v4700_v5 }
 0x808   : > { %v3640_v47 = vadd.f32 %v3639_v38, %v8139_v58  ;;  %v4705_v58 = vld [vmem:[%s8887_s1 + $0x200] sm:$0xff] }
 0x809   : > { %v3976_v31 = vadd.f32 %v3975_v7, %v3863_v39 }
 0x80a   : > { %4099 = vst [vmem:[%s8889_s3 + $0x140] sm:$0xff] %v3640_v47  ;;  %3686 = vmatmul.f32.gmra.mxu1 %v4703_v48 }
 0x80b   : > { %4093 = vst.msk [vmem:[%s8889_s3 + $0x110] sm:$0xff] %vm533_vm1, %v3976_v31  ;;  %3799 = vmatmul.f32.gmra.mxu2 %v4704_v17  ;;  %3912 = vmatmul.f32.gmra.mxu3 %v4705_v58  ;;  %v4716_v17 = vld [vmem:[%s8887_s1 + $0x258] sm:$0xff] }
 0x80c   : > { %v3978_v10 = vpop.f32.mrf.mxu0 }
 0x80e   : > { %v3752_v35 = vpop.f32.mrf.mxu2  ;;  %v3865_v9 = vpop.f32.mrf.mxu3 }
 0x80f   : > { %v3866_v54 = vadd.f32 %v3865_v9, %v3752_v35  ;;  %v3642_v21 = vpop.f32.mrf.mxu1  ;;  %4025 = vmatmul.f32.gmra.mxu0 %v4703_v48  ;;  %v4715_v48 = vld [vmem:[%s8887_s1 + $0x268] sm:$0xff] }
 0x810   : > { %v3643_v4 = vadd.f32 %v3642_v21, %v8149_v23  ;;  %v4708_v23 = vld [vmem:[%s8887_s1 + $0x218] sm:$0xff] }
 0x811   : > { %v3979_v53 = vadd.f32 %v3978_v10, %v3866_v54 }
 0x812   : > { %4106 = vst [vmem:[%s8889_s3 + $0x178] sm:$0xff] %v3643_v4  ;;  %3689 = vmatmul.f32.gmra.mxu1 %v4706_v14 }
 0x813   : > { %4100 = vst.msk [vmem:[%s8889_s3 + $0x148] sm:$0xff] %vm533_vm1, %v3979_v53  ;;  %3802 = vmatmul.f32.gmra.mxu2 %v4707_v50  ;;  %3915 = vmatmul.f32.gmra.mxu3 %v4708_v23  ;;  %v4718_v53 = vld [vmem:[%s8887_s1 + $0x280] sm:$0xff] }
 0x814   : > { %v3981_v62 = vpop.f32.mrf.mxu0 }
 0x816   : > { %v3755_v32 = vpop.f32.mrf.mxu2  ;;  %v3868_v16 = vpop.f32.mrf.mxu3 }
 0x817   : > { %v3869_v55 = vadd.f32 %v3868_v16, %v3755_v32  ;;  %v3645_v42 = vpop.f32.mrf.mxu1  ;;  %4028 = vmatmul.f32.gmra.mxu0 %v4706_v14  ;;  %v4719_v14 = vld [vmem:[%s8887_s1 + $0x270] sm:$0xff] }
 0x818   : > { %v3646_v6 = vadd.f32 %v3645_v42, %v8159_v2  ;;  %v4711_v2 = vld [vmem:[%s8887_s1 + $0x230] sm:$0xff] }
 0x819   : > { %v3982_v46 = vadd.f32 %v3981_v62, %v3869_v55 }
 0x81a   : > { %4113 = vst [vmem:[%s8889_s3 + $0x1b0] sm:$0xff] %v3646_v6  ;;  %3692 = vmatmul.f32.gmra.mxu1 %v4709_v24  ;;  %v4721_v6 = vld [vmem:[%s8887_s1 + $0x298] sm:$0xff] }
 0x81b   : > { %4107 = vst.msk [vmem:[%s8889_s3 + $0x180] sm:$0xff] %vm533_vm1, %v3982_v46  ;;  %3805 = vmatmul.f32.gmra.mxu2 %v4710_v63  ;;  %3918 = vmatmul.f32.gmra.mxu3 %v4711_v2  ;;  %v4722_v46 = vld [vmem:[%s8887_s1 + $0x288] sm:$0xff] }
 0x81c   : > { %v3984_v37 = vpop.f32.mrf.mxu0 }
 0x81e   : > { %v3758_v59 = vpop.f32.mrf.mxu2  ;;  %v3871_v49 = vpop.f32.mrf.mxu3 }
 0x81f   : > { %v3872_v8 = vadd.f32 %v3871_v49, %v3758_v59  ;;  %v3648_v22 = vpop.f32.mrf.mxu1  ;;  %4031 = vmatmul.f32.gmra.mxu0 %v4709_v24 }
 0x820   : > { %v3649_v28 = vadd.f32 %v3648_v22, %v8169_v25  ;;  %v4714_v25 = vld [vmem:[%s8887_s1 + $0x248] sm:$0xff]  ;;  %v4724_v22 = vld [vmem:[%s8887_s1 + $0x2b0] sm:$0xff] }
 0x821   : > { %v3985_v5 = vadd.f32 %v3984_v37, %v3872_v8 }
 0x822   : > { %4120 = vst [vmem:[%s8889_s3 + $0x1e8] sm:$0xff] %v3649_v28  ;;  %3695 = vmatmul.f32.gmra.mxu1 %v4712_v3  ;;  %v4725_v28 = vld [vmem:[%s8887_s1 + $0x2a0] sm:$0xff] }
 0x823   : > { %4114 = vst.msk [vmem:[%s8889_s3 + $0x1b8] sm:$0xff] %vm533_vm1, %v3985_v5  ;;  %3808 = vmatmul.f32.gmra.mxu2 %v4713_v1  ;;  %3921 = vmatmul.f32.gmra.mxu3 %v4714_v25 }
 0x824   : > { %v3987_v7 = vpop.f32.mrf.mxu0 }
 0x826   : > { %v3761_v30 = vpop.f32.mrf.mxu2  ;;  %v3874_v19 = vpop.f32.mrf.mxu3 }
 0x827   : > { %v3875_v39 = vadd.f32 %v3874_v19, %v3761_v30  ;;  %v3651_v38 = vpop.f32.mrf.mxu1  ;;  %4034 = vmatmul.f32.gmra.mxu0 %v4712_v3 }
 0x828   : > { %v3652_v47 = vadd.f32 %v3651_v38, %v8179_v15  ;;  %v4717_v15 = vld [vmem:[%s8887_s1 + $0x260] sm:$0xff]  ;;  %v4728_v38 = vld [vmem:[%s8887_s1 + $0x2b8] sm:$0xff] }
 0x829   : > { %v3988_v31 = vadd.f32 %v3987_v7, %v3875_v39  ;;  %v4727_v39 = vld [vmem:[%s8887_s1 + $0x2c8] sm:$0xff] }
 0x82a   : > { %4127 = vst [vmem:[%s8889_s3 + $0x220] sm:$0xff] %v3652_v47  ;;  %3698 = vmatmul.f32.gmra.mxu1 %v4715_v48 }
 0x82b   : > { %4121 = vst.msk [vmem:[%s8889_s3 + $0x1f0] sm:$0xff] %vm533_vm1, %v3988_v31  ;;  %3811 = vmatmul.f32.gmra.mxu2 %v4716_v17  ;;  %3924 = vmatmul.f32.gmra.mxu3 %v4717_v15 }
 0x82c   : > { %v3990_v58 = vpop.f32.mrf.mxu0 }
 0x82e   : > { %v3764_v10 = vpop.f32.mrf.mxu2  ;;  %v3877_v35 = vpop.f32.mrf.mxu3 }
 0x82f   : > { %v3878_v9 = vadd.f32 %v3877_v35, %v3764_v10  ;;  %v3654_v54 = vpop.f32.mrf.mxu1  ;;  %4037 = vmatmul.f32.gmra.mxu0 %v4715_v48  ;;  %v4730_v35 = vld [vmem:[%s8887_s1 + $0x2e0] sm:$0xff] }
 0x830   : > { %v3655_v21 = vadd.f32 %v3654_v54, %v8189_v33  ;;  %v4720_v33 = vld [vmem:[%s8887_s1 + $0x278] sm:$0xff] }
 0x831   : > { %v3991_v4 = vadd.f32 %v3990_v58, %v3878_v9  ;;  %v4731_v9 = vld [vmem:[%s8887_s1 + $0x2d0] sm:$0xff] }
 0x832   : > { %4134 = vst [vmem:[%s8889_s3 + $0x258] sm:$0xff] %v3655_v21  ;;  %3701 = vmatmul.f32.gmra.mxu1 %v4718_v53 }
 0x833   : > { %4128 = vst.msk [vmem:[%s8889_s3 + $0x228] sm:$0xff] %vm533_vm1, %v3991_v4  ;;  %3814 = vmatmul.f32.gmra.mxu2 %v4719_v14  ;;  %3927 = vmatmul.f32.gmra.mxu3 %v4720_v33 }
 0x834   : > { %v3993_v50 = vpop.f32.mrf.mxu0 }
 0x836   : > { %v3767_v23 = vpop.f32.mrf.mxu2  ;;  %v3880_v62 = vpop.f32.mrf.mxu3 }
 0x837   : > { %v3881_v32 = vadd.f32 %v3880_v62, %v3767_v23  ;;  %v3657_v16 = vpop.f32.mrf.mxu1  ;;  %4040 = vmatmul.f32.gmra.mxu0 %v4718_v53  ;;  %v4733_v23 = vld [vmem:[%s8887_s1 + $0x2f8] sm:$0xff]  ;;  %v4734_v62 = vld [vmem:[%s8887_s1 + $0x2e8] sm:$0xff] }
 0x838   : > { %v3658_v55 = vadd.f32 %v3657_v16, %v8199_v41  ;;  %v4723_v41 = vld [vmem:[%s8887_s1 + $0x290] sm:$0xff] }
 0x839   : > { %v3994_v42 = vadd.f32 %v3993_v50, %v3881_v32 }
 0x83a   : > { %4141 = vst [vmem:[%s8889_s3 + $0x290] sm:$0xff] %v3658_v55  ;;  %3704 = vmatmul.f32.gmra.mxu1 %v4721_v6 }
 0x83b   : > { %4135 = vst.msk [vmem:[%s8889_s3 + $0x260] sm:$0xff] %vm533_vm1, %v3994_v42  ;;  %3817 = vmatmul.f32.gmra.mxu2 %v4722_v46  ;;  %3930 = vmatmul.f32.gmra.mxu3 %v4723_v41 }
 0x83c   : > { %v3996_v24 = vpop.f32.mrf.mxu0 }
 0x83e   : > { %v3770_v63 = vpop.f32.mrf.mxu2  ;;  %v3883_v2 = vpop.f32.mrf.mxu3 }
 0x83f   : > { %v3884_v37 = vadd.f32 %v3883_v2, %v3770_v63  ;;  %v3660_v59 = vpop.f32.mrf.mxu1  ;;  %4043 = vmatmul.f32.gmra.mxu0 %v4721_v6 }
 0x840   : > { %v3661_v49 = vadd.f32 %v3660_v59, %v8209_v45  ;;  %v4726_v45 = vld [vmem:[%s8887_s1 + $0x2a8] sm:$0xff] }
 0x841   : > { %v3997_v8 = vadd.f32 %v3996_v24, %v3884_v37 }
 0x842   : > { %4148 = vst [vmem:[%s8889_s3 + $0x2c8] sm:$0xff] %v3661_v49  ;;  %3707 = vmatmul.f32.gmra.mxu1 %v4724_v22 }
 0x843   : > { %4142 = vst.msk [vmem:[%s8889_s3 + $0x298] sm:$0xff] %vm533_vm1, %v3997_v8  ;;  %3820 = vmatmul.f32.gmra.mxu2 %v4725_v28  ;;  %3933 = vmatmul.f32.gmra.mxu3 %v4726_v45 }
 0x844   : > { %v3999_v5 = vpop.f32.mrf.mxu0 }
 0x846   : > { %v3773_v3 = vpop.f32.mrf.mxu2  ;;  %v3886_v1 = vpop.f32.mrf.mxu3 }
 0x847   : > { %v3887_v25 = vadd.f32 %v3886_v1, %v3773_v3  ;;  %v3663_v7 = vpop.f32.mrf.mxu1  ;;  %4046 = vmatmul.f32.gmra.mxu0 %v4724_v22 }
 0x848   : > { %v3664_v30 = vadd.f32 %v3663_v7, %v8219_v52  ;;  %v4729_v52 = vld [vmem:[%s8887_s1 + $0x2c0] sm:$0xff] }
 0x849   : > { %v4000_v19 = vadd.f32 %v3999_v5, %v3887_v25 }
 0x84a   : > { %4155 = vst [vmem:[%s8889_s3 + $0x300] sm:$0xff] %v3664_v30  ;;  %3710 = vmatmul.f32.gmra.mxu1 %v4727_v39 }
 0x84b   : > { %4149 = vst.msk [vmem:[%s8889_s3 + $0x2d0] sm:$0xff] %vm533_vm1, %v4000_v19  ;;  %3823 = vmatmul.f32.gmra.mxu2 %v4728_v38  ;;  %3936 = vmatmul.f32.gmra.mxu3 %v4729_v52 }
 0x84c   : > { %v4002_v47 = vpop.f32.mrf.mxu0 }
 0x84e   : > { %v3776_v31 = vpop.f32.mrf.mxu2  ;;  %v3889_v48 = vpop.f32.mrf.mxu3 }
 0x84f   : > { %v3890_v17 = vadd.f32 %v3889_v48, %v3776_v31  ;;  %v3666_v15 = vpop.f32.mrf.mxu1  ;;  %4049 = vmatmul.f32.gmra.mxu0 %v4727_v39 }
 0x850   : > { %v3667_v58 = vadd.f32 %v3666_v15, %v8229_v34  ;;  %v4732_v34 = vld [vmem:[%s8887_s1 + $0x2d8] sm:$0xff] }
 0x851   : > { %v4003_v10 = vadd.f32 %v4002_v47, %v3890_v17 }
 0x852   : > { %4162 = vst [vmem:[%s8889_s3 + $0x338] sm:$0xff] %v3667_v58  ;;  %3713 = vmatmul.f32.gmra.mxu1 %v4730_v35 }
 0x853   : > { %4156 = vst.msk [vmem:[%s8889_s3 + $0x308] sm:$0xff] %vm533_vm1, %v4003_v10  ;;  %3826 = vmatmul.f32.gmra.mxu2 %v4731_v9  ;;  %3939 = vmatmul.f32.gmra.mxu3 %v4732_v34 }
 0x854   : > { %v4005_v54 = vpop.f32.mrf.mxu0 }
 0x856   : > { %v3779_v21 = vpop.f32.mrf.mxu2  ;;  %v3892_v4 = vpop.f32.mrf.mxu3 }
 0x857   : > { %v3893_v53 = vadd.f32 %v3892_v4, %v3779_v21  ;;  %v3669_v14 = vpop.f32.mrf.mxu1  ;;  %4052 = vmatmul.f32.gmra.mxu0 %v4730_v35 }
 0x858   : > { %v3670_v33 = vadd.f32 %v3669_v14, %v8244_v18 }
 0x859   : > { %v4006_v50 = vadd.f32 %v4005_v54, %v3893_v53 }
 0x85a   : > { %4169 = vst [vmem:[%s8889_s3 + $0x370] sm:$0xff] %v3670_v33  ;;  %3716 = vmatmul.f32.gmra.mxu1 %v4733_v23 }
 0x85b   : > { %4163 = vst.msk [vmem:[%s8889_s3 + $0x340] sm:$0xff] %vm533_vm1, %v4006_v50  ;;  %3829 = vmatmul.f32.gmra.mxu2 %v4734_v62  ;;  %3942 = vmatmul.f32.gmra.mxu3 %v8238_v12 }
 0x85c   : > { %v4008_v18 = vpop.f32.mrf.mxu0 }
 0x85e   : > { %v3782_v32 = vpop.f32.mrf.mxu2  ;;  %v3895_v16 = vpop.f32.mrf.mxu3 }
 0x85f   : > { %v3896_v55 = vadd.f32 %v3895_v16, %v3782_v32  ;;  %v3672_v42 = vpop.f32.mrf.mxu1  ;;  %4055 = vmatmul.f32.gmra.mxu0 %v4733_v23 }
 0x860   : > { %v3673_v6 = vadd.f32 %v3672_v42, %v8256_v40 }
 0x861   : > { %v4009_v46 = vadd.f32 %v4008_v18, %v3896_v55 }
 0x862   : > { %4176 = vst [vmem:[%s8889_s3 + $0x3a8] sm:$0xff] %v3673_v6 }
 0x863   : > { %4170 = vst.msk [vmem:[%s8889_s3 + $0x378] sm:$0xff] %vm533_vm1, %v4009_v46 }
 0x864   : > { %v4011_v41 = vpop.f32.mrf.mxu0 }
 0x866   : > { %v3785_v12 = vpop.f32.mrf.mxu2  ;;  %v3898_v24 = vpop.f32.mrf.mxu3 }
 0x867   : > { %v3899_v63 = vadd.f32 %v3898_v24, %v3785_v12  ;;  %v3675_v2 = vpop.f32.mrf.mxu1 }
 0x868   : > { %v3676_v37 = vadd.f32 %v3675_v2, %v8269_v57 }
 0x869   : > { %v4012_v59 = vadd.f32 %v4011_v41, %v3899_v63 }
 0x86a   : > { %4183 = vst [vmem:[%s8889_s3 + $0x3e0] sm:$0xff] %v3676_v37 }
 0x86b   : > { %4177 = vst.msk [vmem:[%s8889_s3 + $0x3b0] sm:$0xff] %vm533_vm1, %v4012_v59 }
 0x86c   : > { %v4014_v40 = vpop.f32.mrf.mxu0 }
 0x86e   : > { %v3788_v49 = vpop.f32.mrf.mxu2  ;;  %v3901_v8 = vpop.f32.mrf.mxu3 }
 0x86f   : > { %v3902_v22 = vadd.f32 %v3901_v8, %v3788_v49  ;;  %v3678_v28 = vpop.f32.mrf.mxu1 }
 0x870   : > { %v3679_v45 = vadd.f32 %v3678_v28, %v8282_v43 }
 0x871   : > { %v4015_v5 = vadd.f32 %v4014_v40, %v3902_v22 }
 0x872   : > { %4190 = vst [vmem:[%s8889_s3 + $0x418] sm:$0xff] %v3679_v45 }
 0x873   : > { %4184 = vst.msk [vmem:[%s8889_s3 + $0x3e8] sm:$0xff] %vm533_vm1, %v4015_v5 }
 0x874   : > { %v4017_v57 = vpop.f32.mrf.mxu0 }
 0x876   : > { %v3791_v3 = vpop.f32.mrf.mxu2  ;;  %v3904_v1 = vpop.f32.mrf.mxu3 }
 0x877   : > { %v3905_v25 = vadd.f32 %v3904_v1, %v3791_v3  ;;  %v3681_v7 = vpop.f32.mrf.mxu1 }
 0x878   : > { %v3682_v30 = vadd.f32 %v3681_v7, %v8295_v0 }
 0x879   : > { %v4018_v19 = vadd.f32 %v4017_v57, %v3905_v25 }
 0x87a   : > { %4197 = vst [vmem:[%s8889_s3 + $0x450] sm:$0xff] %v3682_v30 }
 0x87b   : > { %4191 = vst.msk [vmem:[%s8889_s3 + $0x420] sm:$0xff] %vm533_vm1, %v4018_v19 }
 0x87c   : > { %v4020_v43 = vpop.f32.mrf.mxu0 }
 0x87e   : > { %v3794_v39 = vpop.f32.mrf.mxu2  ;;  %v3907_v38 = vpop.f32.mrf.mxu3 }
 0x87f   : > { %v3908_v52 = vadd.f32 %v3907_v38, %v3794_v39  ;;  %v3684_v47 = vpop.f32.mrf.mxu1 }
 0x880   : > { %v3685_v31 = vadd.f32 %v3684_v47, %v8308_v26 }
 0x881   : > { %v4021_v48 = vadd.f32 %v4020_v43, %v3908_v52 }
 0x882   : > { %4204 = vst [vmem:[%s8889_s3 + $0x488] sm:$0xff] %v3685_v31 }
 0x883   : > { %4198 = vst.msk [vmem:[%s8889_s3 + $0x458] sm:$0xff] %vm533_vm1, %v4021_v48 }
 0x884   : > { %v4023_v0 = vpop.f32.mrf.mxu0 }
 0x886   : > { %v3797_v17 = vpop.f32.mrf.mxu2  ;;  %v3910_v15 = vpop.f32.mrf.mxu3 }
 0x887   : > { %v3911_v58 = vadd.f32 %v3910_v15, %v3797_v17  ;;  %v3687_v10 = vpop.f32.mrf.mxu1 }
 0x888   : > { %v3688_v35 = vadd.f32 %v3687_v10, %v8323_v27 }
 0x889   : > { %v4024_v9 = vadd.f32 %v4023_v0, %v3911_v58 }
 0x88a   : > { %4211 = vst [vmem:[%s8889_s3 + $0x4c0] sm:$0xff] %v3688_v35 }
 0x88b   : > { %4205 = vst.msk [vmem:[%s8889_s3 + $0x490] sm:$0xff] %vm533_vm1, %v4024_v9 }
 0x88c   : > { %v4026_v26 = vpop.f32.mrf.mxu0 }
 0x88e   : > { %v3800_v34 = vpop.f32.mrf.mxu2  ;;  %v3913_v54 = vpop.f32.mrf.mxu3 }
 0x88f   : > { %v3914_v21 = vadd.f32 %v3913_v54, %v3800_v34  ;;  %v3690_v4 = vpop.f32.mrf.mxu1 }
 0x890   : > { %v3691_v53 = vadd.f32 %v3690_v4, %v8338_v29 }
 0x891   : > { %v4027_v14 = vadd.f32 %v4026_v26, %v3914_v21 }
 0x892   : > { %4218 = vst [vmem:[%s8889_s3 + $0x4f8] sm:$0xff] %v3691_v53 }
 0x893   : > { %4212 = vst.msk [vmem:[%s8889_s3 + $0x4c8] sm:$0xff] %vm533_vm1, %v4027_v14 }
 0x894   : > { %v4029_v27 = vpop.f32.mrf.mxu0 }
 0x896   : > { %v3803_v33 = vpop.f32.mrf.mxu2  ;;  %v3916_v50 = vpop.f32.mrf.mxu3 }
 0x897   : > { %v3917_v23 = vadd.f32 %v3916_v50, %v3803_v33  ;;  %v3693_v62 = vpop.f32.mrf.mxu1 }
 0x898   : > { %v3694_v18 = vadd.f32 %v3693_v62, %v8353_v36 }
 0x899   : > { %v4030_v32 = vadd.f32 %v4029_v27, %v3917_v23 }
 0x89a   : > { %4225 = vst [vmem:[%s8889_s3 + $0x530] sm:$0xff] %v3694_v18 }
 0x89b   : > { %4219 = vst.msk [vmem:[%s8889_s3 + $0x500] sm:$0xff] %vm533_vm1, %v4030_v32 }
 0x89c   : > { %v4032_v29 = vpop.f32.mrf.mxu0 }
 0x89e   : > { %v3806_v16 = vpop.f32.mrf.mxu2  ;;  %v3919_v55 = vpop.f32.mrf.mxu3 }
 0x89f   : > { %v3920_v42 = vadd.f32 %v3919_v55, %v3806_v16  ;;  %v3696_v6 = vpop.f32.mrf.mxu1 }
 0x8a0   : > { %v3697_v46 = vadd.f32 %v3696_v6, %v8368_v20 }
 0x8a1   : > { %v4033_v41 = vadd.f32 %v4032_v29, %v3920_v42 }
 0x8a2   : > { %4232 = vst [vmem:[%s8889_s3 + $0x568] sm:$0xff] %v3697_v46 }
 0x8a3   : > { %4226 = vst.msk [vmem:[%s8889_s3 + $0x538] sm:$0xff] %vm533_vm1, %v4033_v41 }
 0x8a4   : > { %v4035_v36 = vpop.f32.mrf.mxu0 }
 0x8a6   : > { %v3809_v12 = vpop.f32.mrf.mxu2  ;;  %v3922_v24 = vpop.f32.mrf.mxu3 }
 0x8a7   : > { %v3923_v63 = vadd.f32 %v3922_v24, %v3809_v12  ;;  %v3699_v2 = vpop.f32.mrf.mxu1 }
 0x8a8   : > { %v3700_v37 = vadd.f32 %v3699_v2, %v8383_v11 }
 0x8a9   : > { %v4036_v59 = vadd.f32 %v4035_v36, %v3923_v63 }
 0x8aa   : > { %4239 = vst [vmem:[%s8889_s3 + $0x5a0] sm:$0xff] %v3700_v37 }
 0x8ab   : > { %4233 = vst.msk [vmem:[%s8889_s3 + $0x570] sm:$0xff] %vm533_vm1, %v4036_v59 }
 0x8ac   : > { %v4038_v20 = vpop.f32.mrf.mxu0 }
 0x8ae   : > { %v3812_v40 = vpop.f32.mrf.mxu2  ;;  %v3925_v49 = vpop.f32.mrf.mxu3 }
 0x8af   : > { %v3926_v8 = vadd.f32 %v3925_v49, %v3812_v40  ;;  %v3702_v22 = vpop.f32.mrf.mxu1 }
 0x8b0   : > { %v3703_v28 = vadd.f32 %v3702_v22, %v8398_v51 }
 0x8b1   : > { %v4039_v45 = vadd.f32 %v4038_v20, %v3926_v8 }
 0x8b2   : > { %4246 = vst [vmem:[%s8889_s3 + $0x5d8] sm:$0xff] %v3703_v28 }
 0x8b3   : > { %4240 = vst.msk [vmem:[%s8889_s3 + $0x5a8] sm:$0xff] %vm533_vm1, %v4039_v45 }
 0x8b4   : > { %v4041_v11 = vpop.f32.mrf.mxu0 }
 0x8b6   : > { %v3815_v5 = vpop.f32.mrf.mxu2  ;;  %v3928_v57 = vpop.f32.mrf.mxu3 }
 0x8b7   : > { %v3929_v3 = vadd.f32 %v3928_v57, %v3815_v5  ;;  %v3705_v1 = vpop.f32.mrf.mxu1 }
 0x8b8   : > { %v3706_v25 = vadd.f32 %v3705_v1, %v8413_v56 }
 0x8b9   : > { %v4042_v7 = vadd.f32 %v4041_v11, %v3929_v3 }
 0x8ba   : > { %4253 = vst [vmem:[%s8889_s3 + $0x610] sm:$0xff] %v3706_v25 }
 0x8bb   : > { %4247 = vst.msk [vmem:[%s8889_s3 + $0x5e0] sm:$0xff] %vm533_vm1, %v4042_v7 }
 0x8bc   : > { %v4044_v51 = vpop.f32.mrf.mxu0 }
 0x8be   : > { %v3818_v30 = vpop.f32.mrf.mxu2  ;;  %v3931_v19 = vpop.f32.mrf.mxu3 }
 0x8bf   : > { %v3932_v43 = vadd.f32 %v3931_v19, %v3818_v30  ;;  %v3708_v39 = vpop.f32.mrf.mxu1 }
 0x8c0   : > { %v3709_v38 = vadd.f32 %v3708_v39, %v8428_v61 }
 0x8c1   : > { %v4045_v52 = vadd.f32 %v4044_v51, %v3932_v43 }
 0x8c2   : > { %4260 = vst [vmem:[%s8889_s3 + $0x648] sm:$0xff] %v3709_v38 }
 0x8c3   : > { %4254 = vst.msk [vmem:[%s8889_s3 + $0x618] sm:$0xff] %vm533_vm1, %v4045_v52 }
 0x8c4   : > { %v4047_v56 = vpop.f32.mrf.mxu0 }
 0x8c6   : > { %v3821_v47 = vpop.f32.mrf.mxu2  ;;  %v3934_v31 = vpop.f32.mrf.mxu3 }
 0x8c7   : > { %v3935_v48 = vadd.f32 %v3934_v31, %v3821_v47  ;;  %v3711_v0 = vpop.f32.mrf.mxu1 }
 0x8c8   : > { %v3712_v17 = vadd.f32 %v3711_v0, %v8443_v60 }
 0x8c9   : > { %v4048_v15 = vadd.f32 %v4047_v56, %v3935_v48 }
 0x8ca   : > { %4267 = vst [vmem:[%s8889_s3 + $0x680] sm:$0xff] %v3712_v17 }
 0x8cb   : > { %4261 = vst.msk [vmem:[%s8889_s3 + $0x650] sm:$0xff] %vm533_vm1, %v4048_v15 }
 0x8cc   : > { %v4050_v61 = vpop.f32.mrf.mxu0 }
 0x8ce   : > { %v3824_v58 = vpop.f32.mrf.mxu2  ;;  %v3937_v10 = vpop.f32.mrf.mxu3 }
 0x8cf   : > { %v3938_v35 = vadd.f32 %v3937_v10, %v3824_v58  ;;  %v3714_v9 = vpop.f32.mrf.mxu1 }
 0x8d0   : > { %v3715_v26 = vadd.f32 %v3714_v9, %v8458_v44 }
 0x8d1   : > { %v4051_v34 = vadd.f32 %v4050_v61, %v3938_v35 }
 0x8d2   : > { %4274 = vst [vmem:[%s8889_s3 + $0x6b8] sm:$0xff] %v3715_v26 }
 0x8d3   : > { %4268 = vst.msk [vmem:[%s8889_s3 + $0x688] sm:$0xff] %vm533_vm1, %v4051_v34 }
 0x8d4   : > { %v4053_v60 = vpop.f32.mrf.mxu0 }
 0x8d6   : > { %v3827_v54 = vpop.f32.mrf.mxu2  ;;  %v3940_v21 = vpop.f32.mrf.mxu3 }
 0x8d7   : > { %v3941_v4 = vadd.f32 %v3940_v21, %v3827_v54  ;;  %v3717_v53 = vpop.f32.mrf.mxu1 }
 0x8d8   : > { %v3718_v14 = vadd.f32 %v3717_v53, %v8473_v13 }
 0x8d9   : > { %v4054_v27 = vadd.f32 %v4053_v60, %v3941_v4 }
 0x8da   : > { %4281 = vst [vmem:[%s8889_s3 + $0x6f0] sm:$0xff] %v3718_v14 }
 0x8db   : > { %4275 = vst.msk [vmem:[%s8889_s3 + $0x6c0] sm:$0xff] %vm533_vm1, %v4054_v27 }
 0x8dc   : > { %v4056_v44 = vpop.f32.mrf.mxu0 }
 0x8de   : > { %v3830_v33 = vpop.f32.mrf.mxu2  ;;  %v3943_v50 = vpop.f32.mrf.mxu3 }
 0x8df   : > { %v3944_v23 = vadd.f32 %v3943_v50, %v3830_v33 }
 0x8e1   : > { %v4057_v62 = vadd.f32 %v4056_v44, %v3944_v23 }
 0x8e3   : > { %4282 = vst.msk [vmem:[%s8889_s3 + $0x6f8] sm:$0xff] %vm533_vm1, %v4057_v62 }
 0x8e4 PF: > { %p10_p10 = scmp.ge.s32.totalorder %s4804_s16, 6   ;;  %s9064_s12 = smov %s4753_s13 }
 0x8e5   : > { %s9065_s13 = smov %s4813_s19  ;;  %s9066_s14 = smov %s4804_s16 }
 0x8e6   :  { %12 = sbr.rel (!%p10_p10) target bundleno = 2 (0x2), region = 100 }

</bundles_post_ra>
